<compile_context>
chip_gen: v5e
topology: v5e:2x2
jax: 0.10.0
libtpu: 0.0.40
codegen_flags: <defaults>
</compile_context>

<pallas_src>
import jax
import jax.numpy as jnp
from jax.experimental import pallas as pl
from jax.experimental.pallas import tpu as pltpu

F_IN = 785    # fc1 input features (x.view(-1, 785))
F_OUT = 784   # fc1/fc2/fc3 output features (28*28)
FPAD = 896    # 7*128: lane-aligned padded feature width for MXU tiles


def _round_up(x, m):
    return (x + m - 1) // m * m


def _cdiv(a, b):
    return -(-a // b)


def _leaky_relu(x, slope=0.2):
    # For slope < 1, max(x, slope*x) == leaky_relu(x): 2 VPU ops, no select.
    return jnp.maximum(x, slope * x)


def _make_kernel(tb, n_sub):
    sub = tb // n_sub

    def kernel(x_ref, w1_ref, b1_ref, w2_ref, b2_ref, w3_ref, b3_ref,
               o_ref, xpad_ref):
        # Stage the (tb, 785) f32 input tile as a lane-aligned (tb, 896) bf16
        # tile in VMEM scratch.  Only the 111 tail lanes are zero-filled (cheap,
        # done every step -> correct under megacore grid splitting).
        xpad_ref[:, F_IN:] = jnp.zeros((tb, FPAD - F_IN), jnp.bfloat16)
        xpad_ref[:, :F_IN] = x_ref[...].astype(jnp.bfloat16)

        w1 = w1_ref[...]
        w2 = w2_ref[...]
        w3 = w3_ref[...]
        b1 = b1_ref[...]
        b2 = b2_ref[...]
        b3 = b3_ref[...]

        # Unrolled independent sub-chunks: fc1->fc2->fc3 chains interleave so
        # the MXU matmul of one sub-chunk overlaps the VPU/EUP activation work
        # of another instead of idling during whole-tile activation phases.
        for s in range(n_sub):
            rows = slice(s * sub, (s + 1) * sub)
            h = jnp.dot(xpad_ref[rows, :], w1, preferred_element_type=jnp.float32)
            h = _leaky_relu(h + b1)
            h = jnp.dot(h.astype(jnp.bfloat16), w2, preferred_element_type=jnp.float32)
            h = _leaky_relu(h + b2)
            h = jnp.dot(h.astype(jnp.bfloat16), w3, preferred_element_type=jnp.float32)
            h = jnp.tanh(h + b3)
            # Store only the real 784 feature columns (padded cols are exact 0).
            o_ref[rows, :] = h[:, :F_OUT]

    return kernel


def leader_cnn_forward(x, params, *, tb_max=512):
    """x: any shape with total elems divisible by 785 (matches x.view(-1, 785))."""
    w1, b1, w2, b2, w3, b3 = params
    x2d = x.reshape(-1, F_IN)           # no dtype cast / feature pad here
    B = x2d.shape[0]

    # Batch tiling: guarantee >= 2 grid steps for B > 64 (v7x dual-TensorCore
    # split of the "parallel" axis); tiles rounded to 64 rows, capped at 512
    # (large tiles amortize per-step overhead / DMA on v6e).
    if B <= 64:
        TB = max(8, _round_up(B, 8))
    else:
        TB = min(tb_max, _round_up(_cdiv(B, 2), 64))
    B_pad = _round_up(B, TB)

    # In-kernel sub-chunk count for MXU/VPU overlap.
    if TB >= 256:
        n_sub = 4
    elif TB >= 128:
        n_sub = 2
    else:
        n_sub = 1
    assert TB % n_sub == 0 and (TB // n_sub) % 8 == 0

    # Only the (tiny, usually empty) batch pad happens outside the kernel.
    xp = x2d if B_pad == B else jnp.pad(x2d, ((0, B_pad - B), (0, 0)))

    # Weights are small (< 1.5 MB each): pad once to lane-aligned 896x896 bf16.
    # Zero padding is numerically inert (leaky_relu(0)=0, tanh(0)=0) and padded
    # output columns are sliced off inside the kernel before the store.
    def pad_w(w):
        fin, fout = w.shape
        return jnp.pad(w.astype(jnp.bfloat16), ((0, FPAD - fin), (0, FPAD - fout)))

    def pad_b(b):
        return jnp.pad(b.astype(jnp.float32), ((0, 0), (0, FPAD - b.shape[-1])))

    w1p, w2p, w3p = pad_w(w1), pad_w(w2), pad_w(w3)
    b1p, b2p, b3p = pad_b(b1), pad_b(b2), pad_b(b3)

    grid = (B_pad // TB,)
    x_spec = pl.BlockSpec((TB, F_IN), lambda i: (i, 0))      # raw 785-wide rows
    w_spec = pl.BlockSpec((FPAD, FPAD), lambda i: (0, 0))    # VMEM-resident
    b_spec = pl.BlockSpec((1, FPAD), lambda i: (0, 0))       # VMEM-resident
    o_spec = pl.BlockSpec((TB, F_OUT), lambda i: (i, 0))     # unpadded output

    cost = pl.CostEstimate(
        flops=2 * B_pad * (F_IN * F_OUT + 2 * F_OUT * F_OUT),
        transcendentals=B_pad * F_OUT,                       # tanh
        bytes_accessed=(B_pad * F_IN * 4                     # x (f32)
                        + 3 * FPAD * FPAD * 2                # weights (bf16)
                        + 3 * FPAD * 4                       # biases (f32)
                        + B_pad * F_OUT * 4),                # output (f32)
    )

    out = pl.pallas_call(
        _make_kernel(TB, n_sub),
        out_shape=jax.ShapeDtypeStruct((B_pad, F_OUT), jnp.float32),
        grid=grid,
        in_specs=[x_spec, w_spec, b_spec, w_spec, b_spec, w_spec, b_spec],
        out_specs=o_spec,
        scratch_shapes=[pltpu.VMEM((TB, FPAD), jnp.bfloat16)],
        compiler_params=pltpu.CompilerParams(
            dimension_semantics=("parallel",),
            # Kernel needs ~13-18 MiB; 32 MiB keeps headroom without starving
            # co-scheduled fusions on v7x's 64 MiB VMEM (fine for v5e/v6e too).
            vmem_limit_bytes=32 << 20,
        ),
        cost_estimate=cost,
    )(xp, w1p, b1p, w2p, b2p, w3p, b3p)

    if B_pad != B:
        out = out[:B]
    return out.reshape(-1, 1, 28, 28)    # contiguous reshape: free


def init_params(key):
    """Deterministic init matching PyTorch nn.Linear default:
    U(-1/sqrt(fan_in), 1/sqrt(fan_in)) for both weight and bias.
    Weights are stored (in, out) so the kernel does x @ w directly."""
    dims = [(F_IN, F_OUT), (F_OUT, F_OUT), (F_OUT, F_OUT)]
    params = []
    for i, (fan_in, fan_out) in enumerate(dims):
        kw, kb = jax.random.split(jax.random.fold_in(key, i))
        bound = 1.0 / jnp.sqrt(jnp.float32(fan_in))
        w = jax.random.uniform(kw, (fan_in, fan_out), jnp.float32, -bound, bound)
        b = jax.random.uniform(kb, (1, fan_out), jnp.float32, -bound, bound)
        params += [w, b]
    return tuple(params)


def reference_forward(x, params):
    """Pure-JAX f32 reference of the PyTorch module."""
    w1, b1, w2, b2, w3, b3 = params
    h = x.reshape(-1, F_IN).astype(jnp.float32)
    h = jax.nn.leaky_relu(h @ w1 + b1, negative_slope=0.2)
    h = jax.nn.leaky_relu(h @ w2 + b2, negative_slope=0.2)
    h = jnp.tanh(h @ w3 + b3)
    return h.reshape(-1, 1, 28, 28)


if __name__ == "__main__":
    key = jax.random.PRNGKey(0)
    params = init_params(jax.random.fold_in(key, 1))
    fwd = jax.jit(leader_cnn_forward)

    # Small batch: single grid step, no sub-chunking.
    B = 8
    x = jax.random.normal(jax.random.fold_in(key, 2), (B, F_IN), jnp.float32)
    y = jax.block_until_ready(fwd(x, params))
    y_ref = reference_forward(x, params)
    assert y.shape == (B, 1, 28, 28), y.shape
    # bf16 MXU operands with f32 accumulation vs f32 reference; tanh output in
    # [-1, 1], allow a few 1e-2 absolute slack.
    assert jnp.allclose(y, y_ref, atol=3e-2), float(jnp.max(jnp.abs(y - y_ref)))

    # Larger batch: multi-step batch grid (TB=128, grid=(2,)), batch padding /
    # slicing path, and 2 in-kernel sub-chunks.
    B2 = 192
    x2 = jax.random.normal(jax.random.fold_in(key, 3), (B2, F_IN), jnp.float32)
    y2 = jax.block_until_ready(fwd(x2, params))
    y2_ref = reference_forward(x2, params)
    assert y2.shape == (B2, 1, 28, 28), y2.shape
    assert jnp.allclose(y2, y2_ref, atol=3e-2), float(jnp.max(jnp.abs(y2 - y2_ref)))

    print("KERNEL_OK")
</pallas_src>

<mosaic_0001>
module attributes {stable_mosaic.version = 11 : i64} {
  func.func @kernel(%arg0: i32, %arg1: memref<8x785xf32, #tpu.memory_space<vmem>>, %arg2: memref<896x896xbf16, #tpu.memory_space<vmem>>, %arg3: memref<1x896xf32, #tpu.memory_space<vmem>>, %arg4: memref<896x896xbf16, #tpu.memory_space<vmem>>, %arg5: memref<1x896xf32, #tpu.memory_space<vmem>>, %arg6: memref<896x896xbf16, #tpu.memory_space<vmem>>, %arg7: memref<1x896xf32, #tpu.memory_space<vmem>>, %arg8: memref<8x784xf32, #tpu.memory_space<vmem>>, %arg9: memref<8x896xbf16, #tpu.memory_space<vmem>>) attributes {dimension_semantics = [#tpu.dimension_semantics<parallel>], iteration_bounds = array<i64: 1>, scalar_prefetch = 0 : i64, scratch_operands = 1 : i64, tpu.core_type = #tpu.core_type<tc>, window_params = [{transform_indices = @transform_0, window_bounds = array<i64: 8, 785>}, {pipeline_mode = #tpu.pipeline_mode<synchronous>, transform_indices = @transform_1, window_bounds = array<i64: 896, 896>}, {pipeline_mode = #tpu.pipeline_mode<synchronous>, transform_indices = @transform_2, window_bounds = array<i64: 1, 896>}, {pipeline_mode = #tpu.pipeline_mode<synchronous>, transform_indices = @transform_3, window_bounds = array<i64: 896, 896>}, {pipeline_mode = #tpu.pipeline_mode<synchronous>, transform_indices = @transform_4, window_bounds = array<i64: 1, 896>}, {pipeline_mode = #tpu.pipeline_mode<synchronous>, transform_indices = @transform_5, window_bounds = array<i64: 896, 896>}, {pipeline_mode = #tpu.pipeline_mode<synchronous>, transform_indices = @transform_6, window_bounds = array<i64: 1, 896>}, {transform_indices = @transform_7, window_bounds = array<i64: 8, 784>}]} {
    %cst = arith.constant 0.000000e+00 : bf16
    %0 = vector.broadcast %cst : bf16 to vector<8x111xbf16>
    %c0 = arith.constant 0 : index
    %c785 = arith.constant 785 : index
    %1 = vector.load %arg9[%c0, %c785] : memref<8x896xbf16, #tpu.memory_space<vmem>>, vector<8x111xbf16>
    tpu.vector_store %arg9[%c0, %c785], %0 {strides = array<i32>} : memref<8x896xbf16, #tpu.memory_space<vmem>>, vector<8x111xbf16>,
    %c0_0 = arith.constant 0 : index
    %c0_1 = arith.constant 0 : index
    %2 = vector.load %arg1[%c0_0, %c0_1] : memref<8x785xf32, #tpu.memory_space<vmem>>, vector<8x785xf32>
    %3 = arith.truncf %2 : vector<8x785xf32> to vector<8x785xbf16>
    %c0_2 = arith.constant 0 : index
    %c0_3 = arith.constant 0 : index
    %4 = vector.load %arg9[%c0_2, %c0_3] : memref<8x896xbf16, #tpu.memory_space<vmem>>, vector<8x785xbf16>
    tpu.vector_store %arg9[%c0_2, %c0_3], %3 {strides = array<i32>} : memref<8x896xbf16, #tpu.memory_space<vmem>>, vector<8x785xbf16>,
    %c0_4 = arith.constant 0 : index
    %c0_5 = arith.constant 0 : index
    %5 = vector.load %arg2[%c0_4, %c0_5] : memref<896x896xbf16, #tpu.memory_space<vmem>>, vector<896x896xbf16>
    %c0_6 = arith.constant 0 : index
    %c0_7 = arith.constant 0 : index
    %6 = vector.load %arg4[%c0_6, %c0_7] : memref<896x896xbf16, #tpu.memory_space<vmem>>, vector<896x896xbf16>
    %c0_8 = arith.constant 0 : index
    %c0_9 = arith.constant 0 : index
    %7 = vector.load %arg6[%c0_8, %c0_9] : memref<896x896xbf16, #tpu.memory_space<vmem>>, vector<896x896xbf16>
    %c0_10 = arith.constant 0 : index
    %c0_11 = arith.constant 0 : index
    %8 = vector.load %arg3[%c0_10, %c0_11] : memref<1x896xf32, #tpu.memory_space<vmem>>, vector<1x896xf32>
    %c0_12 = arith.constant 0 : index
    %c0_13 = arith.constant 0 : index
    %9 = vector.load %arg5[%c0_12, %c0_13] : memref<1x896xf32, #tpu.memory_space<vmem>>, vector<1x896xf32>
    %c0_14 = arith.constant 0 : index
    %c0_15 = arith.constant 0 : index
    %10 = vector.load %arg7[%c0_14, %c0_15] : memref<1x896xf32, #tpu.memory_space<vmem>>, vector<1x896xf32>
    %c0_16 = arith.constant 0 : index
    %c0_17 = arith.constant 0 : index
    %11 = vector.load %arg9[%c0_16, %c0_17] : memref<8x896xbf16, #tpu.memory_space<vmem>>, vector<8x896xbf16>
    %cst_18 = arith.constant dense<0.000000e+00> : vector<8x896xf32>
    %12 = tpu.matmul %11, %5, %cst_18 {dimension_numbers = #tpu.dot_dimension_numbers<[1], [0], [0], [1], [0, 0, 1, 1], [], []>} : vector<8x896xbf16>, vector<896x896xbf16>, vector<8x896xf32> -> vector<8x896xf32>
    %13 = vector.broadcast %8 : vector<1x896xf32> to vector<8x896xf32>
    %14 = arith.addf %12, %13 : vector<8x896xf32>
    %cst_19 = arith.constant 2.000000e-01 : f32
    %15 = vector.broadcast %cst_19 : f32 to vector<8x896xf32>
    %16 = arith.mulf %15, %14 : vector<8x896xf32>
    %17 = arith.maximumf %14, %16 : vector<8x896xf32>
    %18 = arith.truncf %17 : vector<8x896xf32> to vector<8x896xbf16>
    %cst_20 = arith.constant dense<0.000000e+00> : vector<8x896xf32>
    %19 = tpu.matmul %18, %6, %cst_20 {dimension_numbers = #tpu.dot_dimension_numbers<[1], [0], [0], [1], [0, 0, 1, 1], [], []>} : vector<8x896xbf16>, vector<896x896xbf16>, vector<8x896xf32> -> vector<8x896xf32>
    %20 = vector.broadcast %9 : vector<1x896xf32> to vector<8x896xf32>
    %21 = arith.addf %19, %20 : vector<8x896xf32>
    %cst_21 = arith.constant 2.000000e-01 : f32
    %22 = vector.broadcast %cst_21 : f32 to vector<8x896xf32>
    %23 = arith.mulf %22, %21 : vector<8x896xf32>
    %24 = arith.maximumf %21, %23 : vector<8x896xf32>
    %25 = arith.truncf %24 : vector<8x896xf32> to vector<8x896xbf16>
    %cst_22 = arith.constant dense<0.000000e+00> : vector<8x896xf32>
    %26 = tpu.matmul %25, %7, %cst_22 {dimension_numbers = #tpu.dot_dimension_numbers<[1], [0], [0], [1], [0, 0, 1, 1], [], []>} : vector<8x896xbf16>, vector<896x896xbf16>, vector<8x896xf32> -> vector<8x896xf32>
    %27 = vector.broadcast %10 : vector<1x896xf32> to vector<8x896xf32>
    %28 = arith.addf %26, %27 : vector<8x896xf32>
    %29 = math.tanh %28 : vector<8x896xf32>
    %30 = vector.extract_strided_slice %29 {offsets = [0, 0], sizes = [8, 784], strides = [1, 1]} : vector<8x896xf32> to vector<8x784xf32>
    %c0_23 = arith.constant 0 : index
    %c0_24 = arith.constant 0 : index
    %31 = vector.load %arg8[%c0_23, %c0_24] : memref<8x784xf32, #tpu.memory_space<vmem>>, vector<8x784xf32>
    tpu.vector_store %arg8[%c0_23, %c0_24], %30 {strides = array<i32>} : memref<8x784xf32, #tpu.memory_space<vmem>>, vector<8x784xf32>,
    return
  }
  func.func @transform_0(%arg0: i32) -> (i32, i32) {
    %c0_i32 = arith.constant 0 : i32
    %c0_i32_0 = arith.constant 0 : i32
    return %arg0, %c0_i32 : i32, i32
  }
  func.func @transform_1(%arg0: i32) -> (i32, i32) {
    %c0_i32 = arith.constant 0 : i32
    %c0_i32_0 = arith.constant 0 : i32
    %c0_i32_1 = arith.constant 0 : i32
    return %c0_i32, %c0_i32_0 : i32, i32
  }
  func.func @transform_2(%arg0: i32) -> (i32, i32) {
    %c0_i32 = arith.constant 0 : i32
    %c0_i32_0 = arith.constant 0 : i32
    %c0_i32_1 = arith.constant 0 : i32
    return %c0_i32, %c0_i32_0 : i32, i32
  }
  func.func @transform_3(%arg0: i32) -> (i32, i32) {
    %c0_i32 = arith.constant 0 : i32
    %c0_i32_0 = arith.constant 0 : i32
    %c0_i32_1 = arith.constant 0 : i32
    return %c0_i32, %c0_i32_0 : i32, i32
  }
  func.func @transform_4(%arg0: i32) -> (i32, i32) {
    %c0_i32 = arith.constant 0 : i32
    %c0_i32_0 = arith.constant 0 : i32
    %c0_i32_1 = arith.constant 0 : i32
    return %c0_i32, %c0_i32_0 : i32, i32
  }
  func.func @transform_5(%arg0: i32) -> (i32, i32) {
    %c0_i32 = arith.constant 0 : i32
    %c0_i32_0 = arith.constant 0 : i32
    %c0_i32_1 = arith.constant 0 : i32
    return %c0_i32, %c0_i32_0 : i32, i32
  }
  func.func @transform_6(%arg0: i32) -> (i32, i32) {
    %c0_i32 = arith.constant 0 : i32
    %c0_i32_0 = arith.constant 0 : i32
    %c0_i32_1 = arith.constant 0 : i32
    return %c0_i32, %c0_i32_0 : i32, i32
  }
  func.func @transform_7(%arg0: i32) -> (i32, i32) {
    %c0_i32 = arith.constant 0 : i32
    %c0_i32_0 = arith.constant 0 : i32
    return %arg0, %c0_i32 : i32, i32
  }
}

</mosaic_0001>

<bundles_post_ra>
// kernel: leader_cnn_forward.1
= control target key start
LH: loop header
LB: loop body
LE: loop exit
PB: predicated region body
PF: predicated region fallthrough
CT: control target
= control target key end

     0   :  { %vm27_vm0 = vcmask 1043592   ;;  %vm43_vm1 = vcmask 134144   ;;  %vm9480_vm2 = vcmask 130048   ;;  %s23050_s1 = inlined_call_operand.vmem [shape: bf16[896,896], index: 1, kind: input, shape index: {}]   ;;  %s23051_s0 = inlined_call_operand.vmem [shape: f32[8,785], index: 0, kind: input, shape index: {}]   ;;  %s23052_s2 = inlined_call_operand.vmem [shape: f32[1,896], index: 2, kind: input, shape index: {}]   ;;  %s23053_s3 = inlined_call_operand.vmem [shape: bf16[896,896], index: 3, kind: input, shape index: {}]   ;;  %s23054_s4 = inlined_call_operand.vmem [shape: f32[1,896], index: 4, kind: input, shape index: {}]   ;;  %s23055_s5 = inlined_call_operand.vmem [shape: bf16[896,896], index: 5, kind: input, shape index: {}]   ;;  %s23056_s6 = inlined_call_operand.vmem [shape: f32[1,896], index: 6, kind: input, shape index: {}]   ;;  %s23057_s7 = inlined_call_operand.vmem [shape: f32[8,784], index: 7, kind: output, shape index: {}]  }
   0x1   :  { %v9684_v0 = vld [vmem:[%s23050_s1 + $0x188] sm:$0xf]  ;;  %v14242_v1 = vld [vmem:[%s23050_s1 + $0x1a0] sm:$0xf0]  ;;  %v9656_v11 = vld [vmem:[%s23050_s1 + $0x150] sm:$0xf] }
   0x2   :  { %v9908_v2 = vld [vmem:[%s23050_s1 + $0x348] sm:$0xf]  ;;  %v9685_v3 = vor.u32 %v14242_v1, %v9684_v0  ;;  %v14298_v4 = vld [vmem:[%s23050_s1 + $0x360] sm:$0xf0]  ;;  %v14235_v13 = vld [vmem:[%s23050_s1 + $0x168] sm:$0xf0] }
   0x3   :  { %v10132_v5 = vld [vmem:[%s23050_s1 + $0x508] sm:$0xf]  ;;  %v14354_v6 = vld [vmem:[%s23050_s1 + $0x520] sm:$0xf0]  ;;  %v9909_v7 = vor.u32 %v14298_v4, %v9908_v2  ;;  %v9880_v14 = vld [vmem:[%s23050_s1 + $0x310] sm:$0xf]  ;;  %v9657_v16 = vor.u32 %v14235_v13, %v9656_v11 }
   0x4   :  { %v10133_v8 = vor.u32 %v14354_v6, %v10132_v5  ;;  %v10356_v9 = vld [vmem:[%s23050_s1 + $0x6c8] sm:$0xf]  ;;  %v14410_v10 = vld [vmem:[%s23050_s1 + $0x6e0] sm:$0xf0]  ;;  %3452 = vmatpush.bf16.msra.mxu0 %v9685_v3  ;;  %v14291_v15 = vld [vmem:[%s23050_s1 + $0x328] sm:$0xf0] }
   0x5   :  { %v10357_v12 = vor.u32 %v14410_v10, %v10356_v9  ;;  %3465 = vmatpush.bf16.msra.mxu1 %v9909_v7  ;;  %v9881_v17 = vor.u32 %v14291_v15, %v9880_v14  ;;  %v10104_v18 = vld [vmem:[%s23050_s1 + $0x4d0] sm:$0xf]  ;;  %v14347_v19 = vld [vmem:[%s23050_s1 + $0x4e8] sm:$0xf0]  ;;  %v9628_v23 = vld [vmem:[%s23050_s1 + $0x118] sm:$0xf] }
   0x6   :  { %3478 = vmatpush.bf16.msra.mxu2 %v10133_v8  ;;  %v10328_v20 = vld [vmem:[%s23050_s1 + $0x690] sm:$0xf]  ;;  %v10105_v21 = vor.u32 %v14347_v19, %v10104_v18  ;;  %v14403_v22 = vld [vmem:[%s23050_s1 + $0x6a8] sm:$0xf0]  ;;  %v14228_v24 = vld [vmem:[%s23050_s1 + $0x130] sm:$0xf0] }
   0x7   :  { %3491 = vmatpush.bf16.msra.mxu3 %v10357_v12  ;;  %v10329_v25 = vor.u32 %v14403_v22, %v10328_v20  ;;  %v9852_v26 = vld [vmem:[%s23050_s1 + $0x2d8] sm:$0xf]  ;;  %v14284_v27 = vld [vmem:[%s23050_s1 + $0x2f0] sm:$0xf0]  ;;  %v9629_v29 = vor.u32 %v14228_v24, %v9628_v23  ;;  %v9600_v35 = vld [vmem:[%s23050_s1 + $0xe0] sm:$0xf] }
   0x8   :  { %v10076_v28 = vld [vmem:[%s23050_s1 + $0x498] sm:$0xf]  ;;  %3453 = vmatpush.bf16.msra.mxu0 %v9657_v16  ;;  %v14340_v30 = vld [vmem:[%s23050_s1 + $0x4b0] sm:$0xf0]  ;;  %v9853_v33 = vor.u32 %v14284_v27, %v9852_v26  ;;  %v14221_v36 = vld [vmem:[%s23050_s1 + $0xf8] sm:$0xf0] }
   0x9   :  { %v10300_v31 = vld [vmem:[%s23050_s1 + $0x658] sm:$0xf]  ;;  %v14396_v32 = vld [vmem:[%s23050_s1 + $0x670] sm:$0xf0]  ;;  %3466 = vmatpush.bf16.msra.mxu1 %v9881_v17  ;;  %v10077_v34 = vor.u32 %v14340_v30, %v10076_v28  ;;  %v9824_v37 = vld [vmem:[%s23050_s1 + $0x2a0] sm:$0xf]  ;;  %v9601_v44 = vor.u32 %v14221_v36, %v9600_v35 }
   0xa   :  { %3479 = vmatpush.bf16.msra.mxu2 %v10105_v21  ;;  %v10301_v38 = vor.u32 %v14396_v32, %v10300_v31  ;;  %v14277_v39 = vld [vmem:[%s23050_s1 + $0x2b8] sm:$0xf0]  ;;  %v10048_v40 = vld [vmem:[%s23050_s1 + $0x460] sm:$0xf]  ;;  %v9572_v47 = vld [vmem:[%s23050_s1 + $0xa8] sm:$0xf] }
   0xb   :  { %3492 = vmatpush.bf16.msra.mxu3 %v10329_v25  ;;  %v14333_v41 = vld [vmem:[%s23050_s1 + $0x478] sm:$0xf0]  ;;  %v10272_v42 = vld [vmem:[%s23050_s1 + $0x620] sm:$0xf]  ;;  %v9825_v45 = vor.u32 %v14277_v39, %v9824_v37  ;;  %v14214_v48 = vld [vmem:[%s23050_s1 + $0xc0] sm:$0xf0] }
   0xc   :  { %v14389_v43 = vld [vmem:[%s23050_s1 + $0x638] sm:$0xf0]  ;;  %3454 = vmatpush.bf16.msra.mxu0 %v9629_v29  ;;  %v10049_v46 = vor.u32 %v14333_v41, %v10048_v40  ;;  %v9796_v49 = vld [vmem:[%s23050_s1 + $0x268] sm:$0xf]  ;;  %v14270_v51 = vld [vmem:[%s23050_s1 + $0x280] sm:$0xf0]  ;;  %v9573_v56 = vor.u32 %v14214_v48, %v9572_v47 }
   0xd   :  { %3467 = vmatpush.bf16.msra.mxu1 %v9853_v33  ;;  %v10273_v50 = vor.u32 %v14389_v43, %v10272_v42  ;;  %v10020_v52 = vld [vmem:[%s23050_s1 + $0x428] sm:$0xf]  ;;  %v14326_v53 = vld [vmem:[%s23050_s1 + $0x440] sm:$0xf0]  ;;  %v9797_v57 = vor.u32 %v14270_v51, %v9796_v49  ;;  %v9544_v59 = vld [vmem:[%s23050_s1 + $0x70] sm:$0xf] }
   0xe   :  { %3480 = vmatpush.bf16.msra.mxu2 %v10077_v34  ;;  %v10244_v54 = vld [vmem:[%s23050_s1 + $0x5e8] sm:$0xf]  ;;  %v14382_v55 = vld [vmem:[%s23050_s1 + $0x600] sm:$0xf0]  ;;  %v10021_v58 = vor.u32 %v14326_v53, %v10020_v52  ;;  %v14207_v60 = vld [vmem:[%s23050_s1 + $0x88] sm:$0xf0] }
   0xf   :  { %3493 = vmatpush.bf16.msra.mxu3 %v10301_v38  ;;  %v9768_v61 = vld [vmem:[%s23050_s1 + $0x230] sm:$0xf]  ;;  %v10245_v62 = vor.u32 %v14382_v55, %v10244_v54  ;;  %v14263_v63 = vld [vmem:[%s23050_s1 + $0x248] sm:$0xf0]  ;;  %v9545_v4 = vor.u32 %v14207_v60, %v9544_v59  ;;  %v9516_v7 = vld [vmem:[%s23050_s1 + $0x38] sm:$0xf] }
  0x10   :  { %3455 = vmatpush.bf16.msra.mxu0 %v9601_v44  ;;  %v9992_v0 = vld [vmem:[%s23050_s1 + $0x3f0] sm:$0xf]  ;;  %v14319_v1 = vld [vmem:[%s23050_s1 + $0x408] sm:$0xf0]  ;;  %v9769_v5 = vor.u32 %v14263_v63, %v9768_v61  ;;  %v14200_v8 = vld [vmem:[%s23050_s1 + $0x50] sm:$0xf0] }
  0x11   :  { %3468 = vmatpush.bf16.msra.mxu1 %v9825_v45  ;;  %v10216_v2 = vld [vmem:[%s23050_s1 + $0x5b0] sm:$0xf]  ;;  %v14375_v3 = vld [vmem:[%s23050_s1 + $0x5c8] sm:$0xf0]  ;;  %v9993_v6 = vor.u32 %v14319_v1, %v9992_v0  ;;  %v9740_v9 = vld [vmem:[%s23050_s1 + $0x1f8] sm:$0xf]  ;;  %v9517_v16 = vor.u32 %v14200_v8, %v9516_v7 }
  0x12   :  { %3481 = vmatpush.bf16.msra.mxu2 %v10049_v46  ;;  %v10217_v10 = vor.u32 %v14375_v3, %v10216_v2  ;;  %v14256_v11 = vld [vmem:[%s23050_s1 + $0x210] sm:$0xf0]  ;;  %v9964_v12 = vld [vmem:[%s23050_s1 + $0x3b8] sm:$0xf]  ;;  %v9488_v17 = vld [vmem:[%s23050_s1] sm:$0xf] }
  0x13   :  { %3494 = vmatpush.bf16.msra.mxu3 %v10273_v50  ;;  %v14312_v13 = vld [vmem:[%s23050_s1 + $0x3d0] sm:$0xf0]  ;;  %v10188_v14 = vld [vmem:[%s23050_s1 + $0x578] sm:$0xf]  ;;  %v14193_v18 = vld [vmem:[%s23050_s1 + $0x18] sm:$0xf0]  ;;  %v9741_v19 = vor.u32 %v14256_v11, %v9740_v9 }
  0x14   :  { %3456 = vmatpush.bf16.msra.mxu0 %v9573_v56  ;;  %v14368_v15 = vld [vmem:[%s23050_s1 + $0x590] sm:$0xf0]  ;;  %v9965_v20 = vor.u32 %v14312_v13, %v9964_v12  ;;  %v9712_v21 = vld [vmem:[%s23050_s1 + $0x1c0] sm:$0xf]  ;;  %v14249_v22 = vld [vmem:[%s23050_s1 + $0x1d8] sm:$0xf0]  ;;  %v9489_v31 = vor.u32 %v14193_v18, %v9488_v17 }
  0x15   :  { %3469 = vmatpush.bf16.msra.mxu1 %v9797_v57  ;;  %v9936_v23 = vld [vmem:[%s23050_s1 + $0x380] sm:$0xf]  ;;  %v10189_v24 = vor.u32 %v14368_v15, %v10188_v14  ;;  %v14305_v25 = vld [vmem:[%s23050_s1 + $0x398] sm:$0xf0]  ;;  %v10580_v28 = vld [vmem:[%s23050_s1 + $0x888] sm:$0xf]  ;;  %v9713_v35 = vor.u32 %v14249_v22, %v9712_v21 }
  0x16   :  { %3482 = vmatpush.bf16.msra.mxu2 %v10021_v58  ;;  %v10160_v26 = vld [vmem:[%s23050_s1 + $0x540] sm:$0xf]  ;;  %v14361_v27 = vld [vmem:[%s23050_s1 + $0x558] sm:$0xf0]  ;;  %v14466_v29 = vld [vmem:[%s23050_s1 + $0x8a0] sm:$0xf0]  ;;  %v9937_v36 = vor.u32 %v14305_v25, %v9936_v23 }
  0x17   :  { %3495 = vmatpush.bf16.msra.mxu3 %v10245_v62  ;;  %v10804_v30 = vld [vmem:[%s23050_s1 + $0xa48] sm:$0xf]  ;;  %v14522_v32 = vld [vmem:[%s23050_s1 + $0xa60] sm:$0xf0]  ;;  %v14239_v37 = vld [vmem:[%s23050_s1 + $0x18c] sm:$0xf]  ;;  %v10161_v39 = vor.u32 %v14361_v27, %v10160_v26  ;;  %v10581_v40 = vor.u32 %v14466_v29, %v10580_v28 }
  0x18   :  { %3457 = vmatpush.bf16.msra.mxu0 %v9545_v4  ;;  %v11028_v33 = vld [vmem:[%s23050_s1 + $0xc08] sm:$0xf]  ;;  %v14578_v34 = vld [vmem:[%s23050_s1 + $0xc20] sm:$0xf0]  ;;  %v10805_v41 = vor.u32 %v14522_v32, %v10804_v30  ;;  %v10552_v43 = vld [vmem:[%s23050_s1 + $0x850] sm:$0xf] }
  0x19   :  { %3470 = vmatpush.bf16.msra.mxu1 %v9769_v5  ;;  %v9686_v38 = vld [vmem:[%s23050_s1 + $0x1a4] sm:$0xf0]  ;;  %v11029_v42 = vor.u32 %v14578_v34, %v11028_v33  ;;  %v14459_v44 = vld [vmem:[%s23050_s1 + $0x868] sm:$0xf0]  ;;  %v10776_v45 = vld [vmem:[%s23050_s1 + $0xa10] sm:$0xf] }
  0x1a   :  { %3483 = vmatpush.bf16.msra.mxu2 %v9993_v6  ;;  %v9689_v46 = vor.u32 %v14239_v37, %v9686_v38  ;;  %v14515_v47 = vld [vmem:[%s23050_s1 + $0xa28] sm:$0xf0]  ;;  %v11000_v48 = vld [vmem:[%s23050_s1 + $0xbd0] sm:$0xf]  ;;  %v14232_v50 = vld [vmem:[%s23050_s1 + $0x154] sm:$0xf]  ;;  %v10553_v53 = vor.u32 %v14459_v44, %v10552_v43 }
  0x1b   :  { %3496 = vmatpush.bf16.msra.mxu3 %v10217_v10  ;;  %v14571_v49 = vld [vmem:[%s23050_s1 + $0xbe8] sm:$0xf0]  ;;  %v9658_v51 = vld [vmem:[%s23050_s1 + $0x16c] sm:$0xf0]  ;;  %v10524_v52 = vld [vmem:[%s23050_s1 + $0x818] sm:$0xf]  ;;  %v10777_v57 = vor.u32 %v14515_v47, %v10776_v45 }
  0x1c   :  { %3458 = vmatpush.bf16.msra.mxu0 %v9517_v16  ;;  %v14452_v54 = vld [vmem:[%s23050_s1 + $0x830] sm:$0xf0]  ;;  %v10748_v55 = vld [vmem:[%s23050_s1 + $0x9d8] sm:$0xf]  ;;  %v11001_v58 = vor.u32 %v14571_v49, %v11000_v48  ;;  %v9661_v62 = vor.u32 %v14232_v50, %v9658_v51  ;;  %v29_v0 = vld [vmem:[%s23051_s0] sm:$0xff]  ;;  %v15386_v51 = vmov 0  }
  0x1d   :  { %3471 = vmatpush.bf16.msra.mxu1 %v9741_v19  ;;  %v14508_v56 = vld [vmem:[%s23050_s1 + $0x9f0] sm:$0xf0]  ;;  %v10972_v59 = vld [vmem:[%s23050_s1 + $0xb98] sm:$0xf]  ;;  %v30_v1 = vld [vmem:[%s23051_s0 + $0x8] sm:$0xff]  ;;  %v10525_v6 = vor.u32 %v14452_v54, %v10524_v52 }
  0x1e   :  { %3484 = vmatpush.bf16.msra.mxu2 %v9965_v20  ;;  %v14564_v60 = vld [vmem:[%s23050_s1 + $0xbb0] sm:$0xf0]  ;;  %v32_v63 = vld [vmem:[%s23051_s0 + $0x18] sm:$0xff]  ;;  %v36_v5 = vpack.c.bf16 %v30_v1, %v29_v0  ;;  %v10496_v7 = vld [vmem:[%s23050_s1 + $0x7e0] sm:$0xf]  ;;  %v10749_v9 = vor.u32 %v14508_v56, %v10748_v55 }
  0x1f   :  { %3497 = vmatpush.bf16.msra.mxu3 %v10189_v24  ;;  %v31_v61 = vld [vmem:[%s23051_s0 + $0x10] sm:$0xff]  ;;  %v14225_v2 = vld [vmem:[%s23050_s1 + $0x11c] sm:$0xf]  ;;  %v9630_v3 = vld [vmem:[%s23050_s1 + $0x134] sm:$0xf0]  ;;  %v10973_v10 = vor.u32 %v14564_v60, %v10972_v59 }
  0x20   :  { %3459 = vmatpush.bf16.msra.mxu0 %v9489_v31  ;;  %v37_v4 = vpack.c.bf16 %v32_v63, %v31_v61  ;;  %v14445_v8 = vld [vmem:[%s23050_s1 + $0x7f8] sm:$0xf0]  ;;  %v10720_v11 = vld [vmem:[%s23050_s1 + $0x9a0] sm:$0xf]  ;;  %v1415_v14 = vunpack.c.l.b16 %v36_v5  ;;  %v9633_v15 = vor.u32 %v14225_v2, %v9630_v3  ;;  %v1416_v18 = vunpack.c.h.b16 %v36_v5  ;;  %v14218_v20 = vld [vmem:[%s23050_s1 + $0xe4] sm:$0xf] }
  0x21   :  { %3472 = vmatpush.bf16.msra.mxu1 %v9713_v35  ;;  %v14501_v12 = vld [vmem:[%s23050_s1 + $0x9b8] sm:$0xf0]  ;;  %v10944_v16 = vld [vmem:[%s23050_s1 + $0xb60] sm:$0xf]  ;;  %v10497_v24 = vor.u32 %v14445_v8, %v10496_v7  ;;  %v35_v27 = vld [vmem:[%s23051_s0 + $0x30] sm:$0xff] }
  0x22   :  { %3485 = vmatpush.bf16.msra.mxu2 %v9937_v36  ;;  %v1417_v13 = vunpack.c.l.b16 %v37_v4  ;;  %v14557_v17 = vld [vmem:[%s23050_s1 + $0xb78] sm:$0xf0]  ;;  %v1418_v19 = vunpack.c.h.b16 %v37_v4  ;;  %v9602_v21 = vld [vmem:[%s23050_s1 + $0xfc] sm:$0xf0]  ;;  %v15729_v23 = vpack.c.b16 %v1415_v14, %v1415_v14  ;;  %v15731_v25 = vpack.c.b16 %v1416_v18, %v1416_v18  ;;  %v10468_v30 = vld [vmem:[%s23050_s1 + $0x7a8] sm:$0xf] }
  0x23   :  { %3498 = vmatpush.bf16.msra.mxu3 %v10161_v39  ;;  %v10721_v28 = vor.u32 %v14501_v12, %v10720_v11  ;;  %v10945_v29 = vor.u32 %v14557_v17, %v10944_v16  ;;  %v14438_v31 = vld [vmem:[%s23050_s1 + $0x7c0] sm:$0xf0]  ;;  %v10692_v32 = vld [vmem:[%s23050_s1 + $0x968] sm:$0xf]  ;;  %v9605_v33 = vor.u32 %v14218_v20, %v9602_v21  ;;  %v14211_v37 = vld [vmem:[%s23050_s1 + $0xac] sm:$0xf]  ;;  %v39_v39 = vpack.c.bf16 %v35_v27, %v35_v27 }
  0x24   :  { %3504 = vmatpush.bf16.msrb.mxu0 %v10581_v40  ;;  %v15727_v22 = vpack.c.b16 %v1417_v13, %v1417_v13  ;;  %v15733_v26 = vpack.c.b16 %v1418_v19, %v1418_v19  ;;  %v14494_v34 = vld [vmem:[%s23050_s1 + $0x980] sm:$0xf0]  ;;  %v10916_v35 = vld [vmem:[%s23050_s1 + $0xb28] sm:$0xf]  ;;  %3473 = vmatmul.bf16.vlgmr.msra.gmra.mxu1 %v15731_v25  ;;  %v10469_v40 = vor.u32 %v14438_v31, %v10468_v30  ;;  %v10664_v45 = vld [vmem:[%s23050_s1 + $0x930] sm:$0xf] }
  0x25   :  { %3517 = vmatpush.bf16.msrb.mxu1 %v10805_v41  ;;  %v14550_v36 = vld [vmem:[%s23050_s1 + $0xb40] sm:$0xf0]  ;;  %v9574_v38 = vld [vmem:[%s23050_s1 + $0xc4] sm:$0xf0]  ;;  %3460 = vmatmul.bf16.vlgmr.msra.gmra.mxu0 %v15729_v23  ;;  %v10440_v41 = vld [vmem:[%s23050_s1 + $0x770] sm:$0xf]  ;;  %v10693_v43 = vor.u32 %v14494_v34, %v10692_v32 }
  0x26   :  { %3530 = vmatpush.bf16.msrb.mxu2 %v11029_v42  ;;  %v14431_v42 = vld [vmem:[%s23050_s1 + $0x788] sm:$0xf0]  ;;  %3499 = vmatmul.bf16.vlgmr.msra.gmra.mxu3 %v15733_v26  ;;  %v10917_v44 = vor.u32 %v14550_v36, %v10916_v35  ;;  %v10888_v47 = vld [vmem:[%s23050_s1 + $0xaf0] sm:$0xf]  ;;  %v9577_v48 = vor.u32 %v14211_v37, %v9574_v38  ;;  %v14204_v50 = vld [vmem:[%s23050_s1 + $0x74] sm:$0xf] }
  0x27   :  { %3543 = vmatpush.bf16.msrb.mxu3 %v9689_v46  ;;  %3486 = vmatmul.bf16.vlgmr.msra.gmra.mxu2 %v15727_v22  ;;  %v14487_v46 = vld [vmem:[%s23050_s1 + $0x948] sm:$0xf0]  ;;  %28 = vst.msk [vmem:[#allocation2 + $0x18] sm:$0xf] %vm27_vm0, %v15386_v51  ;;  %v9546_v52 = vld [vmem:[%s23050_s1 + $0x8c] sm:$0xf0]  ;;  %v10441_v54 = vor.u32 %v14431_v42, %v10440_v41 }
  0x28   :  { %3505 = vmatpush.bf16.msrb.mxu0 %v10553_v53  ;;  %v14543_v49 = vld [vmem:[%s23050_s1 + $0xb08] sm:$0xf0]  ;;  %44 = vst.msk [vmem:[#allocation2 + $0x18] sm:$0xf] %vm43_vm1, %v39_v39  ;;  %v33_v53 = vld [vmem:[%s23051_s0 + $0x20] sm:$0xff]  ;;  %v10665_v56 = vor.u32 %v14487_v46, %v10664_v45  ;;  %v9549_v61 = vor.u32 %v14204_v50, %v9546_v52 }
  0x29   :  { %3518 = vmatpush.bf16.msrb.mxu1 %v10777_v57  ;;  %v10412_v55 = vld [vmem:[%s23050_s1 + $0x738] sm:$0xf]  ;;  %v10889_v57 = vor.u32 %v14543_v49, %v10888_v47  ;;  %v34_v60 = vld [vmem:[%s23051_s0 + $0x28] sm:$0xff]  ;;  %v14536_v0 = vld [vmem:[%s23050_s1 + $0xad0] sm:$0xf0] }
  0x2a   :  { %3531 = vmatpush.bf16.msrb.mxu2 %v11001_v58  ;;  %v14424_v58 = vld [vmem:[%s23050_s1 + $0x750] sm:$0xf0]  ;;  %v10636_v59 = vld [vmem:[%s23050_s1 + $0x8f8] sm:$0xf]  ;;  %v38_v1 = vpack.c.bf16 %v34_v60, %v33_v53  ;;  %v14197_v2 = vld [vmem:[%s23050_s1 + $0x3c] sm:$0xf] }
  0x2b   :  { %3544 = vmatpush.bf16.msrb.mxu3 %v9661_v62  ;;  %v14480_v62 = vld [vmem:[%s23050_s1 + $0x910] sm:$0xf0]  ;;  %v10860_v63 = vld [vmem:[%s23050_s1 + $0xab8] sm:$0xf]  ;;  %v10384_v4 = vld [vmem:[%s23050_s1 + $0x700] sm:$0xf]  ;;  %v10413_v5 = vor.u32 %v14424_v58, %v10412_v55 }
  0x2c   :  { %3506 = vmatpush.bf16.msrb.mxu0 %v10525_v6  ;;  %v9518_v3 = vld [vmem:[%s23050_s1 + $0x54] sm:$0xf0]  ;;  %v14417_v6 = vld [vmem:[%s23050_s1 + $0x718] sm:$0xf0]  ;;  %v10608_v7 = vld [vmem:[%s23050_s1 + $0x8c0] sm:$0xf]  ;;  %v10637_v8 = vor.u32 %v14480_v62, %v10636_v59  ;;  %v1420_v34 = vunpack.c.h.b16 %v38_v1 }
  0x2d   :  { %3519 = vmatpush.bf16.msrb.mxu1 %v10749_v9  ;;  %v10861_v9 = vor.u32 %v14536_v0, %v10860_v63  ;;  %v10832_v11 = vld [vmem:[%s23050_s1 + $0xa80] sm:$0xf]  ;;  %v14529_v12 = vld [vmem:[%s23050_s1 + $0xa98] sm:$0xf0]  ;;  %v9521_v13 = vor.u32 %v14197_v2, %v9518_v3  ;;  %v14190_v14 = vld [vmem:[%s23050_s1 + $0x4] sm:$0xf]  ;;  %v10385_v20 = vor.u32 %v14417_v6, %v10384_v4 }
  0x2e   :  { %3532 = vmatpush.bf16.msrb.mxu2 %v10973_v10  ;;  %v14473_v10 = vld [vmem:[%s23050_s1 + $0x8d8] sm:$0xf0]  ;;  %v14295_v17 = vld [vmem:[%s23050_s1 + $0x34c] sm:$0xf]  ;;  %v9910_v18 = vld [vmem:[%s23050_s1 + $0x364] sm:$0xf0]  ;;  %v10833_v30 = vor.u32 %v14529_v12, %v10832_v11  ;;  %v15897_v50 = vpack.c.b16 %v1420_v34, %v1420_v34 }
  0x2f   :  { %3545 = vmatpush.bf16.msrb.mxu3 %v9633_v15  ;;  %v9490_v15 = vld [vmem:[%s23050_s1 + $0x1c] sm:$0xf0]  ;;  %v1395_v16 = vld [vmem:[#allocation2 + $0x18] sm:$0xf]  ;;  %v14351_v19 = vld [vmem:[%s23050_s1 + $0x50c] sm:$0xf]  ;;  %v9913_v36 = vor.u32 %v14295_v17, %v9910_v18 }
  0x30   :  { %3507 = vmatpush.bf16.msrb.mxu0 %v10497_v24  ;;  %v10134_v21 = vld [vmem:[%s23050_s1 + $0x524] sm:$0xf0]  ;;  %v14407_v24 = vld [vmem:[%s23050_s1 + $0x6cc] sm:$0xf]  ;;  %v9493_v35 = vor.u32 %v14190_v14, %v9490_v15  ;;  %v14288_v39 = vld [vmem:[%s23050_s1 + $0x314] sm:$0xf] }
  0x31   :  { %3520 = vmatpush.bf16.msrb.mxu1 %v10721_v28  ;;  %v10358_v27 = vld [vmem:[%s23050_s1 + $0x6e4] sm:$0xf0]  ;;  %v1421_v28 = vunpack.c.l.b16 %v1395_v16  ;;  %v14463_v31 = vld [vmem:[%s23050_s1 + $0x88c] sm:$0xf]  ;;  %v10137_v37 = vor.u32 %v14351_v19, %v10134_v21  ;;  %v14344_v41 = vld [vmem:[%s23050_s1 + $0x4d4] sm:$0xf] }
  0x32   :  { %3533 = vmatpush.bf16.msrb.mxu2 %v10945_v29  ;;  %v10609_v29 = vor.u32 %v14473_v10, %v10608_v7  ;;  %v10582_v32 = vld [vmem:[%s23050_s1 + $0x8a4] sm:$0xf0]  ;;  %v10361_v38 = vor.u32 %v14407_v24, %v10358_v27  ;;  %v14400_v45 = vld [vmem:[%s23050_s1 + $0x694] sm:$0xf]  ;;  %v10330_v46 = vld [vmem:[%s23050_s1 + $0x6ac] sm:$0xf0] }
  0x33   :  { %3546 = vmatpush.bf16.msrb.mxu3 %v9605_v33  ;;  %v1419_v33 = vunpack.c.l.b16 %v38_v1  ;;  %v10585_v42 = vor.u32 %v14463_v31, %v10582_v32  ;;  %v14456_v47 = vld [vmem:[%s23050_s1 + $0x854] sm:$0xf]  ;;  %v10333_v53 = vor.u32 %v14400_v45, %v10330_v46  ;;  %v9854_v55 = vld [vmem:[%s23050_s1 + $0x2f4] sm:$0xf0]  ;;  %v14393_v59 = vld [vmem:[%s23050_s1 + $0x65c] sm:$0xf] }
  0x34   :  { %3508 = vmatpush.bf16.msrb.mxu0 %v10469_v40  ;;  %v9882_v40 = vld [vmem:[%s23050_s1 + $0x32c] sm:$0xf0]  ;;  %v10078_v58 = vld [vmem:[%s23050_s1 + $0x4b4] sm:$0xf0]  ;;  %v14274_v2 = vld [vmem:[%s23050_s1 + $0x2a4] sm:$0xf] }
  0x35   :  { %3521 = vmatpush.bf16.msrb.mxu1 %v10693_v43  ;;  %v15878_v43 = vpack.c.b16 %v1421_v28, %v1421_v28  ;;  %v15895_v49 = vpack.c.b16 %v1419_v33, %v1419_v33  ;;  %v9885_v51 = vor.u32 %v14288_v39, %v9882_v40  ;;  %v10302_v60 = vld [vmem:[%s23050_s1 + $0x674] sm:$0xf0]  ;;  %v9826_v3 = vld [vmem:[%s23050_s1 + $0x2bc] sm:$0xf0]  ;;  %v14330_v4 = vld [vmem:[%s23050_s1 + $0x464] sm:$0xf] }
  0x36   :  { %3534 = vmatpush.bf16.msrb.mxu2 %v10917_v44  ;;  %v10106_v44 = vld [vmem:[%s23050_s1 + $0x4ec] sm:$0xf0]  ;;  %v10526_v62 = vld [vmem:[%s23050_s1 + $0x834] sm:$0xf0]  ;;  %v10305_v1 = vor.u32 %v14393_v59, %v10302_v60  ;;  %v10050_v6 = vld [vmem:[%s23050_s1 + $0x47c] sm:$0xf0]  ;;  %v9829_v11 = vor.u32 %v14274_v2, %v9826_v3 }
  0x37   :  { %3547 = vmatpush.bf16.msrb.mxu3 %v9577_v48  ;;  %v10554_v48 = vld [vmem:[%s23050_s1 + $0x86c] sm:$0xf0]  ;;  %v10109_v52 = vor.u32 %v14344_v41, %v10106_v44  ;;  %v14386_v7 = vld [vmem:[%s23050_s1 + $0x624] sm:$0xf]  ;;  %v10498_v10 = vld [vmem:[%s23050_s1 + $0x7fc] sm:$0xf0]  ;;  %v10053_v12 = vor.u32 %v14330_v4, %v10050_v6 }
  0x38   :  { %3509 = vmatpush.bf16.msrb.mxu0 %v10441_v54  ;;  %v14281_v54 = vld [vmem:[%s23050_s1 + $0x2dc] sm:$0xf]  ;;  %v14267_v14 = vld [vmem:[%s23050_s1 + $0x26c] sm:$0xf]  ;;  %v9798_v15 = vld [vmem:[%s23050_s1 + $0x284] sm:$0xf0] }
  0x39   :  { %3522 = vmatpush.bf16.msrb.mxu1 %v10665_v56  ;;  %v14337_v56 = vld [vmem:[%s23050_s1 + $0x49c] sm:$0xf]  ;;  %v9857_v63 = vor.u32 %v14281_v54, %v9854_v55  ;;  %v14323_v16 = vld [vmem:[%s23050_s1 + $0x42c] sm:$0xf]  ;;  %v10022_v18 = vld [vmem:[%s23050_s1 + $0x444] sm:$0xf0]  ;;  %v9801_v27 = vor.u32 %v14267_v14, %v9798_v15 }
  0x3a   :  { %3535 = vmatpush.bf16.msrb.mxu2 %v10889_v57  ;;  %v10557_v57 = vor.u32 %v14456_v47, %v10554_v48  ;;  %v10081_v0 = vor.u32 %v14337_v56, %v10078_v58  ;;  %v14379_v19 = vld [vmem:[%s23050_s1 + $0x5ec] sm:$0xf]  ;;  %v10470_v24 = vld [vmem:[%s23050_s1 + $0x7c4] sm:$0xf0]  ;;  %v10025_v28 = vor.u32 %v14323_v16, %v10022_v18  ;;  %v9770_v31 = vld [vmem:[%s23050_s1 + $0x24c] sm:$0xf0] }
  0x3b   :  { %3548 = vmatpush.bf16.msrb.mxu3 %v9549_v61  ;;  %v14449_v61 = vld [vmem:[%s23050_s1 + $0x81c] sm:$0xf]  ;;  %v14435_v21 = vld [vmem:[%s23050_s1 + $0x7ac] sm:$0xf]  ;;  %v14316_v32 = vld [vmem:[%s23050_s1 + $0x3f4] sm:$0xf] }
  0x3c   :  { %3510 = vmatpush.bf16.msrb.mxu0 %v10413_v5  ;;  %v10529_v5 = vor.u32 %v14449_v61, %v10526_v62  ;;  %v10473_v33 = vor.u32 %v14435_v21, %v10470_v24  ;;  %v9994_v34 = vld [vmem:[%s23050_s1 + $0x40c] sm:$0xf0]  ;;  %v9742_v44 = vld [vmem:[%s23050_s1 + $0x214] sm:$0xf0]  ;;  %v14309_v45 = vld [vmem:[%s23050_s1 + $0x3bc] sm:$0xf] }
  0x3d   :  { %3523 = vmatpush.bf16.msrb.mxu1 %v10637_v8  ;;  %v10274_v8 = vld [vmem:[%s23050_s1 + $0x63c] sm:$0xf0]  ;;  %v9997_v40 = vor.u32 %v14316_v32, %v9994_v34  ;;  %v9966_v47 = vld [vmem:[%s23050_s1 + $0x3d4] sm:$0xf0]  ;;  %v14365_v48 = vld [vmem:[%s23050_s1 + $0x57c] sm:$0xf] }
  0x3e   :  { %3536 = vmatpush.bf16.msrb.mxu2 %v10861_v9  ;;  %v14442_v9 = vld [vmem:[%s23050_s1 + $0x7e4] sm:$0xf]  ;;  %v9714_v56 = vld [vmem:[%s23050_s1 + $0x1dc] sm:$0xf0]  ;;  %v14519_v2 = vld [vmem:[%s23050_s1 + $0xa4c] sm:$0xf] }
  0x3f   :  { %3549 = vmatpush.bf16.msrb.mxu3 %v9521_v13  ;;  %v10277_v13 = vor.u32 %v14386_v7, %v10274_v8  ;;  %v10501_v17 = vor.u32 %v14442_v9, %v10498_v10  ;;  %v14246_v55 = vld [vmem:[%s23050_s1 + $0x1c4] sm:$0xf]  ;;  %v9938_v60 = vld [vmem:[%s23050_s1 + $0x39c] sm:$0xf0]  ;;  %v10806_v3 = vld [vmem:[%s23050_s1 + $0xa64] sm:$0xf0] }
  0x40   :  { %3511 = vmatpush.bf16.msrb.mxu0 %v10385_v20  ;;  %v10246_v20 = vld [vmem:[%s23050_s1 + $0x604] sm:$0xf0]  ;;  %v14302_v59 = vld [vmem:[%s23050_s1 + $0x384] sm:$0xf]  ;;  %v14575_v4 = vld [vmem:[%s23050_s1 + $0xc0c] sm:$0xf]  ;;  %v10809_v14 = vor.u32 %v14519_v2, %v10806_v3 }
  0x41   :  { %3524 = vmatpush.bf16.msrb.mxu1 %v10609_v29  ;;  %v10249_v29 = vor.u32 %v14379_v19, %v10246_v20  ;;  %v14358_v61 = vld [vmem:[%s23050_s1 + $0x544] sm:$0xf]  ;;  %v11030_v6 = vld [vmem:[%s23050_s1 + $0xc24] sm:$0xf0]  ;;  %v9692_v7 = vld [vmem:[%s23050_s1 + $0x190] sm:$0xf]  ;;  %v9941_v9 = vor.u32 %v14302_v59, %v9938_v60 }
  0x42   :  { %3537 = vmatpush.bf16.msrb.mxu2 %v10833_v30  ;;  %v14260_v30 = vld [vmem:[%s23050_s1 + $0x234] sm:$0xf]  ;;  %v14243_v8 = vld [vmem:[%s23050_s1 + $0x1a8] sm:$0xf0]  ;;  %v11033_v15 = vor.u32 %v14575_v4, %v11030_v6  ;;  %v10778_v18 = vld [vmem:[%s23050_s1 + $0xa2c] sm:$0xf0] }
  0x43   :  { %3550 = vmatpush.bf16.msrb.mxu3 %v9493_v35  ;;  %3512 = vmatmul.bf16.vlgmr.msrb.gmra.mxu0 %v15895_v49  ;;  %v14372_v35 = vld [vmem:[%s23050_s1 + $0x5b4] sm:$0xf]  ;;  %v9773_v39 = vor.u32 %v14260_v30, %v9770_v31  ;;  %v9693_v16 = vor.u32 %v14243_v8, %v9692_v7  ;;  %v11002_v21 = vld [vmem:[%s23050_s1 + $0xbec] sm:$0xf0]  ;;  %v9664_v24 = vld [vmem:[%s23050_s1 + $0x158] sm:$0xf] }
  0x44   :  { %3556 = vmatpush.bf16.msra.mxu0 %v9913_v36  ;;  %3525 = vmatmul.bf16.vlgmr.msrb.gmra.mxu1 %v15897_v50  ;;  %v10218_v36 = vld [vmem:[%s23050_s1 + $0x5cc] sm:$0xf0]  ;;  %v14568_v19 = vld [vmem:[%s23050_s1 + $0xbd4] sm:$0xf]  ;;  %v10750_v34 = vld [vmem:[%s23050_s1 + $0x9f4] sm:$0xf0] }
  0x45   :  { %3569 = vmatpush.bf16.msra.mxu1 %v10137_v37  ;;  %3538 = vmatmul.bf16.vlgmr.msrb.gmra.mxu2 %v15878_v43  ;;  %v14428_v37 = vld [vmem:[%s23050_s1 + $0x774] sm:$0xf]  ;;  %v10221_v41 = vor.u32 %v14372_v35, %v10218_v36  ;;  %v11005_v31 = vor.u32 %v14568_v19, %v11002_v21  ;;  %v14561_v35 = vld [vmem:[%s23050_s1 + $0xb9c] sm:$0xf]  ;;  %v14491_v60 = vld [vmem:[%s23050_s1 + $0x96c] sm:$0xf] }
  0x46   :  { %3582 = vmatpush.bf16.msra.mxu2 %v10361_v38  ;;  %3551 = vmatmul.bf16.vlgmr.msrb.gmra.mxu3 %v15729_v23  ;;  %v10442_v38 = vld [vmem:[%s23050_s1 + $0x78c] sm:$0xf0]  ;;  %v14215_v2 = vld [vmem:[%s23050_s1 + $0xc8] sm:$0xf0]  ;;  %v14484_v8 = vld [vmem:[%s23050_s1 + $0x934] sm:$0xf] }
  0x47   :  { %3595 = vmatpush.bf16.msra.mxu3 %v10585_v42  ;;  %v14253_v42 = vld [vmem:[%s23050_s1 + $0x1fc] sm:$0xf]  ;;  %v10445_v46 = vor.u32 %v14428_v37, %v10442_v38  ;;  %v10974_v37 = vld [vmem:[%s23050_s1 + $0xbb4] sm:$0xf0]  ;;  %v9636_v38 = vld [vmem:[%s23050_s1 + $0x120] sm:$0xf] }
  0x48   :  { %3557 = vmatpush.bf16.msra.mxu0 %v9885_v51  ;;  %v10190_v51 = vld [vmem:[%s23050_s1 + $0x594] sm:$0xf0]  ;;  %v9745_v54 = vor.u32 %v14253_v42, %v9742_v44  ;;  %v10977_v44 = vor.u32 %v14561_v35, %v10974_v37  ;;  %v9804_v3 = vld [vmem:[%s23050_s1 + $0x270] sm:$0xf]  ;;  %v14271_v4 = vld [vmem:[%s23050_s1 + $0x288] sm:$0xf0] }
  0x49   :  { %3570 = vmatpush.bf16.msra.mxu1 %v10109_v52  ;;  %v14421_v52 = vld [vmem:[%s23050_s1 + $0x73c] sm:$0xf]  ;;  %v10193_v58 = vor.u32 %v14365_v48, %v10190_v51  ;;  %v14554_v48 = vld [vmem:[%s23050_s1 + $0xb64] sm:$0xf]  ;;  %v10638_v21 = vld [vmem:[%s23050_s1 + $0x914] sm:$0xf0] }
  0x4a   :  { %3583 = vmatpush.bf16.msra.mxu2 %v10333_v53  ;;  %v10414_v53 = vld [vmem:[%s23050_s1 + $0x754] sm:$0xf0]  ;;  %v10610_v35 = vld [vmem:[%s23050_s1 + $0x8dc] sm:$0xf0] }
  0x4b   :  { %3596 = vmatpush.bf16.msra.mxu3 %v10557_v57  ;;  %v9969_v57 = vor.u32 %v14309_v45, %v9966_v47  ;;  %v10417_v62 = vor.u32 %v14421_v52, %v10414_v53  ;;  %v10722_v47 = vld [vmem:[%s23050_s1 + $0x9bc] sm:$0xf0]  ;;  %v9608_v53 = vld [vmem:[%s23050_s1 + $0xe8] sm:$0xf] }
  0x4c   :  { %3558 = vmatpush.bf16.msra.mxu0 %v9857_v63  ;;  %v10162_v63 = vld [vmem:[%s23050_s1 + $0x55c] sm:$0xf0] }
  0x4d   :  { %3571 = vmatpush.bf16.msra.mxu1 %v10081_v0  ;;  %v14414_v0 = vld [vmem:[%s23050_s1 + $0x704] sm:$0xf]  ;;  %v10165_v10 = vor.u32 %v14358_v61, %v10162_v63  ;;  %v10946_v52 = vld [vmem:[%s23050_s1 + $0xb7c] sm:$0xf0]  ;;  %v10694_v61 = vld [vmem:[%s23050_s1 + $0x984] sm:$0xf0] }
  0x4e   :  { %3584 = vmatpush.bf16.msra.mxu2 %v10305_v1  ;;  %v10386_v1 = vld [vmem:[%s23050_s1 + $0x71c] sm:$0xf0] }
  0x4f   :  { %3597 = vmatpush.bf16.msra.mxu3 %v10529_v5  ;;  %v9717_v5 = vor.u32 %v14246_v55, %v9714_v56  ;;  %v9832_v55 = vld [vmem:[%s23050_s1 + $0x2a8] sm:$0xf]  ;;  %v14278_v56 = vld [vmem:[%s23050_s1 + $0x2c0] sm:$0xf0] }
  0x50   :  { %3559 = vmatpush.bf16.msra.mxu0 %v9829_v11  ;;  %v9916_v11 = vld [vmem:[%s23050_s1 + $0x350] sm:$0xf]  ;;  %v9833_v63 = vor.u32 %v14278_v56, %v9832_v55 }
  0x51   :  { %3572 = vmatpush.bf16.msra.mxu1 %v10053_v12  ;;  %v14299_v12 = vld [vmem:[%s23050_s1 + $0x368] sm:$0xf0] }
  0x52   :  { %3585 = vmatpush.bf16.msra.mxu2 %v10277_v13  ;;  %v10389_v13 = vor.u32 %v14414_v0, %v10386_v1  ;;  %v9917_v20 = vor.u32 %v14299_v12, %v9916_v11  ;;  %v10918_v0 = vld [vmem:[%s23050_s1 + $0xb44] sm:$0xf0]  ;;  %v9580_v1 = vld [vmem:[%s23050_s1 + $0xb0] sm:$0xf]  ;;  %v9805_v11 = vor.u32 %v14271_v4, %v9804_v3  ;;  %v14404_v3 = vld [vmem:[%s23050_s1 + $0x6b0] sm:$0xf0] }
  0x53   :  { %3598 = vmatpush.bf16.msra.mxu3 %v10501_v17  ;;  %v14512_v17 = vld [vmem:[%s23050_s1 + $0xa14] sm:$0xf]  ;;  %v9581_v7 = vor.u32 %v14215_v2, %v9580_v1  ;;  %v10890_v12 = vld [vmem:[%s23050_s1 + $0xb0c] sm:$0xf0]  ;;  %v10336_v1 = vld [vmem:[%s23050_s1 + $0x698] sm:$0xf] }
  0x54   :  { %3560 = vmatpush.bf16.msra.mxu0 %v9801_v27  ;;  %v14236_v27 = vld [vmem:[%s23050_s1 + $0x170] sm:$0xf0]  ;;  %v10781_v30 = vor.u32 %v14512_v17, %v10778_v18  ;;  %v10560_v4 = vld [vmem:[%s23050_s1 + $0x858] sm:$0xf] }
  0x55   :  { %3573 = vmatpush.bf16.msra.mxu1 %v10025_v28  ;;  %v9888_v28 = vld [vmem:[%s23050_s1 + $0x318] sm:$0xf]  ;;  %v9665_v32 = vor.u32 %v14236_v27, %v9664_v24  ;;  %v14533_v24 = vld [vmem:[%s23050_s1 + $0xabc] sm:$0xf] }
  0x56   :  { %3586 = vmatpush.bf16.msra.mxu2 %v10249_v29  ;;  %v14292_v29 = vld [vmem:[%s23050_s1 + $0x330] sm:$0xf0] }
  0x57   :  { %3599 = vmatpush.bf16.msra.mxu3 %v10473_v33  ;;  %v14505_v33 = vld [vmem:[%s23050_s1 + $0x9dc] sm:$0xf]  ;;  %v9889_v36 = vor.u32 %v14292_v29, %v9888_v28  ;;  %v10862_v28 = vld [vmem:[%s23050_s1 + $0xad4] sm:$0xf0]  ;;  %v9524_v29 = vld [vmem:[%s23050_s1 + $0x40] sm:$0xf] }
  0x58   :  { %3561 = vmatpush.bf16.msra.mxu0 %v9773_v39  ;;  %v14229_v39 = vld [vmem:[%s23050_s1 + $0x138] sm:$0xf0]  ;;  %v10753_v42 = vor.u32 %v14505_v33, %v10750_v34  ;;  %v14470_v34 = vld [vmem:[%s23050_s1 + $0x8c4] sm:$0xf] }
  0x59   :  { %3574 = vmatpush.bf16.msra.mxu1 %v9997_v40  ;;  %v9860_v40 = vld [vmem:[%s23050_s1 + $0x2e0] sm:$0xf]  ;;  %v9637_v45 = vor.u32 %v14229_v39, %v9636_v38  ;;  %v14526_v38 = vld [vmem:[%s23050_s1 + $0xa84] sm:$0xf] }
  0x5a   :  { %3587 = vmatpush.bf16.msra.mxu2 %v10221_v41  ;;  %v14285_v41 = vld [vmem:[%s23050_s1 + $0x2f8] sm:$0xf0]  ;;  %v10834_v39 = vld [vmem:[%s23050_s1 + $0xa9c] sm:$0xf0] }
  0x5b   :  { %3600 = vmatpush.bf16.msra.mxu3 %v10445_v46  ;;  %v14498_v46 = vld [vmem:[%s23050_s1 + $0x9a4] sm:$0xf]  ;;  %v9861_v51 = vor.u32 %v14285_v41, %v9860_v40  ;;  %v9496_v40 = vld [vmem:[%s23050_s1 + $0x8] sm:$0xf]  ;;  %v10837_v55 = vor.u32 %v14526_v38, %v10834_v39  ;;  %v10028_v39 = vld [vmem:[%s23050_s1 + $0x430] sm:$0xf] }
  0x5c   :  { %3562 = vmatpush.bf16.msra.mxu0 %v9745_v54  ;;  %v14222_v54 = vld [vmem:[%s23050_s1 + $0x100] sm:$0xf0] }
  0x5d   :  { %3575 = vmatpush.bf16.msra.mxu1 %v9969_v57  ;;  %v10725_v57 = vor.u32 %v14498_v46, %v10722_v47  ;;  %v9609_v59 = vor.u32 %v14222_v54, %v9608_v53  ;;  %v10140_v46 = vld [vmem:[%s23050_s1 + $0x510] sm:$0xf]  ;;  %v14355_v47 = vld [vmem:[%s23050_s1 + $0x528] sm:$0xf0] }
  0x5e   :  { %3588 = vmatpush.bf16.msra.mxu2 %v10193_v58  ;;  %v10949_v58 = vor.u32 %v14554_v48, %v10946_v52  ;;  %v10364_v48 = vld [vmem:[%s23050_s1 + $0x6d0] sm:$0xf]  ;;  %v14411_v52 = vld [vmem:[%s23050_s1 + $0x6e8] sm:$0xf0] }
  0x5f   :  { %3601 = vmatpush.bf16.msra.mxu3 %v10417_v62  ;;  %v14547_v62 = vld [vmem:[%s23050_s1 + $0xb2c] sm:$0xf]  ;;  %v10588_v53 = vld [vmem:[%s23050_s1 + $0x890] sm:$0xf] }
  0x60   :  { %3563 = vmatpush.bf16.msra.mxu0 %v9717_v5  ;;  %v10697_v5 = vor.u32 %v14491_v60, %v10694_v61  ;;  %v10921_v6 = vor.u32 %v14547_v62, %v10918_v0  ;;  %v14467_v54 = vld [vmem:[%s23050_s1 + $0x8a8] sm:$0xf0]  ;;  %v10141_v60 = vor.u32 %v14355_v47, %v10140_v46  ;;  %v10365_v61 = vor.u32 %v14411_v52, %v10364_v48  ;;  %v14348_v0 = vld [vmem:[%s23050_s1 + $0x4f0] sm:$0xf0]  ;;  %v10700_v47 = vld [vmem:[%s23050_s1 + $0x970] sm:$0xf] }
  0x61   :  { %3576 = vmatpush.bf16.msra.mxu1 %v9941_v9  ;;  %v10666_v9 = vld [vmem:[%s23050_s1 + $0x94c] sm:$0xf0]  ;;  %v10589_v62 = vor.u32 %v14467_v54, %v10588_v53  ;;  %v14439_v46 = vld [vmem:[%s23050_s1 + $0x7c8] sm:$0xf0]  ;;  %v10000_v54 = vld [vmem:[%s23050_s1 + $0x3f8] sm:$0xf] }
  0x62   :  { %3589 = vmatpush.bf16.msra.mxu2 %v10165_v10  ;;  %v14540_v10 = vld [vmem:[%s23050_s1 + $0xaf4] sm:$0xf]  ;;  %v10669_v17 = vor.u32 %v14484_v8, %v10666_v9  ;;  %v10337_v9 = vor.u32 %v14404_v3, %v10336_v1  ;;  %v14495_v48 = vld [vmem:[%s23050_s1 + $0x988] sm:$0xf0]  ;;  %v14313_v3 = vld [vmem:[%s23050_s1 + $0x3d8] sm:$0xf0] }
  0x63   :  { %3602 = vmatpush.bf16.msra.mxu3 %v10389_v13  ;;  %3564 = vmatmul.bf16.vlgmr.msra.gmra.mxu0 %v15731_v25  ;;  %v9552_v13 = vld [vmem:[%s23050_s1 + $0x78] sm:$0xf]  ;;  %v10893_v18 = vor.u32 %v14540_v10, %v10890_v12  ;;  %v14341_v12 = vld [vmem:[%s23050_s1 + $0x4b8] sm:$0xf0] }
  0x64   :  { %3608 = vmatpush.bf16.msrb.mxu0 %v10809_v14  ;;  %3577 = vmatmul.bf16.vlgmr.msra.gmra.mxu1 %v15727_v22  ;;  %v14208_v14 = vld [vmem:[%s23050_s1 + $0x90] sm:$0xf0] }
  0x65   :  { %3621 = vmatpush.bf16.msrb.mxu1 %v11033_v15  ;;  %3590 = vmatmul.bf16.vlgmr.msra.gmra.mxu2 %v15733_v26  ;;  %v9776_v15 = vld [vmem:[%s23050_s1 + $0x238] sm:$0xf]  ;;  %v9553_v19 = vor.u32 %v14208_v14, %v9552_v13  ;;  %v10308_v13 = vld [vmem:[%s23050_s1 + $0x660] sm:$0xf] }
  0x66   :  { %3634 = vmatpush.bf16.msrb.mxu2 %v9693_v16  ;;  %3603 = vmatmul.bf16.vlgmr.msra.gmra.mxu3 %v15895_v49  ;;  %v14264_v16 = vld [vmem:[%s23050_s1 + $0x250] sm:$0xf0] }
  0x67   :  { %3647 = vmatpush.bf16.msrb.mxu3 %v9917_v20  ;;  %v14477_v20 = vld [vmem:[%s23050_s1 + $0x8fc] sm:$0xf]  ;;  %v9777_v27 = vor.u32 %v14264_v16, %v9776_v15  ;;  %v10532_v16 = vld [vmem:[%s23050_s1 + $0x820] sm:$0xf] }
  0x68   :  { %3609 = vmatpush.bf16.msrb.mxu0 %v10781_v30  ;;  %v14201_v30 = vld [vmem:[%s23050_s1 + $0x58] sm:$0xf0]  ;;  %v10641_v33 = vor.u32 %v14477_v20, %v10638_v21 }
  0x69   :  { %3622 = vmatpush.bf16.msrb.mxu1 %v11005_v31  ;;  %v9748_v31 = vld [vmem:[%s23050_s1 + $0x200] sm:$0xf]  ;;  %v9525_v37 = vor.u32 %v14201_v30, %v9524_v29  ;;  %v14397_v15 = vld [vmem:[%s23050_s1 + $0x678] sm:$0xf0]  ;;  %v10280_v29 = vld [vmem:[%s23050_s1 + $0x628] sm:$0xf] }
  0x6a   :  { %3635 = vmatpush.bf16.msrb.mxu2 %v9665_v32  ;;  %v14257_v32 = vld [vmem:[%s23050_s1 + $0x218] sm:$0xf0]  ;;  %v10309_v21 = vor.u32 %v14397_v15, %v10308_v13  ;;  %v14306_v13 = vld [vmem:[%s23050_s1 + $0x3a0] sm:$0xf0] }
  0x6b   :  { %3648 = vmatpush.bf16.msrb.mxu3 %v9889_v36  ;;  %v10865_v36 = vor.u32 %v14533_v24, %v10862_v28  ;;  %v9749_v41 = vor.u32 %v14257_v32, %v9748_v31  ;;  %v14334_v28 = vld [vmem:[%s23050_s1 + $0x480] sm:$0xf0]  ;;  %v10504_v32 = vld [vmem:[%s23050_s1 + $0x7e8] sm:$0xf] }
  0x6c   :  { %3610 = vmatpush.bf16.msrb.mxu0 %v10753_v42  ;;  %v14194_v42 = vld [vmem:[%s23050_s1 + $0x20] sm:$0xf0] }
  0x6d   :  { %3623 = vmatpush.bf16.msrb.mxu1 %v10977_v44  ;;  %v9720_v44 = vld [vmem:[%s23050_s1 + $0x1c8] sm:$0xf]  ;;  %v9497_v56 = vor.u32 %v14194_v42, %v9496_v40  ;;  %v14390_v31 = vld [vmem:[%s23050_s1 + $0x640] sm:$0xf0]  ;;  %v14327_v40 = vld [vmem:[%s23050_s1 + $0x448] sm:$0xf0] }
  0x6e   :  { %3636 = vmatpush.bf16.msrb.mxu2 %v9637_v45  ;;  %v14250_v45 = vld [vmem:[%s23050_s1 + $0x1e0] sm:$0xf0] }
  0x6f   :  { %3649 = vmatpush.bf16.msrb.mxu3 %v9861_v51  ;;  %v10613_v51 = vor.u32 %v14470_v34, %v10610_v35  ;;  %v10728_v34 = vld [vmem:[%s23050_s1 + $0x9a8] sm:$0xf]  ;;  %v14502_v35 = vld [vmem:[%s23050_s1 + $0x9c0] sm:$0xf0] }
  0x70   :  { %3611 = vmatpush.bf16.msrb.mxu0 %v10725_v57  ;;  %v10812_v57 = vld [vmem:[%s23050_s1 + $0xa50] sm:$0xf]  ;;  %v10729_v42 = vor.u32 %v14502_v35, %v10728_v34 }
  0x71   :  { %3624 = vmatpush.bf16.msrb.mxu1 %v10949_v58  ;;  %v14523_v58 = vld [vmem:[%s23050_s1 + $0xa68] sm:$0xf0] }
  0x72   :  { %3637 = vmatpush.bf16.msrb.mxu2 %v9609_v59  ;;  %v9721_v59 = vor.u32 %v14250_v45, %v9720_v44  ;;  %v10813_v2 = vor.u32 %v14523_v58, %v10812_v57  ;;  %v14383_v44 = vld [vmem:[%s23050_s1 + $0x608] sm:$0xf0]  ;;  %v10476_v45 = vld [vmem:[%s23050_s1 + $0x7b0] sm:$0xf]  ;;  %v10701_v57 = vor.u32 %v14495_v48, %v10700_v47  ;;  %v14376_v58 = vld [vmem:[%s23050_s1 + $0x5d0] sm:$0xf0] }
  0x73   :  { %3650 = vmatpush.bf16.msrb.mxu3 %v9833_v63  ;;  %v10112_v63 = vld [vmem:[%s23050_s1 + $0x4d8] sm:$0xf]  ;;  %v10477_v53 = vor.u32 %v14439_v46, %v10476_v45  ;;  %v14233_v45 = vld [vmem:[%s23050_s1 + $0x15c] sm:$0xf] }
  0x74   :  { %3612 = vmatpush.bf16.msrb.mxu0 %v10697_v5  ;;  %v14460_v5 = vld [vmem:[%s23050_s1 + $0x870] sm:$0xf0]  ;;  %v10113_v8 = vor.u32 %v14348_v0, %v10112_v63  ;;  %v9666_v47 = vld [vmem:[%s23050_s1 + $0x174] sm:$0xf0]  ;;  %v14289_v48 = vld [vmem:[%s23050_s1 + $0x31c] sm:$0xf] }
  0x75   :  { %3625 = vmatpush.bf16.msrb.mxu1 %v10921_v6  ;;  %v10784_v6 = vld [vmem:[%s23050_s1 + $0xa18] sm:$0xf]  ;;  %v10561_v10 = vor.u32 %v14460_v5, %v10560_v4  ;;  %v10196_v4 = vld [vmem:[%s23050_s1 + $0x580] sm:$0xf] }
  0x76   :  { %3638 = vmatpush.bf16.msrb.mxu2 %v9581_v7  ;;  %v14516_v7 = vld [vmem:[%s23050_s1 + $0xa30] sm:$0xf0] }
  0x77   :  { %3651 = vmatpush.bf16.msrb.mxu3 %v9805_v11  ;;  %v10084_v11 = vld [vmem:[%s23050_s1 + $0x4a0] sm:$0xf]  ;;  %v10785_v14 = vor.u32 %v14516_v7, %v10784_v6  ;;  %v14369_v6 = vld [vmem:[%s23050_s1 + $0x598] sm:$0xf0] }
  0x78   :  { %3613 = vmatpush.bf16.msrb.mxu0 %v10669_v17  ;;  %v14453_v17 = vld [vmem:[%s23050_s1 + $0x838] sm:$0xf0]  ;;  %v10085_v20 = vor.u32 %v14341_v12, %v10084_v11  ;;  %v10420_v7 = vld [vmem:[%s23050_s1 + $0x740] sm:$0xf]  ;;  %v9944_v12 = vld [vmem:[%s23050_s1 + $0x388] sm:$0xf] }
  0x79   :  { %3626 = vmatpush.bf16.msrb.mxu1 %v10893_v18  ;;  %v10756_v18 = vld [vmem:[%s23050_s1 + $0x9e0] sm:$0xf]  ;;  %v10533_v24 = vor.u32 %v14453_v17, %v10532_v16  ;;  %v10168_v16 = vld [vmem:[%s23050_s1 + $0x548] sm:$0xf]  ;;  %v14362_v17 = vld [vmem:[%s23050_s1 + $0x560] sm:$0xf0] }
  0x7a   :  { %3639 = vmatpush.bf16.msrb.mxu2 %v9553_v19  ;;  %v14509_v19 = vld [vmem:[%s23050_s1 + $0x9f8] sm:$0xf0]  ;;  %v10169_v34 = vor.u32 %v14362_v17, %v10168_v16 }
  0x7b   :  { %3652 = vmatpush.bf16.msrb.mxu3 %v9777_v27  ;;  %v10056_v27 = vld [vmem:[%s23050_s1 + $0x468] sm:$0xf]  ;;  %v10757_v30 = vor.u32 %v14509_v19, %v10756_v18 }
  0x7c   :  { %3614 = vmatpush.bf16.msrb.mxu0 %v10641_v33  ;;  %v14446_v33 = vld [vmem:[%s23050_s1 + $0x800] sm:$0xf0]  ;;  %v10392_v18 = vld [vmem:[%s23050_s1 + $0x708] sm:$0xf] }
  0x7d   :  { %3627 = vmatpush.bf16.msrb.mxu1 %v10865_v36  ;;  %v10057_v36 = vor.u32 %v14334_v28, %v10056_v27  ;;  %v10505_v38 = vor.u32 %v14446_v33, %v10504_v32  ;;  %v11036_v27 = vld [vmem:[%s23050_s1 + $0xc10] sm:$0xf]  ;;  %v14579_v28 = vld [vmem:[%s23050_s1 + $0xc28] sm:$0xf0]  ;;  %v14296_v32 = vld [vmem:[%s23050_s1 + $0x354] sm:$0xf] }
  0x7e   :  { %3640 = vmatpush.bf16.msrb.mxu2 %v9525_v37  ;;  %v10281_v37 = vor.u32 %v14390_v31, %v10280_v29  ;;  %v14240_v29 = vld [vmem:[%s23050_s1 + $0x194] sm:$0xf]  ;;  %v9694_v31 = vld [vmem:[%s23050_s1 + $0x1ac] sm:$0xf0] }
  0x7f   :  { %3653 = vmatpush.bf16.msrb.mxu3 %v9749_v41  ;;  %v10252_v41 = vld [vmem:[%s23050_s1 + $0x5f0] sm:$0xf] }
  0x80   :  { %3615 = vmatpush.bf16.msrb.mxu0 %v10613_v51  ;;  %v10029_v51 = vor.u32 %v14327_v40, %v10028_v39  ;;  %v10253_v52 = vor.u32 %v14383_v44, %v10252_v41  ;;  %v9918_v33 = vld [vmem:[%s23050_s1 + $0x36c] sm:$0xf0]  ;;  %v11037_v39 = vor.u32 %v14579_v28, %v11036_v27  ;;  %v9697_v40 = vor.u32 %v14240_v29, %v9694_v31  ;;  %v14572_v44 = vld [vmem:[%s23050_s1 + $0xbf0] sm:$0xf0]  ;;  %v16560_v28 = vld [vmem:[%s23052_s2] sm:$0xff] }
  0x81   :  { %3628 = vmatpush.bf16.msrb.mxu1 %v10837_v55  ;;  %v14320_v55 = vld [vmem:[%s23050_s1 + $0x410] sm:$0xf0]  ;;  %v9921_v41 = vor.u32 %v14296_v32, %v9918_v33  ;;  %v9806_v27 = vld [vmem:[%s23050_s1 + $0x28c] sm:$0xf0]  ;;  %v10896_v32 = vld [vmem:[%s23050_s1 + $0xaf8] sm:$0xf] }
  0x82   :  { %3641 = vmatpush.bf16.msrb.mxu2 %v9497_v56  ;;  %v10224_v56 = vld [vmem:[%s23050_s1 + $0x5b8] sm:$0xf]  ;;  %v10001_v63 = vor.u32 %v14320_v55, %v10000_v54  ;;  %v9669_v55 = vor.u32 %v14233_v45, %v9666_v47  ;;  %v14324_v29 = vld [vmem:[%s23050_s1 + $0x434] sm:$0xf] }
  0x83   :  { %3654 = vmatpush.bf16.msrb.mxu3 %v9721_v59  ;;  %3616 = vmatmul.bf16.vlgmr.msrb.gmra.mxu0 %v15897_v50  ;;  %v10448_v59 = vld [vmem:[%s23050_s1 + $0x778] sm:$0xf]  ;;  %v10225_v0 = vor.u32 %v14376_v58, %v10224_v56  ;;  %v14565_v58 = vld [vmem:[%s23050_s1 + $0xbb8] sm:$0xf0] }
  0x84   :  { %3660 = vmatpush.bf16.msra.mxu0 %v10141_v60  ;;  %3629 = vmatmul.bf16.vlgmr.msrb.gmra.mxu1 %v15878_v43  ;;  %v14432_v60 = vld [vmem:[%s23050_s1 + $0x790] sm:$0xf0] }
  0x85   :  { %3673 = vmatpush.bf16.msra.mxu1 %v10365_v61  ;;  %3642 = vmatmul.bf16.vlgmr.msrb.gmra.mxu2 %v15729_v23  ;;  %v10672_v61 = vld [vmem:[%s23050_s1 + $0x938] sm:$0xf]  ;;  %v10449_v1 = vor.u32 %v14432_v60, %v10448_v59  ;;  %v14226_v59 = vld [vmem:[%s23050_s1 + $0x124] sm:$0xf] }
  0x86   :  { %3686 = vmatpush.bf16.msra.mxu2 %v10589_v62  ;;  %3655 = vmatmul.bf16.vlgmr.msrb.gmra.mxu3 %v15731_v25  ;;  %v14488_v62 = vld [vmem:[%s23050_s1 + $0x950] sm:$0xf0] }
  0x87   :  { %3699 = vmatpush.bf16.msra.mxu3 %v10813_v2  ;;  %v9972_v2 = vld [vmem:[%s23050_s1 + $0x3c0] sm:$0xf]  ;;  %v10673_v5 = vor.u32 %v14488_v62, %v10672_v61  ;;  %v14282_v62 = vld [vmem:[%s23050_s1 + $0x2e4] sm:$0xf] }
  0x88   :  { %3661 = vmatpush.bf16.msra.mxu0 %v10113_v8  ;;  %v14425_v8 = vld [vmem:[%s23050_s1 + $0x758] sm:$0xf0]  ;;  %v9973_v11 = vor.u32 %v14313_v3, %v9972_v2  ;;  %v9638_v61 = vld [vmem:[%s23050_s1 + $0x13c] sm:$0xf0] }
  0x89   :  { %3674 = vmatpush.bf16.msra.mxu1 %v10337_v9  ;;  %v10644_v9 = vld [vmem:[%s23050_s1 + $0x900] sm:$0xf]  ;;  %v10421_v15 = vor.u32 %v14425_v8, %v10420_v7  ;;  %v9641_v3 = vor.u32 %v14226_v59, %v9638_v61  ;;  %v14219_v7 = vld [vmem:[%s23050_s1 + $0xec] sm:$0xf] }
  0x8a   :  { %3687 = vmatpush.bf16.msra.mxu2 %v10561_v10  ;;  %v14481_v10 = vld [vmem:[%s23050_s1 + $0x918] sm:$0xf0]  ;;  %v9750_v59 = vld [vmem:[%s23050_s1 + $0x21c] sm:$0xf0] }
  0x8b   :  { %3700 = vmatpush.bf16.msra.mxu3 %v10785_v14  ;;  %v10197_v14 = vor.u32 %v14369_v6, %v10196_v4  ;;  %v10645_v19 = vor.u32 %v14481_v10, %v10644_v9  ;;  %v14558_v6 = vld [vmem:[%s23050_s1 + $0xb80] sm:$0xf0]  ;;  %v9610_v9 = vld [vmem:[%s23050_s1 + $0x104] sm:$0xf0]  ;;  %v14275_v10 = vld [vmem:[%s23050_s1 + $0x2ac] sm:$0xf] }
  0x8c   :  { %3662 = vmatpush.bf16.msra.mxu0 %v10085_v20  ;;  %v14418_v20 = vld [vmem:[%s23050_s1 + $0x720] sm:$0xf0]  ;;  %v9613_v16 = vor.u32 %v14219_v7, %v9610_v9  ;;  %v9974_v61 = vld [vmem:[%s23050_s1 + $0x3dc] sm:$0xf0]  ;;  %v9722_v9 = vld [vmem:[%s23050_s1 + $0x1e4] sm:$0xf0] }
  0x8d   :  { %3675 = vmatpush.bf16.msra.mxu1 %v10309_v21  ;;  %v10616_v21 = vld [vmem:[%s23050_s1 + $0x8c8] sm:$0xf]  ;;  %v10393_v35 = vor.u32 %v14418_v20, %v10392_v18  ;;  %v14551_v18 = vld [vmem:[%s23050_s1 + $0xb48] sm:$0xf0]  ;;  %v9582_v20 = vld [vmem:[%s23050_s1 + $0xcc] sm:$0xf0] }
  0x8e   :  { %3688 = vmatpush.bf16.msra.mxu2 %v10533_v24  ;;  %v14474_v24 = vld [vmem:[%s23050_s1 + $0x8e0] sm:$0xf0] }
  0x8f   :  { %3701 = vmatpush.bf16.msra.mxu3 %v10757_v30  ;;  %v9945_v30 = vor.u32 %v14306_v13, %v9944_v12  ;;  %v14331_v12 = vld [vmem:[%s23050_s1 + $0x46c] sm:$0xf]  ;;  %v10058_v13 = vld [vmem:[%s23050_s1 + $0x484] sm:$0xf0] }
  0x90   :  { %3663 = vmatpush.bf16.msra.mxu0 %v10057_v36  ;;  %v14352_v36 = vld [vmem:[%s23050_s1 + $0x514] sm:$0xf] }
  0x91   :  { %3676 = vmatpush.bf16.msra.mxu1 %v10281_v37  ;;  %v10142_v37 = vld [vmem:[%s23050_s1 + $0x52c] sm:$0xf0] }
  0x92   :  { %3689 = vmatpush.bf16.msra.mxu2 %v10505_v38  ;;  %v10617_v38 = vor.u32 %v14474_v24, %v10616_v21  ;;  %v10145_v46 = vor.u32 %v14352_v36, %v10142_v37  ;;  %v10061_v21 = vor.u32 %v14331_v12, %v10058_v13  ;;  %v14268_v24 = vld [vmem:[%s23050_s1 + $0x274] sm:$0xf]  ;;  %v14205_v36 = vld [vmem:[%s23050_s1 + $0x7c] sm:$0xf]  ;;  %v1397_v37 = vperm.slane %v16560_v28, 0 }
  0x93   :  { %3702 = vmatpush.bf16.msra.mxu3 %v10729_v42  ;;  %v11008_v42 = vld [vmem:[%s23050_s1 + $0xbd8] sm:$0xf]  ;;  %v14408_v13 = vld [vmem:[%s23050_s1 + $0x6d4] sm:$0xf] }
  0x94   :  { %3664 = vmatpush.bf16.msra.mxu0 %v10029_v51  ;;  %v9890_v51 = vld [vmem:[%s23050_s1 + $0x334] sm:$0xf0]  ;;  %v11009_v54 = vor.u32 %v14572_v44, %v11008_v42  ;;  %v14317_v42 = vld [vmem:[%s23050_s1 + $0x3fc] sm:$0xf] }
  0x95   :  { %3677 = vmatpush.bf16.msra.mxu1 %v10253_v52  ;;  %v14345_v52 = vld [vmem:[%s23050_s1 + $0x4dc] sm:$0xf]  ;;  %v9893_v56 = vor.u32 %v14289_v48, %v9890_v51  ;;  %v10002_v44 = vld [vmem:[%s23050_s1 + $0x414] sm:$0xf0] }
  0x96   :  { %3690 = vmatpush.bf16.msra.mxu2 %v10477_v53  ;;  %v10114_v53 = vld [vmem:[%s23050_s1 + $0x4f4] sm:$0xf0] }
  0x97   :  { %3703 = vmatpush.bf16.msra.mxu3 %v10701_v57  ;;  %v10980_v57 = vld [vmem:[%s23050_s1 + $0xba0] sm:$0xf]  ;;  %v10117_v60 = vor.u32 %v14345_v52, %v10114_v53  ;;  %v14537_v53 = vld [vmem:[%s23050_s1 + $0xad8] sm:$0xf0] }
  0x98   :  { %3665 = vmatpush.bf16.msra.mxu0 %v10001_v63  ;;  %v9862_v63 = vld [vmem:[%s23050_s1 + $0x2fc] sm:$0xf0]  ;;  %v10981_v2 = vor.u32 %v14565_v58, %v10980_v57  ;;  %v14254_v58 = vld [vmem:[%s23050_s1 + $0x204] sm:$0xf] }
  0x99   :  { %3678 = vmatpush.bf16.msra.mxu1 %v10225_v0  ;;  %v14338_v0 = vld [vmem:[%s23050_s1 + $0x4a4] sm:$0xf]  ;;  %v9865_v4 = vor.u32 %v14282_v62, %v9862_v63  ;;  %v10868_v52 = vld [vmem:[%s23050_s1 + $0xac0] sm:$0xf] }
  0x9a   :  { %3691 = vmatpush.bf16.msra.mxu2 %v10449_v1  ;;  %v10086_v1 = vld [vmem:[%s23050_s1 + $0x4bc] sm:$0xf0]  ;;  %v10869_v63 = vor.u32 %v14537_v53, %v10868_v52  ;;  %v14394_v53 = vld [vmem:[%s23050_s1 + $0x664] sm:$0xf] }
  0x9b   :  { %3704 = vmatpush.bf16.msra.mxu3 %v10673_v5  ;;  %v10952_v5 = vld [vmem:[%s23050_s1 + $0xb68] sm:$0xf]  ;;  %v10089_v8 = vor.u32 %v14338_v0, %v10086_v1  ;;  %v9526_v57 = vld [vmem:[%s23050_s1 + $0x5c] sm:$0xf0]  ;;  %v14530_v1 = vld [vmem:[%s23050_s1 + $0xaa0] sm:$0xf0] }
  0x9c   :  { %3666 = vmatpush.bf16.msra.mxu0 %v9973_v11  ;;  %v9834_v11 = vld [vmem:[%s23050_s1 + $0x2c4] sm:$0xf0] }
  0x9d   :  { %3679 = vmatpush.bf16.msra.mxu1 %v10197_v14  ;;  %v10953_v14 = vor.u32 %v14558_v6, %v10952_v5  ;;  %v9837_v17 = vor.u32 %v14275_v10, %v9834_v11  ;;  %v10840_v0 = vld [vmem:[%s23050_s1 + $0xa88] sm:$0xf]  ;;  %v14247_v6 = vld [vmem:[%s23050_s1 + $0x1cc] sm:$0xf] }
  0x9e   :  { %3692 = vmatpush.bf16.msra.mxu2 %v10421_v15  ;;  %v10924_v15 = vld [vmem:[%s23050_s1 + $0xb30] sm:$0xf]  ;;  %v9498_v5 = vld [vmem:[%s23050_s1 + $0x24] sm:$0xf0]  ;;  %v14303_v10 = vld [vmem:[%s23050_s1 + $0x38c] sm:$0xf] }
  0x9f   :  { %3705 = vmatpush.bf16.msra.mxu3 %v10645_v19  ;;  %v14212_v19 = vld [vmem:[%s23050_s1 + $0xb4] sm:$0xf]  ;;  %v10925_v31 = vor.u32 %v14551_v18, %v10924_v15  ;;  %v9946_v11 = vld [vmem:[%s23050_s1 + $0x3a4] sm:$0xf0]  ;;  %v10590_v18 = vld [vmem:[%s23050_s1 + $0x8ac] sm:$0xf0] }
  0xa0   :  { %3667 = vmatpush.bf16.msra.mxu0 %v9945_v30  ;;  %v10030_v30 = vld [vmem:[%s23050_s1 + $0x44c] sm:$0xf0]  ;;  %v9585_v33 = vor.u32 %v14212_v19, %v9582_v20  ;;  %v14464_v15 = vld [vmem:[%s23050_s1 + $0x894] sm:$0xf] }
  0xa1   :  { %3680 = vmatpush.bf16.msra.mxu1 %v10169_v34  ;;  %v9809_v34 = vor.u32 %v14268_v24, %v9806_v27  ;;  %v3474_v47 = vpop.f32.mrf.mxu1  ;;  %v14520_v19 = vld [vmem:[%s23050_s1 + $0xa54] sm:$0xf]  ;;  %v10814_v20 = vld [vmem:[%s23050_s1 + $0xa6c] sm:$0xf0] }
  0xa2   :  { %3693 = vmatpush.bf16.msra.mxu2 %v10393_v35  ;;  %v14544_v35 = vld [vmem:[%s23050_s1 + $0xb10] sm:$0xf0] }
  0xa3   :  { %3706 = vmatpush.bf16.msra.mxu3 %v10617_v38  ;;  %3668 = vmatmul.bf16.vlgmr.msra.gmra.mxu0 %v15727_v22  ;;  %v10033_v38 = vor.u32 %v14324_v29, %v10030_v30  ;;  %v10897_v45 = vor.u32 %v14544_v35, %v10896_v32  ;;  %v9725_v30 = vor.u32 %v14247_v6, %v9722_v9  ;;  %v11038_v32 = vld [vmem:[%s23050_s1 + $0xc2c] sm:$0xf0]  ;;  %v10506_v6 = vld [vmem:[%s23050_s1 + $0x804] sm:$0xf0]  ;;  %v14555_v9 = vld [vmem:[%s23050_s1 + $0xb6c] sm:$0xf] }
  0xa4   :  { %3712 = vmatpush.bf16.msrb.mxu0 %v11037_v39  ;;  %3681 = vmatmul.bf16.vlgmr.msra.gmra.mxu1 %v15733_v26  ;;  %v9554_v39 = vld [vmem:[%s23050_s1 + $0x94] sm:$0xf0]  ;;  %v10593_v35 = vor.u32 %v14464_v15, %v10590_v18  ;;  %v10254_v18 = vld [vmem:[%s23050_s1 + $0x60c] sm:$0xf0] }
  0xa5   :  { %3725 = vmatpush.bf16.msrb.mxu1 %v9697_v40  ;;  %3694 = vmatmul.bf16.vlgmr.msra.gmra.mxu2 %v15895_v49  ;;  %v14261_v40 = vld [vmem:[%s23050_s1 + $0x23c] sm:$0xf]  ;;  %v9557_v48 = vor.u32 %v14205_v36, %v9554_v39  ;;  %v10817_v36 = vor.u32 %v14520_v19, %v10814_v20  ;;  %v14436_v19 = vld [vmem:[%s23050_s1 + $0x7b4] sm:$0xf] }
  0xa6   :  { %3738 = vmatpush.bf16.msrb.mxu2 %v9921_v41  ;;  %3707 = vmatmul.bf16.vlgmr.msra.gmra.mxu3 %v15897_v50  ;;  %v9778_v41 = vld [vmem:[%s23050_s1 + $0x254] sm:$0xf0]  ;;  %v14457_v39 = vld [vmem:[%s23050_s1 + $0x85c] sm:$0xf] }
  0xa7   :  { %3751 = vmatpush.bf16.msrb.mxu3 %v10145_v46  ;;  %v3461_v46 = vpop.f32.mrf.mxu0  ;;  %v9781_v51 = vor.u32 %v14261_v40, %v9778_v41  ;;  %v10562_v41 = vld [vmem:[%s23050_s1 + $0x874] sm:$0xf0] }
  0xa8   :  { %3713 = vmatpush.bf16.msrb.mxu0 %v11009_v54  ;;  %v14198_v54 = vld [vmem:[%s23050_s1 + $0x44] sm:$0xf] }
  0xa9   :  { %3726 = vmatpush.bf16.msrb.mxu1 %v9669_v55  ;;  %v3462_v55 = vadd.f32 %v3461_v46, %v1397_v37  ;;  %v3476_v24 = vpop.f32.mrf.mxu1  ;;  %v14401_v37 = vld [vmem:[%s23050_s1 + $0x69c] sm:$0xf]  ;;  %v11010_v46 = vld [vmem:[%s23050_s1 + $0xbf4] sm:$0xf0] }
  0xaa   :  { %3739 = vmatpush.bf16.msrb.mxu2 %v9893_v56  ;;  %v10005_v56 = vor.u32 %v14317_v42, %v10002_v44  ;;  %v3487_v7 = vpop.f32.mrf.mxu2  ;;  %v14513_v42 = vld [vmem:[%s23050_s1 + $0xa1c] sm:$0xf]  ;;  %v10786_v44 = vld [vmem:[%s23050_s1 + $0xa34] sm:$0xf0]  ;;  %v14492_v24 = vld [vmem:[%s23050_s1 + $0x974] sm:$0xf] }
  0xab   :  { %3752 = vmatpush.bf16.msrb.mxu3 %v10117_v60  ;;  %v14310_v60 = vld [vmem:[%s23050_s1 + $0x3c4] sm:$0xf]  ;;  %v3475_v62 = vadd.f32 %v3474_v47, %v3462_v55  ;;  %v10789_v52 = vor.u32 %v14513_v42, %v10786_v44  ;;  %v14485_v42 = vld [vmem:[%s23050_s1 + $0x93c] sm:$0xf]  ;;  %v10674_v44 = vld [vmem:[%s23050_s1 + $0x954] sm:$0xf0] }
  0xac   :  { %3714 = vmatpush.bf16.msrb.mxu0 %v10981_v2  ;;  %v9529_v2 = vor.u32 %v14198_v54, %v9526_v57  ;;  %v10310_v54 = vld [vmem:[%s23050_s1 + $0x67c] sm:$0xf0]  ;;  %v14450_v55 = vld [vmem:[%s23050_s1 + $0x824] sm:$0xf] }
  0xad   :  { %3727 = vmatpush.bf16.msrb.mxu1 %v9641_v3  ;;  %v9753_v3 = vor.u32 %v14254_v58, %v9750_v59  ;;  %v3488_v12 = vadd.f32 %v3487_v7, %v3475_v62  ;;  %v10534_v58 = vld [vmem:[%s23050_s1 + $0x83c] sm:$0xf0]  ;;  %v14506_v59 = vld [vmem:[%s23050_s1 + $0x9e4] sm:$0xf]  ;;  %v14499_v7 = vld [vmem:[%s23050_s1 + $0x9ac] sm:$0xf] }
  0xae   :  { %3740 = vmatpush.bf16.msrb.mxu2 %v9865_v4  ;;  %v14191_v4 = vld [vmem:[%s23050_s1 + $0xc] sm:$0xf]  ;;  %v10982_v62 = vld [vmem:[%s23050_s1 + $0xbbc] sm:$0xf0] }
  0xaf   :  { %3753 = vmatpush.bf16.msrb.mxu3 %v10089_v8  ;;  %v9977_v8 = vor.u32 %v14310_v60, %v9974_v61  ;;  %v9501_v29 = vor.u32 %v14191_v4, %v9498_v5  ;;  %v10758_v60 = vld [vmem:[%s23050_s1 + $0x9fc] sm:$0xf0]  ;;  %v14562_v61 = vld [vmem:[%s23050_s1 + $0xba4] sm:$0xf]  ;;  %v14443_v4 = vld [vmem:[%s23050_s1 + $0x7ec] sm:$0xf] }
  0xb0   :  { %3715 = vmatpush.bf16.msrb.mxu0 %v10953_v14  ;;  %v10366_v14 = vld [vmem:[%s23050_s1 + $0x6ec] sm:$0xf0]  ;;  %v10985_v5 = vor.u32 %v14562_v61, %v10982_v62  ;;  %v14534_v61 = vld [vmem:[%s23050_s1 + $0xac4] sm:$0xf]  ;;  %v10870_v62 = vld [vmem:[%s23050_s1 + $0xadc] sm:$0xf0] }
  0xb1   :  { %3728 = vmatpush.bf16.msrb.mxu1 %v9613_v16  ;;  %v3500_v16 = vpop.f32.mrf.mxu3 }
  0xb2   :  { %3741 = vmatpush.bf16.msrb.mxu2 %v9837_v17  ;;  %v10841_v17 = vor.u32 %v14530_v1, %v10840_v0  ;;  %v16659_v27 = vadd.f32 %v3500_v16, %v3488_v12  ;;  %v3489_v47 = vpop.f32.mrf.mxu2  ;;  %v10537_v0 = vor.u32 %v14450_v55, %v10534_v58  ;;  %v10761_v1 = vor.u32 %v14506_v59, %v10758_v60  ;;  %v10198_v55 = vld [vmem:[%s23050_s1 + $0x59c] sm:$0xf0]  ;;  %v14478_v59 = vld [vmem:[%s23050_s1 + $0x904] sm:$0xf] }
  0xb3   :  { %3754 = vmatpush.bf16.msrb.mxu3 %v10061_v21  ;;  %v3463_v21 = vpop.f32.mrf.mxu0  ;;  %v10422_v58 = vld [vmem:[%s23050_s1 + $0x75c] sm:$0xf0] }
  0xb4   :  { %3716 = vmatpush.bf16.msrb.mxu0 %v10925_v31  ;;  %v14576_v31 = vld [vmem:[%s23050_s1 + $0xc14] sm:$0xf]  ;;  %v10478_v21 = vld [vmem:[%s23050_s1 + $0x7cc] sm:$0xf0]  ;;  %v10646_v60 = vld [vmem:[%s23050_s1 + $0x91c] sm:$0xf0] }
  0xb5   :  { %3729 = vmatpush.bf16.msrb.mxu1 %v9585_v33  ;;  %v9949_v33 = vor.u32 %v14303_v10, %v9946_v11  ;;  %v11041_v40 = vor.u32 %v14576_v31, %v11038_v32  ;;  %v10954_v10 = vld [vmem:[%s23050_s1 + $0xb84] sm:$0xf0] }
  0xb6   :  { %3742 = vmatpush.bf16.msrb.mxu2 %v9809_v34  ;;  %v10369_v34 = vor.u32 %v14408_v13, %v10366_v14  ;;  %v10509_v14 = vor.u32 %v14443_v4, %v10506_v6  ;;  %v10957_v20 = vor.u32 %v14555_v9, %v10954_v10  ;;  %v14415_v4 = vld [vmem:[%s23050_s1 + $0x70c] sm:$0xf]  ;;  %v10618_v9 = vld [vmem:[%s23050_s1 + $0x8e4] sm:$0xf0] }
  0xb7   :  { %3755 = vmatpush.bf16.msrb.mxu3 %v10033_v38  ;;  %v10338_v38 = vld [vmem:[%s23050_s1 + $0x6b4] sm:$0xf0]  ;;  %v14471_v6 = vld [vmem:[%s23050_s1 + $0x8cc] sm:$0xf] }
  0xb8   :  { %3717 = vmatpush.bf16.msrb.mxu0 %v10897_v45  ;;  %v14569_v45 = vld [vmem:[%s23050_s1 + $0xbdc] sm:$0xf]  ;;  %v14527_v10 = vld [vmem:[%s23050_s1 + $0xa8c] sm:$0xf] }
  0xb9   :  { %3730 = vmatpush.bf16.msrb.mxu1 %v9557_v48  ;;  %v10341_v48 = vor.u32 %v14401_v37, %v10338_v38  ;;  %v11013_v57 = vor.u32 %v14569_v45, %v11010_v46  ;;  %v10226_v37 = vld [vmem:[%s23050_s1 + $0x5d4] sm:$0xf0]  ;;  %v14429_v38 = vld [vmem:[%s23050_s1 + $0x77c] sm:$0xf] }
  0xba   :  { %3743 = vmatpush.bf16.msrb.mxu2 %v9781_v51  ;;  %v10565_v51 = vor.u32 %v14457_v39, %v10562_v41  ;;  %v10450_v41 = vld [vmem:[%s23050_s1 + $0x794] sm:$0xf0]  ;;  %v14541_v45 = vld [vmem:[%s23050_s1 + $0xafc] sm:$0xf] }
  0xbb   :  { %3756 = vmatpush.bf16.msrb.mxu3 %v10005_v56  ;;  %v3502_v56 = vpop.f32.mrf.mxu3  ;;  %v10898_v46 = vld [vmem:[%s23050_s1 + $0xb14] sm:$0xf0] }
  0xbc   :  { %3718 = vmatpush.bf16.msrb.mxu0 %v10869_v63  ;;  %v10313_v63 = vor.u32 %v14394_v53, %v10310_v54  ;;  %v10677_v53 = vor.u32 %v14485_v42, %v10674_v44  ;;  %v14366_v54 = vld [vmem:[%s23050_s1 + $0x584] sm:$0xf]  ;;  %v14405_v42 = vld [vmem:[%s23050_s1 + $0x6b8] sm:$0xf0] }
  0xbd   :  { %3731 = vmatpush.bf16.msrb.mxu1 %v9529_v2  ;;  %v14387_v2 = vld [vmem:[%s23050_s1 + $0x62c] sm:$0xf]  ;;  %v14422_v56 = vld [vmem:[%s23050_s1 + $0x744] sm:$0xf] }
  0xbe   :  { %3744 = vmatpush.bf16.msrb.mxu2 %v9753_v3  ;;  %v10282_v3 = vld [vmem:[%s23050_s1 + $0x644] sm:$0xf0] }
  0xbf   :  { %3757 = vmatpush.bf16.msrb.mxu3 %v9977_v8  ;;  %v10730_v8 = vld [vmem:[%s23050_s1 + $0x9c4] sm:$0xf0]  ;;  %v10285_v11 = vor.u32 %v14387_v2, %v10282_v3  ;;  %v10425_v2 = vor.u32 %v14422_v56, %v10422_v58  ;;  %v10649_v3 = vor.u32 %v14478_v59, %v10646_v60  ;;  %v14342_v56 = vld [vmem:[%s23050_s1 + $0x4c0] sm:$0xf0] }
  0xc0   :  { %3719 = vmatpush.bf16.msrb.mxu0 %v10841_v17  ;;  %v3513_v12 = vpop.f32.mrf.mxu0  ;;  %v10733_v15 = vor.u32 %v14499_v7, %v10730_v8  ;;  %v14380_v17 = vld [vmem:[%s23050_s1 + $0x5f4] sm:$0xf]  ;;  %v10873_v8 = vor.u32 %v14534_v61, %v10870_v62  ;;  %v10316_v58 = vld [vmem:[%s23050_s1 + $0x668] sm:$0xf]  ;;  %v14398_v59 = vld [vmem:[%s23050_s1 + $0x680] sm:$0xf0] }
  0xc1   :  { %3732 = vmatpush.bf16.msrb.mxu1 %v9501_v29  ;;  %v3526_v13 = vpop.f32.mrf.mxu1  ;;  %v3514_v16 = vadd.f32 %v3513_v12, %v16659_v27  ;;  %v10702_v27 = vld [vmem:[%s23050_s1 + $0x98c] sm:$0xf0]  ;;  %v14548_v29 = vld [vmem:[%s23050_s1 + $0xb34] sm:$0xf]  ;;  %v10257_v32 = vor.u32 %v14380_v17, %v10254_v18  ;;  %v9700_v12 = vld [vmem:[%s23050_s1 + $0x198] sm:$0xf] }
  0xc2   :  { %3745 = vmatpush.bf16.msrb.mxu2 %v9725_v30  ;;  %v10926_v30 = vld [vmem:[%s23050_s1 + $0xb4c] sm:$0xf0]  ;;  %v10148_v17 = vld [vmem:[%s23050_s1 + $0x518] sm:$0xf]  ;;  %v14356_v18 = vld [vmem:[%s23050_s1 + $0x530] sm:$0xf0] }
  0xc3   :  { %3758 = vmatpush.bf16.msrb.mxu3 %v9949_v33  ;;  %3720 = vmatmul.bf16.vlgmr.msrb.gmra.mxu0 %v15878_v43  ;;  %v3527_v31 = vadd.f32 %v3526_v13, %v3514_v16  ;;  %v10481_v33 = vor.u32 %v14436_v19, %v10478_v21  ;;  %v10929_v39 = vor.u32 %v14548_v29, %v10926_v30  ;;  %v14244_v13 = vld [vmem:[%s23050_s1 + $0x1b0] sm:$0xf0] }
  0xc4   :  { %3764 = vmatpush.bf16.msra.mxu0 %v10369_v34  ;;  %3733 = vmatmul.bf16.vlgmr.msrb.gmra.mxu1 %v15729_v23  ;;  %v10705_v34 = vor.u32 %v14492_v24, %v10702_v27  ;;  %v14300_v16 = vld [vmem:[%s23050_s1 + $0x370] sm:$0xf0]  ;;  %v10621_v21 = vor.u32 %v14471_v6, %v10618_v9  ;;  %v10372_v24 = vld [vmem:[%s23050_s1 + $0x6d8] sm:$0xf]  ;;  %v9701_v30 = vor.u32 %v14244_v13, %v9700_v12  ;;  %v14335_v6 = vld [vmem:[%s23050_s1 + $0x488] sm:$0xf0] }
  0xc5   :  { %3777 = vmatpush.bf16.msra.mxu1 %v10593_v35  ;;  %3746 = vmatmul.bf16.vlgmr.msrb.gmra.mxu2 %v15731_v25  ;;  %v14412_v27 = vld [vmem:[%s23050_s1 + $0x6f0] sm:$0xf0] }
  0xc6   :  { %3790 = vmatpush.bf16.msra.mxu2 %v10817_v36  ;;  %3759 = vmatmul.bf16.vlgmr.msrb.gmra.mxu3 %v15727_v22  ;;  %v14373_v36 = vld [vmem:[%s23050_s1 + $0x5bc] sm:$0xf] }
  0xc7   :  { %3803 = vmatpush.bf16.msra.mxu3 %v11041_v40  ;;  %v10229_v47 = vor.u32 %v14373_v36, %v10226_v37  ;;  %v10373_v36 = vor.u32 %v14412_v27, %v10372_v24  ;;  %v14293_v37 = vld [vmem:[%s23050_s1 + $0x338] sm:$0xf0]  ;;  %v10260_v27 = vld [vmem:[%s23050_s1 + $0x5f8] sm:$0xf] }
  0xc8   :  { %3765 = vmatpush.bf16.msra.mxu0 %v10341_v48  ;;  %v3539_v35 = vpop.f32.mrf.mxu2  ;;  %v3515_v48 = vpop.f32.mrf.mxu0 }
  0xc9   :  { %3778 = vmatpush.bf16.msra.mxu1 %v10565_v51  ;;  %v16777_v40 = vadd.f32 %v3539_v35, %v3527_v31  ;;  %v3528_v51 = vpop.f32.mrf.mxu1  ;;  %v3552_v19 = vpop.f32.mrf.mxu3  ;;  %v9896_v35 = vld [vmem:[%s23050_s1 + $0x320] sm:$0xf]  ;;  %v9644_v48 = vld [vmem:[%s23050_s1 + $0x128] sm:$0xf] }
  0xca   :  { %3791 = vmatpush.bf16.msra.mxu2 %v10789_v52  ;;  %v10453_v52 = vor.u32 %v14429_v38, %v10450_v41  ;;  %v10120_v38 = vld [vmem:[%s23050_s1 + $0x4e0] sm:$0xf]  ;;  %v14230_v51 = vld [vmem:[%s23050_s1 + $0x140] sm:$0xf0] }
  0xcb   :  { %3804 = vmatpush.bf16.msra.mxu3 %v11013_v57  ;;  %v10901_v57 = vor.u32 %v14541_v45, %v10898_v46  ;;  %v10344_v41 = vld [vmem:[%s23050_s1 + $0x6a0] sm:$0xf]  ;;  %v1398_v45 = vperm.slane %v16560_v28, 1  ;;  %v9897_v46 = vor.u32 %v14293_v37, %v9896_v35  ;;  %v9645_v60 = vor.u32 %v14230_v51, %v9644_v48  ;;  %v14265_v37 = vld [vmem:[%s23050_s1 + $0x258] sm:$0xf0] }
  0xcc   :  { %3766 = vmatpush.bf16.msra.mxu0 %v10313_v63  ;;  %v10201_v63 = vor.u32 %v14366_v54, %v10198_v55  ;;  %v14286_v54 = vld [vmem:[%s23050_s1 + $0x300] sm:$0xf0]  ;;  %v10092_v55 = vld [vmem:[%s23050_s1 + $0x4a8] sm:$0xf]  ;;  %v9784_v35 = vld [vmem:[%s23050_s1 + $0x240] sm:$0xf] }
  0xcd   :  { %3779 = vmatpush.bf16.msra.mxu1 %v10537_v0  ;;  %v14359_v0 = vld [vmem:[%s23050_s1 + $0x54c] sm:$0xf]  ;;  %v3553_v61 = vadd.f32 %v3552_v19, %v1398_v45  ;;  %v14272_v19 = vld [vmem:[%s23050_s1 + $0x290] sm:$0xf0] }
  0xce   :  { %3792 = vmatpush.bf16.msra.mxu2 %v10761_v1  ;;  %v10170_v1 = vld [vmem:[%s23050_s1 + $0x564] sm:$0xf0] }
  0xcf   :  { %3805 = vmatpush.bf16.msra.mxu3 %v10985_v5  ;;  %v10394_v5 = vld [vmem:[%s23050_s1 + $0x724] sm:$0xf0] }
  0xd0   :  { %3767 = vmatpush.bf16.msra.mxu0 %v10285_v11  ;;  %v3541_v7 = vpop.f32.mrf.mxu2  ;;  %v10842_v11 = vld [vmem:[%s23050_s1 + $0xaa4] sm:$0xf0] }
  0xd1   :  { %3780 = vmatpush.bf16.msra.mxu1 %v10509_v14  ;;  %v9924_v14 = vld [vmem:[%s23050_s1 + $0x358] sm:$0xf]  ;;  %v10845_v29 = vor.u32 %v14527_v10, %v10842_v11  ;;  %v10288_v7 = vld [vmem:[%s23050_s1 + $0x630] sm:$0xf] }
  0xd2   :  { %3793 = vmatpush.bf16.msra.mxu2 %v10733_v15  ;;  %v10173_v15 = vor.u32 %v14359_v0, %v10170_v1  ;;  %v9925_v31 = vor.u32 %v14300_v16, %v9924_v14  ;;  %v9616_v0 = vld [vmem:[%s23050_s1 + $0xf0] sm:$0xf]  ;;  %v14223_v1 = vld [vmem:[%s23050_s1 + $0x108] sm:$0xf0]  ;;  %v14216_v16 = vld [vmem:[%s23050_s1 + $0xd0] sm:$0xf0] }
  0xd3   :  { %3806 = vmatpush.bf16.msra.mxu3 %v10957_v20  ;;  %v10397_v20 = vor.u32 %v14415_v4, %v10394_v5  ;;  %v14279_v4 = vld [vmem:[%s23050_s1 + $0x2c8] sm:$0xf0]  ;;  %v10064_v5 = vld [vmem:[%s23050_s1 + $0x470] sm:$0xf]  ;;  %v9617_v10 = vor.u32 %v14223_v1, %v9616_v0 }
  0xd4   :  { %3768 = vmatpush.bf16.msra.mxu0 %v10257_v32  ;;  %v10149_v32 = vor.u32 %v14356_v18, %v10148_v17  ;;  %v10065_v14 = vor.u32 %v14335_v6, %v10064_v5  ;;  %v9812_v17 = vld [vmem:[%s23050_s1 + $0x278] sm:$0xf]  ;;  %v9504_v1 = vld [vmem:[%s23050_s1 + $0x10] sm:$0xf]  ;;  %v14251_v6 = vld [vmem:[%s23050_s1 + $0x1e8] sm:$0xf0] }
  0xd5   :  { %3781 = vmatpush.bf16.msra.mxu1 %v10481_v33  ;;  %v9672_v33 = vld [vmem:[%s23050_s1 + $0x160] sm:$0xf]  ;;  %v9728_v5 = vld [vmem:[%s23050_s1 + $0x1d0] sm:$0xf] }
  0xd6   :  { %3794 = vmatpush.bf16.msra.mxu2 %v10705_v34  ;;  %v14237_v34 = vld [vmem:[%s23050_s1 + $0x178] sm:$0xf0] }
  0xd7   :  { %3807 = vmatpush.bf16.msra.mxu3 %v10929_v39  ;;  %v14349_v39 = vld [vmem:[%s23050_s1 + $0x4f8] sm:$0xf0]  ;;  %v9673_v44 = vor.u32 %v14237_v34, %v9672_v33  ;;  %v9560_v33 = vld [vmem:[%s23050_s1 + $0x80] sm:$0xf] }
  0xd8   :  { %3769 = vmatpush.bf16.msra.mxu0 %v10229_v47  ;;  %v10121_v47 = vor.u32 %v14349_v39, %v10120_v38  ;;  %v14209_v34 = vld [vmem:[%s23050_s1 + $0x98] sm:$0xf0]  ;;  %v10008_v38 = vld [vmem:[%s23050_s1 + $0x400] sm:$0xf] }
  0xd9   :  { %3782 = vmatpush.bf16.msra.mxu1 %v10453_v52  ;;  %v9868_v52 = vld [vmem:[%s23050_s1 + $0x2e8] sm:$0xf]  ;;  %v14321_v39 = vld [vmem:[%s23050_s1 + $0x418] sm:$0xf0]  ;;  %v9561_v48 = vor.u32 %v14209_v34, %v9560_v33  ;;  %v10568_v34 = vld [vmem:[%s23050_s1 + $0x860] sm:$0xf] }
  0xda   :  { %3795 = vmatpush.bf16.msra.mxu2 %v10677_v53  ;;  %v10345_v53 = vor.u32 %v14405_v42, %v10344_v41  ;;  %v9869_v62 = vor.u32 %v14286_v54, %v9868_v52  ;;  %v10232_v42 = vld [vmem:[%s23050_s1 + $0x5c0] sm:$0xf]  ;;  %v9785_v52 = vor.u32 %v14265_v37, %v9784_v35  ;;  %v9532_v54 = vld [vmem:[%s23050_s1 + $0x48] sm:$0xf]  ;;  %v14461_v35 = vld [vmem:[%s23050_s1 + $0x878] sm:$0xf0] }
  0xdb   :  { %3808 = vmatpush.bf16.msra.mxu3 %v10901_v57  ;;  %v3554_v57 = vpop.f32.mrf.mxu3 }
  0xdc   :  { %3770 = vmatpush.bf16.msra.mxu0 %v10201_v63  ;;  %v10093_v63 = vor.u32 %v14342_v56, %v10092_v55  ;;  %v14202_v55 = vld [vmem:[%s23050_s1 + $0x60] sm:$0xf0]  ;;  %v9756_v56 = vld [vmem:[%s23050_s1 + $0x208] sm:$0xf] }
  0xdd   :  { %3783 = vmatpush.bf16.msra.mxu1 %v10425_v2  ;;  %v9840_v2 = vld [vmem:[%s23050_s1 + $0x2b0] sm:$0xf]  ;;  %v9533_v0 = vor.u32 %v14202_v55, %v9532_v54  ;;  %v14510_v54 = vld [vmem:[%s23050_s1 + $0xa00] sm:$0xf0]  ;;  %v10988_v55 = vld [vmem:[%s23050_s1 + $0xba8] sm:$0xf] }
  0xde   :  { %3796 = vmatpush.bf16.msra.mxu2 %v10649_v3  ;;  %v10317_v3 = vor.u32 %v14398_v59, %v10316_v58  ;;  %v9841_v13 = vor.u32 %v14279_v4, %v9840_v2  ;;  %v14258_v59 = vld [vmem:[%s23050_s1 + $0x220] sm:$0xf0]  ;;  %v14195_v2 = vld [vmem:[%s23050_s1 + $0x28] sm:$0xf0] }
  0xdf   :  { %3809 = vmatpush.bf16.msra.mxu3 %v10873_v8  ;;  %v14391_v8 = vld [vmem:[%s23050_s1 + $0x648] sm:$0xf0] }
  0xe0   :  { %3771 = vmatpush.bf16.msra.mxu0 %v10173_v15  ;;  %v3565_v9 = vpop.f32.mrf.mxu0  ;;  %v9588_v15 = vld [vmem:[%s23050_s1 + $0xb8] sm:$0xf]  ;;  %v10289_v18 = vor.u32 %v14391_v8, %v10288_v7  ;;  %v9952_v7 = vld [vmem:[%s23050_s1 + $0x390] sm:$0xf] }
  0xe1   :  { %3784 = vmatpush.bf16.msra.mxu1 %v10397_v20  ;;  %v3566_v11 = vadd.f32 %v3565_v9, %v3553_v61  ;;  %v3578_v12 = vpop.f32.mrf.mxu1  ;;  %v10036_v20 = vld [vmem:[%s23050_s1 + $0x438] sm:$0xf]  ;;  %v14314_v61 = vld [vmem:[%s23050_s1 + $0x3e0] sm:$0xf0]  ;;  %v14307_v9 = vld [vmem:[%s23050_s1 + $0x3a8] sm:$0xf0] }
  0xe2   :  { %3797 = vmatpush.bf16.msra.mxu2 %v10621_v21  ;;  %v14328_v21 = vld [vmem:[%s23050_s1 + $0x450] sm:$0xf0] }
  0xe3   :  { %3810 = vmatpush.bf16.msra.mxu3 %v10845_v29  ;;  %3772 = vmatmul.bf16.vlgmr.msra.gmra.mxu0 %v15733_v26  ;;  %v3579_v24 = vadd.f32 %v3578_v12, %v3566_v11  ;;  %v14384_v29 = vld [vmem:[%s23050_s1 + $0x610] sm:$0xf0]  ;;  %v14363_v11 = vld [vmem:[%s23050_s1 + $0x568] sm:$0xf0] }
  0xe4   :  { %3816 = vmatpush.bf16.msrb.mxu0 %v9701_v30  ;;  %3785 = vmatmul.bf16.vlgmr.msra.gmra.mxu1 %v15895_v49  ;;  %v9589_v30 = vor.u32 %v14216_v16, %v9588_v15  ;;  %v10820_v15 = vld [vmem:[%s23050_s1 + $0xa58] sm:$0xf] }
  0xe5   :  { %3829 = vmatpush.bf16.msrb.mxu1 %v9925_v31  ;;  %3798 = vmatmul.bf16.vlgmr.msra.gmra.mxu2 %v15897_v50  ;;  %v9813_v31 = vor.u32 %v14272_v19, %v9812_v17  ;;  %v9505_v17 = vor.u32 %v14195_v2, %v9504_v1  ;;  %v11044_v19 = vld [vmem:[%s23050_s1 + $0xc18] sm:$0xf]  ;;  %v10736_v1 = vld [vmem:[%s23050_s1 + $0x9b0] sm:$0xf] }
  0xe6   :  { %3842 = vmatpush.bf16.msrb.mxu2 %v10149_v32  ;;  %3811 = vmatmul.bf16.vlgmr.msra.gmra.mxu3 %v15878_v43  ;;  %v10037_v32 = vor.u32 %v14328_v21, %v10036_v20  ;;  %v14580_v20 = vld [vmem:[%s23050_s1 + $0xc30] sm:$0xf0]  ;;  %v9729_v21 = vor.u32 %v14251_v6, %v9728_v5  ;;  %v14559_v5 = vld [vmem:[%s23050_s1 + $0xb88] sm:$0xf0] }
  0xe7   :  { %3855 = vmatpush.bf16.msrb.mxu3 %v10373_v36  ;;  %v10261_v36 = vor.u32 %v14384_v29, %v10260_v27  ;;  %v14241_v27 = vld [vmem:[%s23050_s1 + $0x19c] sm:$0xf]  ;;  %v9702_v29 = vld [vmem:[%s23050_s1 + $0x1b4] sm:$0xf0]  ;;  %v11045_v33 = vor.u32 %v14580_v20, %v11044_v19  ;;  %v14220_v6 = vld [vmem:[%s23050_s1 + $0xf4] sm:$0xf] }
  0xe8   :  { %3817 = vmatpush.bf16.msrb.mxu0 %v9673_v44  ;;  %v3591_v41 = vpop.f32.mrf.mxu2  ;;  %v14377_v44 = vld [vmem:[%s23050_s1 + $0x5d8] sm:$0xf0]  ;;  %v3567_v45 = vpop.f32.mrf.mxu0  ;;  %v9705_v37 = vor.u32 %v14241_v27, %v9702_v29  ;;  %v14552_v19 = vld [vmem:[%s23050_s1 + $0xb50] sm:$0xf0] }
  0xe9   :  { %3830 = vmatpush.bf16.msrb.mxu1 %v9897_v46  ;;  %v3592_v46 = vadd.f32 %v3591_v41, %v3579_v24  ;;  %v3580_v51 = vpop.f32.mrf.mxu1  ;;  %v10233_v58 = vor.u32 %v14377_v44, %v10232_v42  ;;  %v9953_v24 = vor.u32 %v14307_v9, %v9952_v7  ;;  %v14573_v41 = vld [vmem:[%s23050_s1 + $0xbf8] sm:$0xf0]  ;;  %v14234_v42 = vld [vmem:[%s23050_s1 + $0x164] sm:$0xf]  ;;  %v9674_v44 = vld [vmem:[%s23050_s1 + $0x17c] sm:$0xf0]  ;;  %v10569_v45 = vor.u32 %v14461_v35, %v10568_v34 }
  0xea   :  { %3843 = vmatpush.bf16.msrb.mxu2 %v10121_v47  ;;  %v3604_v47 = vpop.f32.mrf.mxu3  ;;  %v14454_v51 = vld [vmem:[%s23050_s1 + $0x840] sm:$0xf0]  ;;  %v9618_v7 = vld [vmem:[%s23050_s1 + $0x10c] sm:$0xf0]  ;;  %v14489_v35 = vld [vmem:[%s23050_s1 + $0x958] sm:$0xf0] }
  0xeb   :  { %3856 = vmatpush.bf16.msrb.mxu3 %v10345_v53  ;;  %v10009_v53 = vor.u32 %v14321_v39, %v10008_v38  ;;  %v17000_v57 = vadd.f32 %v3604_v47, %v3592_v46  ;;  %v14517_v38 = vld [vmem:[%s23050_s1 + $0xa38] sm:$0xf0]  ;;  %v11016_v39 = vld [vmem:[%s23050_s1 + $0xbe0] sm:$0xf] }
  0xec   :  { %3818 = vmatpush.bf16.msrb.mxu0 %v9645_v60  ;;  %v9980_v60 = vld [vmem:[%s23050_s1 + $0x3c8] sm:$0xf]  ;;  %v11017_v47 = vor.u32 %v14573_v41, %v11016_v39  ;;  %v9562_v39 = vld [vmem:[%s23050_s1 + $0x9c] sm:$0xf0] }
  0xed   :  { %3831 = vmatpush.bf16.msrb.mxu1 %v9869_v62  ;;  %v10204_v62 = vld [vmem:[%s23050_s1 + $0x588] sm:$0xf]  ;;  %v9981_v4 = vor.u32 %v14314_v61, %v9980_v60 }
  0xee   :  { %3844 = vmatpush.bf16.msrb.mxu2 %v10093_v63  ;;  %v14370_v63 = vld [vmem:[%s23050_s1 + $0x5a0] sm:$0xf0] }
  0xef   :  { %3857 = vmatpush.bf16.msrb.mxu3 %v10317_v3  ;;  %v9757_v3 = vor.u32 %v14258_v59, %v9756_v56  ;;  %v10205_v8 = vor.u32 %v14370_v63, %v10204_v62  ;;  %v14566_v56 = vld [vmem:[%s23050_s1 + $0xbc0] sm:$0xf0]  ;;  %v9646_v59 = vld [vmem:[%s23050_s1 + $0x144] sm:$0xf0]  ;;  %v10512_v63 = vld [vmem:[%s23050_s1 + $0x7f0] sm:$0xf] }
  0xf0   :  { %3819 = vmatpush.bf16.msrb.mxu0 %v9617_v10  ;;  %v10176_v10 = vld [vmem:[%s23050_s1 + $0x550] sm:$0xf]  ;;  %v3593_v12 = vpop.f32.mrf.mxu2  ;;  %v10989_v62 = vor.u32 %v14566_v56, %v10988_v55  ;;  %v14538_v55 = vld [vmem:[%s23050_s1 + $0xae0] sm:$0xf0]  ;;  %v14199_v56 = vld [vmem:[%s23050_s1 + $0x4c] sm:$0xf] }
  0xf1   :  { %3832 = vmatpush.bf16.msrb.mxu1 %v9841_v13  ;;  %v10596_v13 = vld [vmem:[%s23050_s1 + $0x898] sm:$0xf] }
  0xf2   :  { %3845 = vmatpush.bf16.msrb.mxu2 %v10065_v14  ;;  %v14468_v14 = vld [vmem:[%s23050_s1 + $0x8b0] sm:$0xf0]  ;;  %v3606_v16 = vpop.f32.mrf.mxu3 }
  0xf3   :  { %3858 = vmatpush.bf16.msrb.mxu3 %v10289_v18  ;;  %v14524_v18 = vld [vmem:[%s23050_s1 + $0xa70] sm:$0xf0]  ;;  %v10708_v16 = vld [vmem:[%s23050_s1 + $0x978] sm:$0xf] }
  0xf4   :  { %3820 = vmatpush.bf16.msrb.mxu0 %v9589_v30  ;;  %v10177_v30 = vor.u32 %v14363_v11, %v10176_v10 }
  0xf5   :  { %3833 = vmatpush.bf16.msrb.mxu1 %v9813_v31  ;;  %v10597_v31 = vor.u32 %v14468_v14, %v10596_v13  ;;  %v10484_v14 = vld [vmem:[%s23050_s1 + $0x7b8] sm:$0xf] }
  0xf6   :  { %3846 = vmatpush.bf16.msrb.mxu2 %v10037_v32  ;;  %v10821_v32 = vor.u32 %v14524_v18, %v10820_v15  ;;  %v14440_v15 = vld [vmem:[%s23050_s1 + $0x7d0] sm:$0xf0]  ;;  %v10932_v18 = vld [vmem:[%s23050_s1 + $0xb38] sm:$0xf] }
  0xf7   :  { %3859 = vmatpush.bf16.msrb.mxu3 %v10261_v36  ;;  %v10792_v36 = vld [vmem:[%s23050_s1 + $0xa20] sm:$0xf]  ;;  %v10485_v27 = vor.u32 %v14440_v15, %v10484_v14  ;;  %v14409_v14 = vld [vmem:[%s23050_s1 + $0x6dc] sm:$0xf]  ;;  %v10374_v15 = vld [vmem:[%s23050_s1 + $0x6f4] sm:$0xf0] }
  0xf8   :  { %3821 = vmatpush.bf16.msrb.mxu0 %v9561_v48  ;;  %v10793_v46 = vor.u32 %v14517_v38, %v10792_v36  ;;  %v10540_v48 = vld [vmem:[%s23050_s1 + $0x828] sm:$0xf]  ;;  %v10904_v36 = vld [vmem:[%s23050_s1 + $0xb00] sm:$0xf]  ;;  %v14206_v38 = vld [vmem:[%s23050_s1 + $0x84] sm:$0xf] }
  0xf9   :  { %3834 = vmatpush.bf16.msrb.mxu1 %v9785_v52  ;;  %v10764_v52 = vld [vmem:[%s23050_s1 + $0x9e8] sm:$0xf]  ;;  %v10541_v60 = vor.u32 %v14454_v51, %v10540_v48  ;;  %v14426_v48 = vld [vmem:[%s23050_s1 + $0x760] sm:$0xf0] }
  0xfa   :  { %3847 = vmatpush.bf16.msrb.mxu2 %v10009_v53  ;;  %v9677_v53 = vor.u32 %v14234_v42, %v9674_v44  ;;  %v10765_v61 = vor.u32 %v14510_v54, %v10764_v52  ;;  %v10652_v51 = vld [vmem:[%s23050_s1 + $0x908] sm:$0xf]  ;;  %v9565_v52 = vor.u32 %v14206_v38, %v9562_v39  ;;  %v14458_v39 = vld [vmem:[%s23050_s1 + $0x864] sm:$0xf] }
  0xfb   :  { %3860 = vmatpush.bf16.msrb.mxu3 %v10233_v58  ;;  %v14227_v58 = vld [vmem:[%s23050_s1 + $0x12c] sm:$0xf]  ;;  %v10876_v54 = vld [vmem:[%s23050_s1 + $0xac8] sm:$0xf] }
  0xfc   :  { %3822 = vmatpush.bf16.msrb.mxu0 %v9533_v0  ;;  %v14447_v0 = vld [vmem:[%s23050_s1 + $0x808] sm:$0xf0]  ;;  %v9649_v2 = vor.u32 %v14227_v58, %v9646_v59  ;;  %v9534_v58 = vld [vmem:[%s23050_s1 + $0x64] sm:$0xf0] }
  0xfd   :  { %3835 = vmatpush.bf16.msrb.mxu1 %v9757_v3  ;;  %v14503_v3 = vld [vmem:[%s23050_s1 + $0x9c8] sm:$0xf0]  ;;  %v10513_v9 = vor.u32 %v14447_v0, %v10512_v63 }
  0xfe   :  { %3848 = vmatpush.bf16.msrb.mxu2 %v9981_v4  ;;  %v10960_v4 = vld [vmem:[%s23050_s1 + $0xb70] sm:$0xf]  ;;  %v10737_v12 = vor.u32 %v14503_v3, %v10736_v1  ;;  %v10877_v1 = vor.u32 %v14538_v55, %v10876_v54  ;;  %v14475_v3 = vld [vmem:[%s23050_s1 + $0x8e8] sm:$0xf0]  ;;  %v10318_v54 = vld [vmem:[%s23050_s1 + $0x684] sm:$0xf0] }
  0xff   :  { %3861 = vmatpush.bf16.msrb.mxu3 %v10205_v8  ;;  %v10961_v13 = vor.u32 %v14559_v5, %v10960_v4  ;;  %v10848_v4 = vld [vmem:[%s23050_s1 + $0xa90] sm:$0xf]  ;;  %v9537_v5 = vor.u32 %v14199_v56, %v9534_v58  ;;  %v14451_v56 = vld [vmem:[%s23050_s1 + $0x82c] sm:$0xf]  ;;  %v10542_v58 = vld [vmem:[%s23050_s1 + $0x844] sm:$0xf0] }
 0x100   :  { %3823 = vmatpush.bf16.msrb.mxu0 %v9505_v17  ;;  %v3617_v8 = vpop.f32.mrf.mxu0  ;;  %v9621_v17 = vor.u32 %v14220_v6, %v9618_v7  ;;  %v14192_v6 = vld [vmem:[%s23050_s1 + $0x14] sm:$0xf]  ;;  %v9506_v7 = vld [vmem:[%s23050_s1 + $0x2c] sm:$0xf0] }
 0x101   :  { %3836 = vmatpush.bf16.msrb.mxu1 %v9729_v21  ;;  %v3618_v10 = vadd.f32 %v3617_v8, %v17000_v57  ;;  %v3630_v11 = vpop.f32.mrf.mxu1  ;;  %v14496_v57 = vld [vmem:[%s23050_s1 + $0x990] sm:$0xf0]  ;;  %v14213_v21 = vld [vmem:[%s23050_s1 + $0xbc] sm:$0xf] }
 0x102   :  { %3849 = vmatpush.bf16.msrb.mxu2 %v9953_v24  ;;  %v9590_v24 = vld [vmem:[%s23050_s1 + $0xd4] sm:$0xf0]  ;;  %v10709_v29 = vor.u32 %v14496_v57, %v10708_v16 }
 0x103   :  { %3862 = vmatpush.bf16.msrb.mxu3 %v10177_v30  ;;  %3824 = vmatmul.bf16.vlgmr.msrb.gmra.mxu0 %v15729_v23  ;;  %v17160_v20 = vadd.f32 %v3630_v11, %v3618_v10  ;;  %v10933_v30 = vor.u32 %v14552_v19, %v10932_v18  ;;  %v9593_v34 = vor.u32 %v14213_v21, %v9590_v24  ;;  %v9926_v10 = vld [vmem:[%s23050_s1 + $0x374] sm:$0xf0]  ;;  %v14353_v11 = vld [vmem:[%s23050_s1 + $0x51c] sm:$0xf] }
 0x104   :  { %3868 = vmatpush.bf16.msra.mxu0 %v10597_v31  ;;  %3837 = vmatmul.bf16.vlgmr.msrb.gmra.mxu1 %v15731_v25  ;;  %v10456_v31 = vld [vmem:[%s23050_s1 + $0x780] sm:$0xf]  ;;  %v14465_v18 = vld [vmem:[%s23050_s1 + $0x89c] sm:$0xf]  ;;  %v10598_v19 = vld [vmem:[%s23050_s1 + $0x8b4] sm:$0xf0]  ;;  %v9509_v24 = vor.u32 %v14192_v6, %v9506_v7 }
 0x105   :  { %3881 = vmatpush.bf16.msra.mxu1 %v10821_v32  ;;  %3850 = vmatmul.bf16.vlgmr.msrb.gmra.mxu2 %v15727_v22  ;;  %v14433_v32 = vld [vmem:[%s23050_s1 + $0x798] sm:$0xf0] }
 0x106   :  { %3894 = vmatpush.bf16.msra.mxu2 %v11045_v33  ;;  %3863 = vmatmul.bf16.vlgmr.msrb.gmra.mxu3 %v15733_v26  ;;  %v10680_v33 = vld [vmem:[%s23050_s1 + $0x940] sm:$0xf]  ;;  %v10457_v42 = vor.u32 %v14433_v32, %v10456_v31  ;;  %v14290_v31 = vld [vmem:[%s23050_s1 + $0x324] sm:$0xf] }
 0x107   :  { %3907 = vmatpush.bf16.msra.mxu3 %v9705_v37  ;;  %v14545_v37 = vld [vmem:[%s23050_s1 + $0xb18] sm:$0xf0]  ;;  %v9898_v32 = vld [vmem:[%s23050_s1 + $0x33c] sm:$0xf0] }
 0x108   :  { %3869 = vmatpush.bf16.msra.mxu0 %v10569_v45  ;;  %v3619_v41 = vpop.f32.mrf.mxu0  ;;  %v10681_v45 = vor.u32 %v14489_v35, %v10680_v33  ;;  %v3643_v63 = vpop.f32.mrf.mxu2  ;;  %v14346_v33 = vld [vmem:[%s23050_s1 + $0x4e4] sm:$0xf]  ;;  %v10122_v35 = vld [vmem:[%s23050_s1 + $0x4fc] sm:$0xf0] }
 0x109   :  { %3882 = vmatpush.bf16.msra.mxu1 %v10793_v46  ;;  %v3632_v44 = vpop.f32.mrf.mxu1  ;;  %v10905_v46 = vor.u32 %v14545_v37, %v10904_v36  ;;  %v3656_v16 = vpop.f32.mrf.mxu3  ;;  %v14402_v36 = vld [vmem:[%s23050_s1 + $0x6a4] sm:$0xf]  ;;  %v10346_v37 = vld [vmem:[%s23050_s1 + $0x6bc] sm:$0xf0] }
 0x10a   :  { %3895 = vmatpush.bf16.msra.mxu2 %v11017_v47  ;;  %v10428_v47 = vld [vmem:[%s23050_s1 + $0x748] sm:$0xf]  ;;  %v10570_v41 = vld [vmem:[%s23050_s1 + $0x87c] sm:$0xf0]  ;;  %v10125_v44 = vor.u32 %v14346_v33, %v10122_v35  ;;  %v14374_v35 = vld [vmem:[%s23050_s1 + $0x5c4] sm:$0xf] }
 0x10b   :  { %3908 = vmatpush.bf16.msra.mxu3 %v9677_v53  ;;  %v14482_v53 = vld [vmem:[%s23050_s1 + $0x920] sm:$0xf0]  ;;  %v10429_v59 = vor.u32 %v14426_v48, %v10428_v47  ;;  %v9870_v47 = vld [vmem:[%s23050_s1 + $0x304] sm:$0xf0]  ;;  %v14339_v48 = vld [vmem:[%s23050_s1 + $0x4ac] sm:$0xf] }
 0x10c   :  { %3870 = vmatpush.bf16.msra.mxu0 %v10541_v60  ;;  %v10400_v60 = vld [vmem:[%s23050_s1 + $0x710] sm:$0xf]  ;;  %v10653_v0 = vor.u32 %v14482_v53, %v10652_v51  ;;  %v10573_v51 = vor.u32 %v14458_v39, %v10570_v41  ;;  %v14395_v53 = vld [vmem:[%s23050_s1 + $0x66c] sm:$0xf]  ;;  %v14430_v39 = vld [vmem:[%s23050_s1 + $0x784] sm:$0xf] }
 0x10d   :  { %3883 = vmatpush.bf16.msra.mxu1 %v10765_v61  ;;  %v14419_v61 = vld [vmem:[%s23050_s1 + $0x728] sm:$0xf0]  ;;  %v10458_v41 = vld [vmem:[%s23050_s1 + $0x79c] sm:$0xf0] }
 0x10e   :  { %3896 = vmatpush.bf16.msra.mxu2 %v10989_v62  ;;  %v1399_v62 = vperm.slane %v16560_v28, 2  ;;  %v14531_v28 = vld [vmem:[%s23050_s1 + $0xaa8] sm:$0xf0] }
 0x10f   :  { %3909 = vmatpush.bf16.msra.mxu3 %v9649_v2  ;;  %v10624_v2 = vld [vmem:[%s23050_s1 + $0x8d0] sm:$0xf]  ;;  %v10849_v57 = vor.u32 %v14531_v28, %v10848_v4 }
 0x110   :  { %3871 = vmatpush.bf16.msra.mxu0 %v10513_v9  ;;  %v3644_v8 = vadd.f32 %v3643_v63, %v1399_v62  ;;  %v14297_v9 = vld [vmem:[%s23050_s1 + $0x35c] sm:$0xf]  ;;  %v3645_v38 = vpop.f32.mrf.mxu2  ;;  %v14276_v62 = vld [vmem:[%s23050_s1 + $0x2b4] sm:$0xf]  ;;  %v9842_v63 = vld [vmem:[%s23050_s1 + $0x2cc] sm:$0xf0] }
 0x111   :  { %3884 = vmatpush.bf16.msra.mxu1 %v10737_v12  ;;  %v10401_v12 = vor.u32 %v14419_v61, %v10400_v60  ;;  %v3658_v55 = vpop.f32.mrf.mxu3  ;;  %v10321_v61 = vor.u32 %v14395_v53, %v10318_v54  ;;  %v10290_v4 = vld [vmem:[%s23050_s1 + $0x64c] sm:$0xf0]  ;;  %v9845_v7 = vor.u32 %v14276_v62, %v9842_v63  ;;  %v14248_v63 = vld [vmem:[%s23050_s1 + $0x1d4] sm:$0xf] }
 0x112   :  { %3897 = vmatpush.bf16.msra.mxu2 %v10961_v13  ;;  %v10150_v13 = vld [vmem:[%s23050_s1 + $0x534] sm:$0xf0]  ;;  %v3657_v21 = vadd.f32 %v3656_v16, %v3644_v8  ;;  %v10514_v28 = vld [vmem:[%s23050_s1 + $0x80c] sm:$0xf0]  ;;  %v10461_v55 = vor.u32 %v14430_v39, %v10458_v41  ;;  %v14294_v39 = vld [vmem:[%s23050_s1 + $0x340] sm:$0xf0] }
 0x113   :  { %3910 = vmatpush.bf16.msra.mxu3 %v9621_v17  ;;  %v10625_v17 = vor.u32 %v14475_v3, %v10624_v2  ;;  %v10066_v2 = vld [vmem:[%s23050_s1 + $0x48c] sm:$0xf0]  ;;  %v14388_v3 = vld [vmem:[%s23050_s1 + $0x634] sm:$0xf]  ;;  %v10038_v16 = vld [vmem:[%s23050_s1 + $0x454] sm:$0xf0] }
 0x114   :  { %3872 = vmatpush.bf16.msra.mxu0 %v10485_v27  ;;  %v9929_v27 = vor.u32 %v14297_v9, %v9926_v10  ;;  %v10293_v10 = vor.u32 %v14388_v3, %v10290_v4  ;;  %v14304_v3 = vld [vmem:[%s23050_s1 + $0x394] sm:$0xf]  ;;  %v9954_v4 = vld [vmem:[%s23050_s1 + $0x3ac] sm:$0xf0] }
 0x115   :  { %3885 = vmatpush.bf16.msra.mxu1 %v10709_v29  ;;  %v10153_v29 = vor.u32 %v14353_v11, %v10150_v13  ;;  %v14269_v11 = vld [vmem:[%s23050_s1 + $0x27c] sm:$0xf] }
 0x116   :  { %3898 = vmatpush.bf16.msra.mxu2 %v10933_v30  ;;  %v10377_v30 = vor.u32 %v14409_v14, %v10374_v15  ;;  %v14325_v13 = vld [vmem:[%s23050_s1 + $0x43c] sm:$0xf] }
 0x117   :  { %3911 = vmatpush.bf16.msra.mxu3 %v9593_v34  ;;  %v10601_v34 = vor.u32 %v14465_v18, %v10598_v19  ;;  %v14437_v19 = vld [vmem:[%s23050_s1 + $0x7bc] sm:$0xf] }
 0x118   :  { %3873 = vmatpush.bf16.msra.mxu0 %v10457_v42  ;;  %v9901_v42 = vor.u32 %v14290_v31, %v9898_v32  ;;  %v9786_v31 = vld [vmem:[%s23050_s1 + $0x25c] sm:$0xf0]  ;;  %v14318_v32 = vld [vmem:[%s23050_s1 + $0x404] sm:$0xf] }
 0x119   :  { %3886 = vmatpush.bf16.msra.mxu1 %v10681_v45  ;;  %v10349_v45 = vor.u32 %v14402_v36, %v10346_v37  ;;  %v10234_v36 = vld [vmem:[%s23050_s1 + $0x5dc] sm:$0xf0] }
 0x11a   :  { %3899 = vmatpush.bf16.msra.mxu2 %v10905_v46  ;;  %v14283_v46 = vld [vmem:[%s23050_s1 + $0x2ec] sm:$0xf] }
 0x11b   :  { %3912 = vmatpush.bf16.msra.mxu3 %v9565_v52  ;;  %v10094_v52 = vld [vmem:[%s23050_s1 + $0x4c4] sm:$0xf0] }
 0x11c   :  { %3874 = vmatpush.bf16.msra.mxu0 %v10429_v59  ;;  %v9873_v59 = vor.u32 %v14283_v46, %v9870_v47  ;;  %v10097_v60 = vor.u32 %v14339_v48, %v10094_v52  ;;  %v10237_v47 = vor.u32 %v14374_v35, %v10234_v36  ;;  %v14255_v48 = vld [vmem:[%s23050_s1 + $0x20c] sm:$0xf]  ;;  %v11018_v35 = vld [vmem:[%s23050_s1 + $0xbfc] sm:$0xf0]  ;;  %v9680_v36 = vld [vmem:[%s23050_s1 + $0x168] sm:$0xf] }
 0x11d   :  { %3887 = vmatpush.bf16.msra.mxu1 %v10653_v0  ;;  %v14332_v0 = vld [vmem:[%s23050_s1 + $0x474] sm:$0xf]  ;;  %v14311_v52 = vld [vmem:[%s23050_s1 + $0x3cc] sm:$0xf] }
 0x11e   :  { %3900 = vmatpush.bf16.msra.mxu2 %v10877_v1  ;;  %v10545_v1 = vor.u32 %v14451_v56, %v10542_v58  ;;  %v10069_v9 = vor.u32 %v14332_v0, %v10066_v2  ;;  %v9982_v56 = vld [vmem:[%s23050_s1 + $0x3e4] sm:$0xf0]  ;;  %v14367_v58 = vld [vmem:[%s23050_s1 + $0x58c] sm:$0xf]  ;;  %v9730_v0 = vld [vmem:[%s23050_s1 + $0x1ec] sm:$0xf0] }
 0x11f   :  { %3913 = vmatpush.bf16.msra.mxu3 %v9537_v5  ;;  %v14444_v5 = vld [vmem:[%s23050_s1 + $0x7f4] sm:$0xf] }
 0x120   :  { %3875 = vmatpush.bf16.msra.mxu0 %v10401_v12  ;;  %v3669_v6 = vpop.f32.mrf.mxu0  ;;  %v9814_v12 = vld [vmem:[%s23050_s1 + $0x294] sm:$0xf0]  ;;  %v10517_v15 = vor.u32 %v14444_v5, %v10514_v28  ;;  %v14360_v5 = vld [vmem:[%s23050_s1 + $0x554] sm:$0xf] }
 0x121   :  { %3888 = vmatpush.bf16.msra.mxu1 %v10625_v17  ;;  %v3670_v8 = vadd.f32 %v3669_v6, %v3657_v21  ;;  %v3682_v14 = vpop.f32.mrf.mxu1  ;;  %v14381_v17 = vld [vmem:[%s23050_s1 + $0x5fc] sm:$0xf]  ;;  %v10486_v21 = vld [vmem:[%s23050_s1 + $0x7d4] sm:$0xf0]  ;;  %v10178_v6 = vld [vmem:[%s23050_s1 + $0x56c] sm:$0xf0] }
 0x122   :  { %3901 = vmatpush.bf16.msra.mxu2 %v10849_v57  ;;  %v10262_v57 = vld [vmem:[%s23050_s1 + $0x614] sm:$0xf0]  ;;  %v10489_v33 = vor.u32 %v14437_v19, %v10486_v21  ;;  %v9932_v19 = vld [vmem:[%s23050_s1 + $0x360] sm:$0xf]  ;;  %v14301_v21 = vld [vmem:[%s23050_s1 + $0x378] sm:$0xf0] }
 0x123   :  { %3914 = vmatpush.bf16.msra.mxu3 %v9509_v24  ;;  %3876 = vmatmul.bf16.vlgmr.msra.gmra.mxu0 %v15895_v49  ;;  %v3683_v18 = vadd.f32 %v3682_v14, %v3670_v8  ;;  %v9817_v24 = vor.u32 %v14269_v11, %v9814_v12  ;;  %v10402_v8 = vld [vmem:[%s23050_s1 + $0x72c] sm:$0xf0]  ;;  %v14521_v11 = vld [vmem:[%s23050_s1 + $0xa5c] sm:$0xf]  ;;  %v10822_v12 = vld [vmem:[%s23050_s1 + $0xa74] sm:$0xf0]  ;;  %v9733_v14 = vor.u32 %v14248_v63, %v9730_v0 }
 0x124   :  { %3920 = vmatpush.bf16.msrb.mxu0 %v9929_v27  ;;  %3889 = vmatmul.bf16.vlgmr.msra.gmra.mxu1 %v15897_v50  ;;  %v10041_v27 = vor.u32 %v14325_v13, %v10038_v16  ;;  %v14577_v13 = vld [vmem:[%s23050_s1 + $0xc1c] sm:$0xf]  ;;  %v9708_v16 = vld [vmem:[%s23050_s1 + $0x1a0] sm:$0xf]  ;;  %v14556_v63 = vld [vmem:[%s23050_s1 + $0xb74] sm:$0xf] }
 0x125   :  { %3933 = vmatpush.bf16.msrb.mxu1 %v10153_v29  ;;  %3902 = vmatmul.bf16.vlgmr.msra.gmra.mxu2 %v15878_v43  ;;  %v10265_v29 = vor.u32 %v14381_v17, %v10262_v57  ;;  %v14245_v17 = vld [vmem:[%s23050_s1 + $0x1b8] sm:$0xf0]  ;;  %v9957_v57 = vor.u32 %v14304_v3, %v9954_v4  ;;  %v14224_v3 = vld [vmem:[%s23050_s1 + $0x110] sm:$0xf0]  ;;  %v9848_v4 = vld [vmem:[%s23050_s1 + $0x2b8] sm:$0xf] }
 0x126   :  { %3946 = vmatpush.bf16.msrb.mxu2 %v10377_v30  ;;  %3915 = vmatmul.bf16.vlgmr.msra.gmra.mxu3 %v15729_v23  ;;  %v14262_v30 = vld [vmem:[%s23050_s1 + $0x244] sm:$0xf] }
 0x127   :  { %3959 = vmatpush.bf16.msrb.mxu3 %v10601_v34  ;;  %v10010_v34 = vld [vmem:[%s23050_s1 + $0x41c] sm:$0xf0] }
 0x128   :  { %3921 = vmatpush.bf16.msrb.mxu0 %v9901_v42  ;;  %v3695_v37 = vpop.f32.mrf.mxu2  ;;  %v3671_v42 = vpop.f32.mrf.mxu0  ;;  %v10013_v46 = vor.u32 %v14318_v32, %v10010_v34  ;;  %v10794_v32 = vld [vmem:[%s23050_s1 + $0xa3c] sm:$0xf0]  ;;  %v9933_v34 = vor.u32 %v14301_v21, %v9932_v19  ;;  %v14486_v21 = vld [vmem:[%s23050_s1 + $0x944] sm:$0xf] }
 0x129   :  { %3934 = vmatpush.bf16.msrb.mxu1 %v10125_v44  ;;  %v3708_v38 = vpop.f32.mrf.mxu3  ;;  %v3696_v44 = vadd.f32 %v3695_v37, %v3683_v18  ;;  %v3684_v54 = vpop.f32.mrf.mxu1  ;;  %v10181_v18 = vor.u32 %v14360_v5, %v10178_v6  ;;  %v14238_v37 = vld [vmem:[%s23050_s1 + $0x180] sm:$0xf0]  ;;  %v14280_v5 = vld [vmem:[%s23050_s1 + $0x2d0] sm:$0xf0] }
 0x12a   :  { %3947 = vmatpush.bf16.msrb.mxu2 %v10349_v45  ;;  %v9789_v45 = vor.u32 %v14262_v30, %v9786_v31  ;;  %v9709_v30 = vor.u32 %v14245_v17, %v9708_v16  ;;  %v14514_v31 = vld [vmem:[%s23050_s1 + $0xa24] sm:$0xf]  ;;  %v14231_v54 = vld [vmem:[%s23050_s1 + $0x148] sm:$0xf0]  ;;  %v9820_v16 = vld [vmem:[%s23050_s1 + $0x280] sm:$0xf] }
 0x12b   :  { %3960 = vmatpush.bf16.msrb.mxu3 %v10573_v51  ;;  %v9758_v51 = vld [vmem:[%s23050_s1 + $0x224] sm:$0xf0]  ;;  %v17398_v53 = vadd.f32 %v3708_v38, %v3696_v44  ;;  %v10797_v41 = vor.u32 %v14514_v31, %v10794_v32  ;;  %v9681_v44 = vor.u32 %v14238_v37, %v9680_v36  ;;  %v14273_v17 = vld [vmem:[%s23050_s1 + $0x298] sm:$0xf0]  ;;  %v14210_v32 = vld [vmem:[%s23050_s1 + $0xa0] sm:$0xf0] }
 0x12c   :  { %3922 = vmatpush.bf16.msrb.mxu0 %v9873_v59  ;;  %v10206_v59 = vld [vmem:[%s23050_s1 + $0x5a4] sm:$0xf0]  ;;  %v9761_v62 = vor.u32 %v14255_v48, %v9758_v51 }
 0x12d   :  { %3935 = vmatpush.bf16.msrb.mxu1 %v10097_v60  ;;  %v14423_v60 = vld [vmem:[%s23050_s1 + $0x74c] sm:$0xf]  ;;  %v10209_v2 = vor.u32 %v14367_v58, %v10206_v59  ;;  %v9904_v38 = vld [vmem:[%s23050_s1 + $0x328] sm:$0xf] }
 0x12e   :  { %3948 = vmatpush.bf16.msrb.mxu2 %v10321_v61  ;;  %v10430_v61 = vld [vmem:[%s23050_s1 + $0x764] sm:$0xf0]  ;;  %v9905_v48 = vor.u32 %v14294_v39, %v9904_v38  ;;  %v14479_v39 = vld [vmem:[%s23050_s1 + $0x90c] sm:$0xf] }
 0x12f   :  { %3961 = vmatpush.bf16.msrb.mxu3 %v10545_v1  ;;  %v9985_v1 = vor.u32 %v14311_v52, %v9982_v56  ;;  %v10433_v28 = vor.u32 %v14423_v60, %v10430_v61  ;;  %v10990_v51 = vld [vmem:[%s23050_s1 + $0xbc4] sm:$0xf0]  ;;  %v9652_v52 = vld [vmem:[%s23050_s1 + $0x130] sm:$0xf]  ;;  %v14287_v56 = vld [vmem:[%s23050_s1 + $0x308] sm:$0xf0] }
 0x130   :  { %3923 = vmatpush.bf16.msrb.mxu0 %v9845_v7  ;;  %v14416_v7 = vld [vmem:[%s23050_s1 + $0x714] sm:$0xf]  ;;  %v9653_v60 = vor.u32 %v14231_v54, %v9652_v52  ;;  %v9568_v31 = vld [vmem:[%s23050_s1 + $0x88] sm:$0xf] }
 0x131   :  { %3936 = vmatpush.bf16.msrb.mxu1 %v10069_v9  ;;  %v3697_v9 = vpop.f32.mrf.mxu2  ;;  %v14500_v61 = vld [vmem:[%s23050_s1 + $0x9b4] sm:$0xf]  ;;  %v9569_v38 = vor.u32 %v14210_v32, %v9568_v31  ;;  %v10352_v31 = vld [vmem:[%s23050_s1 + $0x6a8] sm:$0xf] }
 0x132   :  { %3949 = vmatpush.bf16.msrb.mxu2 %v10293_v10  ;;  %v3710_v10 = vpop.f32.mrf.mxu3  ;;  %v14472_v54 = vld [vmem:[%s23050_s1 + $0x8d4] sm:$0xf] }
 0x133   :  { %3962 = vmatpush.bf16.msrb.mxu3 %v10517_v15  ;;  %v11046_v15 = vld [vmem:[%s23050_s1 + $0xc34] sm:$0xf0]  ;;  %v14493_v10 = vld [vmem:[%s23050_s1 + $0x97c] sm:$0xf] }
 0x134   :  { %3924 = vmatpush.bf16.msrb.mxu0 %v9817_v24  ;;  %v10405_v24 = vor.u32 %v14416_v7, %v10402_v8 }
 0x135   :  { %3937 = vmatpush.bf16.msrb.mxu1 %v10041_v27  ;;  %v10825_v27 = vor.u32 %v14521_v11, %v10822_v12  ;;  %v10710_v11 = vld [vmem:[%s23050_s1 + $0x994] sm:$0xf0]  ;;  %v14549_v12 = vld [vmem:[%s23050_s1 + $0xb3c] sm:$0xf] }
 0x136   :  { %3950 = vmatpush.bf16.msrb.mxu2 %v10265_v29  ;;  %v11049_v29 = vor.u32 %v14577_v13, %v11046_v15  ;;  %v9849_v13 = vor.u32 %v14280_v5, %v9848_v4  ;;  %v14217_v15 = vld [vmem:[%s23050_s1 + $0xd8] sm:$0xf0]  ;;  %v9736_v4 = vld [vmem:[%s23050_s1 + $0x1d8] sm:$0xf]  ;;  %v14252_v5 = vld [vmem:[%s23050_s1 + $0x1f0] sm:$0xf0] }
 0x137   :  { %3963 = vmatpush.bf16.msrb.mxu3 %v10489_v33  ;;  %v14570_v33 = vld [vmem:[%s23050_s1 + $0xbe4] sm:$0xf] }
 0x138   :  { %3925 = vmatpush.bf16.msrb.mxu0 %v9789_v45  ;;  %v11021_v42 = vor.u32 %v14570_v33, %v11018_v35  ;;  %v14507_v45 = vld [vmem:[%s23050_s1 + $0x9ec] sm:$0xf]  ;;  %v9792_v33 = vld [vmem:[%s23050_s1 + $0x248] sm:$0xf] }
 0x139   :  { %3938 = vmatpush.bf16.msrb.mxu1 %v10013_v46  ;;  %v10766_v46 = vld [vmem:[%s23050_s1 + $0xa04] sm:$0xf0] }
 0x13a   :  { %3951 = vmatpush.bf16.msrb.mxu2 %v10237_v47  ;;  %v14563_v47 = vld [vmem:[%s23050_s1 + $0xbac] sm:$0xf]  ;;  %v10769_v58 = vor.u32 %v14507_v45, %v10766_v46  ;;  %v10878_v45 = vld [vmem:[%s23050_s1 + $0xae4] sm:$0xf0]  ;;  %v9540_v46 = vld [vmem:[%s23050_s1 + $0x50] sm:$0xf] }
 0x13b   :  { %3964 = vmatpush.bf16.msrb.mxu3 %v10461_v55  ;;  %v9876_v55 = vld [vmem:[%s23050_s1 + $0x2f0] sm:$0xf]  ;;  %v10993_v59 = vor.u32 %v14563_v47, %v10990_v51  ;;  %v14203_v47 = vld [vmem:[%s23050_s1 + $0x68] sm:$0xf0] }
 0x13c   :  { %3926 = vmatpush.bf16.msrb.mxu0 %v9761_v62  ;;  %v10738_v62 = vld [vmem:[%s23050_s1 + $0x9cc] sm:$0xf0]  ;;  %v9877_v0 = vor.u32 %v14287_v56, %v9876_v55  ;;  %v14259_v51 = vld [vmem:[%s23050_s1 + $0x228] sm:$0xf0]  ;;  %v17623_v56 = vld [vmem:[%s23052_s2] sm:$0xff] }
 0x13d   :  { %3939 = vmatpush.bf16.msrb.mxu1 %v9985_v1  ;;  %v10962_v1 = vld [vmem:[%s23050_s1 + $0xb8c] sm:$0xf0]  ;;  %v10741_v6 = vor.u32 %v14500_v61, %v10738_v62  ;;  %v9541_v62 = vor.u32 %v14203_v47, %v9540_v46  ;;  %v14343_v46 = vld [vmem:[%s23050_s1 + $0x4c8] sm:$0xf0] }
 0x13e   :  { %3952 = vmatpush.bf16.msrb.mxu2 %v10209_v2  ;;  %v9624_v2 = vld [vmem:[%s23050_s1 + $0xf8] sm:$0xf]  ;;  %v10965_v8 = vor.u32 %v14556_v63, %v10962_v1  ;;  %v10626_v55 = vld [vmem:[%s23050_s1 + $0x8ec] sm:$0xf0]  ;;  %v14528_v63 = vld [vmem:[%s23050_s1 + $0xa94] sm:$0xf] }
 0x13f   :  { %3965 = vmatpush.bf16.msrb.mxu3 %v10433_v28  ;;  %v9625_v9 = vor.u32 %v14224_v3, %v9624_v2  ;;  %v9512_v1 = vld [vmem:[%s23050_s1 + $0x18] sm:$0xf]  ;;  %v14196_v3 = vld [vmem:[%s23050_s1 + $0x30] sm:$0xf0]  ;;  %v10324_v47 = vld [vmem:[%s23050_s1 + $0x670] sm:$0xf] }
 0x140   :  { %3927 = vmatpush.bf16.msrb.mxu0 %v9733_v14  ;;  %v3721_v28 = vpop.f32.mrf.mxu0  ;;  %v9596_v14 = vld [vmem:[%s23050_s1 + $0xc0] sm:$0xf] }
 0x141   :  { %3940 = vmatpush.bf16.msrb.mxu1 %v9957_v57  ;;  %v17540_v7 = vadd.f32 %v3721_v28, %v17398_v53  ;;  %v10934_v53 = vld [vmem:[%s23050_s1 + $0xb54] sm:$0xf0]  ;;  %v10713_v57 = vor.u32 %v14493_v10, %v10710_v11  ;;  %v9597_v19 = vor.u32 %v14217_v15, %v9596_v14  ;;  %v10629_v10 = vor.u32 %v14472_v54, %v10626_v55  ;;  %v14413_v11 = vld [vmem:[%s23050_s1 + $0x6f8] sm:$0xf0]  ;;  %v14455_v54 = vld [vmem:[%s23050_s1 + $0x848] sm:$0xf0] }
 0x142   :  { %3953 = vmatpush.bf16.msrb.mxu2 %v10181_v18  ;;  %v10937_v18 = vor.u32 %v14549_v12, %v10934_v53  ;;  %v10604_v12 = vld [vmem:[%s23050_s1 + $0x8a0] sm:$0xf] }
 0x143   :  { %3966 = vmatpush.bf16.msrb.mxu3 %v10405_v24  ;;  %3928 = vmatmul.bf16.vlgmr.msrb.gmra.mxu0 %v15731_v25  ;;  %v10682_v24 = vld [vmem:[%s23050_s1 + $0x95c] sm:$0xf0] }
 0x144   :  { %3972 = vmatpush.bf16.msra.mxu0 %v10825_v27  ;;  %3941 = vmatmul.bf16.vlgmr.msrb.gmra.mxu1 %v15727_v22  ;;  %v14542_v27 = vld [vmem:[%s23050_s1 + $0xb04] sm:$0xf]  ;;  %v10685_v36 = vor.u32 %v14486_v21, %v10682_v24 }
 0x145   :  { %3985 = vmatpush.bf16.msra.mxu1 %v11049_v29  ;;  %3954 = vmatmul.bf16.vlgmr.msrb.gmra.mxu2 %v15733_v26  ;;  %v9821_v29 = vor.u32 %v14273_v17, %v9820_v16  ;;  %v9513_v16 = vor.u32 %v14196_v3, %v9512_v1  ;;  %v10828_v17 = vld [vmem:[%s23050_s1 + $0xa60] sm:$0xf]  ;;  %v14448_v3 = vld [vmem:[%s23050_s1 + $0x810] sm:$0xf0] }
 0x146   :  { %3998 = vmatpush.bf16.msra.mxu2 %v9709_v30  ;;  %3967 = vmatmul.bf16.vlgmr.msrb.gmra.mxu3 %v15895_v49  ;;  %v10906_v30 = vld [vmem:[%s23050_s1 + $0xb1c] sm:$0xf0] }
 0x147   :  { %4011 = vmatpush.bf16.msra.mxu3 %v9933_v34  ;;  %v14266_v34 = vld [vmem:[%s23050_s1 + $0x260] sm:$0xf0]  ;;  %v10909_v37 = vor.u32 %v14542_v27, %v10906_v30 }
 0x148   :  { %3973 = vmatpush.bf16.msra.mxu0 %v10797_v41  ;;  %v3723_v35 = vpop.f32.mrf.mxu0  ;;  %v10654_v41 = vld [vmem:[%s23050_s1 + $0x924] sm:$0xf0]  ;;  %v14350_v30 = vld [vmem:[%s23050_s1 + $0x500] sm:$0xf0] }
 0x149   :  { %3986 = vmatpush.bf16.msra.mxu1 %v11021_v42  ;;  %v14535_v42 = vld [vmem:[%s23050_s1 + $0xacc] sm:$0xf]  ;;  %v10657_v52 = vor.u32 %v14479_v39, %v10654_v41  ;;  %v3760_v14 = vpop.f32.mrf.mxu3  ;;  %v14462_v35 = vld [vmem:[%s23050_s1 + $0x880] sm:$0xf0] }
 0x14a   :  { %3999 = vmatpush.bf16.msra.mxu2 %v9681_v44  ;;  %v9793_v44 = vor.u32 %v14266_v34, %v9792_v33  ;;  %v10881_v61 = vor.u32 %v14535_v42, %v10878_v45  ;;  %v14406_v33 = vld [vmem:[%s23050_s1 + $0x6c0] sm:$0xf0]  ;;  %v10576_v34 = vld [vmem:[%s23050_s1 + $0x868] sm:$0xf]  ;;  %v10100_v45 = vld [vmem:[%s23050_s1 + $0x4b0] sm:$0xf] }
 0x14b   :  { %4012 = vmatpush.bf16.msra.mxu3 %v9905_v48  ;;  %v9764_v48 = vld [vmem:[%s23050_s1 + $0x210] sm:$0xf]  ;;  %v14518_v39 = vld [vmem:[%s23050_s1 + $0xa40] sm:$0xf0]  ;;  %v10353_v42 = vor.u32 %v14406_v33, %v10352_v31  ;;  %v10240_v31 = vld [vmem:[%s23050_s1 + $0x5c8] sm:$0xf] }
 0x14c   :  { %3974 = vmatpush.bf16.msra.mxu0 %v10769_v58  ;;  %v1400_v58 = vperm.slane %v17623_v56, 3  ;;  %v9765_v2 = vor.u32 %v14259_v51, %v9764_v48  ;;  %v14399_v51 = vld [vmem:[%s23050_s1 + $0x688] sm:$0xf0]  ;;  %v14378_v33 = vld [vmem:[%s23050_s1 + $0x5e0] sm:$0xf0] }
 0x14d   :  { %3987 = vmatpush.bf16.msra.mxu1 %v10993_v59  ;;  %v3734_v59 = vpop.f32.mrf.mxu1 }
 0x14e   :  { %4000 = vmatpush.bf16.msra.mxu2 %v9653_v60  ;;  %v3747_v60 = vpop.f32.mrf.mxu2  ;;  %v3735_v28 = vadd.f32 %v3734_v59, %v1400_v58  ;;  %v10772_v58 = vld [vmem:[%s23050_s1 + $0x9f0] sm:$0xf]  ;;  %v14511_v59 = vld [vmem:[%s23050_s1 + $0xa08] sm:$0xf0] }
 0x14f   :  { %4013 = vmatpush.bf16.msra.mxu3 %v9877_v0  ;;  %v10850_v0 = vld [vmem:[%s23050_s1 + $0xaac] sm:$0xf0]  ;;  %v10773_v1 = vor.u32 %v14511_v59, %v10772_v58  ;;  %v14371_v58 = vld [vmem:[%s23050_s1 + $0x5a8] sm:$0xf0] }
 0x150   :  { %3975 = vmatpush.bf16.msra.mxu0 %v10741_v6  ;;  %v10156_v6 = vld [vmem:[%s23050_s1 + $0x520] sm:$0xf]  ;;  %v3748_v53 = vadd.f32 %v3747_v60, %v3735_v28  ;;  %v10853_v15 = vor.u32 %v14528_v63, %v10850_v0  ;;  %v10101_v60 = vor.u32 %v14343_v46, %v10100_v45  ;;  %v10072_v63 = vld [vmem:[%s23050_s1 + $0x478] sm:$0xf]  ;;  %v14336_v0 = vld [vmem:[%s23050_s1 + $0x490] sm:$0xf0]  ;;  %v10241_v45 = vor.u32 %v14378_v33, %v10240_v31 }
 0x151   :  { %3988 = vmatpush.bf16.msra.mxu1 %v10965_v8  ;;  %v14357_v8 = vld [vmem:[%s23050_s1 + $0x538] sm:$0xf0]  ;;  %v3762_v55 = vpop.f32.mrf.mxu3  ;;  %v10436_v59 = vld [vmem:[%s23050_s1 + $0x750] sm:$0xf]  ;;  %v14574_v31 = vld [vmem:[%s23050_s1 + $0xc00] sm:$0xf0] }
 0x152   :  { %4001 = vmatpush.bf16.msra.mxu2 %v9625_v9  ;;  %v10380_v9 = vld [vmem:[%s23050_s1 + $0x6e0] sm:$0xf]  ;;  %v3761_v21 = vadd.f32 %v3760_v14, %v3748_v53 }
 0x153   :  { %4014 = vmatpush.bf16.msra.mxu3 %v9849_v13  ;;  %v14469_v13 = vld [vmem:[%s23050_s1 + $0x8b8] sm:$0xf0]  ;;  %v10381_v24 = vor.u32 %v14413_v11, %v10380_v9  ;;  %v10044_v11 = vld [vmem:[%s23050_s1 + $0x440] sm:$0xf] }
 0x154   :  { %3976 = vmatpush.bf16.msra.mxu0 %v10713_v57  ;;  %v14525_v57 = vld [vmem:[%s23050_s1 + $0xa78] sm:$0xf0]  ;;  %v10605_v27 = vor.u32 %v14469_v13, %v10604_v12  ;;  %v10268_v13 = vld [vmem:[%s23050_s1 + $0x600] sm:$0xf] }
 0x155   :  { %3989 = vmatpush.bf16.msra.mxu1 %v10937_v18  ;;  %v9737_v18 = vor.u32 %v14252_v5, %v9736_v4  ;;  %v10829_v32 = vor.u32 %v14525_v57, %v10828_v17  ;;  %v10744_v4 = vld [vmem:[%s23050_s1 + $0x9b8] sm:$0xf]  ;;  %v14504_v5 = vld [vmem:[%s23050_s1 + $0x9d0] sm:$0xf0]  ;;  %v14329_v12 = vld [vmem:[%s23050_s1 + $0x458] sm:$0xf0] }
 0x156   :  { %4002 = vmatpush.bf16.msra.mxu2 %v9597_v19  ;;  %v10157_v19 = vor.u32 %v14357_v8, %v10156_v6  ;;  %v10073_v6 = vor.u32 %v14336_v0, %v10072_v63  ;;  %v10745_v14 = vor.u32 %v14504_v5, %v10744_v4  ;;  %v14441_v17 = vld [vmem:[%s23050_s1 + $0x7d8] sm:$0xf0]  ;;  %v9960_v0 = vld [vmem:[%s23050_s1 + $0x398] sm:$0xf] }
 0x157   :  { %4015 = vmatpush.bf16.msra.mxu3 %v9821_v29  ;;  %v10128_v29 = vld [vmem:[%s23050_s1 + $0x4e8] sm:$0xf]  ;;  %v10408_v4 = vld [vmem:[%s23050_s1 + $0x718] sm:$0xf] }
 0x158   :  { %3977 = vmatpush.bf16.msra.mxu0 %v10685_v36  ;;  %v3736_v36 = vpop.f32.mrf.mxu1  ;;  %v10129_v41 = vor.u32 %v14350_v30, %v10128_v29  ;;  %v10016_v29 = vld [vmem:[%s23050_s1 + $0x408] sm:$0xf]  ;;  %v14322_v30 = vld [vmem:[%s23050_s1 + $0x420] sm:$0xf0] }
 0x159   :  { %3990 = vmatpush.bf16.msra.mxu1 %v10909_v37  ;;  %v3749_v37 = vpop.f32.mrf.mxu2 }
 0x15a   :  { %4003 = vmatpush.bf16.msra.mxu2 %v9569_v38  ;;  %v10800_v38 = vld [vmem:[%s23050_s1 + $0xa28] sm:$0xf] }
 0x15b   :  { %4016 = vmatpush.bf16.msra.mxu3 %v9793_v44  ;;  %v10577_v44 = vor.u32 %v14462_v35, %v10576_v34  ;;  %v10801_v48 = vor.u32 %v14518_v39, %v10800_v38  ;;  %v10464_v34 = vld [vmem:[%s23050_s1 + $0x788] sm:$0xf]  ;;  %v14434_v35 = vld [vmem:[%s23050_s1 + $0x7a0] sm:$0xf0] }
 0x15c   :  { %3978 = vmatpush.bf16.msra.mxu0 %v10657_v52  ;;  %v10548_v52 = vld [vmem:[%s23050_s1 + $0x830] sm:$0xf]  ;;  %v10688_v38 = vld [vmem:[%s23050_s1 + $0x948] sm:$0xf]  ;;  %v14490_v39 = vld [vmem:[%s23050_s1 + $0x960] sm:$0xf0]  ;;  %v10465_v46 = vor.u32 %v14434_v35, %v10464_v34 }
 0x15d   :  { %3991 = vmatpush.bf16.msra.mxu1 %v10881_v61  ;;  %v10325_v61 = vor.u32 %v14399_v51, %v10324_v47  ;;  %v9988_v47 = vld [vmem:[%s23050_s1 + $0x3d0] sm:$0xf]  ;;  %v10689_v55 = vor.u32 %v14490_v39, %v10688_v38  ;;  %v14627_v34 = vld [vmem:[%s23053_s3 + $0x168] sm:$0xf0] }
 0x15e   :  { %4004 = vmatpush.bf16.msra.mxu2 %v9541_v62  ;;  %v10549_v62 = vor.u32 %v14455_v54, %v10548_v52  ;;  %v10212_v51 = vld [vmem:[%s23050_s1 + $0x590] sm:$0xf]  ;;  %v14739_v38 = vld [vmem:[%s23053_s3 + $0x4e8] sm:$0xf0] }
 0x15f   :  { %4017 = vmatpush.bf16.msra.mxu3 %v9765_v2  ;;  %v10520_v2 = vld [vmem:[%s23050_s1 + $0x7f8] sm:$0xf]  ;;  %v11448_v35 = vld [vmem:[%s23053_s3 + $0x310] sm:$0xf] }
 0x160   :  { %3979 = vmatpush.bf16.msra.mxu0 %v10629_v10  ;;  %v3773_v28 = vpop.f32.mrf.mxu0  ;;  %v10521_v10 = vor.u32 %v14448_v3, %v10520_v2  ;;  %v10184_v2 = vld [vmem:[%s23050_s1 + $0x558] sm:$0xf]  ;;  %v14364_v3 = vld [vmem:[%s23050_s1 + $0x570] sm:$0xf0] }
 0x161   :  { %3992 = vmatpush.bf16.msra.mxu1 %v10853_v15  ;;  %v3774_v8 = vadd.f32 %v3773_v28, %v3761_v21  ;;  %v3786_v53 = vpop.f32.mrf.mxu1  ;;  %v14385_v15 = vld [vmem:[%s23050_s1 + $0x618] sm:$0xf0]  ;;  %v10045_v21 = vor.u32 %v14329_v12, %v10044_v11  ;;  %v14420_v28 = vld [vmem:[%s23050_s1 + $0x730] sm:$0xf0]  ;;  %v11052_v11 = vld [vmem:[%s23050_s1 + $0xc20] sm:$0xf] }
 0x162   :  { %4005 = vmatpush.bf16.msra.mxu2 %v9513_v16  ;;  %v10492_v16 = vld [vmem:[%s23050_s1 + $0x7c0] sm:$0xf]  ;;  %v14581_v12 = vld [vmem:[%s23050_s1 + $0xc38] sm:$0xf0] }
 0x163   :  { %4018 = vmatpush.bf16.msra.mxu3 %v9737_v18  ;;  %3980 = vmatmul.bf16.vlgmr.msra.gmra.mxu0 %v15897_v50  ;;  %v3787_v57 = vadd.f32 %v3786_v53, %v3774_v8  ;;  %v10716_v18 = vld [vmem:[%s23050_s1 + $0x980] sm:$0xf]  ;;  %v14476_v8 = vld [vmem:[%s23050_s1 + $0x8f0] sm:$0xf0] }
 0x164   :  { %4024 = vmatpush.bf16.msrb.mxu0 %v10157_v19  ;;  %3993 = vmatmul.bf16.vlgmr.msra.gmra.mxu1 %v15878_v43  ;;  %v14497_v19 = vld [vmem:[%s23050_s1 + $0x998] sm:$0xf0] }
 0x165   :  { %4037 = vmatpush.bf16.msrb.mxu1 %v10381_v24  ;;  %4006 = vmatmul.bf16.vlgmr.msra.gmra.mxu2 %v15729_v23  ;;  %v10296_v23 = vld [vmem:[%s23050_s1 + $0x638] sm:$0xf]  ;;  %v10269_v24 = vor.u32 %v14385_v15, %v10268_v13  ;;  %v11252_v13 = vld [vmem:[%s23053_s3 + $0x188] sm:$0xf] }
 0x166   :  { %4050 = vmatpush.bf16.msrb.mxu2 %v10605_v27  ;;  %4019 = vmatmul.bf16.vlgmr.msra.gmra.mxu3 %v15731_v25  ;;  %v14392_v25 = vld [vmem:[%s23050_s1 + $0x650] sm:$0xf0]  ;;  %v10493_v27 = vor.u32 %v14441_v17, %v10492_v16  ;;  %v11476_v15 = vld [vmem:[%s23053_s3 + $0x348] sm:$0xf]  ;;  %v14690_v16 = vld [vmem:[%s23053_s3 + $0x360] sm:$0xf0]  ;;  %v10185_v17 = vor.u32 %v14364_v3, %v10184_v2 }
 0x167   :  { %4063 = vmatpush.bf16.msrb.mxu3 %v10829_v32  ;;  %v10297_v9 = vor.u32 %v14392_v25, %v10296_v23  ;;  %v10717_v32 = vor.u32 %v14497_v19, %v10716_v18  ;;  %v14308_v23 = vld [vmem:[%s23050_s1 + $0x3b0] sm:$0xf0]  ;;  %v11700_v18 = vld [vmem:[%s23053_s3 + $0x508] sm:$0xf]  ;;  %v14746_v19 = vld [vmem:[%s23053_s3 + $0x520] sm:$0xf0] }
 0x168   :  { %4025 = vmatpush.bf16.msrb.mxu0 %v10129_v41  ;;  %v3799_v36 = vpop.f32.mrf.mxu2  ;;  %v3775_v41 = vpop.f32.mrf.mxu0  ;;  %v9961_v53 = vor.u32 %v14308_v23, %v9960_v0  ;;  %v11701_v33 = vor.u32 %v14746_v19, %v11700_v18  ;;  %v14669_v0 = vld [vmem:[%s23053_s3 + $0x2b8] sm:$0xf0]  ;;  %v11616_v23 = vld [vmem:[%s23053_s3 + $0x460] sm:$0xf]  ;;  %v11112_v18 = vld [vmem:[%s23053_s3 + $0x70] sm:$0xf] }
 0x169   :  { %4038 = vmatpush.bf16.msrb.mxu1 %v10353_v42  ;;  %v3812_v37 = vpop.f32.mrf.mxu3  ;;  %v3800_v42 = vadd.f32 %v3799_v36, %v3787_v57  ;;  %v3788_v54 = vpop.f32.mrf.mxu1  ;;  %v10409_v57 = vor.u32 %v14420_v28, %v10408_v4  ;;  %v14683_v36 = vld [vmem:[%s23053_s3 + $0x328] sm:$0xf0]  ;;  %v10940_v28 = vld [vmem:[%s23050_s1 + $0xb40] sm:$0xf] }
 0x16a   :  { %4051 = vmatpush.bf16.msrb.mxu2 %v10577_v44  ;;  %v10017_v44 = vor.u32 %v14322_v30, %v10016_v29  ;;  %v11477_v29 = vor.u32 %v14690_v16, %v11476_v15  ;;  %v11024_v30 = vld [vmem:[%s23050_s1 + $0xbe8] sm:$0xf]  ;;  %v14676_v54 = vld [vmem:[%s23053_s3 + $0x2f0] sm:$0xf0] }
 0x16b   :  { %4064 = vmatpush.bf16.msrb.mxu3 %v10801_v48  ;;  %v14315_v48 = vld [vmem:[%s23050_s1 + $0x3e8] sm:$0xf0]  ;;  %v17801_v52 = vadd.f32 %v3812_v37, %v3800_v42  ;;  %v11672_v37 = vld [vmem:[%s23053_s3 + $0x4d0] sm:$0xf]  ;;  %v11025_v39 = vor.u32 %v14574_v31, %v11024_v30  ;;  %v11449_v42 = vor.u32 %v14683_v36, %v11448_v35 }
 0x16c   :  { %4026 = vmatpush.bf16.msrb.mxu0 %v10101_v60  ;;  %v14427_v60 = vld [vmem:[%s23050_s1 + $0x768] sm:$0xf0]  ;;  %v9989_v63 = vor.u32 %v14315_v48, %v9988_v47  ;;  %v11673_v47 = vor.u32 %v14739_v38, %v11672_v37  ;;  %v14620_v48 = vld [vmem:[%s23053_s3 + $0x130] sm:$0xf0]  ;;  %v11560_v30 = vld [vmem:[%s23053_s3 + $0x3f0] sm:$0xf] }
 0x16d   :  { %4039 = vmatpush.bf16.msrb.mxu1 %v10325_v61  ;;  %v10660_v61 = vld [vmem:[%s23050_s1 + $0x910] sm:$0xf]  ;;  %v10437_v25 = vor.u32 %v14427_v60, %v10436_v59  ;;  %v14711_v31 = vld [vmem:[%s23053_s3 + $0x408] sm:$0xf0] }
 0x16e   :  { %4052 = vmatpush.bf16.msrb.mxu2 %v10549_v62  ;;  %v14483_v62 = vld [vmem:[%s23050_s1 + $0x928] sm:$0xf0] }
 0x16f   :  { %4065 = vmatpush.bf16.msrb.mxu3 %v10773_v1  ;;  %v10213_v1 = vor.u32 %v14371_v58, %v10212_v51  ;;  %v10661_v5 = vor.u32 %v14483_v62, %v10660_v61  ;;  %v11420_v51 = vld [vmem:[%s23053_s3 + $0x2d8] sm:$0xf]  ;;  %v14560_v62 = vld [vmem:[%s23050_s1 + $0xb90] sm:$0xf0] }
 0x170   :  { %4027 = vmatpush.bf16.msrb.mxu0 %v10073_v6  ;;  %v10632_v6 = vld [vmem:[%s23050_s1 + $0x8d8] sm:$0xf]  ;;  %v11421_v60 = vor.u32 %v14676_v54, %v11420_v51  ;;  %v14704_v54 = vld [vmem:[%s23053_s3 + $0x3d0] sm:$0xf0] }
 0x171   :  { %4040 = vmatpush.bf16.msrb.mxu1 %v10297_v9  ;;  %v3801_v9 = vpop.f32.mrf.mxu2  ;;  %v10968_v61 = vld [vmem:[%s23050_s1 + $0xb78] sm:$0xf] }
 0x172   :  { %4053 = vmatpush.bf16.msrb.mxu2 %v10521_v10  ;;  %v3814_v10 = vpop.f32.mrf.mxu3  ;;  %v11532_v51 = vld [vmem:[%s23053_s3 + $0x3b8] sm:$0xf] }
 0x173   :  { %4066 = vmatpush.bf16.msrb.mxu3 %v10745_v14  ;;  %v14634_v14 = vld [vmem:[%s23053_s3 + $0x1a0] sm:$0xf0] }
 0x174   :  { %4028 = vmatpush.bf16.msrb.mxu0 %v10045_v21  ;;  %v10633_v21 = vor.u32 %v14476_v8, %v10632_v6  ;;  %v14553_v6 = vld [vmem:[%s23050_s1 + $0xb58] sm:$0xf0]  ;;  %v11140_v8 = vld [vmem:[%s23053_s3 + $0xa8] sm:$0xf]  ;;  %v14606_v10 = vld [vmem:[%s23053_s3 + $0xc0] sm:$0xf0] }
 0x175   :  { %4041 = vmatpush.bf16.msrb.mxu1 %v10269_v24  ;;  %v11053_v24 = vor.u32 %v14581_v12, %v11052_v11  ;;  %v11364_v11 = vld [vmem:[%s23053_s3 + $0x268] sm:$0xf]  ;;  %v14662_v12 = vld [vmem:[%s23053_s3 + $0x280] sm:$0xf0]  ;;  %v11141_v15 = vor.u32 %v14606_v10, %v11140_v8 }
 0x176   :  { %4054 = vmatpush.bf16.msrb.mxu2 %v10493_v27  ;;  %v11253_v27 = vor.u32 %v14634_v14, %v11252_v13  ;;  %v11588_v13 = vld [vmem:[%s23053_s3 + $0x428] sm:$0xf]  ;;  %v10941_v14 = vor.u32 %v14553_v6, %v10940_v28  ;;  %v11365_v16 = vor.u32 %v14662_v12, %v11364_v11 }
 0x177   :  { %4067 = vmatpush.bf16.msrb.mxu3 %v10717_v32  ;;  %v11224_v32 = vld [vmem:[%s23053_s3 + $0x150] sm:$0xf]  ;;  %v12148_v8 = vld [vmem:[%s23053_s3 + $0x888] sm:$0xf] }
 0x178   :  { %4029 = vmatpush.bf16.msrb.mxu0 %v10017_v44  ;;  %v11225_v41 = vor.u32 %v14627_v34, %v11224_v32  ;;  %v10996_v44 = vld [vmem:[%s23050_s1 + $0xbb0] sm:$0xf] }
 0x179   :  { %4042 = vmatpush.bf16.msrb.mxu1 %v10241_v45  ;;  %v14567_v45 = vld [vmem:[%s23050_s1 + $0xbc8] sm:$0xf0] }
 0x17a   :  { %4055 = vmatpush.bf16.msrb.mxu2 %v10465_v46  ;;  %v11196_v46 = vld [vmem:[%s23053_s3 + $0x118] sm:$0xf]  ;;  %v10997_v58 = vor.u32 %v14567_v45, %v10996_v44  ;;  %v11561_v44 = vor.u32 %v14711_v31, %v11560_v30  ;;  %v14592_v45 = vld [vmem:[%s23053_s3 + $0x50] sm:$0xf0]  ;;  %v14907_v30 = vld [vmem:[%s23053_s3 + $0xa28] sm:$0xf0] }
 0x17b   :  { %4068 = vmatpush.bf16.msrb.mxu3 %v10689_v55  ;;  %v11644_v55 = vld [vmem:[%s23053_s3 + $0x498] sm:$0xf]  ;;  %v11197_v59 = vor.u32 %v14620_v48, %v11196_v46  ;;  %v4090_v48 = vmul.f32 0.2, %v17160_v20 }
 0x17c   :  { %4030 = vmatpush.bf16.msrb.mxu0 %v9989_v63  ;;  %v11392_v63 = vld [vmem:[%s23053_s3 + $0x2a0] sm:$0xf]  ;;  %v11308_v46 = vld [vmem:[%s23053_s3 + $0x1f8] sm:$0xf] }
 0x17d   :  { %4043 = vmatpush.bf16.msrb.mxu1 %v10213_v1  ;;  %v14725_v1 = vld [vmem:[%s23053_s3 + $0x478] sm:$0xf0] }
 0x17e   :  { %4056 = vmatpush.bf16.msrb.mxu2 %v10437_v25  ;;  %v10969_v25 = vor.u32 %v14560_v62, %v10968_v61  ;;  %v11617_v9 = vor.u32 %v14725_v1, %v11616_v23  ;;  %v14532_v62 = vld [vmem:[%s23050_s1 + $0xab0] sm:$0xf0]  ;;  %v11504_v23 = vld [vmem:[%s23053_s3 + $0x380] sm:$0xf]  ;;  %v14697_v1 = vld [vmem:[%s23053_s3 + $0x398] sm:$0xf0] }
 0x17f   :  { %4069 = vmatpush.bf16.msrb.mxu3 %v10661_v5  ;;  %v11393_v5 = vor.u32 %v14669_v0, %v11392_v63  ;;  %v11280_v63 = vld [vmem:[%s23053_s3 + $0x1c0] sm:$0xf]  ;;  %v14641_v0 = vld [vmem:[%s23053_s3 + $0x1d8] sm:$0xf0] }
 0x180   :  { %4031 = vmatpush.bf16.msrb.mxu0 %v9961_v53  ;;  %v17942_v2 = vpop.f32.mrf.mxu0  ;;  %v14718_v53 = vld [vmem:[%s23053_s3 + $0x440] sm:$0xf0]  ;;  %v11281_v11 = vor.u32 %v14641_v0, %v11280_v63  ;;  %v12260_v63 = vld [vmem:[%s23053_s3 + $0x968] sm:$0xf] }
 0x181   :  { %4044 = vmatpush.bf16.msrb.mxu1 %v10185_v17  ;;  %v17944_v3 = vpop.f32.mrf.mxu1  ;;  %v10912_v17 = vld [vmem:[%s23050_s1 + $0xb08] sm:$0xf]  ;;  %v14886_v0 = vld [vmem:[%s23053_s3 + $0x980] sm:$0xf0] }
 0x182   :  { %4057 = vmatpush.bf16.msrb.mxu2 %v10409_v57  ;;  %v14546_v57 = vld [vmem:[%s23050_s1 + $0xb20] sm:$0xf0] }
 0x183   :  { %4070 = vmatpush.bf16.msrb.mxu3 %v10633_v21  ;;  %4032 = vmatmul.bf16.vlgmr.msrb.gmra.mxu0 %v15727_v22  ;;  %v14732_v22 = vld [vmem:[%s23053_s3 + $0x4b0] sm:$0xf0]  ;;  %v11589_v21 = vor.u32 %v14718_v53, %v11588_v13  ;;  %v10913_v34 = vor.u32 %v14546_v57, %v10912_v17  ;;  %v4097_v13 = vmax.f32 %v17160_v20, %v4090_v48  ;;  %v14795_v20 = vld [vmem:[%s23053_s3 + $0x6a8] sm:$0xf0] }
 0x184   :  { %4076 = vmatpush.bf16.msra.mxu0 %v11053_v24  ;;  %4045 = vmatmul.bf16.vlgmr.msrb.gmra.mxu1 %v15733_v26  ;;  %v11168_v26 = vld [vmem:[%s23053_s3 + $0xe0] sm:$0xf]  ;;  %v14599_v24 = vld [vmem:[%s23053_s3 + $0x88] sm:$0xf0]  ;;  %v11505_v53 = vor.u32 %v14697_v1, %v11504_v23 }
 0x185   :  { %6141 = vmatpush.bf16.msra.mxu1 %v11253_v27  ;;  %4058 = vmatmul.bf16.vlgmr.msrb.gmra.mxu2 %v15895_v49  ;;  %v11645_v49 = vor.u32 %v14732_v22, %v11644_v55  ;;  %v11336_v27 = vld [vmem:[%s23053_s3 + $0x230] sm:$0xf]  ;;  %v11113_v37 = vor.u32 %v14599_v24, %v11112_v18  ;;  %v4091_v55 = vmul.f32 0.2, %v17540_v7 }
 0x186   :  { %6154 = vmatpush.bf16.msra.mxu2 %v11477_v29  ;;  %4071 = vmatmul.bf16.vlgmr.msrb.gmra.mxu3 %v15897_v50  ;;  %v14613_v50 = vld [vmem:[%s23053_s3 + $0xf8] sm:$0xf0]  ;;  %v14655_v29 = vld [vmem:[%s23053_s3 + $0x248] sm:$0xf0]  ;;  %v12120_v18 = vld [vmem:[%s23053_s3 + $0x850] sm:$0xf] }
 0x187   :  { %6167 = vmatpush.bf16.msra.mxu3 %v11701_v33  ;;  %v11169_v4 = vor.u32 %v14613_v50, %v11168_v26  ;;  %v4089_v33 = vmul.f32 0.2, %v16777_v40  ;;  %v11337_v38 = vor.u32 %v14655_v29, %v11336_v27  ;;  %v11056_v26 = vld [vmem:[%s23053_s3] sm:$0xf]  ;;  %v11533_v50 = vor.u32 %v14704_v54, %v11532_v51 }
 0x188   :  { %4077 = vmatpush.bf16.msra.mxu0 %v11025_v39  ;;  %v17979_v19 = vpop.f32.mrf.mxu2  ;;  %v3827_v35 = vpop.f32.mrf.mxu0  ;;  %v10884_v39 = vld [vmem:[%s23050_s1 + $0xad0] sm:$0xf]  ;;  %v18087_v27 = vpack.c.bf16 %v4097_v13, %v4097_v13 }
 0x189   :  { %6142 = vmatpush.bf16.msra.mxu1 %v11225_v41  ;;  %v17996_v32 = vpop.f32.mrf.mxu3  ;;  %v3840_v36 = vpop.f32.mrf.mxu1  ;;  %v14539_v41 = vld [vmem:[%s23050_s1 + $0xae8] sm:$0xf0]  ;;  %v4096_v12 = vmax.f32 %v16777_v40, %v4089_v33  ;;  %v11896_v40 = vld [vmem:[%s23053_s3 + $0x690] sm:$0xf]  ;;  %v14788_v35 = vld [vmem:[%s23053_s3 + $0x670] sm:$0xf0] }
 0x18a   :  { %6155 = vmatpush.bf16.msra.mxu2 %v11449_v42  ;;  %v11084_v42 = vld [vmem:[%s23053_s3 + $0x38] sm:$0xf]  ;;  %v10885_v22 = vor.u32 %v14539_v41, %v10884_v39  ;;  %v11897_v29 = vor.u32 %v14795_v20, %v11896_v40  ;;  %v4092_v20 = vmul.f32 0.2, %v17801_v52 }
 0x18b   :  { %6168 = vmatpush.bf16.msra.mxu3 %v11673_v47  ;;  %v14648_v47 = vld [vmem:[%s23053_s3 + $0x210] sm:$0xf0]  ;;  %v18085_v24 = vpack.c.bf16 %v4096_v12, %v4096_v12  ;;  %v12316_v41 = vld [vmem:[%s23053_s3 + $0x9d8] sm:$0xf]  ;;  %v14879_v12 = vld [vmem:[%s23053_s3 + $0x948] sm:$0xf0] }
 0x18c   :  { %4078 = vmatpush.bf16.msra.mxu0 %v10997_v58  ;;  %v1401_v58 = vperm.slane %v17623_v56, 4  ;;  %v11309_v61 = vor.u32 %v14648_v47, %v11308_v46  ;;  %v14585_v56 = vld [vmem:[%s23053_s3 + $0x18] sm:$0xf0]  ;;  %v12064_v46 = vld [vmem:[%s23053_s3 + $0x7e0] sm:$0xf] }
 0x18d   :  { %6143 = vmatpush.bf16.msra.mxu1 %v11197_v59  ;;  %v10856_v59 = vld [vmem:[%s23050_s1 + $0xa98] sm:$0xf]  ;;  %v11057_v10 = vor.u32 %v14585_v56, %v11056_v26  ;;  %v14837_v47 = vld [vmem:[%s23053_s3 + $0x7f8] sm:$0xf0]  ;;  %v12036_v26 = vld [vmem:[%s23053_s3 + $0x7a8] sm:$0xf] }
 0x18e   :  { %6156 = vmatpush.bf16.msra.mxu2 %v11421_v60  ;;  %v11085_v60 = vor.u32 %v14592_v45, %v11084_v42  ;;  %v3826_v28 = vadd.f32 %v17942_v2, %v1401_v58  ;;  %v10857_v6 = vor.u32 %v14532_v62, %v10856_v59  ;;  %v14781_v45 = vld [vmem:[%s23053_s3 + $0x638] sm:$0xf0]  ;;  %v12288_v58 = vld [vmem:[%s23053_s3 + $0x9a0] sm:$0xf]  ;;  %v14830_v56 = vld [vmem:[%s23053_s3 + $0x7c0] sm:$0xf0] }
 0x18f   :  { %6169 = vmatpush.bf16.msra.mxu3 %v11645_v49  ;;  %v14893_v59 = vld [vmem:[%s23053_s3 + $0x9b8] sm:$0xf0]  ;;  %v12037_v23 = vor.u32 %v14830_v56, %v12036_v26  ;;  %v14736_v56 = vld [vmem:[%s23053_s3 + $0x4d4] sm:$0xf] }
 0x190   :  { %4079 = vmatpush.bf16.msra.mxu0 %v10969_v25  ;;  %v3853_v49 = vpop.f32.mrf.mxu2  ;;  %v11924_v25 = vld [vmem:[%s23053_s3 + $0x6c8] sm:$0xf]  ;;  %v3839_v57 = vadd.f32 %v17944_v3, %v3826_v28  ;;  %v12344_v3 = vld [vmem:[%s23053_s3 + $0xa10] sm:$0xf] }
 0x191   :  { %6144 = vmatpush.bf16.msra.mxu1 %v11169_v4  ;;  %v14802_v4 = vld [vmem:[%s23053_s3 + $0x6e0] sm:$0xf0]  ;;  %v12289_v49 = vor.u32 %v14893_v59, %v12288_v58  ;;  %v12008_v28 = vld [vmem:[%s23053_s3 + $0x770] sm:$0xf]  ;;  %v14680_v59 = vld [vmem:[%s23053_s3 + $0x314] sm:$0xf] }
 0x192   :  { %6157 = vmatpush.bf16.msra.mxu2 %v11393_v5  ;;  %v3866_v5 = vpop.f32.mrf.mxu3  ;;  %v11925_v2 = vor.u32 %v14802_v4, %v11924_v25  ;;  %v3852_v36 = vadd.f32 %v17979_v19, %v3839_v57  ;;  %v14900_v19 = vld [vmem:[%s23053_s3 + $0x9f0] sm:$0xf0]  ;;  %v11784_v25 = vld [vmem:[%s23053_s3 + $0x5b0] sm:$0xf]  ;;  %v14767_v4 = vld [vmem:[%s23053_s3 + $0x5c8] sm:$0xf0] }
 0x193   :  { %6170 = vmatpush.bf16.msra.mxu3 %v11617_v9  ;;  %v14858_v9 = vld [vmem:[%s23053_s3 + $0x8a0] sm:$0xf0]  ;;  %v12317_v51 = vor.u32 %v14900_v19, %v12316_v41 }
 0x194   :  { %4080 = vmatpush.bf16.msra.mxu0 %v10941_v14  ;;  %v12372_v14 = vld [vmem:[%s23053_s3 + $0xa48] sm:$0xf]  ;;  %v12149_v17 = vor.u32 %v14858_v9, %v12148_v8  ;;  %v3865_v48 = vadd.f32 %v17996_v32, %v3852_v36  ;;  %v12261_v8 = vor.u32 %v14886_v0, %v12260_v63  ;;  %v11785_v9 = vor.u32 %v14767_v4, %v11784_v25  ;;  %v14617_v0 = vld [vmem:[%s23053_s3 + $0x11c] sm:$0xf]  ;;  %v11422_v25 = vld [vmem:[%s23053_s3 + $0x2f4] sm:$0xf0] }
 0x195   :  { %6145 = vmatpush.bf16.msra.mxu1 %v11141_v15  ;;  %v14914_v15 = vld [vmem:[%s23053_s3 + $0xa60] sm:$0xf0]  ;;  %v11812_v32 = vld [vmem:[%s23053_s3 + $0x5e8] sm:$0xf] }
 0x196   :  { %6158 = vmatpush.bf16.msra.mxu2 %v11365_v16  ;;  %v4098_v16 = vmax.f32 %v17540_v7, %v4091_v55  ;;  %v14851_v7 = vld [vmem:[%s23053_s3 + $0x868] sm:$0xf0] }
 0x197   :  { %6171 = vmatpush.bf16.msra.mxu3 %v11589_v21  ;;  %v12373_v21 = vor.u32 %v14914_v15, %v12372_v14  ;;  %v12121_v33 = vor.u32 %v14851_v7, %v12120_v18  ;;  %v14760_v14 = vld [vmem:[%s23053_s3 + $0x590] sm:$0xf0]  ;;  %v11728_v7 = vld [vmem:[%s23053_s3 + $0x540] sm:$0xf] }
 0x198   :  { %4081 = vmatpush.bf16.msra.mxu0 %v10913_v34  ;;  %v18095_v31 = vpack.c.bf16 %v4098_v16, %v4098_v16  ;;  %v11868_v34 = vld [vmem:[%s23053_s3 + $0x658] sm:$0xf] }
 0x199   :  { %6146 = vmatpush.bf16.msra.mxu1 %v11113_v37  ;;  %v12092_v37 = vld [vmem:[%s23053_s3 + $0x818] sm:$0xf]  ;;  %v11869_v39 = vor.u32 %v14788_v35, %v11868_v34  ;;  %v14809_v34 = vld [vmem:[%s23053_s3 + $0x718] sm:$0xf0] }
 0x19a   :  { %6159 = vmatpush.bf16.msra.mxu2 %v11337_v38  ;;  %v12345_v38 = vor.u32 %v14907_v30, %v12344_v3  ;;  %v11980_v16 = vld [vmem:[%s23053_s3 + $0x738] sm:$0xf]  ;;  %v14753_v30 = vld [vmem:[%s23053_s3 + $0x558] sm:$0xf0] }
 0x19b   :  { %6172 = vmatpush.bf16.msra.mxu3 %v11561_v44  ;;  %v11840_v44 = vld [vmem:[%s23053_s3 + $0x620] sm:$0xf]  ;;  %v11729_v19 = vor.u32 %v14753_v30, %v11728_v7  ;;  %v11366_v7 = vld [vmem:[%s23053_s3 + $0x284] sm:$0xf0] }
 0x19c   :  { %4082 = vmatpush.bf16.msra.mxu0 %v10885_v22  ;;  %v11841_v54 = vor.u32 %v14781_v45, %v11840_v44  ;;  %v14865_v44 = vld [vmem:[%s23053_s3 + $0x8d8] sm:$0xf0]  ;;  %v4099_v45 = vmax.f32 %v17801_v52, %v4092_v20  ;;  %v11226_v52 = vld [vmem:[%s23053_s3 + $0x16c] sm:$0xf0]  ;;  %v11142_v20 = vld [vmem:[%s23053_s3 + $0xc4] sm:$0xf0] }
 0x19d   :  { %6147 = vmatpush.bf16.msra.mxu1 %v11085_v60  ;;  %v12065_v60 = vor.u32 %v14837_v47, %v12064_v46  ;;  %v11590_v30 = vld [vmem:[%s23053_s3 + $0x444] sm:$0xf0] }
 0x19e   :  { %6160 = vmatpush.bf16.msra.mxu2 %v11309_v61  ;;  %v14774_v61 = vld [vmem:[%s23053_s3 + $0x600] sm:$0xf0] }
 0x19f   :  { %6173 = vmatpush.bf16.msra.mxu3 %v11533_v50  ;;  %v11813_v50 = vor.u32 %v14774_v61, %v11812_v32 }
 0x1a0   :  { %4083 = vmatpush.bf16.msra.mxu0 %v10857_v6  ;;  %v3877_v55 = vpop.f32.mrf.mxu0  ;;  %v14823_v6 = vld [vmem:[%s23053_s3 + $0x788] sm:$0xf0] }
 0x1a1   :  { %6148 = vmatpush.bf16.msra.mxu1 %v11057_v10  ;;  %v3890_v22 = vpop.f32.mrf.mxu1  ;;  %v3878_v62 = vadd.f32 %v3877_v55, %v3865_v48  ;;  %v14743_v48 = vld [vmem:[%s23053_s3 + $0x50c] sm:$0xf] }
 0x1a2   :  { %6161 = vmatpush.bf16.msra.mxu2 %v11281_v11  ;;  %v12232_v11 = vld [vmem:[%s23053_s3 + $0x930] sm:$0xf] }
 0x1a3   :  { %6174 = vmatpush.bf16.msra.mxu3 %v11505_v53  ;;  %4084 = vmatmul.bf16.vlgmr.msra.gmra.mxu0 %v15878_v43  ;;  %v14844_v43 = vld [vmem:[%s23053_s3 + $0x830] sm:$0xf0]  ;;  %v3891_v5 = vadd.f32 %v3890_v22, %v3878_v62  ;;  %v12009_v53 = vor.u32 %v14823_v6, %v12008_v28  ;;  %v12233_v57 = vor.u32 %v14879_v12, %v12232_v11  ;;  %v14729_v28 = vld [vmem:[%s23053_s3 + $0x49c] sm:$0xf]  ;;  %v11646_v6 = vld [vmem:[%s23053_s3 + $0x4b4] sm:$0xf0] }
 0x1a4   :  { %6180 = vmatpush.bf16.msrb.mxu0 %v11925_v2  ;;  %6149 = vmatmul.bf16.vlgmr.msra.gmra.mxu1 %v18085_v24  ;;  %v12093_v42 = vor.u32 %v14844_v43, %v12092_v37  ;;  %v11756_v2 = vld [vmem:[%s23053_s3 + $0x578] sm:$0xf]  ;;  %v14631_v37 = vld [vmem:[%s23053_s3 + $0x18c] sm:$0xf]  ;;  %v11254_v43 = vld [vmem:[%s23053_s3 + $0x1a4] sm:$0xf0]  ;;  %v18245_v62 = vpack.c.bf16 %v4099_v45, %v4099_v45 }
 0x1a5   :  { %6193 = vmatpush.bf16.msrb.mxu1 %v12149_v17  ;;  %6162 = vmatmul.bf16.vlgmr.msra.gmra.mxu2 %v18087_v27  ;;  %v14816_v17 = vld [vmem:[%s23053_s3 + $0x750] sm:$0xf0]  ;;  %v11757_v18 = vor.u32 %v14760_v14, %v11756_v2  ;;  %v11257_v47 = vor.u32 %v14631_v37, %v11254_v43  ;;  %v14666_v11 = vld [vmem:[%s23053_s3 + $0x2a4] sm:$0xf]  ;;  %v11394_v12 = vld [vmem:[%s23053_s3 + $0x2bc] sm:$0xf0] }
 0x1a6   :  { %6175 = vmatmul.bf16.vlgmr.msra.gmra.mxu3 %v18095_v31  ;;  %6206 = vmatpush.bf16.msrb.mxu2 %v12373_v21  ;;  %v12204_v21 = vld [vmem:[%s23053_s3 + $0x8f8] sm:$0xf]  ;;  %v11981_v3 = vor.u32 %v14816_v17, %v11980_v16  ;;  %v14624_v22 = vld [vmem:[%s23053_s3 + $0x154] sm:$0xf]  ;;  %v14722_v14 = vld [vmem:[%s23053_s3 + $0x464] sm:$0xf]  ;;  %v11397_v16 = vor.u32 %v14666_v11, %v11394_v12 }
 0x1a7   :  { %v11229_v26 = vor.u32 %v14624_v22, %v11226_v52  ;;  %v14603_v17 = vld [vmem:[%s23053_s3 + $0xac] sm:$0xf]  ;;  %v11338_v37 = vld [vmem:[%s23053_s3 + $0x24c] sm:$0xf0]  ;;  %v18330_v43 = vld [vmem:[%s23052_s2] sm:$0xff] }
 0x1a8   :  { %6181 = vmatpush.bf16.msrb.mxu0 %v11897_v29  ;;  %v3903_v1 = vpop.f32.mrf.mxu2  ;;  %v3879_v10 = vpop.f32.mrf.mxu0  ;;  %v14872_v29 = vld [vmem:[%s23053_s3 + $0x910] sm:$0xf0]  ;;  %v11086_v22 = vld [vmem:[%s23053_s3 + $0x54] sm:$0xf0]  ;;  %v14645_v52 = vld [vmem:[%s23053_s3 + $0x1fc] sm:$0xf] }
 0x1a9   :  { %6194 = vmatpush.bf16.msrb.mxu1 %v12121_v33  ;;  %v3892_v13 = vpop.f32.mrf.mxu1  ;;  %v3904_v15 = vadd.f32 %v3903_v1, %v3891_v5  ;;  %v18187_v40 = vpop.f32.mrf.mxu3  ;;  %v11952_v33 = vld [vmem:[%s23053_s3 + $0x700] sm:$0xf]  ;;  %v12205_v41 = vor.u32 %v14872_v29, %v12204_v21  ;;  %v14673_v1 = vld [vmem:[%s23053_s3 + $0x2dc] sm:$0xf]  ;;  %v11145_v29 = vor.u32 %v14603_v17, %v11142_v20  ;;  %v12374_v11 = vld [vmem:[%s23053_s3 + $0xa64] sm:$0xf0] }
 0x1aa   :  { %6207 = vmatpush.bf16.msrb.mxu2 %v12345_v38  ;;  %v14687_v38 = vld [vmem:[%s23053_s3 + $0x34c] sm:$0xf]  ;;  %v11953_v46 = vor.u32 %v14809_v34, %v11952_v33  ;;  %v11170_v10 = vld [vmem:[%s23053_s3 + $0xfc] sm:$0xf0]  ;;  %v11649_v13 = vor.u32 %v14729_v28, %v11646_v6  ;;  %v14596_v34 = vld [vmem:[%s23053_s3 + $0x74] sm:$0xf] }
 0x1ab   :  { %v4093_v36 = vmul.f32 0.2, %v3904_v15  ;;  %v12150_v28 = vld [vmem:[%s23053_s3 + $0x8a4] sm:$0xf0]  ;;  %v12540_v6 = vld [vmem:[%s23053_s3 + $0xb98] sm:$0xf] }
 0x1ac   :  { %6182 = vmatpush.bf16.msrb.mxu0 %v11869_v39  ;;  %v11478_v39 = vld [vmem:[%s23053_s3 + $0x364] sm:$0xf0] }
 0x1ad   :  { %6195 = vmatpush.bf16.msrb.mxu1 %v12093_v42  ;;  %v12176_v42 = vld [vmem:[%s23053_s3 + $0x8c0] sm:$0xf]  ;;  %v11481_v55 = vor.u32 %v14687_v38, %v11478_v39  ;;  %v1402_v38 = vperm.slane %v18330_v43, 5 }
 0x1ae   :  { %6208 = vmatpush.bf16.msrb.mxu2 %v12317_v51  ;;  %v11702_v51 = vld [vmem:[%s23053_s3 + $0x524] sm:$0xf0]  ;;  %v12177_v32 = vor.u32 %v14865_v44, %v12176_v42  ;;  %v14970_v42 = vld [vmem:[%s23053_s3 + $0xc20] sm:$0xf0] }
 0x1af   :  { %v11705_v61 = vor.u32 %v14743_v48, %v11702_v51  ;;  %v11562_v48 = vld [vmem:[%s23053_s3 + $0x40c] sm:$0xf0] }
 0x1b0   :  { %6183 = vmatpush.bf16.msrb.mxu0 %v11841_v54  ;;  %v3905_v35 = vpop.f32.mrf.mxu2  ;;  %v4100_v54 = vmax.f32 %v3904_v15, %v4093_v36  ;;  %v11618_v15 = vld [vmem:[%s23053_s3 + $0x47c] sm:$0xf0]  ;;  %v14652_v36 = vld [vmem:[%s23053_s3 + $0x234] sm:$0xf] }
 0x1b1   :  { %6196 = vmatpush.bf16.msrb.mxu1 %v12065_v60  ;;  %v3918_v58 = vpop.f32.mrf.mxu3  ;;  %v11450_v60 = vld [vmem:[%s23053_s3 + $0x32c] sm:$0xf0]  ;;  %v11621_v21 = vor.u32 %v14722_v14, %v11618_v15  ;;  %v14694_v15 = vld [vmem:[%s23053_s3 + $0x384] sm:$0xf] }
 0x1b2   :  { %6209 = vmatpush.bf16.msrb.mxu2 %v12289_v49  ;;  %v11674_v49 = vld [vmem:[%s23053_s3 + $0x4ec] sm:$0xf0]  ;;  %v11453_v63 = vor.u32 %v14680_v59, %v11450_v60  ;;  %v11310_v59 = vld [vmem:[%s23053_s3 + $0x214] sm:$0xf0] }
 0x1b3   :  { %v11677_v4 = vor.u32 %v14736_v56, %v11674_v49  ;;  %v11114_v35 = vld [vmem:[%s23053_s3 + $0x8c] sm:$0xf0] }
 0x1b4   :  { %6184 = vmatpush.bf16.msrb.mxu0 %v11813_v50  ;;  %v18253_v50 = vpack.c.bf16 %v4100_v54, %v4100_v54  ;;  %v11117_v44 = vor.u32 %v14596_v34, %v11114_v35  ;;  %v11341_v54 = vor.u32 %v14652_v36, %v11338_v37  ;;  %v12568_v60 = vld [vmem:[%s23053_s3 + $0xbd0] sm:$0xf]  ;;  %v12512_v34 = vld [vmem:[%s23053_s3 + $0xb60] sm:$0xf]  ;;  %v14949_v35 = vld [vmem:[%s23053_s3 + $0xb78] sm:$0xf0] }
 0x1b5   :  { %6197 = vmatpush.bf16.msrb.mxu1 %v12037_v23  ;;  %v11198_v23 = vld [vmem:[%s23053_s3 + $0x134] sm:$0xf0]  ;;  %v12513_v36 = vor.u32 %v14949_v35, %v12512_v34  ;;  %v14869_v34 = vld [vmem:[%s23053_s3 + $0x8fc] sm:$0xf] }
 0x1b6   :  { %6210 = vmatpush.bf16.msrb.mxu2 %v12261_v8  ;;  %v11201_v5 = vor.u32 %v14617_v0, %v11198_v23  ;;  %v11425_v8 = vor.u32 %v14673_v1, %v11422_v25  ;;  %v11058_v0 = vld [vmem:[%s23053_s3 + $0x1c] sm:$0xf0]  ;;  %v14701_v23 = vld [vmem:[%s23053_s3 + $0x3bc] sm:$0xf]  ;;  %v11313_v1 = vor.u32 %v14645_v52, %v11310_v59  ;;  %v14638_v25 = vld [vmem:[%s23053_s3 + $0x1c4] sm:$0xf] }
 0x1b7   :  { %v12456_v59 = vld [vmem:[%s23053_s3 + $0xaf0] sm:$0xf] }
 0x1b8   :  { %6185 = vmatpush.bf16.msrb.mxu0 %v11785_v9  ;;  %v14610_v9 = vld [vmem:[%s23053_s3 + $0xe4] sm:$0xf] }
 0x1b9   :  { %6198 = vmatpush.bf16.msrb.mxu1 %v12009_v53  ;;  %v11173_v53 = vor.u32 %v14610_v9, %v11170_v10  ;;  %v14911_v10 = vld [vmem:[%s23053_s3 + $0xa4c] sm:$0xf] }
 0x1ba   :  { %6211 = vmatpush.bf16.msrb.mxu2 %v12233_v57 }
 0x1bc   :  { %6186 = vmatpush.bf16.msrb.mxu0 %v11757_v18  ;;  %v14659_v18 = vld [vmem:[%s23053_s3 + $0x26c] sm:$0xf] }
 0x1bd   :  { %6199 = vmatpush.bf16.msrb.mxu1 %v11981_v3  ;;  %v14715_v3 = vld [vmem:[%s23053_s3 + $0x42c] sm:$0xf]  ;;  %v11369_v33 = vor.u32 %v14659_v18, %v11366_v7  ;;  %v12377_v18 = vor.u32 %v14911_v10, %v12374_v11  ;;  %v14848_v7 = vld [vmem:[%s23053_s3 + $0x854] sm:$0xf]  ;;  %v12234_v11 = vld [vmem:[%s23053_s3 + $0x94c] sm:$0xf0] }
 0x1be   :  { %6212 = vmatpush.bf16.msrb.mxu2 %v12205_v41  ;;  %v11593_v41 = vor.u32 %v14715_v3, %v11590_v30  ;;  %v12346_v30 = vld [vmem:[%s23053_s3 + $0xa2c] sm:$0xf0] }
 0x1c0   :  { %6187 = vmatpush.bf16.msrb.mxu0 %v11729_v19  ;;  %v18287_v2 = vpop.f32.mrf.mxu0  ;;  %v12596_v19 = vld [vmem:[%s23053_s3 + $0xc08] sm:$0xf] }
 0x1c1   :  { %6200 = vmatpush.bf16.msrb.mxu1 %v11953_v46  ;;  %v18301_v57 = vpop.f32.mrf.mxu1  ;;  %v12597_v51 = vor.u32 %v14970_v42, %v12596_v19  ;;  %v14897_v19 = vld [vmem:[%s23053_s3 + $0x9dc] sm:$0xf] }
 0x1c2   :  { %6213 = vmatpush.bf16.msrb.mxu2 %v12177_v32  ;;  %v14963_v32 = vld [vmem:[%s23053_s3 + $0xbe8] sm:$0xf0] }
 0x1c3   :  { %6188 = vmatmul.bf16.vlgmr.msrb.gmra.mxu0 %v18245_v62  ;;  %6219 = vmatpush.bf16.msrb.mxu3 %v12597_v51  ;;  %v12569_v49 = vor.u32 %v14963_v32, %v12568_v60  ;;  %v14935_v60 = vld [vmem:[%s23053_s3 + $0xb08] sm:$0xf0] }
 0x1c4   :  { %6232 = vmatpush.bf16.msra.mxu0 %v11257_v47  ;;  %6201 = vmatmul.bf16.vlgmr.msrb.gmra.mxu1 %v18253_v50  ;;  %v14708_v47 = vld [vmem:[%s23053_s3 + $0x3f4] sm:$0xf]  ;;  %v12457_v32 = vor.u32 %v14935_v60, %v12456_v59  ;;  %v11708_v59 = vld [vmem:[%s23053_s3 + $0x510] sm:$0xf]  ;;  %v14747_v60 = vld [vmem:[%s23053_s3 + $0x528] sm:$0xf0] }
 0x1c5   :  { %6245 = vmatpush.bf16.msra.mxu1 %v11481_v55  ;;  %v14589_v55 = vld [vmem:[%s23053_s3 + $0x3c] sm:$0xf]  ;;  %v11565_v56 = vor.u32 %v14708_v47, %v11562_v48  ;;  %v14942_v47 = vld [vmem:[%s23053_s3 + $0xb40] sm:$0xf0] }
 0x1c6   :  { %6258 = vmatpush.bf16.msra.mxu2 %v11705_v61  ;;  %v3917_v61 = vadd.f32 %v18187_v40, %v1402_v38  ;;  %v11534_v40 = vld [vmem:[%s23053_s3 + $0x3d4] sm:$0xf0]  ;;  %v14841_v38 = vld [vmem:[%s23053_s3 + $0x81c] sm:$0xf] }
 0x1c7   :  { %6220 = vmatpush.bf16.msrb.mxu3 %v12569_v49  ;;  %v11537_v12 = vor.u32 %v14701_v23, %v11534_v40  ;;  %v12038_v49 = vld [vmem:[%s23053_s3 + $0x7c4] sm:$0xf0] }
 0x1c8   :  { %6233 = vmatpush.bf16.msra.mxu0 %v11229_v26  ;;  %v18333_v39 = vpop.f32.mrf.mxu2  ;;  %v3931_v45 = vpop.f32.mrf.mxu0  ;;  %v14582_v26 = vld [vmem:[%s23053_s3 + $0x4] sm:$0xf]  ;;  %v3930_v9 = vadd.f32 %v18287_v2, %v3917_v61  ;;  %v11506_v2 = vld [vmem:[%s23053_s3 + $0x39c] sm:$0xf0]  ;;  %v12262_v40 = vld [vmem:[%s23053_s3 + $0x984] sm:$0xf0] }
 0x1c9   :  { %6246 = vmatpush.bf16.msra.mxu1 %v11453_v63  ;;  %v18341_v46 = vpop.f32.mrf.mxu3  ;;  %v3944_v58 = vpop.f32.mrf.mxu1  ;;  %v11089_v63 = vor.u32 %v14589_v55, %v11086_v22  ;;  %v11061_v14 = vor.u32 %v14582_v26, %v11058_v0  ;;  %v12484_v45 = vld [vmem:[%s23053_s3 + $0xb28] sm:$0xf]  ;;  %v12066_v55 = vld [vmem:[%s23053_s3 + $0x7fc] sm:$0xf0]  ;;  %v14890_v22 = vld [vmem:[%s23053_s3 + $0x9a4] sm:$0xf] }
 0x1ca   :  { %6259 = vmatpush.bf16.msra.mxu2 %v11677_v4  ;;  %v11282_v4 = vld [vmem:[%s23053_s3 + $0x1dc] sm:$0xf0]  ;;  %v3943_v3 = vadd.f32 %v18301_v57, %v3930_v9  ;;  %v12485_v48 = vor.u32 %v14942_v47, %v12484_v45  ;;  %v14876_v9 = vld [vmem:[%s23053_s3 + $0x934] sm:$0xf]  ;;  %v14806_v47 = vld [vmem:[%s23053_s3 + $0x704] sm:$0xf] }
 0x1cb   :  { %v11285_v17 = vor.u32 %v14638_v25, %v11282_v4  ;;  %v12290_v58 = vld [vmem:[%s23053_s3 + $0x9bc] sm:$0xf0]  ;;  %v14928_v25 = vld [vmem:[%s23053_s3 + $0xad0] sm:$0xf0] }
 0x1cc   :  { %6234 = vmatpush.bf16.msra.mxu0 %v11201_v5  ;;  %v14855_v5 = vld [vmem:[%s23053_s3 + $0x88c] sm:$0xf]  ;;  %v3956_v42 = vadd.f32 %v18333_v39, %v3943_v3 }
 0x1cd   :  { %6247 = vmatpush.bf16.msra.mxu1 %v11425_v8  ;;  %v14956_v8 = vld [vmem:[%s23053_s3 + $0xbb0] sm:$0xf0]  ;;  %v12153_v20 = vor.u32 %v14855_v5, %v12150_v28 }
 0x1ce   :  { %6260 = vmatpush.bf16.msra.mxu2 %v11649_v13  ;;  %v12541_v13 = vor.u32 %v14956_v8, %v12540_v6  ;;  %v3969_v52 = vadd.f32 %v18341_v46, %v3956_v42  ;;  %v14827_v46 = vld [vmem:[%s23053_s3 + $0x7ac] sm:$0xf]  ;;  %v14820_v6 = vld [vmem:[%s23053_s3 + $0x774] sm:$0xf]  ;;  %v12010_v8 = vld [vmem:[%s23053_s3 + $0x78c] sm:$0xf0] }
 0x1cf   :  { %v12041_v28 = vor.u32 %v14827_v46, %v12038_v49  ;;  %v14792_v42 = vld [vmem:[%s23053_s3 + $0x694] sm:$0xf] }
 0x1d0   :  { %6235 = vmatpush.bf16.msra.mxu0 %v11173_v53  ;;  %v3957_v53 = vpop.f32.mrf.mxu2  ;;  %6221 = vmatpush.bf16.msrb.mxu3 %v12541_v13  ;;  %v12598_v13 = vld [vmem:[%s23053_s3 + $0xc24] sm:$0xf0] }
 0x1d1   :  { %6248 = vmatpush.bf16.msra.mxu1 %v11397_v16  ;;  %v3970_v16 = vpop.f32.mrf.mxu3 }
 0x1d2   :  { %6261 = vmatpush.bf16.msra.mxu2 %v11621_v21  ;;  %v12122_v21 = vld [vmem:[%s23053_s3 + $0x86c] sm:$0xf0]  ;;  %v14799_v16 = vld [vmem:[%s23053_s3 + $0x6cc] sm:$0xf] }
 0x1d3   :  { %v12125_v37 = vor.u32 %v14848_v7, %v12122_v21 }
 0x1d4   :  { %6236 = vmatpush.bf16.msra.mxu0 %v11145_v29  ;;  %v14904_v29 = vld [vmem:[%s23053_s3 + $0xa14] sm:$0xf]  ;;  %6222 = vmatpush.bf16.msrb.mxu3 %v12513_v36 }
 0x1d5   :  { %6249 = vmatpush.bf16.msra.mxu1 %v11369_v33  ;;  %v11509_v33 = vor.u32 %v14694_v15, %v11506_v2  ;;  %v12349_v57 = vor.u32 %v14904_v29, %v12346_v30  ;;  %v14921_v15 = vld [vmem:[%s23053_s3 + $0xa98] sm:$0xf0]  ;;  %v12237_v29 = vor.u32 %v14876_v9, %v12234_v11  ;;  %v12514_v9 = vld [vmem:[%s23053_s3 + $0xb7c] sm:$0xf0] }
 0x1d6   :  { %6262 = vmatpush.bf16.msra.mxu2 %v11593_v41  ;;  %v12094_v41 = vld [vmem:[%s23053_s3 + $0x834] sm:$0xf0]  ;;  %v14813_v30 = vld [vmem:[%s23053_s3 + $0x73c] sm:$0xf]  ;;  %v11842_v11 = vld [vmem:[%s23053_s3 + $0x63c] sm:$0xf0] }
 0x1d7   :  { %v12097_v51 = vor.u32 %v14841_v38, %v12094_v41  ;;  %v14960_v38 = vld [vmem:[%s23053_s3 + $0xbd4] sm:$0xf]  ;;  %v12570_v41 = vld [vmem:[%s23053_s3 + $0xbec] sm:$0xf0] }
 0x1d8   :  { %6237 = vmatpush.bf16.msra.mxu0 %v11117_v44  ;;  %v12318_v44 = vld [vmem:[%s23053_s3 + $0x9f4] sm:$0xf0]  ;;  %6223 = vmatpush.bf16.msrb.mxu3 %v12485_v48  ;;  %v11954_v48 = vld [vmem:[%s23053_s3 + $0x71c] sm:$0xf0] }
 0x1d9   :  { %6250 = vmatpush.bf16.msra.mxu1 %v11341_v54  ;;  %v12321_v39 = vor.u32 %v14897_v19, %v12318_v44  ;;  %v14834_v54 = vld [vmem:[%s23053_s3 + $0x7e4] sm:$0xf]  ;;  %v11898_v44 = vld [vmem:[%s23053_s3 + $0x6ac] sm:$0xf0]  ;;  %v11957_v46 = vor.u32 %v14806_v47, %v11954_v48 }
 0x1da   :  { %6263 = vmatpush.bf16.msra.mxu2 %v11565_v56  ;;  %v12069_v61 = vor.u32 %v14834_v54, %v12066_v55  ;;  %v12293_v56 = vor.u32 %v14890_v22, %v12290_v58  ;;  %v12573_v55 = vor.u32 %v14960_v38, %v12570_v41  ;;  %v12178_v22 = vld [vmem:[%s23053_s3 + $0x8dc] sm:$0xf0]  ;;  %v14691_v58 = vld [vmem:[%s23053_s3 + $0x368] sm:$0xf0]  ;;  %v11624_v38 = vld [vmem:[%s23053_s3 + $0x468] sm:$0xf] }
 0x1db   :  { %v14726_v41 = vld [vmem:[%s23053_s3 + $0x480] sm:$0xf0] }
 0x1dc   :  { %6238 = vmatpush.bf16.msra.mxu0 %v11089_v63  ;;  %v14883_v63 = vld [vmem:[%s23053_s3 + $0x96c] sm:$0xf]  ;;  %6224 = vmatpush.bf16.msrb.mxu3 %v12457_v32  ;;  %v14953_v32 = vld [vmem:[%s23053_s3 + $0xb9c] sm:$0xf] }
 0x1dd   :  { %6251 = vmatpush.bf16.msra.mxu1 %v11313_v1  ;;  %v12428_v1 = vld [vmem:[%s23053_s3 + $0xab8] sm:$0xf]  ;;  %v12265_v10 = vor.u32 %v14883_v63, %v12262_v40 }
 0x1de   :  { %6264 = vmatpush.bf16.msra.mxu2 %v11537_v12  ;;  %v12429_v4 = vor.u32 %v14928_v25, %v12428_v1  ;;  %v14967_v12 = vld [vmem:[%s23053_s3 + $0xc0c] sm:$0xf]  ;;  %v11456_v40 = vld [vmem:[%s23053_s3 + $0x318] sm:$0xf]  ;;  %v14684_v1 = vld [vmem:[%s23053_s3 + $0x330] sm:$0xf0] }
 0x1df   :  { %v12601_v3 = vor.u32 %v14967_v12, %v12598_v13  ;;  %v11457_v13 = vor.u32 %v14684_v1, %v11456_v40  ;;  %v11568_v1 = vld [vmem:[%s23053_s3 + $0x3f8] sm:$0xf] }
 0x1e0   :  { %6239 = vmatpush.bf16.msra.mxu0 %v11061_v14  ;;  %v3981_v26 = vpop.f32.mrf.mxu0  ;;  %6225 = vmatpush.bf16.msrb.mxu3 %v12429_v4  ;;  %v12400_v14 = vld [vmem:[%s23053_s3 + $0xa80] sm:$0xf]  ;;  %v11709_v4 = vor.u32 %v14747_v60, %v11708_v59  ;;  %v12430_v60 = vld [vmem:[%s23053_s3 + $0xad4] sm:$0xf0] }
 0x1e1   :  { %6252 = vmatpush.bf16.msra.mxu1 %v11285_v17  ;;  %v3982_v0 = vadd.f32 %v3981_v26, %v3969_v52  ;;  %v3994_v23 = vpop.f32.mrf.mxu1  ;;  %v12401_v2 = vor.u32 %v14921_v15, %v12400_v14  ;;  %v11926_v17 = vld [vmem:[%s23053_s3 + $0x6e4] sm:$0xf0]  ;;  %v11484_v52 = vld [vmem:[%s23053_s3 + $0x350] sm:$0xf]  ;;  %v14785_v26 = vld [vmem:[%s23053_s3 + $0x65c] sm:$0xf] }
 0x1e2   :  { %6265 = vmatpush.bf16.msra.mxu2 %v11509_v33  ;;  %v11929_v21 = vor.u32 %v14799_v16, %v11926_v17  ;;  %v11982_v33 = vld [vmem:[%s23053_s3 + $0x754] sm:$0xf0]  ;;  %v14677_v14 = vld [vmem:[%s23053_s3 + $0x2f8] sm:$0xf0]  ;;  %v11652_v16 = vld [vmem:[%s23053_s3 + $0x4a0] sm:$0xf] }
 0x1e3   :  { %6240 = vmatmul.bf16.vlgmr.msra.gmra.mxu0 %v18085_v24  ;;  %v3995_v5 = vadd.f32 %v3994_v23, %v3982_v0  ;;  %v11985_v45 = vor.u32 %v14813_v30, %v11982_v33  ;;  %v11485_v23 = vor.u32 %v14691_v58, %v11484_v52  ;;  %v14733_v17 = vld [vmem:[%s23053_s3 + $0x4b8] sm:$0xf0]  ;;  %v11400_v33 = vld [vmem:[%s23053_s3 + $0x2a8] sm:$0xf]  ;;  %v14719_v52 = vld [vmem:[%s23053_s3 + $0x448] sm:$0xf0] }
 0x1e4   :  { %6284 = vmatpush.bf16.msrb.mxu0 %v12153_v20  ;;  %6253 = vmatmul.bf16.vlgmr.msra.gmra.mxu1 %v18087_v27  ;;  %v14925_v58 = vld [vmem:[%s23053_s3 + $0xabc] sm:$0xf] }
 0x1e5   :  { %6297 = vmatpush.bf16.msrb.mxu1 %v12377_v18  ;;  %v4094_v53 = vmul.f32 0.2, %v3995_v5  ;;  %v12013_v18 = vor.u32 %v14820_v6, %v12010_v8  ;;  %6226 = vmatpush.bf16.msrb.mxu3 %v12401_v2  ;;  %v14740_v6 = vld [vmem:[%s23053_s3 + $0x4f0] sm:$0xf0]  ;;  %v14946_v8 = vld [vmem:[%s23053_s3 + $0xb64] sm:$0xf]  ;;  %v12433_v40 = vor.u32 %v14925_v58, %v12430_v60 }
 0x1e6   :  { %v12517_v2 = vor.u32 %v14946_v8, %v12514_v9  ;;  %v14803_v8 = vld [vmem:[%s23053_s3 + $0x6e8] sm:$0xf0]  ;;  %v12352_v58 = vld [vmem:[%s23053_s3 + $0xa18] sm:$0xf]  ;;  %v14908_v60 = vld [vmem:[%s23053_s3 + $0xa30] sm:$0xf0] }
 0x1e7   :  { %v4101_v20 = vmax.f32 %v3995_v5, %v4094_v53  ;;  %v11428_v53 = vld [vmem:[%s23053_s3 + $0x2e0] sm:$0xf] }
 0x1e8   :  { %6285 = vmatpush.bf16.msrb.mxu0 %v12125_v37  ;;  %v18518_v7 = vpop.f32.mrf.mxu2  ;;  %v3983_v35 = vpop.f32.mrf.mxu0  ;;  %v11429_v30 = vor.u32 %v14677_v14, %v11428_v53  ;;  %v14649_v53 = vld [vmem:[%s23053_s3 + $0x218] sm:$0xf0] }
 0x1e9   :  { %6298 = vmatpush.bf16.msrb.mxu1 %v12349_v57  ;;  %v18529_v36 = vpop.f32.mrf.mxu3  ;;  %v18531_v37 = vpack.c.bf16 %v4101_v20, %v4101_v20  ;;  %v12206_v57 = vld [vmem:[%s23053_s3 + $0x914] sm:$0xf0]  ;;  %v3996_v19 = vpop.f32.mrf.mxu1  ;;  %6271 = vmatpush.bf16.msra.mxu3 %v11929_v21  ;;  %v14939_v20 = vld [vmem:[%s23053_s3 + $0xb2c] sm:$0xf]  ;;  %v11653_v35 = vor.u32 %v14733_v17, %v11652_v16  ;;  %v11540_v17 = vld [vmem:[%s23053_s3 + $0x3c0] sm:$0xf] }
 0x1ea   :  { %v12209_v54 = vor.u32 %v14869_v34, %v12206_v57  ;;  %v14771_v21 = vld [vmem:[%s23053_s3 + $0x5ec] sm:$0xf]  ;;  %v14670_v34 = vld [vmem:[%s23053_s3 + $0x2c0] sm:$0xf0]  ;;  %v14932_v19 = vld [vmem:[%s23053_s3 + $0xaf4] sm:$0xf] }
 0x1eb   :  { %6214 = vmatmul.bf16.vlgmr.msrb.gmra.mxu2 %v18531_v37  ;;  %v11401_v48 = vor.u32 %v14670_v34, %v11400_v33  ;;  %v14642_v34 = vld [vmem:[%s23053_s3 + $0x1e0] sm:$0xf0] }
 0x1ec   :  { %6286 = vmatpush.bf16.msrb.mxu0 %v12097_v51  ;;  %v14862_v51 = vld [vmem:[%s23053_s3 + $0x8c4] sm:$0xf]  ;;  %6310 = vmatpush.bf16.msrb.mxu2 %v12601_v3 }
 0x1ed   :  { %6299 = vmatpush.bf16.msrb.mxu1 %v12321_v39  ;;  %v11901_v39 = vor.u32 %v14792_v42, %v11898_v44  ;;  %v12181_v0 = vor.u32 %v14862_v51, %v12178_v22  ;;  %v12458_v42 = vld [vmem:[%s23053_s3 + $0xb0c] sm:$0xf0]  ;;  %v14764_v44 = vld [vmem:[%s23053_s3 + $0x5b4] sm:$0xf] }
 0x1ee   :  { %v11372_v51 = vld [vmem:[%s23053_s3 + $0x270] sm:$0xf] }
 0x1ef   :  { %6272 = vmatpush.bf16.msra.mxu3 %v11901_v39  ;;  %v14663_v39 = vld [vmem:[%s23053_s3 + $0x288] sm:$0xf0]  ;;  %v11596_v22 = vld [vmem:[%s23053_s3 + $0x430] sm:$0xf] }
 0x1f0   :  { %6287 = vmatpush.bf16.msrb.mxu0 %v12069_v61  ;;  %v12542_v61 = vld [vmem:[%s23053_s3 + $0xbb4] sm:$0xf0]  ;;  %v4009_v49 = vpop.f32.mrf.mxu2  ;;  %6311 = vmatpush.bf16.msrb.mxu2 %v12573_v55  ;;  %v12461_v55 = vor.u32 %v14932_v19, %v12458_v42  ;;  %v12380_v19 = vld [vmem:[%s23053_s3 + $0xa50] sm:$0xf]  ;;  %v14915_v42 = vld [vmem:[%s23053_s3 + $0xa68] sm:$0xf0] }
 0x1f1   :  { %6300 = vmatpush.bf16.msrb.mxu1 %v12293_v56  ;;  %v11870_v56 = vld [vmem:[%s23053_s3 + $0x674] sm:$0xf0]  ;;  %v4022_v25 = vpop.f32.mrf.mxu3  ;;  %v12545_v5 = vor.u32 %v14953_v32, %v12542_v61  ;;  %v14757_v32 = vld [vmem:[%s23053_s3 + $0x57c] sm:$0xf]  ;;  %v11373_v49 = vor.u32 %v14663_v39, %v11372_v51  ;;  %v12381_v39 = vor.u32 %v14915_v42, %v12380_v19 }
 0x1f2   :  { %v11873_v63 = vor.u32 %v14785_v26, %v11870_v56  ;;  %v11758_v61 = vld [vmem:[%s23053_s3 + $0x594] sm:$0xf0]  ;;  %v14918_v25 = vld [vmem:[%s23053_s3 + $0xa84] sm:$0xf] }
 0x1f3   :  { %v11761_v56 = vor.u32 %v14757_v32, %v11758_v61  ;;  %v12576_v32 = vld [vmem:[%s23053_s3 + $0xbd8] sm:$0xf] }
 0x1f4   :  { %6288 = vmatpush.bf16.msrb.mxu0 %v12041_v28  ;;  %v11680_v28 = vld [vmem:[%s23053_s3 + $0x4d8] sm:$0xf]  ;;  %6273 = vmatpush.bf16.msra.mxu3 %v11873_v63 }
 0x1f5   :  { %6301 = vmatpush.bf16.msrb.mxu1 %v12265_v10  ;;  %v14778_v10 = vld [vmem:[%s23053_s3 + $0x624] sm:$0xf]  ;;  %6312 = vmatpush.bf16.msrb.mxu2 %v12545_v5  ;;  %v11681_v15 = vor.u32 %v14740_v6, %v11680_v28  ;;  %v11344_v63 = vld [vmem:[%s23053_s3 + $0x238] sm:$0xf]  ;;  %v11730_v28 = vld [vmem:[%s23053_s3 + $0x55c] sm:$0xf0] }
 0x1f6   :  { %v11845_v12 = vor.u32 %v14778_v10, %v11842_v11  ;;  %v14750_v5 = vld [vmem:[%s23053_s3 + $0x544] sm:$0xf]  ;;  %v11932_v6 = vld [vmem:[%s23053_s3 + $0x6d0] sm:$0xf]  ;;  %v12240_v19 = vld [vmem:[%s23053_s3 + $0x938] sm:$0xf] }
 0x1f7   :  { %v11733_v9 = vor.u32 %v14750_v5, %v11730_v28 }
 0x1f8   :  { %6289 = vmatpush.bf16.msrb.mxu0 %v12013_v18  ;;  %v12486_v18 = vld [vmem:[%s23053_s3 + $0xb44] sm:$0xf0]  ;;  %6274 = vmatpush.bf16.msra.mxu3 %v11845_v12 }
 0x1f9   :  { %6302 = vmatpush.bf16.msrb.mxu1 %v12237_v29  ;;  %v11814_v29 = vld [vmem:[%s23053_s3 + $0x604] sm:$0xf0]  ;;  %6313 = vmatpush.bf16.msrb.mxu2 %v12517_v2  ;;  %v12489_v57 = vor.u32 %v14939_v20, %v12486_v18  ;;  %v11933_v2 = vor.u32 %v14803_v8, %v11932_v6  ;;  %v14705_v20 = vld [vmem:[%s23053_s3 + $0x3d8] sm:$0xf0] }
 0x1fa   :  { %v11817_v3 = vor.u32 %v14771_v21, %v11814_v29  ;;  %v11904_v21 = vld [vmem:[%s23053_s3 + $0x698] sm:$0xf]  ;;  %v11541_v33 = vor.u32 %v14705_v20, %v11540_v17  ;;  %v12268_v20 = vld [vmem:[%s23053_s3 + $0x970] sm:$0xf] }
 0x1fb   :  { %6266 = vmatmul.bf16.vlgmr.msra.gmra.mxu2 %v18095_v31 }
 0x1fc   :  { %6290 = vmatpush.bf16.msrb.mxu0 %v11985_v45  ;;  %6275 = vmatpush.bf16.msra.mxu3 %v11817_v3  ;;  %v11786_v45 = vld [vmem:[%s23053_s3 + $0x5cc] sm:$0xf0] }
 0x1fd   :  { %6303 = vmatpush.bf16.msrb.mxu1 %v12209_v54  ;;  %v11789_v47 = vor.u32 %v14764_v44, %v11786_v45  ;;  %6314 = vmatpush.bf16.msrb.mxu2 %v12489_v57  ;;  %v11625_v54 = vor.u32 %v14726_v41, %v11624_v38  ;;  %v14698_v57 = vld [vmem:[%s23053_s3 + $0x3a0] sm:$0xf0]  ;;  %v12604_v44 = vld [vmem:[%s23053_s3 + $0xc10] sm:$0xf]  ;;  %v14971_v45 = vld [vmem:[%s23053_s3 + $0xc28] sm:$0xf0] }
 0x200   :  { %6291 = vmatpush.bf16.msrb.mxu0 %v11957_v46  ;;  %v18675_v59 = vpop.f32.mrf.mxu0  ;;  %6276 = vmatpush.bf16.msra.mxu3 %v11789_v47  ;;  %v1403_v46 = vperm.slane %v18330_v43, 6  ;;  %v14712_v43 = vld [vmem:[%s23053_s3 + $0x410] sm:$0xf0]  ;;  %v14789_v47 = vld [vmem:[%s23053_s3 + $0x678] sm:$0xf0] }
 0x201   :  { %6304 = vmatpush.bf16.msrb.mxu1 %v12181_v0  ;;  %v18686_v26 = vpop.f32.mrf.mxu1  ;;  %v14656_v0 = vld [vmem:[%s23053_s3 + $0x250] sm:$0xf0]  ;;  %6315 = vmatpush.bf16.msrb.mxu2 %v12461_v55  ;;  %v11569_v11 = vor.u32 %v14712_v43, %v11568_v1  ;;  %v14901_v1 = vld [vmem:[%s23053_s3 + $0x9f8] sm:$0xf0]  ;;  %v12548_v43 = vld [vmem:[%s23053_s3 + $0xba0] sm:$0xf] }
 0x202   :  { %v11345_v10 = vor.u32 %v14656_v0, %v11344_v63 }
 0x203   :  { %6292 = vmatmul.bf16.vlgmr.msrb.gmra.mxu0 %v18253_v50 }
 0x204   :  { %6336 = vmatpush.bf16.msra.mxu0 %v11485_v23  ;;  %6305 = vmatmul.bf16.vlgmr.msrb.gmra.mxu1 %v18531_v37  ;;  %v11597_v23 = vor.u32 %v14719_v52, %v11596_v22  ;;  %v12605_v22 = vor.u32 %v14971_v45, %v12604_v44 }
 0x205   :  { %6349 = vmatpush.bf16.msra.mxu1 %v11709_v4  ;;  %v12402_v4 = vld [vmem:[%s23053_s3 + $0xa9c] sm:$0xf0]  ;;  %6277 = vmatpush.bf16.msra.mxu3 %v11761_v56  ;;  %v11848_v56 = vld [vmem:[%s23053_s3 + $0x628] sm:$0xf] }
 0x206   :  { %6316 = vmatpush.bf16.msrb.mxu2 %v12433_v40  ;;  %v12405_v12 = vor.u32 %v14918_v25, %v12402_v4  ;;  %v12324_v40 = vld [vmem:[%s23053_s3 + $0x9e0] sm:$0xf]  ;;  %v11820_v25 = vld [vmem:[%s23053_s3 + $0x5f0] sm:$0xf]  ;;  %v14775_v4 = vld [vmem:[%s23053_s3 + $0x608] sm:$0xf0] }
 0x207   :  { %v12325_v5 = vor.u32 %v14901_v1, %v12324_v40  ;;  %v11821_v8 = vor.u32 %v14775_v4, %v11820_v25  ;;  %v14929_v25 = vld [vmem:[%s23053_s3 + $0xad8] sm:$0xf0] }
 0x208   :  { %6337 = vmatpush.bf16.msra.mxu0 %v11457_v13  ;;  %v11316_v13 = vld [vmem:[%s23053_s3 + $0x200] sm:$0xf]  ;;  %v18725_v14 = vpop.f32.mrf.mxu2  ;;  %v4035_v16 = vpop.f32.mrf.mxu0 }
 0x209   :  { %6350 = vmatpush.bf16.msra.mxu1 %v11681_v15  ;;  %v4008_v15 = vadd.f32 %v18518_v7, %v1403_v46  ;;  %v18734_v18 = vpop.f32.mrf.mxu3  ;;  %6278 = vmatpush.bf16.msra.mxu3 %v11733_v9  ;;  %v14796_v7 = vld [vmem:[%s23053_s3 + $0x6b0] sm:$0xf0]  ;;  %v4048_v29 = vpop.f32.mrf.mxu1  ;;  %v11317_v3 = vor.u32 %v14649_v53, %v11316_v13  ;;  %v14782_v46 = vld [vmem:[%s23053_s3 + $0x640] sm:$0xf0]  ;;  %v12296_v9 = vld [vmem:[%s23053_s3 + $0x9a8] sm:$0xf] }
 0x20a   :  { %6317 = vmatpush.bf16.msrb.mxu2 %v12405_v12  ;;  %v11905_v41 = vor.u32 %v14796_v7, %v11904_v21  ;;  %v14950_v12 = vld [vmem:[%s23053_s3 + $0xb80] sm:$0xf0]  ;;  %v11792_v13 = vld [vmem:[%s23053_s3 + $0x5b8] sm:$0xf]  ;;  %v14768_v53 = vld [vmem:[%s23053_s3 + $0x5d0] sm:$0xf0] }
 0x20b   :  { %v4021_v38 = vadd.f32 %v18529_v36, %v4008_v15  ;;  %v11876_v36 = vld [vmem:[%s23053_s3 + $0x660] sm:$0xf]  ;;  %v11793_v17 = vor.u32 %v14768_v53, %v11792_v13  ;;  %v14887_v21 = vld [vmem:[%s23053_s3 + $0x988] sm:$0xf0]  ;;  %v12492_v7 = vld [vmem:[%s23053_s3 + $0xb30] sm:$0xf] }
 0x20c   :  { %6338 = vmatpush.bf16.msra.mxu0 %v11429_v30  ;;  %v11288_v30 = vld [vmem:[%s23053_s3 + $0x1c8] sm:$0xf]  ;;  %v11877_v52 = vor.u32 %v14789_v47, %v11876_v36  ;;  %v14880_v36 = vld [vmem:[%s23053_s3 + $0x950] sm:$0xf0]  ;;  %v12464_v47 = vld [vmem:[%s23053_s3 + $0xaf8] sm:$0xf] }
 0x20d   :  { %6351 = vmatpush.bf16.msra.mxu1 %v11653_v35  ;;  %v11512_v35 = vld [vmem:[%s23053_s3 + $0x388] sm:$0xf]  ;;  %v4034_v55 = vadd.f32 %v18675_v59, %v4021_v38  ;;  %v14964_v59 = vld [vmem:[%s23053_s3 + $0xbf0] sm:$0xf0]  ;;  %v11260_v38 = vld [vmem:[%s23053_s3 + $0x190] sm:$0xf] }
 0x20e   :  { %6362 = vmatpush.bf16.msra.mxu2 %v11933_v2  ;;  %v11513_v51 = vor.u32 %v14698_v57, %v11512_v35  ;;  %v12577_v0 = vor.u32 %v14964_v59, %v12576_v32  ;;  %v12269_v57 = vor.u32 %v14887_v21, %v12268_v20  ;;  %v11232_v32 = vld [vmem:[%s23053_s3 + $0x158] sm:$0xf]  ;;  %v14866_v53 = vld [vmem:[%s23053_s3 + $0x8e0] sm:$0xf0]  ;;  %v11710_v20 = vld [vmem:[%s23053_s3 + $0x52c] sm:$0xf0] }
 0x20f   :  { %v4047_v63 = vadd.f32 %v18686_v26, %v4034_v55  ;;  %v14957_v26 = vld [vmem:[%s23053_s3 + $0xbb8] sm:$0xf0]  ;;  %v14632_v55 = vld [vmem:[%s23053_s3 + $0x194] sm:$0xf] }
 0x210   :  { %6339 = vmatpush.bf16.msra.mxu0 %v11401_v48  ;;  %v11289_v48 = vor.u32 %v14642_v34, %v11288_v30  ;;  %v12549_v6 = vor.u32 %v14957_v26, %v12548_v43  ;;  %v14761_v30 = vld [vmem:[%s23053_s3 + $0x598] sm:$0xf0]  ;;  %v12436_v26 = vld [vmem:[%s23053_s3 + $0xac0] sm:$0xf]  ;;  %v14800_v21 = vld [vmem:[%s23053_s3 + $0x6d4] sm:$0xf] }
 0x211   :  { %6352 = vmatpush.bf16.msra.mxu1 %v11625_v54  ;;  %v4061_v54 = vpop.f32.mrf.mxu2  ;;  %v4074_v61 = vpop.f32.mrf.mxu3  ;;  %v4060_v28 = vadd.f32 %v18725_v14, %v4047_v63  ;;  %v18835_v14 = vld [vmem:[%s23054_s4] sm:$0xff]  ;;  %v12437_v13 = vor.u32 %v14929_v25, %v12436_v26  ;;  %v14723_v26 = vld [vmem:[%s23053_s3 + $0x46c] sm:$0xf]  ;;  %v11626_v25 = vld [vmem:[%s23053_s3 + $0x484] sm:$0xf0] }
 0x212   :  { %6363 = vmatpush.bf16.msra.mxu2 %v11905_v41  ;;  %v4111_v34 = vperm.slane %v18835_v14, 0  ;;  %v14635_v41 = vld [vmem:[%s23053_s3 + $0x1a8] sm:$0xf0]  ;;  %v12212_v63 = vld [vmem:[%s23053_s3 + $0x900] sm:$0xf] }
 0x213   :  { %v4073_v2 = vadd.f32 %v18734_v18, %v4060_v28  ;;  %v14943_v18 = vld [vmem:[%s23053_s3 + $0xb48] sm:$0xf0]  ;;  %v11234_v28 = vld [vmem:[%s23053_s3 + $0x174] sm:$0xf0] }
 0x214   :  { %6340 = vmatpush.bf16.msra.mxu0 %v11373_v49  ;;  %v12353_v49 = vor.u32 %v14908_v60, %v12352_v58  ;;  %v12493_v44 = vor.u32 %v14943_v18, %v12492_v7  ;;  %v11261_v58 = vor.u32 %v14635_v41, %v11260_v38  ;;  %v12241_v60 = vor.u32 %v14880_v36, %v12240_v19  ;;  %v11934_v7 = vld [vmem:[%s23053_s3 + $0x6ec] sm:$0xf0]  ;;  %v11206_v18 = vld [vmem:[%s23053_s3 + $0x13c] sm:$0xf0]  ;;  %v14614_v38 = vld [vmem:[%s23053_s3 + $0x100] sm:$0xf0] }
 0x215   :  { %6353 = vmatpush.bf16.msra.mxu1 %v11597_v23  ;;  %v11849_v23 = vor.u32 %v14782_v46, %v11848_v56  ;;  %v11937_v19 = vor.u32 %v14800_v21, %v11934_v7  ;;  %v14793_v36 = vld [vmem:[%s23053_s3 + $0x69c] sm:$0xf]  ;;  %v11094_v21 = vld [vmem:[%s23053_s3 + $0x5c] sm:$0xf0] }
 0x216   :  { %6364 = vmatpush.bf16.msra.mxu2 %v11877_v52 }
 0x218   :  { %6341 = vmatpush.bf16.msra.mxu0 %v11345_v10  ;;  %v14894_v10 = vld [vmem:[%s23053_s3 + $0x9c0] sm:$0xf0] }
 0x219   :  { %6354 = vmatpush.bf16.msra.mxu1 %v11569_v11  ;;  %v12520_v11 = vld [vmem:[%s23053_s3 + $0xb68] sm:$0xf]  ;;  %v12297_v15 = vor.u32 %v14894_v10, %v12296_v9  ;;  %v11204_v10 = vld [vmem:[%s23053_s3 + $0x120] sm:$0xf] }
 0x21a   :  { %6365 = vmatpush.bf16.msra.mxu2 %v11849_v23  ;;  %v12521_v16 = vor.u32 %v14950_v12, %v12520_v11  ;;  %v14621_v11 = vld [vmem:[%s23053_s3 + $0x138] sm:$0xf0]  ;;  %v12184_v12 = vld [vmem:[%s23053_s3 + $0x8c8] sm:$0xf] }
 0x21c   :  { %6342 = vmatpush.bf16.msra.mxu0 %v11317_v3  ;;  %v11764_v3 = vld [vmem:[%s23053_s3 + $0x580] sm:$0xf] }
 0x21d   :  { %6355 = vmatpush.bf16.msra.mxu1 %v11541_v33  ;;  %v11765_v45 = vor.u32 %v14761_v30, %v11764_v3  ;;  %v11205_v3 = vor.u32 %v14621_v11, %v11204_v10  ;;  %v12185_v30 = vor.u32 %v14866_v53, %v12184_v12  ;;  %v11629_v10 = vor.u32 %v14723_v26, %v11626_v25  ;;  %v11092_v11 = vld [vmem:[%s23053_s3 + $0x40] sm:$0xf]  ;;  %v14593_v12 = vld [vmem:[%s23053_s3 + $0x58] sm:$0xf0] }
 0x21e   :  { %6366 = vmatpush.bf16.msra.mxu2 %v11821_v8 }
 0x220   :  { %6343 = vmatpush.bf16.msra.mxu0 %v11289_v48  ;;  %v4085_v29 = vpop.f32.mrf.mxu0  ;;  %v14936_v48 = vld [vmem:[%s23053_s3 + $0xb10] sm:$0xf0] }
 0x221   :  { %6356 = vmatpush.bf16.msra.mxu1 %v11513_v51  ;;  %v4086_v33 = vadd.f32 %v4085_v29, %v4073_v2  ;;  %v6150_v35 = vpop.f32.mrf.mxu1  ;;  %v11736_v51 = vld [vmem:[%s23053_s3 + $0x548] sm:$0xf]  ;;  %v12465_v56 = vor.u32 %v14936_v48, %v12464_v47  ;;  %v14922_v2 = vld [vmem:[%s23053_s3 + $0xaa0] sm:$0xf0]  ;;  %v11906_v47 = vld [vmem:[%s23053_s3 + $0x6b4] sm:$0xf0] }
 0x222   :  { %6367 = vmatpush.bf16.msra.mxu2 %v11793_v17  ;;  %v6151_v52 = vadd.f32 %v6150_v35, %v4111_v34  ;;  %v14744_v17 = vld [vmem:[%s23053_s3 + $0x514] sm:$0xf]  ;;  %v14618_v29 = vld [vmem:[%s23053_s3 + $0x124] sm:$0xf]  ;;  %v14611_v48 = vld [vmem:[%s23053_s3 + $0xec] sm:$0xf] }
 0x223   :  { %6344 = vmatmul.bf16.vlgmr.msra.gmra.mxu0 %v18087_v27  ;;  %v4095_v42 = vmul.f32 0.2, %v4086_v33  ;;  %v11713_v35 = vor.u32 %v14744_v17, %v11710_v20  ;;  %v11822_v17 = vld [vmem:[%s23053_s3 + $0x60c] sm:$0xf0]  ;;  %v14590_v20 = vld [vmem:[%s23053_s3 + $0x44] sm:$0xf] }
 0x224   :  { %6388 = vmatpush.bf16.msrb.mxu0 %v12381_v39  ;;  %6357 = vmatmul.bf16.vlgmr.msra.gmra.mxu1 %v18095_v31  ;;  %v14754_v39 = vld [vmem:[%s23053_s3 + $0x560] sm:$0xf0] }
 0x225   :  { %6401 = vmatpush.bf16.msrb.mxu1 %v12605_v22  ;;  %v4102_v54 = vmax.f32 %v4086_v33, %v4095_v42  ;;  %v11262_v22 = vld [vmem:[%s23053_s3 + $0x1ac] sm:$0xf0]  ;;  %v11737_v46 = vor.u32 %v14754_v39, %v11736_v51  ;;  %v11209_v42 = vor.u32 %v14618_v29, %v11206_v18  ;;  %v11178_v51 = vld [vmem:[%s23053_s3 + $0x104] sm:$0xf0]  ;;  %v11093_v29 = vor.u32 %v14593_v12, %v11092_v11  ;;  %v14968_v11 = vld [vmem:[%s23053_s3 + $0xc14] sm:$0xf] }
 0x226   :  { %6368 = vmatpush.bf16.msra.mxu2 %v11765_v45  ;;  %v11265_v43 = vor.u32 %v14632_v55, %v11262_v22  ;;  %v11682_v45 = vld [vmem:[%s23053_s3 + $0x4f4] sm:$0xf0]  ;;  %v11148_v55 = vld [vmem:[%s23053_s3 + $0xb0] sm:$0xf]  ;;  %v14607_v22 = vld [vmem:[%s23053_s3 + $0xc8] sm:$0xf0] }
 0x227   :  { %v18890_v61 = vpack.c.bf16 %v4102_v54, %v4102_v54  ;;  %v11064_v18 = vld [vmem:[%s23053_s3 + $0x8] sm:$0xf]  ;;  %v12606_v12 = vld [vmem:[%s23053_s3 + $0xc2c] sm:$0xf0] }
 0x228   :  { %6389 = vmatpush.bf16.msrb.mxu0 %v12353_v49  ;;  %v6163_v59 = vpop.f32.mrf.mxu2  ;;  %v14628_v49 = vld [vmem:[%s23053_s3 + $0x170] sm:$0xf0]  ;;  %v4087_v1 = vpop.f32.mrf.mxu0 }
 0x229   :  { %6402 = vmatpush.bf16.msrb.mxu1 %v12577_v0  ;;  %v14873_v0 = vld [vmem:[%s23053_s3 + $0x918] sm:$0xf0]  ;;  %v6164_v23 = vadd.f32 %v6163_v59, %v6151_v52  ;;  %v6176_v40 = vpop.f32.mrf.mxu3  ;;  %v6152_v4 = vpop.f32.mrf.mxu1  ;;  %6227 = vmatmul.bf16.vlgmr.msrb.gmra.mxu3 %v18890_v61  ;;  %v11233_v8 = vor.u32 %v14628_v49, %v11232_v32  ;;  %v11909_v52 = vor.u32 %v14793_v36, %v11906_v47  ;;  %v11654_v32 = vld [vmem:[%s23053_s3 + $0x4bc] sm:$0xf0]  ;;  %v14786_v59 = vld [vmem:[%s23053_s3 + $0x664] sm:$0xf] }
 0x22a   :  { %6318 = vmatmul.bf16.vlgmr.msrb.gmra.mxu2 %v18890_v61  ;;  %6323 = vmatpush.bf16.msrb.mxu3 %v11261_v58  ;;  %v12213_v9 = vor.u32 %v14873_v0, %v12212_v63  ;;  %v11181_v58 = vor.u32 %v14611_v48, %v11178_v51  ;;  %v11150_v49 = vld [vmem:[%s23053_s3 + $0xcc] sm:$0xf0]  ;;  %v11149_v63 = vor.u32 %v14607_v22, %v11148_v55  ;;  %v14779_v4 = vld [vmem:[%s23053_s3 + $0x62c] sm:$0xf]  ;;  %v11066_v47 = vld [vmem:[%s23053_s3 + $0x24] sm:$0xf0] }
 0x22b   :  { %6369 = vmatpush.bf16.msra.mxu2 %v11737_v46  ;;  %v14604_v46 = vld [vmem:[%s23053_s3 + $0xb4] sm:$0xf]  ;;  %v14583_v36 = vld [vmem:[%s23053_s3 + $0xc] sm:$0xf] }
 0x22c   :  { %6390 = vmatpush.bf16.msrb.mxu0 %v12325_v5  ;;  %v14625_v5 = vld [vmem:[%s23053_s3 + $0x15c] sm:$0xf]  ;;  %v14856_v51 = vld [vmem:[%s23053_s3 + $0x894] sm:$0xf] }
 0x22d   :  { %6403 = vmatpush.bf16.msrb.mxu1 %v12549_v6  ;;  %v18915_v6 = vadd.f32 %v6176_v40, %v6164_v23  ;;  %v11120_v23 = vld [vmem:[%s23053_s3 + $0x78] sm:$0xf]  ;;  %v14600_v40 = vld [vmem:[%s23053_s3 + $0x90] sm:$0xf0] }
 0x22e   :  { %6324 = vmatpush.bf16.msrb.mxu3 %v11233_v8  ;;  %v11122_v8 = vld [vmem:[%s23053_s3 + $0x94] sm:$0xf0] }
 0x22f   :  { %6414 = vmatpush.bf16.msrb.mxu2 %v11265_v43  ;;  %v11153_v43 = vor.u32 %v14604_v46, %v11150_v49  ;;  %v14758_v46 = vld [vmem:[%s23053_s3 + $0x584] sm:$0xf]  ;;  %v11766_v49 = vld [vmem:[%s23053_s3 + $0x59c] sm:$0xf0] }
 0x230   :  { %6391 = vmatpush.bf16.msrb.mxu0 %v12297_v15  ;;  %v12408_v15 = vld [vmem:[%s23053_s3 + $0xa88] sm:$0xf]  ;;  %v6165_v33 = vpop.f32.mrf.mxu2  ;;  %v11769_v25 = vor.u32 %v14758_v46, %v11766_v49  ;;  %v11184_v49 = vld [vmem:[%s23053_s3 + $0xf0] sm:$0xf] }
 0x231   :  { %6404 = vmatpush.bf16.msrb.mxu1 %v12521_v16  ;;  %v11237_v16 = vor.u32 %v14625_v5, %v11234_v28  ;;  %v12409_v34 = vor.u32 %v14922_v2, %v12408_v15  ;;  %v6178_v41 = vpop.f32.mrf.mxu3  ;;  %v11850_v5 = vld [vmem:[%s23053_s3 + $0x644] sm:$0xf0]  ;;  %v14597_v28 = vld [vmem:[%s23053_s3 + $0x7c] sm:$0xf]  ;;  %v14716_v15 = vld [vmem:[%s23053_s3 + $0x434] sm:$0xf] }
 0x232   :  { %6325 = vmatpush.bf16.msrb.mxu3 %v11205_v3  ;;  %v11125_v53 = vor.u32 %v14597_v28, %v11122_v8  ;;  %v11598_v2 = vld [vmem:[%s23053_s3 + $0x44c] sm:$0xf0]  ;;  %v11097_v41 = vor.u32 %v14590_v20, %v11094_v21  ;;  %v11514_v28 = vld [vmem:[%s23053_s3 + $0x3a4] sm:$0xf0]  ;;  %v12609_v21 = vor.u32 %v14968_v11, %v12606_v12  ;;  %v14814_v11 = vld [vmem:[%s23053_s3 + $0x744] sm:$0xf] }
 0x233   :  { %6415 = vmatpush.bf16.msrb.mxu2 %v11237_v16  ;;  %v14772_v16 = vld [vmem:[%s23053_s3 + $0x5f4] sm:$0xf]  ;;  %v11601_v33 = vor.u32 %v14716_v15, %v11598_v2  ;;  %v14842_v2 = vld [vmem:[%s23053_s3 + $0x824] sm:$0xf]  ;;  %v12522_v46 = vld [vmem:[%s23053_s3 + $0xb84] sm:$0xf0] }
 0x234   :  { %6392 = vmatpush.bf16.msrb.mxu0 %v12269_v57  ;;  %v11176_v57 = vld [vmem:[%s23053_s3 + $0xe8] sm:$0xf]  ;;  %v11990_v12 = vld [vmem:[%s23053_s3 + $0x75c] sm:$0xf0] }
 0x235   :  { %6405 = vmatpush.bf16.msrb.mxu1 %v12493_v44  ;;  %v14737_v44 = vld [vmem:[%s23053_s3 + $0x4dc] sm:$0xf]  ;;  %v11177_v39 = vor.u32 %v14614_v38, %v11176_v57  ;;  %v14859_v57 = vld [vmem:[%s23053_s3 + $0x8a8] sm:$0xf0]  ;;  %v11825_v38 = vor.u32 %v14772_v16, %v11822_v17  ;;  %v12102_v16 = vld [vmem:[%s23053_s3 + $0x83c] sm:$0xf0] }
 0x236   :  { %v11685_v54 = vor.u32 %v14737_v44, %v11682_v45  ;;  %v11794_v45 = vld [vmem:[%s23053_s3 + $0x5d4] sm:$0xf0] }
 0x237   :  { %6416 = vmatpush.bf16.msrb.mxu2 %v11209_v42  ;;  %6326 = vmatpush.bf16.msrb.mxu3 %v11177_v39  ;;  %v14765_v42 = vld [vmem:[%s23053_s3 + $0x5bc] sm:$0xf]  ;;  %v12158_v39 = vld [vmem:[%s23053_s3 + $0x8ac] sm:$0xf0] }
 0x238   :  { %6393 = vmatpush.bf16.msrb.mxu0 %v12241_v60  ;;  %v14730_v60 = vld [vmem:[%s23053_s3 + $0x4a4] sm:$0xf]  ;;  %v11797_v22 = vor.u32 %v14765_v42, %v11794_v45  ;;  %v12044_v42 = vld [vmem:[%s23053_s3 + $0x7b0] sm:$0xf]  ;;  %v14831_v45 = vld [vmem:[%s23053_s3 + $0x7c8] sm:$0xf0] }
 0x239   :  { %6406 = vmatpush.bf16.msrb.mxu1 %v12465_v56  ;;  %v11878_v56 = vld [vmem:[%s23053_s3 + $0x67c] sm:$0xf0]  ;;  %v11657_v0 = vor.u32 %v14730_v60, %v11654_v32  ;;  %6279 = vmatmul.bf16.vlgmr.msra.gmra.mxu3 %v18245_v62  ;;  %v14852_v60 = vld [vmem:[%s23053_s3 + $0x870] sm:$0xf0]  ;;  %v14702_v32 = vld [vmem:[%s23053_s3 + $0x3c4] sm:$0xf] }
 0x23a   :  { %v11881_v1 = vor.u32 %v14786_v59, %v11878_v56  ;;  %6370 = vmatmul.bf16.vlgmr.msra.gmra.mxu2 %v18245_v62  ;;  %v12161_v59 = vor.u32 %v14856_v51, %v12158_v39  ;;  %v11542_v56 = vld [vmem:[%s23053_s3 + $0x3dc] sm:$0xf0]  ;;  %v11212_v51 = vld [vmem:[%s23053_s3 + $0x128] sm:$0xf]  ;;  %v14622_v39 = vld [vmem:[%s23053_s3 + $0x140] sm:$0xf0] }
 0x23b   :  { %6417 = vmatpush.bf16.msrb.mxu2 %v11181_v58  ;;  %6327 = vmatpush.bf16.msrb.mxu3 %v11149_v63  ;;  %v12128_v58 = vld [vmem:[%s23053_s3 + $0x858] sm:$0xf]  ;;  %v11545_v26 = vor.u32 %v14702_v32, %v11542_v56  ;;  %v14824_v32 = vld [vmem:[%s23053_s3 + $0x790] sm:$0xf0] }
 0x23c   :  { %6394 = vmatpush.bf16.msrb.mxu0 %v12213_v9  ;;  %v11121_v9 = vor.u32 %v14600_v40, %v11120_v23  ;;  %v12130_v23 = vld [vmem:[%s23053_s3 + $0x874] sm:$0xf0] }
 0x23d   :  { %6407 = vmatpush.bf16.msrb.mxu1 %v12437_v13  ;;  %v11853_v13 = vor.u32 %v14779_v4, %v11850_v5  ;;  %v14845_v4 = vld [vmem:[%s23053_s3 + $0x838] sm:$0xf0]  ;;  %v14695_v5 = vld [vmem:[%s23053_s3 + $0x38c] sm:$0xf] }
 0x23e   :  { %v11517_v17 = vor.u32 %v14695_v5, %v11514_v28  ;;  %v14940_v5 = vld [vmem:[%s23053_s3 + $0xb34] sm:$0xf] }
 0x23f   :  { %6418 = vmatpush.bf16.msrb.mxu2 %v11153_v43  ;;  %6328 = vmatpush.bf16.msrb.mxu3 %v11121_v9  ;;  %v12100_v43 = vld [vmem:[%s23053_s3 + $0x820] sm:$0xf]  ;;  %v14751_v9 = vld [vmem:[%s23053_s3 + $0x54c] sm:$0xf] }
 0x240   :  { %6395 = vmatpush.bf16.msrb.mxu0 %v12185_v30  ;;  %v6189_v7 = vpop.f32.mrf.mxu0  ;;  %v12101_v15 = vor.u32 %v14845_v4, %v12100_v43  ;;  %v14817_v4 = vld [vmem:[%s23053_s3 + $0x758] sm:$0xf0] }
 0x241   :  { %6408 = vmatpush.bf16.msrb.mxu1 %v12409_v34  ;;  %v6190_v3 = vadd.f32 %v6189_v7, %v18915_v6  ;;  %v6202_v30 = vpop.f32.mrf.mxu1  ;;  %v14586_v34 = vld [vmem:[%s23053_s3 + $0x20] sm:$0xf0]  ;;  %v14709_v6 = vld [vmem:[%s23053_s3 + $0x3fc] sm:$0xf] }
 0x242   :  { %v11065_v48 = vor.u32 %v14586_v34, %v11064_v18  ;;  %v14838_v18 = vld [vmem:[%s23053_s3 + $0x800] sm:$0xf0]  ;;  %v11240_v34 = vld [vmem:[%s23053_s3 + $0x160] sm:$0xf] }
 0x243   :  { %6396 = vmatmul.bf16.vlgmr.msrb.gmra.mxu0 %v18531_v37  ;;  %6419 = vmatpush.bf16.msrb.mxu2 %v11125_v53  ;;  %v19075_v44 = vadd.f32 %v6202_v30, %v6190_v3  ;;  %v14636_v53 = vld [vmem:[%s23053_s3 + $0x1b0] sm:$0xf0]  ;;  %v14961_v3 = vld [vmem:[%s23053_s3 + $0xbdc] sm:$0xf]  ;;  %v12105_v30 = vor.u32 %v14842_v2, %v12102_v16  ;;  %v11960_v2 = vld [vmem:[%s23053_s3 + $0x708] sm:$0xf] }
 0x244   :  { %6440 = vmatpush.bf16.msra.mxu0 %v11713_v35  ;;  %6409 = vmatmul.bf16.vlgmr.msrb.gmra.mxu1 %v18890_v61  ;;  %v12156_v35 = vld [vmem:[%s23053_s3 + $0x890] sm:$0xf] }
 0x245   :  { %6453 = vmatpush.bf16.msra.mxu1 %v11937_v19  ;;  %v11570_v19 = vld [vmem:[%s23053_s3 + $0x414] sm:$0xf0]  ;;  %6329 = vmatpush.bf16.msrb.mxu3 %v11093_v29  ;;  %v12072_v29 = vld [vmem:[%s23053_s3 + $0x7e8] sm:$0xf] }
 0x246   :  { %v11573_v55 = vor.u32 %v14709_v6, %v11570_v19 }
 0x247   :  { %6420 = vmatpush.bf16.msrb.mxu2 %v11097_v41  ;;  %v12073_v41 = vor.u32 %v14838_v18, %v12072_v29  ;;  %v11993_v18 = vor.u32 %v14814_v11, %v11990_v12 }
 0x248   :  { %6441 = vmatpush.bf16.msra.mxu0 %v11685_v54  ;;  %v12157_v54 = vor.u32 %v14859_v57, %v12156_v35  ;;  %v6191_v63 = vpop.f32.mrf.mxu0  ;;  %v14629_v35 = vld [vmem:[%s23053_s3 + $0x178] sm:$0xf0]  ;;  %v14835_v57 = vld [vmem:[%s23053_s3 + $0x7ec] sm:$0xf] }
 0x249   :  { %6454 = vmatpush.bf16.msra.mxu1 %v11909_v52  ;;  %v11069_v52 = vor.u32 %v14583_v36, %v11066_v47  ;;  %6330 = vmatpush.bf16.msrb.mxu3 %v11065_v48  ;;  %v6204_v40 = vpop.f32.mrf.mxu1  ;;  %v11241_v19 = vor.u32 %v14629_v35, %v11240_v34  ;;  %v14954_v36 = vld [vmem:[%s23053_s3 + $0xba4] sm:$0xf]  ;;  %v12550_v48 = vld [vmem:[%s23053_s3 + $0xbbc] sm:$0xf0]  ;;  %v14615_v63 = vld [vmem:[%s23053_s3 + $0x108] sm:$0xf0] }
 0x24a   :  { %v4112_v40 = vperm.slane %v18835_v14, 1  ;;  %v12494_v14 = vld [vmem:[%s23053_s3 + $0xb4c] sm:$0xf0]  ;;  %v14601_v34 = vld [vmem:[%s23053_s3 + $0x98] sm:$0xf0] }
 0x24b   :  { %6421 = vmatpush.bf16.msrb.mxu2 %v11069_v52  ;;  %v12553_v52 = vor.u32 %v14954_v36, %v12550_v48  ;;  %v12497_v16 = vor.u32 %v14940_v5, %v12494_v14  ;;  %v14807_v35 = vld [vmem:[%s23053_s3 + $0x70c] sm:$0xf]  ;;  %v11458_v48 = vld [vmem:[%s23053_s3 + $0x334] sm:$0xf0]  ;;  %v14860_v5 = vld [vmem:[%s23053_s3 + $0x8b0] sm:$0xf0] }
 0x24c   :  { %6442 = vmatpush.bf16.msra.mxu0 %v11657_v0  ;;  %v14849_v0 = vld [vmem:[%s23053_s3 + $0x85c] sm:$0xf]  ;;  %6331 = vmatmul.bf16.vlgmr.msrb.gmra.mxu3 %v18085_v24  ;;  %v11436_v14 = vld [vmem:[%s23053_s3 + $0x2e8] sm:$0xf] }
 0x24d   :  { %6455 = vmatpush.bf16.msra.mxu1 %v11881_v1  ;;  %6375 = vmatpush.bf16.msra.mxu3 %v12157_v54  ;;  %v12129_v1 = vor.u32 %v14852_v60, %v12128_v58  ;;  %v12133_v8 = vor.u32 %v14849_v0, %v12130_v23  ;;  %v14828_v54 = vld [vmem:[%s23053_s3 + $0x7b4] sm:$0xf]  ;;  %v11213_v58 = vor.u32 %v14622_v39, %v11212_v51  ;;  %v12016_v60 = vld [vmem:[%s23053_s3 + $0x778] sm:$0xf]  ;;  %v14821_v0 = vld [vmem:[%s23053_s3 + $0x77c] sm:$0xf] }
 0x24e   :  { %6422 = vmatmul.bf16.vlgmr.msrb.gmra.mxu2 %v18085_v24  ;;  %v12018_v23 = vld [vmem:[%s23053_s3 + $0x794] sm:$0xf0]  ;;  %v14926_v51 = vld [vmem:[%s23053_s3 + $0xac4] sm:$0xf] }
 0x24f   :  { %6466 = vmatpush.bf16.msra.mxu2 %v12161_v59  ;;  %v14947_v59 = vld [vmem:[%s23053_s3 + $0xb6c] sm:$0xf]  ;;  %v12021_v28 = vor.u32 %v14821_v0, %v12018_v23  ;;  %v12410_v23 = vld [vmem:[%s23053_s3 + $0xaa4] sm:$0xf0] }
 0x250   :  { %6443 = vmatpush.bf16.msra.mxu0 %v11629_v10  ;;  %v11738_v10 = vld [vmem:[%s23053_s3 + $0x564] sm:$0xf0]  ;;  %v12525_v43 = vor.u32 %v14947_v59, %v12522_v46  ;;  %v14919_v0 = vld [vmem:[%s23053_s3 + $0xa8c] sm:$0xf] }
 0x251   :  { %6456 = vmatpush.bf16.msra.mxu1 %v11853_v13  ;;  %v11268_v13 = vld [vmem:[%s23053_s3 + $0x198] sm:$0xf]  ;;  %6376 = vmatpush.bf16.msra.mxu3 %v12129_v1  ;;  %v11741_v20 = vor.u32 %v14751_v9, %v11738_v10  ;;  %v12017_v1 = vor.u32 %v14824_v32, %v12016_v60  ;;  %v14608_v9 = vld [vmem:[%s23053_s3 + $0xd0] sm:$0xf0]  ;;  %v11464_v60 = vld [vmem:[%s23053_s3 + $0x320] sm:$0xf] }
 0x252   :  { %v11269_v7 = vor.u32 %v14636_v53, %v11268_v13  ;;  %v14685_v32 = vld [vmem:[%s23053_s3 + $0x338] sm:$0xf0] }
 0x253   :  { %6467 = vmatpush.bf16.msra.mxu2 %v12133_v8  ;;  %v11156_v8 = vld [vmem:[%s23053_s3 + $0xb8] sm:$0xf] }
 0x254   :  { %6444 = vmatpush.bf16.msra.mxu0 %v11601_v33  ;;  %v12578_v33 = vld [vmem:[%s23053_s3 + $0xbf4] sm:$0xf0] }
 0x255   :  { %6457 = vmatpush.bf16.msra.mxu1 %v11825_v38  ;;  %6377 = vmatpush.bf16.msra.mxu3 %v12101_v15  ;;  %v12074_v38 = vld [vmem:[%s23053_s3 + $0x804] sm:$0xf0]  ;;  %v12581_v6 = vor.u32 %v14961_v3, %v12578_v33  ;;  %v14933_v3 = vld [vmem:[%s23053_s3 + $0xafc] sm:$0xf]  ;;  %v11128_v33 = vld [vmem:[%s23053_s3 + $0x80] sm:$0xf] }
 0x256   :  { %v12077_v47 = vor.u32 %v14835_v57, %v12074_v38  ;;  %v11962_v57 = vld [vmem:[%s23053_s3 + $0x724] sm:$0xf0] }
 0x257   :  { %6468 = vmatpush.bf16.msra.mxu2 %v12105_v30  ;;  %v12466_v30 = vld [vmem:[%s23053_s3 + $0xb14] sm:$0xf0]  ;;  %v11965_v36 = vor.u32 %v14807_v35, %v11962_v57  ;;  %v11884_v35 = vld [vmem:[%s23053_s3 + $0x668] sm:$0xf] }
 0x258   :  { %6445 = vmatpush.bf16.msra.mxu0 %v11573_v55  ;;  %v12046_v55 = vld [vmem:[%s23053_s3 + $0x7cc] sm:$0xf0] }
 0x259   :  { %6458 = vmatpush.bf16.msra.mxu1 %v11797_v22  ;;  %6378 = vmatpush.bf16.msra.mxu3 %v12073_v41  ;;  %v12045_v22 = vor.u32 %v14831_v45, %v12044_v42  ;;  %v12049_v56 = vor.u32 %v14828_v54, %v12046_v55  ;;  %v11492_v41 = vld [vmem:[%s23053_s3 + $0x358] sm:$0xf]  ;;  %v12469_v42 = vor.u32 %v14933_v3, %v12466_v30  ;;  %v12438_v55 = vld [vmem:[%s23053_s3 + $0xadc] sm:$0xf0] }
 0x25a   :  { %v11129_v45 = vor.u32 %v14601_v34, %v11128_v33  ;;  %v12441_v46 = vor.u32 %v14926_v51, %v12438_v55  ;;  %v14660_v33 = vld [vmem:[%s23053_s3 + $0x274] sm:$0xf]  ;;  %v11374_v34 = vld [vmem:[%s23053_s3 + $0x28c] sm:$0xf0]  ;;  %v14653_v51 = vld [vmem:[%s23053_s3 + $0x23c] sm:$0xf] }
 0x25b   :  { %6469 = vmatpush.bf16.msra.mxu2 %v12077_v47  ;;  %v14681_v47 = vld [vmem:[%s23053_s3 + $0x31c] sm:$0xf] }
 0x25c   :  { %6446 = vmatpush.bf16.msra.mxu0 %v11545_v26  ;;  %v11185_v26 = vor.u32 %v14615_v63, %v11184_v49  ;;  %v11461_v59 = vor.u32 %v14681_v47, %v11458_v48  ;;  %v11430_v63 = vld [vmem:[%s23053_s3 + $0x2fc] sm:$0xf0] }
 0x25d   :  { %6459 = vmatpush.bf16.msra.mxu1 %v11769_v25  ;;  %6379 = vmatpush.bf16.msra.mxu3 %v12045_v22  ;;  %v11988_v25 = vld [vmem:[%s23053_s3 + $0x740] sm:$0xf]  ;;  %v11100_v22 = vld [vmem:[%s23053_s3 + $0x48] sm:$0xf] }
 0x25e   :  { %v11989_v15 = vor.u32 %v14817_v4, %v11988_v25  ;;  %v14804_v25 = vld [vmem:[%s23053_s3 + $0x6f0] sm:$0xf0]  ;;  %v12164_v4 = vld [vmem:[%s23053_s3 + $0x898] sm:$0xf] }
 0x25f   :  { %6470 = vmatpush.bf16.msra.mxu2 %v12049_v56  ;;  %v14674_v56 = vld [vmem:[%s23053_s3 + $0x2e4] sm:$0xf]  ;;  %v12165_v12 = vor.u32 %v14860_v5, %v12164_v4  ;;  %v11324_v4 = vld [vmem:[%s23053_s3 + $0x208] sm:$0xf] }
 0x260   :  { %6447 = vmatpush.bf16.msra.mxu0 %v11517_v17  ;;  %v6241_v10 = vpop.f32.mrf.mxu0  ;;  %v11157_v17 = vor.u32 %v14608_v9, %v11156_v8  ;;  %v14678_v8 = vld [vmem:[%s23053_s3 + $0x300] sm:$0xf0]  ;;  %v12413_v9 = vor.u32 %v14919_v0, %v12410_v23  ;;  %v11828_v0 = vld [vmem:[%s23053_s3 + $0x5f8] sm:$0xf] }
 0x261   :  { %6460 = vmatpush.bf16.msra.mxu1 %v11741_v20  ;;  %v6242_v13 = vadd.f32 %v6241_v10, %v4112_v40  ;;  %v6254_v53 = vpop.f32.mrf.mxu1  ;;  %6380 = vmatpush.bf16.msra.mxu3 %v12017_v1  ;;  %v14810_v20 = vld [vmem:[%s23053_s3 + $0x720] sm:$0xf0]  ;;  %v11465_v40 = vor.u32 %v14685_v32, %v11464_v60  ;;  %v11072_v1 = vld [vmem:[%s23053_s3 + $0x10] sm:$0xf]  ;;  %v14839_v60 = vld [vmem:[%s23053_s3 + $0x808] sm:$0xf0] }
 0x262   :  { %v11961_v38 = vor.u32 %v14810_v20, %v11960_v2  ;;  %v11437_v2 = vor.u32 %v14678_v8, %v11436_v14  ;;  %v14853_v20 = vld [vmem:[%s23053_s3 + $0x878] sm:$0xf0]  ;;  %v11352_v32 = vld [vmem:[%s23053_s3 + $0x240] sm:$0xf]  ;;  %v14650_v5 = vld [vmem:[%s23053_s3 + $0x220] sm:$0xf0] }
 0x263   :  { %6448 = vmatmul.bf16.vlgmr.msra.gmra.mxu0 %v18095_v31  ;;  %v19265_v29 = vadd.f32 %v6254_v53, %v6242_v13  ;;  %6471 = vmatpush.bf16.msra.mxu2 %v12021_v28  ;;  %v11433_v28 = vor.u32 %v14674_v56, %v11430_v63  ;;  %v14667_v13 = vld [vmem:[%s23053_s3 + $0x2ac] sm:$0xf]  ;;  %v11402_v53 = vld [vmem:[%s23053_s3 + $0x2c4] sm:$0xf0]  ;;  %v11318_v63 = vld [vmem:[%s23053_s3 + $0x21c] sm:$0xf0] }
 0x264   :  { %6492 = vmatpush.bf16.msrb.mxu0 %v12609_v21  ;;  %6461 = vmatmul.bf16.vlgmr.msra.gmra.mxu1 %v18245_v62  ;;  %v14688_v21 = vld [vmem:[%s23053_s3 + $0x354] sm:$0xf]  ;;  %v14639_v14 = vld [vmem:[%s23053_s3 + $0x1cc] sm:$0xf] }
 0x265   :  { %6505 = vmatpush.bf16.msrb.mxu1 %v11269_v7  ;;  %v11486_v7 = vld [vmem:[%s23053_s3 + $0x36c] sm:$0xf0]  ;;  %6381 = vmatpush.bf16.msra.mxu3 %v11989_v15  ;;  %v11912_v15 = vld [vmem:[%s23053_s3 + $0x6a0] sm:$0xf] }
 0x267   :  { %6472 = vmatpush.bf16.msra.mxu2 %v11993_v18  ;;  %v11405_v18 = vor.u32 %v14667_v13, %v11402_v53  ;;  %v12382_v13 = vld [vmem:[%s23053_s3 + $0xa6c] sm:$0xf0]  ;;  %v11325_v53 = vor.u32 %v14650_v5, %v11324_v4 }
 0x268   :  { %6493 = vmatpush.bf16.msrb.mxu0 %v12581_v6  ;;  %v14692_v6 = vld [vmem:[%s23053_s3 + $0x370] sm:$0xf0]  ;;  %v6243_v39 = vpop.f32.mrf.mxu0 }
 0x269   :  { %6506 = vmatpush.bf16.msrb.mxu1 %v11241_v19  ;;  %v11489_v19 = vor.u32 %v14688_v21, %v11486_v7  ;;  %v11493_v54 = vor.u32 %v14692_v6, %v11492_v41  ;;  %6382 = vmatpush.bf16.msra.mxu3 %v11961_v38  ;;  %v11408_v21 = vld [vmem:[%s23053_s3 + $0x2b0] sm:$0xf]  ;;  %v14671_v7 = vld [vmem:[%s23053_s3 + $0x2c8] sm:$0xf0]  ;;  %v14790_v38 = vld [vmem:[%s23053_s3 + $0x680] sm:$0xf0] }
 0x26a   :  { %v11409_v57 = vor.u32 %v14671_v7, %v11408_v21  ;;  %v12108_v41 = vld [vmem:[%s23053_s3 + $0x828] sm:$0xf]  ;;  %v14846_v6 = vld [vmem:[%s23053_s3 + $0x840] sm:$0xf0]  ;;  %v11885_v47 = vor.u32 %v14790_v38, %v11884_v35  ;;  %v11346_v39 = vld [vmem:[%s23053_s3 + $0x254] sm:$0xf0] }
 0x26b   :  { %6473 = vmatpush.bf16.msra.mxu2 %v11965_v36  ;;  %v12109_v48 = vor.u32 %v14846_v6, %v12108_v41  ;;  %v14643_v21 = vld [vmem:[%s23053_s3 + $0x1e8] sm:$0xf0]  ;;  %v14905_v38 = vld [vmem:[%s23053_s3 + $0xa1c] sm:$0xf]  ;;  %v12354_v41 = vld [vmem:[%s23053_s3 + $0xa34] sm:$0xf0] }
 0x26c   :  { %6494 = vmatpush.bf16.msrb.mxu0 %v12553_v52  ;;  %v14594_v52 = vld [vmem:[%s23053_s3 + $0x60] sm:$0xf0]  ;;  %6383 = vmatmul.bf16.vlgmr.msra.gmra.mxu3 %v18253_v50  ;;  %v11772_v6 = vld [vmem:[%s23053_s3 + $0x588] sm:$0xf] }
 0x26d   :  { %6507 = vmatpush.bf16.msrb.mxu1 %v11213_v58  ;;  %v6256_v58 = vpop.f32.mrf.mxu1  ;;  %6427 = vmatpush.bf16.msrb.mxu3 %v11489_v19  ;;  %v11101_v49 = vor.u32 %v14594_v52, %v11100_v22  ;;  %v11380_v19 = vld [vmem:[%s23053_s3 + $0x278] sm:$0xf]  ;;  %v14783_v52 = vld [vmem:[%s23053_s3 + $0x648] sm:$0xf0] }
 0x26e   :  { %6474 = vmatmul.bf16.vlgmr.msra.gmra.mxu2 %v18253_v50  ;;  %v6215_v36 = vpop.f32.mrf.mxu2  ;;  %v12080_v58 = vld [vmem:[%s23053_s3 + $0x7f0] sm:$0xf] }
 0x26f   :  { %6518 = vmatpush.bf16.msrb.mxu2 %v11493_v54  ;;  %v11856_v54 = vld [vmem:[%s23053_s3 + $0x630] sm:$0xf]  ;;  %v19413_v55 = vadd.f32 %v6215_v36, %v19075_v44  ;;  %v14657_v44 = vld [vmem:[%s23053_s3 + $0x258] sm:$0xf0]  ;;  %v11996_v36 = vld [vmem:[%s23053_s3 + $0x748] sm:$0xf] }
 0x270   :  { %6495 = vmatpush.bf16.msrb.mxu0 %v12525_v43  ;;  %v14587_v43 = vld [vmem:[%s23053_s3 + $0x28] sm:$0xf0]  ;;  %v11857_v56 = vor.u32 %v14783_v52, %v11856_v54  ;;  %v12357_v54 = vor.u32 %v14905_v38, %v12354_v41  ;;  %v14888_v38 = vld [vmem:[%s23053_s3 + $0x990] sm:$0xf0] }
 0x271   :  { %6508 = vmatpush.bf16.msrb.mxu1 %v11185_v26  ;;  %v11940_v26 = vld [vmem:[%s23053_s3 + $0x6d8] sm:$0xf]  ;;  %6428 = vmatpush.bf16.msrb.mxu3 %v11461_v59  ;;  %v11073_v10 = vor.u32 %v14587_v43, %v11072_v1  ;;  %v11349_v59 = vor.u32 %v14653_v51, %v11346_v39  ;;  %v14776_v1 = vld [vmem:[%s23053_s3 + $0x610] sm:$0xf0]  ;;  %v14909_v51 = vld [vmem:[%s23053_s3 + $0xa38] sm:$0xf0] }
 0x272   :  { %v11941_v11 = vor.u32 %v14804_v25, %v11940_v26  ;;  %v12052_v43 = vld [vmem:[%s23053_s3 + $0x7b8] sm:$0xf]  ;;  %v14832_v26 = vld [vmem:[%s23053_s3 + $0x7d0] sm:$0xf0] }
 0x273   :  { %6519 = vmatpush.bf16.msrb.mxu2 %v11465_v40  ;;  %v11353_v40 = vor.u32 %v14657_v44, %v11352_v32  ;;  %v12326_v32 = vld [vmem:[%s23053_s3 + $0x9fc] sm:$0xf0]  ;;  %v11744_v44 = vld [vmem:[%s23053_s3 + $0x550] sm:$0xf] }
 0x274   :  { %6496 = vmatpush.bf16.msrb.mxu0 %v12497_v16  ;;  %v14797_v16 = vld [vmem:[%s23053_s3 + $0x6b8] sm:$0xf0] }
 0x275   :  { %6509 = vmatpush.bf16.msrb.mxu1 %v11157_v17  ;;  %v12136_v17 = vld [vmem:[%s23053_s3 + $0x860] sm:$0xf]  ;;  %6429 = vmatpush.bf16.msrb.mxu3 %v11433_v28  ;;  %v11913_v3 = vor.u32 %v14797_v16, %v11912_v15 }
 0x276   :  { %v12137_v30 = vor.u32 %v14853_v20, %v12136_v17  ;;  %v6217_v8 = vpop.f32.mrf.mxu2  ;;  %v11800_v15 = vld [vmem:[%s23053_s3 + $0x5c0] sm:$0xf]  ;;  %v14825_v17 = vld [vmem:[%s23053_s3 + $0x798] sm:$0xf0]  ;;  %v11296_v20 = vld [vmem:[%s23053_s3 + $0x1d0] sm:$0xf] }
 0x277   :  { %6520 = vmatpush.bf16.msrb.mxu2 %v11437_v2  ;;  %v14769_v2 = vld [vmem:[%s23053_s3 + $0x5d8] sm:$0xf0]  ;;  %v12024_v16 = vld [vmem:[%s23053_s3 + $0x780] sm:$0xf]  ;;  %v14891_v8 = vld [vmem:[%s23053_s3 + $0x9ac] sm:$0xf] }
 0x278   :  { %6497 = vmatpush.bf16.msrb.mxu0 %v12469_v42  ;;  %v14664_v42 = vld [vmem:[%s23053_s3 + $0x290] sm:$0xf0]  ;;  %v12025_v35 = vor.u32 %v14825_v17, %v12024_v16  ;;  %v14895_v16 = vld [vmem:[%s23053_s3 + $0x9c8] sm:$0xf0] }
 0x279   :  { %6510 = vmatpush.bf16.msrb.mxu1 %v11129_v45  ;;  %6430 = vmatpush.bf16.msrb.mxu3 %v11405_v18  ;;  %v11377_v45 = vor.u32 %v14660_v33, %v11374_v34  ;;  %v11381_v22 = vor.u32 %v14664_v42, %v11380_v19  ;;  %v12388_v18 = vld [vmem:[%s23053_s3 + $0xa58] sm:$0xf]  ;;  %v11801_v33 = vor.u32 %v14769_v2, %v11800_v15  ;;  %v12304_v2 = vld [vmem:[%s23053_s3 + $0x9b0] sm:$0xf] }
 0x27b   :  { %6521 = vmatpush.bf16.msrb.mxu2 %v11409_v57  ;;  %v11297_v57 = vor.u32 %v14643_v21, %v11296_v20 }
 0x27c   :  { %6498 = vmatpush.bf16.msrb.mxu0 %v12441_v46  ;;  %v12081_v46 = vor.u32 %v14839_v60, %v12080_v58 }
 0x27d   :  { %6511 = vmatpush.bf16.msrb.mxu1 %v11101_v49  ;;  %6431 = vmatpush.bf16.msrb.mxu3 %v11377_v45  ;;  %v14646_v49 = vld [vmem:[%s23053_s3 + $0x204] sm:$0xf] }
 0x27e   :  { %v11321_v28 = vor.u32 %v14646_v49, %v11318_v63  ;;  %v14762_v45 = vld [vmem:[%s23053_s3 + $0x5a0] sm:$0xf0]  ;;  %v6267_v39 = vpop.f32.mrf.mxu2  ;;  %v14633_v49 = vld [vmem:[%s23053_s3 + $0x19c] sm:$0xf]  ;;  %v11270_v63 = vld [vmem:[%s23053_s3 + $0x1b4] sm:$0xf0] }
 0x27f   :  { %6522 = vmatpush.bf16.msrb.mxu2 %v11381_v22  ;;  %v14898_v22 = vld [vmem:[%s23053_s3 + $0x9e4] sm:$0xf]  ;;  %v19522_v52 = vadd.f32 %v6267_v39, %v19265_v29  ;;  %v11773_v58 = vor.u32 %v14762_v45, %v11772_v6  ;;  %v11968_v29 = vld [vmem:[%s23053_s3 + $0x710] sm:$0xf]  ;;  %v12242_v45 = vld [vmem:[%s23053_s3 + $0x954] sm:$0xf0] }
 0x280   :  { %6499 = vmatpush.bf16.msrb.mxu0 %v12413_v9  ;;  %v19439_v23 = vpop.f32.mrf.mxu0  ;;  %v11829_v9 = vor.u32 %v14776_v1, %v11828_v0  ;;  %v14689_v0 = vld [vmem:[%s23053_s3 + $0x35c] sm:$0xf]  ;;  %v12329_v1 = vor.u32 %v14898_v22, %v12326_v32  ;;  %v11410_v39 = vld [vmem:[%s23053_s3 + $0x2cc] sm:$0xf0] }
 0x281   :  { %6512 = vmatpush.bf16.msrb.mxu1 %v11073_v10  ;;  %v19450_v25 = vpop.f32.mrf.mxu1  ;;  %6432 = vmatpush.bf16.msrb.mxu3 %v11349_v59  ;;  %v12053_v10 = vor.u32 %v14832_v26, %v12052_v43  ;;  %v14755_v59 = vld [vmem:[%s23053_s3 + $0x568] sm:$0xf0]  ;;  %v12332_v43 = vld [vmem:[%s23053_s3 + $0x9e8] sm:$0xf]  ;;  %v14902_v26 = vld [vmem:[%s23053_s3 + $0xa00] sm:$0xf0] }
 0x282   :  { %v11745_v4 = vor.u32 %v14755_v59, %v11744_v44  ;;  %v14881_v22 = vld [vmem:[%s23053_s3 + $0x958] sm:$0xf0]  ;;  %v14870_v59 = vld [vmem:[%s23053_s3 + $0x904] sm:$0xf] }
 0x283   :  { %6500 = vmatmul.bf16.vlgmr.msrb.gmra.mxu0 %v18890_v61  ;;  %6523 = vmatpush.bf16.msrb.mxu2 %v11353_v40  ;;  %v11494_v40 = vld [vmem:[%s23053_s3 + $0x374] sm:$0xf0] }
 0x284   :  { %6544 = vmatpush.bf16.msra.mxu0 %v11941_v11  ;;  %6513 = vmatmul.bf16.vlgmr.msrb.gmra.mxu1 %v18085_v24  ;;  %v11290_v11 = vld [vmem:[%s23053_s3 + $0x1e4] sm:$0xf0] }
 0x285   :  { %6557 = vmatpush.bf16.msra.mxu1 %v12165_v12  ;;  %v14912_v12 = vld [vmem:[%s23053_s3 + $0xa54] sm:$0xf]  ;;  %6433 = vmatpush.bf16.msrb.mxu3 %v11321_v28  ;;  %v11293_v7 = vor.u32 %v14639_v14, %v11290_v11  ;;  %v11273_v28 = vor.u32 %v14633_v49, %v11270_v63  ;;  %v11497_v14 = vor.u32 %v14689_v0, %v11494_v40  ;;  %v11158_v63 = vld [vmem:[%s23053_s3 + $0xd4] sm:$0xf0]  ;;  %v14661_v0 = vld [vmem:[%s23053_s3 + $0x27c] sm:$0xf] }
 0x286   :  { %v12333_v11 = vor.u32 %v14902_v26, %v12332_v43  ;;  %v6269_v15 = vpop.f32.mrf.mxu2  ;;  %v11382_v40 = vld [vmem:[%s23053_s3 + $0x294] sm:$0xf0]  ;;  %v14874_v43 = vld [vmem:[%s23053_s3 + $0x920] sm:$0xf0] }
 0x287   :  { %6524 = vmatpush.bf16.msrb.mxu2 %v11325_v53  ;;  %v11466_v53 = vld [vmem:[%s23053_s3 + $0x33c] sm:$0xf0]  ;;  %v12192_v15 = vld [vmem:[%s23053_s3 + $0x8d0] sm:$0xf] }
 0x288   :  { %6545 = vmatpush.bf16.msra.mxu0 %v11913_v3  ;;  %v14916_v3 = vld [vmem:[%s23053_s3 + $0xa70] sm:$0xf0]  ;;  %v6295_v34 = vpop.f32.mrf.mxu0 }
 0x289   :  { %6558 = vmatpush.bf16.msra.mxu1 %v12137_v30  ;;  %v12385_v30 = vor.u32 %v14912_v12, %v12382_v13  ;;  %v6308_v19 = vpop.f32.mrf.mxu1  ;;  %v12389_v42 = vor.u32 %v14916_v3, %v12388_v18  ;;  %6434 = vmatpush.bf16.msrb.mxu3 %v11293_v7  ;;  %v11242_v12 = vld [vmem:[%s23053_s3 + $0x17c] sm:$0xf0]  ;;  %v14682_v13 = vld [vmem:[%s23053_s3 + $0x324] sm:$0xf]  ;;  %v14884_v7 = vld [vmem:[%s23053_s3 + $0x974] sm:$0xf] }
 0x28a   :  { %v11469_v21 = vor.u32 %v14682_v13, %v11466_v53  ;;  %v12270_v18 = vld [vmem:[%s23053_s3 + $0x98c] sm:$0xf0]  ;;  %v14619_v3 = vld [vmem:[%s23053_s3 + $0x12c] sm:$0xf]  ;;  %v14654_v13 = vld [vmem:[%s23053_s3 + $0x244] sm:$0xf] }
 0x28b   :  { %6525 = vmatpush.bf16.msrb.mxu2 %v11297_v57  ;;  %v14675_v34 = vld [vmem:[%s23053_s3 + $0x2ec] sm:$0xf]  ;;  %v12276_v57 = vld [vmem:[%s23053_s3 + $0x978] sm:$0xf]  ;;  %v12273_v41 = vor.u32 %v14884_v7, %v12270_v18  ;;  %v11354_v53 = vld [vmem:[%s23053_s3 + $0x25c] sm:$0xf0] }
 0x28c   :  { %6546 = vmatpush.bf16.msra.mxu0 %v11885_v47  ;;  %v14818_v47 = vld [vmem:[%s23053_s3 + $0x760] sm:$0xf0]  ;;  %6435 = vmatmul.bf16.vlgmr.msrb.gmra.mxu3 %v18087_v27 }
 0x28d   :  { %6559 = vmatpush.bf16.msra.mxu1 %v12109_v48  ;;  %v12360_v48 = vld [vmem:[%s23053_s3 + $0xa20] sm:$0xf]  ;;  %6479 = vmatpush.bf16.msra.mxu3 %v12385_v30  ;;  %v11997_v60 = vor.u32 %v14818_v47, %v11996_v36  ;;  %v12305_v30 = vor.u32 %v14895_v16, %v12304_v2  ;;  %v14612_v36 = vld [vmem:[%s23053_s3 + $0xf4] sm:$0xf]  ;;  %v12277_v47 = vor.u32 %v14888_v38, %v12276_v57  ;;  %v14867_v2 = vld [vmem:[%s23053_s3 + $0x8e8] sm:$0xf0] }
 0x28e   :  { %6526 = vmatmul.bf16.vlgmr.msrb.gmra.mxu2 %v18087_v27  ;;  %v14591_v57 = vld [vmem:[%s23053_s3 + $0x4c] sm:$0xf] }
 0x28f   :  { %6570 = vmatpush.bf16.msra.mxu2 %v12389_v42  ;;  %v14877_v42 = vld [vmem:[%s23053_s3 + $0x93c] sm:$0xf] }
 0x290   :  { %6547 = vmatpush.bf16.msra.mxu0 %v11857_v56  ;;  %v12361_v56 = vor.u32 %v14909_v51, %v12360_v48  ;;  %v11186_v48 = vld [vmem:[%s23053_s3 + $0x10c] sm:$0xf0]  ;;  %v14668_v51 = vld [vmem:[%s23053_s3 + $0x2b4] sm:$0xf] }
 0x291   :  { %6560 = vmatpush.bf16.msra.mxu1 %v12081_v46  ;;  %v14811_v46 = vld [vmem:[%s23053_s3 + $0x728] sm:$0xf0]  ;;  %6480 = vmatpush.bf16.msra.mxu3 %v12357_v54  ;;  %v12248_v54 = vld [vmem:[%s23053_s3 + $0x940] sm:$0xf]  ;;  %v11189_v32 = vor.u32 %v14612_v36, %v11186_v48  ;;  %v11413_v44 = vor.u32 %v14668_v51, %v11410_v39  ;;  %v14734_v39 = vld [vmem:[%s23053_s3 + $0x4c0] sm:$0xf0] }
 0x292   :  { %v11969_v5 = vor.u32 %v14811_v46, %v11968_v29  ;;  %v14605_v29 = vld [vmem:[%s23053_s3 + $0xbc] sm:$0xf]  ;;  %v12249_v49 = vor.u32 %v14881_v22, %v12248_v54  ;;  %v14584_v54 = vld [vmem:[%s23053_s3 + $0x14] sm:$0xf]  ;;  %v11074_v22 = vld [vmem:[%s23053_s3 + $0x2c] sm:$0xf0] }
 0x293   :  { %6571 = vmatpush.bf16.msra.mxu2 %v12361_v56  ;;  %v12214_v56 = vld [vmem:[%s23053_s3 + $0x91c] sm:$0xf0] }
 0x294   :  { %6548 = vmatpush.bf16.msra.mxu0 %v11829_v9  ;;  %v12298_v9 = vld [vmem:[%s23053_s3 + $0x9c4] sm:$0xf0]  ;;  %v12217_v26 = vor.u32 %v14870_v59, %v12214_v56  ;;  %v14857_v59 = vld [vmem:[%s23053_s3 + $0x89c] sm:$0xf]  ;;  %v12166_v56 = vld [vmem:[%s23053_s3 + $0x8b4] sm:$0xf0] }
 0x295   :  { %6561 = vmatpush.bf16.msra.mxu1 %v12053_v10  ;;  %v14626_v10 = vld [vmem:[%s23053_s3 + $0x164] sm:$0xf]  ;;  %6481 = vmatpush.bf16.msra.mxu3 %v12329_v1  ;;  %v12301_v17 = vor.u32 %v14891_v8, %v12298_v9  ;;  %v12220_v1 = vld [vmem:[%s23053_s3 + $0x908] sm:$0xf]  ;;  %v11716_v8 = vld [vmem:[%s23053_s3 + $0x518] sm:$0xf] }
 0x296   :  { %v11245_v20 = vor.u32 %v14626_v10, %v11242_v12  ;;  %v14748_v9 = vld [vmem:[%s23053_s3 + $0x530] sm:$0xf0]  ;;  %v12221_v10 = vor.u32 %v14874_v43, %v12220_v1  ;;  %v11130_v12 = vld [vmem:[%s23053_s3 + $0x9c] sm:$0xf0]  ;;  %v11077_v1 = vor.u32 %v14584_v54, %v11074_v22 }
 0x297   :  { %6572 = vmatpush.bf16.msra.mxu2 %v12333_v11  ;;  %v14598_v11 = vld [vmem:[%s23053_s3 + $0x84] sm:$0xf]  ;;  %v11717_v7 = vor.u32 %v14748_v9, %v11716_v8  ;;  %v12138_v9 = vld [vmem:[%s23053_s3 + $0x87c] sm:$0xf0] }
 0x298   :  { %6549 = vmatpush.bf16.msra.mxu0 %v11801_v33  ;;  %v11214_v33 = vld [vmem:[%s23053_s3 + $0x144] sm:$0xf0]  ;;  %v11133_v18 = vor.u32 %v14598_v11, %v11130_v12  ;;  %v12362_v11 = vld [vmem:[%s23053_s3 + $0xa3c] sm:$0xf0]  ;;  %v14724_v12 = vld [vmem:[%s23053_s3 + $0x474] sm:$0xf] }
 0x299   :  { %6562 = vmatpush.bf16.msra.mxu1 %v12025_v35  ;;  %v11438_v35 = vld [vmem:[%s23053_s3 + $0x304] sm:$0xf0]  ;;  %6482 = vmatpush.bf16.msra.mxu3 %v12301_v17  ;;  %v11217_v6 = vor.u32 %v14619_v3, %v11214_v33  ;;  %v14745_v17 = vld [vmem:[%s23053_s3 + $0x51c] sm:$0xf]  ;;  %v12193_v33 = vor.u32 %v14867_v2, %v12192_v15 }
 0x29a   :  { %v11441_v19 = vor.u32 %v14675_v34, %v11438_v35  ;;  %v11688_v34 = vld [vmem:[%s23053_s3 + $0x4e0] sm:$0xf]  ;;  %v14741_v35 = vld [vmem:[%s23053_s3 + $0x4f8] sm:$0xf0] }
 0x29b   :  { %6573 = vmatpush.bf16.msra.mxu2 %v12305_v30  ;;  %v11357_v30 = vor.u32 %v14654_v13, %v11354_v53  ;;  %v11689_v36 = vor.u32 %v14741_v35, %v11688_v34  ;;  %v11634_v13 = vld [vmem:[%s23053_s3 + $0x48c] sm:$0xf0]  ;;  %v14717_v35 = vld [vmem:[%s23053_s3 + $0x43c] sm:$0xf] }
 0x29c   :  { %6550 = vmatpush.bf16.msra.mxu0 %v11773_v58  ;;  %v12245_v58 = vor.u32 %v14877_v42, %v12242_v45  ;;  %v14738_v42 = vld [vmem:[%s23053_s3 + $0x4e4] sm:$0xf]  ;;  %v11690_v45 = vld [vmem:[%s23053_s3 + $0x4fc] sm:$0xf0] }
 0x29d   :  { %6563 = vmatpush.bf16.msra.mxu1 %v11997_v60  ;;  %6483 = vmatpush.bf16.msra.mxu3 %v12273_v41  ;;  %v11102_v41 = vld [vmem:[%s23053_s3 + $0x64] sm:$0xf0] }
 0x29e   :  { %v11105_v48 = vor.u32 %v14591_v57, %v11102_v41  ;;  %v11606_v57 = vld [vmem:[%s23053_s3 + $0x454] sm:$0xf0] }
 0x29f   :  { %6574 = vmatpush.bf16.msra.mxu2 %v12277_v47  ;;  %v11660_v47 = vld [vmem:[%s23053_s3 + $0x4a8] sm:$0xf] }
 0x2a0   :  { %6551 = vmatpush.bf16.msra.mxu0 %v11745_v4  ;;  %v19633_v60 = vpop.f32.mrf.mxu0  ;;  %v14863_v4 = vld [vmem:[%s23053_s3 + $0x8cc] sm:$0xf] }
 0x2a1   :  { %6564 = vmatpush.bf16.msra.mxu1 %v11969_v5  ;;  %v19644_v46 = vpop.f32.mrf.mxu1  ;;  %6484 = vmatpush.bf16.msra.mxu3 %v12245_v58  ;;  %v11161_v5 = vor.u32 %v14605_v29, %v11158_v63  ;;  %v11693_v58 = vor.u32 %v14738_v42, %v11690_v45  ;;  %v14913_v29 = vld [vmem:[%s23053_s3 + $0xa5c] sm:$0xf]  ;;  %v11661_v63 = vor.u32 %v14734_v39, %v11660_v47  ;;  %v14836_v42 = vld [vmem:[%s23053_s3 + $0x7f4] sm:$0xf]  ;;  %v11578_v39 = vld [vmem:[%s23053_s3 + $0x41c] sm:$0xf0] }
 0x2a2   :  { %v11609_v45 = vor.u32 %v14717_v35, %v11606_v57  ;;  %v14892_v47 = vld [vmem:[%s23053_s3 + $0x9b4] sm:$0xf] }
 0x2a3   :  { %6552 = vmatmul.bf16.vlgmr.msra.gmra.mxu0 %v18245_v62  ;;  %6575 = vmatpush.bf16.msra.mxu2 %v12249_v49  ;;  %v12390_v49 = vld [vmem:[%s23053_s3 + $0xa74] sm:$0xf0] }
 0x2a4   :  { %6596 = vmatpush.bf16.msrb.mxu0 %v11273_v28  ;;  %6565 = vmatmul.bf16.vlgmr.msra.gmra.mxu1 %v18253_v50  ;;  %v11385_v28 = vor.u32 %v14661_v0, %v11382_v40  ;;  %v14731_v0 = vld [vmem:[%s23053_s3 + $0x4ac] sm:$0xf]  ;;  %v11662_v40 = vld [vmem:[%s23053_s3 + $0x4c4] sm:$0xf0] }
 0x2a5   :  { %6609 = vmatpush.bf16.msrb.mxu1 %v11497_v14  ;;  %v12186_v14 = vld [vmem:[%s23053_s3 + $0x8e4] sm:$0xf0]  ;;  %6485 = vmatpush.bf16.msra.mxu3 %v12217_v26  ;;  %v12169_v26 = vor.u32 %v14857_v59, %v12166_v56  ;;  %v11665_v8 = vor.u32 %v14731_v0, %v11662_v40  ;;  %v14706_v56 = vld [vmem:[%s23053_s3 + $0x3e0] sm:$0xf0]  ;;  %v12054_v40 = vld [vmem:[%s23053_s3 + $0x7d4] sm:$0xf0] }
 0x2a6   :  { %v12189_v16 = vor.u32 %v14863_v4, %v12186_v14  ;;  %v12393_v4 = vor.u32 %v14913_v29, %v12390_v49  ;;  %v14850_v14 = vld [vmem:[%s23053_s3 + $0x864] sm:$0xf]  ;;  %v11548_v59 = vld [vmem:[%s23053_s3 + $0x3c8] sm:$0xf]  ;;  %v14829_v29 = vld [vmem:[%s23053_s3 + $0x7bc] sm:$0xf] }
 0x2a7   :  { %6576 = vmatpush.bf16.msra.mxu2 %v12221_v10  ;;  %v14906_v10 = vld [vmem:[%s23053_s3 + $0xa24] sm:$0xf]  ;;  %v12141_v15 = vor.u32 %v14850_v14, %v12138_v9  ;;  %v12057_v14 = vor.u32 %v14829_v29, %v12054_v40  ;;  %v14699_v9 = vld [vmem:[%s23053_s3 + $0x3a8] sm:$0xf0]  ;;  %v14864_v40 = vld [vmem:[%s23053_s3 + $0x8d4] sm:$0xf] }
 0x2a8   :  { %6597 = vmatpush.bf16.msrb.mxu0 %v11245_v20  ;;  %v11718_v20 = vld [vmem:[%s23053_s3 + $0x534] sm:$0xf0]  ;;  %v12365_v2 = vor.u32 %v14906_v10, %v12362_v11  ;;  %v14972_v11 = vld [vmem:[%s23053_s3 + $0xc30] sm:$0xf0]  ;;  %v14958_v29 = vld [vmem:[%s23053_s3 + $0xbc0] sm:$0xf0] }
 0x2a9   :  { %6610 = vmatpush.bf16.msrb.mxu1 %v11469_v21  ;;  %v6347_v21 = vpop.f32.mrf.mxu0  ;;  %v6360_v3 = vpop.f32.mrf.mxu1  ;;  %v11721_v38 = vor.u32 %v14745_v17, %v11718_v20  ;;  %6486 = vmatpush.bf16.msra.mxu3 %v12189_v16  ;;  %v11604_v16 = vld [vmem:[%s23053_s3 + $0x438] sm:$0xf]  ;;  %v14720_v17 = vld [vmem:[%s23053_s3 + $0x450] sm:$0xf0]  ;;  %v14843_v20 = vld [vmem:[%s23053_s3 + $0x82c] sm:$0xf] }
 0x2aa   :  { %v11637_v21 = vor.u32 %v14724_v12, %v11634_v13  ;;  %v12110_v3 = vld [vmem:[%s23053_s3 + $0x844] sm:$0xf0]  ;;  %v12612_v10 = vld [vmem:[%s23053_s3 + $0xc18] sm:$0xf]  ;;  %v14822_v13 = vld [vmem:[%s23053_s3 + $0x784] sm:$0xf] }
 0x2ab   :  { %6577 = vmatpush.bf16.msra.mxu2 %v12193_v33  ;;  %v12334_v33 = vld [vmem:[%s23053_s3 + $0xa04] sm:$0xf0]  ;;  %v12113_v41 = vor.u32 %v14843_v20, %v12110_v3  ;;  %v12614_v3 = vld [vmem:[%s23053_s3 + $0xc34] sm:$0xf0] }
 0x2ac   :  { %6598 = vmatpush.bf16.msrb.mxu0 %v11217_v6  ;;  %v14647_v6 = vld [vmem:[%s23053_s3 + $0x20c] sm:$0xf]  ;;  %6487 = vmatmul.bf16.vlgmr.msra.gmra.mxu3 %v18531_v37 }
 0x2ad   :  { %6611 = vmatpush.bf16.msrb.mxu1 %v11441_v19  ;;  %v11326_v19 = vld [vmem:[%s23053_s3 + $0x224] sm:$0xf0]  ;;  %6531 = vmatpush.bf16.msrb.mxu3 %v11717_v7  ;;  %v6228_v7 = vpop.f32.mrf.mxu3 }
 0x2ae   :  { %v11329_v51 = vor.u32 %v14647_v6, %v11326_v19  ;;  %6578 = vmatmul.bf16.vlgmr.msra.gmra.mxu2 %v18531_v37  ;;  %v19806_v34 = vadd.f32 %v6228_v7, %v19413_v55  ;;  %v11576_v19 = vld [vmem:[%s23053_s3 + $0x400] sm:$0xf]  ;;  %v14713_v55 = vld [vmem:[%s23053_s3 + $0x418] sm:$0xf0] }
 0x2af   :  { %6622 = vmatpush.bf16.msrb.mxu2 %v11721_v38  ;;  %v11605_v38 = vor.u32 %v14720_v17, %v11604_v16  ;;  %v11577_v22 = vor.u32 %v14713_v55, %v11576_v19  ;;  %v14696_v16 = vld [vmem:[%s23053_s3 + $0x394] sm:$0xf]  ;;  %v11522_v17 = vld [vmem:[%s23053_s3 + $0x3ac] sm:$0xf0]  ;;  %v14969_v7 = vld [vmem:[%s23053_s3 + $0xc1c] sm:$0xf] }
 0x2b0   :  { %6599 = vmatpush.bf16.msrb.mxu0 %v11189_v32  ;;  %v14640_v32 = vld [vmem:[%s23053_s3 + $0x1d4] sm:$0xf]  ;;  %v12584_v19 = vld [vmem:[%s23053_s3 + $0xbe0] sm:$0xf]  ;;  %v14965_v55 = vld [vmem:[%s23053_s3 + $0xbf8] sm:$0xf0] }
 0x2b1   :  { %6612 = vmatpush.bf16.msrb.mxu1 %v11413_v44  ;;  %v11298_v44 = vld [vmem:[%s23053_s3 + $0x1ec] sm:$0xf0]  ;;  %6532 = vmatpush.bf16.msrb.mxu3 %v11689_v36 }
 0x2b2   :  { %v11301_v43 = vor.u32 %v14640_v32, %v11298_v44  ;;  %v12082_v36 = vld [vmem:[%s23053_s3 + $0x80c] sm:$0xf0] }
 0x2b3   :  { %6623 = vmatpush.bf16.msrb.mxu2 %v11693_v58  ;;  %v12085_v32 = vor.u32 %v14836_v42, %v12082_v36  ;;  %v14815_v42 = vld [vmem:[%s23053_s3 + $0x74c] sm:$0xf]  ;;  %v12617_v36 = vor.u32 %v14969_v7, %v12614_v3  ;;  %v14948_v7 = vld [vmem:[%s23053_s3 + $0xb74] sm:$0xf]  ;;  %v12530_v3 = vld [vmem:[%s23053_s3 + $0xb8c] sm:$0xf0] }
 0x2b4   :  { %6600 = vmatpush.bf16.msrb.mxu0 %v11161_v5  ;;  %v11632_v5 = vld [vmem:[%s23053_s3 + $0x470] sm:$0xf] }
 0x2b5   :  { %6613 = vmatpush.bf16.msrb.mxu1 %v11385_v28  ;;  %v14727_v28 = vld [vmem:[%s23053_s3 + $0x488] sm:$0xf0]  ;;  %6533 = vmatpush.bf16.msrb.mxu3 %v11661_v63  ;;  %v6230_v63 = vpop.f32.mrf.mxu3 }
 0x2b6   :  { %v11633_v53 = vor.u32 %v14727_v28, %v11632_v5  ;;  %v11549_v5 = vor.u32 %v14706_v56, %v11548_v59  ;;  %v11520_v28 = vld [vmem:[%s23053_s3 + $0x390] sm:$0xf] }
 0x2b7   :  { %6624 = vmatpush.bf16.msrb.mxu2 %v11665_v8 }
 0x2b8   :  { %6601 = vmatpush.bf16.msrb.mxu0 %v11133_v18  ;;  %v19792_v18 = vpop.f32.mrf.mxu2 }
 0x2b9   :  { %6614 = vmatpush.bf16.msrb.mxu1 %v11357_v30  ;;  %v14899_v30 = vld [vmem:[%s23053_s3 + $0x9ec] sm:$0xf]  ;;  %6534 = vmatpush.bf16.msrb.mxu3 %v11633_v53  ;;  %v12026_v53 = vld [vmem:[%s23053_s3 + $0x79c] sm:$0xf0] }
 0x2ba   :  { %v12337_v6 = vor.u32 %v14899_v30, %v12334_v33  ;;  %v12613_v33 = vor.u32 %v14972_v11, %v12612_v10  ;;  %v12029_v35 = vor.u32 %v14822_v13, %v12026_v53  ;;  %v12528_v53 = vld [vmem:[%s23053_s3 + $0xb70] sm:$0xf] }
 0x2bb   :  { %6625 = vmatpush.bf16.msrb.mxu2 %v11637_v21  ;;  %v11521_v21 = vor.u32 %v14699_v9, %v11520_v28 }
 0x2bc   :  { %6602 = vmatpush.bf16.msrb.mxu0 %v11105_v48  ;;  %v12306_v48 = vld [vmem:[%s23053_s3 + $0x9cc] sm:$0xf0] }
 0x2bd   :  { %6615 = vmatpush.bf16.msrb.mxu1 %v11329_v51  ;;  %v14710_v51 = vld [vmem:[%s23053_s3 + $0x404] sm:$0xf]  ;;  %6535 = vmatpush.bf16.msrb.mxu3 %v11605_v38  ;;  %v12309_v44 = vor.u32 %v14892_v47, %v12306_v48  ;;  %v11525_v38 = vor.u32 %v14696_v16, %v11522_v17  ;;  %v11998_v47 = vld [vmem:[%s23053_s3 + $0x764] sm:$0xf0]  ;;  %v14871_v48 = vld [vmem:[%s23053_s3 + $0x90c] sm:$0xf] }
 0x2be   :  { %v11581_v49 = vor.u32 %v14710_v51, %v11578_v39  ;;  %v12222_v51 = vld [vmem:[%s23053_s3 + $0x924] sm:$0xf0]  ;;  %v14962_v39 = vld [vmem:[%s23053_s3 + $0xbe4] sm:$0xf]  ;;  %v12001_v59 = vor.u32 %v14815_v42, %v11998_v47  ;;  %v12533_v42 = vor.u32 %v14948_v7, %v12530_v3  ;;  %v14735_v47 = vld [vmem:[%s23053_s3 + $0x4c8] sm:$0xf0] }
 0x2bf   :  { %6626 = vmatpush.bf16.msrb.mxu2 %v11609_v45  ;;  %v12225_v56 = vor.u32 %v14871_v48, %v12222_v51  ;;  %v14686_v17 = vld [vmem:[%s23053_s3 + $0x340] sm:$0xf0]  ;;  %v14941_v48 = vld [vmem:[%s23053_s3 + $0xb3c] sm:$0xf]  ;;  %v12502_v51 = vld [vmem:[%s23053_s3 + $0xb54] sm:$0xf0] }
 0x2c0   :  { %6603 = vmatpush.bf16.msrb.mxu0 %v11077_v1  ;;  %v19838_v54 = vpop.f32.mrf.mxu0  ;;  %v6321_v0 = vpop.f32.mrf.mxu2  ;;  %v14885_v1 = vld [vmem:[%s23053_s3 + $0x97c] sm:$0xf]  ;;  %v14923_v3 = vld [vmem:[%s23053_s3 + $0xaa8] sm:$0xf0] }
 0x2c1   :  { %6616 = vmatpush.bf16.msrb.mxu1 %v11301_v43  ;;  %v19840_v58 = vpop.f32.mrf.mxu1  ;;  %v12278_v43 = vld [vmem:[%s23053_s3 + $0x994] sm:$0xf0]  ;;  %6536 = vmatpush.bf16.msrb.mxu3 %v11577_v22 }
 0x2c2   :  { %v12281_v8 = vor.u32 %v14885_v1, %v12278_v43  ;;  %v12194_v1 = vld [vmem:[%s23053_s3 + $0x8ec] sm:$0xf0]  ;;  %v11500_v43 = vld [vmem:[%s23053_s3 + $0x360] sm:$0xf] }
 0x2c3   :  { %6604 = vmatmul.bf16.vlgmr.msrb.gmra.mxu0 %v18085_v24  ;;  %6627 = vmatpush.bf16.msrb.mxu2 %v11581_v49  ;;  %v14808_v49 = vld [vmem:[%s23053_s3 + $0x714] sm:$0xf]  ;;  %v12197_v10 = vor.u32 %v14864_v40, %v12194_v1 }
 0x2c4   :  { %6648 = vmatpush.bf16.msra.mxu0 %v12169_v26  ;;  %6617 = vmatmul.bf16.vlgmr.msrb.gmra.mxu1 %v18087_v27  ;;  %v14703_v26 = vld [vmem:[%s23053_s3 + $0x3cc] sm:$0xf]  ;;  %v14728_v40 = vld [vmem:[%s23053_s3 + $0x490] sm:$0xf0] }
 0x2c5   :  { %6661 = vmatpush.bf16.msra.mxu1 %v12393_v4  ;;  %v11550_v4 = vld [vmem:[%s23053_s3 + $0x3e4] sm:$0xf0]  ;;  %6537 = vmatpush.bf16.msrb.mxu3 %v11549_v5 }
 0x2c6   :  { %v11553_v12 = vor.u32 %v14703_v26, %v11550_v4  ;;  %v11724_v26 = vld [vmem:[%s23053_s3 + $0x520] sm:$0xf]  ;;  %v14749_v4 = vld [vmem:[%s23053_s3 + $0x538] sm:$0xf0] }
 0x2c7   :  { %v11725_v13 = vor.u32 %v14749_v4, %v11724_v26 }
 0x2c8   :  { %6649 = vmatpush.bf16.msra.mxu0 %v12141_v15  ;;  %v14878_v15 = vld [vmem:[%s23053_s3 + $0x944] sm:$0xf]  ;;  %v6399_v20 = vpop.f32.mrf.mxu0  ;;  %6628 = vmatpush.bf16.msrb.mxu2 %v11553_v12 }
 0x2c9   :  { %6662 = vmatpush.bf16.msra.mxu1 %v12365_v2  ;;  %v12250_v2 = vld [vmem:[%s23053_s3 + $0x95c] sm:$0xf0]  ;;  %v6412_v30 = vpop.f32.mrf.mxu1  ;;  %6538 = vmatpush.bf16.msrb.mxu3 %v11521_v21  ;;  %v11696_v20 = vld [vmem:[%s23053_s3 + $0x4e8] sm:$0xf]  ;;  %v14742_v21 = vld [vmem:[%s23053_s3 + $0x500] sm:$0xf0] }
 0x2ca   :  { %v12253_v57 = vor.u32 %v14878_v15, %v12250_v2  ;;  %v14951_v15 = vld [vmem:[%s23053_s3 + $0xb88] sm:$0xf0]  ;;  %v11472_v2 = vld [vmem:[%s23053_s3 + $0x328] sm:$0xf] }
 0x2cb   :  { %v12529_v30 = vor.u32 %v14951_v15, %v12528_v53  ;;  %v14721_v53 = vld [vmem:[%s23053_s3 + $0x458] sm:$0xf0]  ;;  %v14927_v15 = vld [vmem:[%s23053_s3 + $0xacc] sm:$0xf] }
 0x2cc   :  { %6650 = vmatpush.bf16.msra.mxu0 %v12113_v41  ;;  %v6280_v41 = vpop.f32.mrf.mxu3  ;;  %6629 = vmatpush.bf16.msrb.mxu2 %v11525_v38  ;;  %v14944_v38 = vld [vmem:[%s23053_s3 + $0xb50] sm:$0xf0] }
 0x2cd   :  { %6663 = vmatpush.bf16.msra.mxu1 %v12337_v6  ;;  %v19902_v6 = vpop.f32.mrf.mxu2  ;;  %v6281_v45 = vadd.f32 %v6280_v41, %v19522_v52  ;;  %v12586_v52 = vld [vmem:[%s23053_s3 + $0xbfc] sm:$0xf0]  ;;  %6583 = vmatpush.bf16.msra.mxu3 %v12613_v33  ;;  %v12500_v33 = vld [vmem:[%s23053_s3 + $0xb38] sm:$0xf]  ;;  %v11444_v41 = vld [vmem:[%s23053_s3 + $0x2f0] sm:$0xf] }
 0x2ce   :  { %6539 = vmatmul.bf16.vlgmr.msrb.gmra.mxu3 %v18095_v31  ;;  %v12589_v0 = vor.u32 %v14962_v39, %v12586_v52  ;;  %v12501_v39 = vor.u32 %v14944_v38, %v12500_v33  ;;  %v14658_v38 = vld [vmem:[%s23053_s3 + $0x260] sm:$0xf0] }
 0x2cf   :  { %v6294_v22 = vadd.f32 %v19439_v23, %v6281_v45  ;;  %v11970_v23 = vld [vmem:[%s23053_s3 + $0x72c] sm:$0xf0]  ;;  %6630 = vmatmul.bf16.vlgmr.msrb.gmra.mxu2 %v18095_v31  ;;  %v14679_v45 = vld [vmem:[%s23053_s3 + $0x308] sm:$0xf0] }
 0x2d0   :  { %6651 = vmatpush.bf16.msra.mxu0 %v12085_v32  ;;  %v12585_v32 = vor.u32 %v14965_v55, %v12584_v19  ;;  %6674 = vmatpush.bf16.msra.mxu2 %v12617_v36  ;;  %v11973_v9 = vor.u32 %v14808_v49, %v11970_v23  ;;  %v20008_v19 = vld [vmem:[%s23054_s4] sm:$0xff]  ;;  %v11668_v36 = vld [vmem:[%s23053_s3 + $0x4b0] sm:$0xf]  ;;  %v12505_v49 = vor.u32 %v14941_v48, %v12502_v51 }
 0x2d1   :  { %6664 = vmatpush.bf16.msra.mxu1 %v12309_v44  ;;  %v12556_v44 = vld [vmem:[%s23053_s3 + $0xba8] sm:$0xf]  ;;  %v6307_v63 = vadd.f32 %v19450_v25, %v6294_v22  ;;  %v14693_v25 = vld [vmem:[%s23053_s3 + $0x378] sm:$0xf0]  ;;  %v4113_v55 = vperm.slane %v20008_v19, 2  ;;  %v11445_v22 = vor.u32 %v14679_v45, %v11444_v41 }
 0x2d2   :  { %6584 = vmatpush.bf16.msra.mxu3 %v12585_v32  ;;  %v12557_v28 = vor.u32 %v14958_v29, %v12556_v44  ;;  %v11669_v32 = vor.u32 %v14735_v47, %v11668_v36  ;;  %v11416_v29 = vld [vmem:[%s23053_s3 + $0x2b8] sm:$0xf]  ;;  %v11584_v41 = vld [vmem:[%s23053_s3 + $0x408] sm:$0xf]  ;;  %v12418_v45 = vld [vmem:[%s23053_s3 + $0xaac] sm:$0xf0] }
 0x2d3   :  { %v19963_v5 = vadd.f32 %v19792_v18, %v6307_v63  ;;  %v11501_v18 = vor.u32 %v14693_v25, %v11500_v43  ;;  %v14672_v63 = vld [vmem:[%s23053_s3 + $0x2d0] sm:$0xf0]  ;;  %v14934_v43 = vld [vmem:[%s23053_s3 + $0xb04] sm:$0xf]  ;;  %v12474_v25 = vld [vmem:[%s23053_s3 + $0xb1c] sm:$0xf0] }
 0x2d4   :  { %6652 = vmatpush.bf16.msra.mxu0 %v12057_v14  ;;  %v14955_v14 = vld [vmem:[%s23053_s3 + $0xbac] sm:$0xf]  ;;  %v6282_v11 = vpop.f32.mrf.mxu3  ;;  %6675 = vmatpush.bf16.msra.mxu2 %v12589_v0  ;;  %v11640_v0 = vld [vmem:[%s23053_s3 + $0x478] sm:$0xf]  ;;  %v11948_v51 = vld [vmem:[%s23053_s3 + $0x6e0] sm:$0xf] }
 0x2d5   :  { %6665 = vmatpush.bf16.msra.mxu1 %v12281_v8  ;;  %v12558_v8 = vld [vmem:[%s23053_s3 + $0xbc4] sm:$0xf0]  ;;  %v6373_v12 = vpop.f32.mrf.mxu2 }
 0x2d6   :  { %v12561_v16 = vor.u32 %v14955_v14, %v12558_v8  ;;  %6585 = vmatpush.bf16.msra.mxu3 %v12557_v28  ;;  %v11417_v14 = vor.u32 %v14672_v63, %v11416_v29  ;;  %v11641_v8 = vor.u32 %v14728_v40, %v11640_v0  ;;  %v12477_v12 = vor.u32 %v14934_v43, %v12474_v25  ;;  %v11332_v29 = vld [vmem:[%s23053_s3 + $0x210] sm:$0xf]  ;;  %v14651_v63 = vld [vmem:[%s23053_s3 + $0x228] sm:$0xf0]  ;;  %v14798_v43 = vld [vmem:[%s23053_s3 + $0x6c0] sm:$0xf0] }
 0x2d7   :  { %v11556_v0 = vld [vmem:[%s23053_s3 + $0x3d0] sm:$0xf]  ;;  %v14707_v40 = vld [vmem:[%s23053_s3 + $0x3e8] sm:$0xf0] }
 0x2d8   :  { %6653 = vmatpush.bf16.msra.mxu0 %v12029_v35  ;;  %v11473_v35 = vor.u32 %v14686_v17, %v11472_v2  ;;  %6676 = vmatpush.bf16.msra.mxu2 %v12561_v16 }
 0x2d9   :  { %6666 = vmatpush.bf16.msra.mxu1 %v12253_v57  ;;  %v11697_v57 = vor.u32 %v14742_v21, %v11696_v20  ;;  %v12416_v20 = vld [vmem:[%s23053_s3 + $0xa90] sm:$0xf] }
 0x2da   :  { %6586 = vmatpush.bf16.msra.mxu3 %v12529_v30  ;;  %v11942_v30 = vld [vmem:[%s23053_s3 + $0x6f4] sm:$0xf0]  ;;  %v12417_v48 = vor.u32 %v14923_v3, %v12416_v20  ;;  %v14791_v20 = vld [vmem:[%s23053_s3 + $0x688] sm:$0xf0] }
 0x2dc   :  { %6654 = vmatpush.bf16.msra.mxu0 %v12001_v59  ;;  %v6332_v52 = vpop.f32.mrf.mxu3  ;;  %v12472_v59 = vld [vmem:[%s23053_s3 + $0xb00] sm:$0xf]  ;;  %6677 = vmatpush.bf16.msra.mxu2 %v12533_v42  ;;  %v14920_v42 = vld [vmem:[%s23053_s3 + $0xa94] sm:$0xf] }
 0x2dd   :  { %6667 = vmatpush.bf16.msra.mxu1 %v12225_v56  ;;  %v6333_v44 = vadd.f32 %v6332_v52, %v4113_v55  ;;  %v14937_v56 = vld [vmem:[%s23053_s3 + $0xb18] sm:$0xf0]  ;;  %v20037_v23 = vpop.f32.mrf.mxu2  ;;  %v14714_v55 = vld [vmem:[%s23053_s3 + $0x420] sm:$0xf0] }
 0x2de   :  { %6587 = vmatpush.bf16.msra.mxu3 %v12501_v39  ;;  %v12473_v28 = vor.u32 %v14937_v56, %v12472_v59  ;;  %v14805_v39 = vld [vmem:[%s23053_s3 + $0x6f8] sm:$0xf0]  ;;  %v14794_v59 = vld [vmem:[%s23053_s3 + $0x6a4] sm:$0xf]  ;;  %v11914_v56 = vld [vmem:[%s23053_s3 + $0x6bc] sm:$0xf0] }
 0x2df   :  { %v6346_v1 = vadd.f32 %v19633_v60, %v6333_v44  ;;  %v12444_v60 = vld [vmem:[%s23053_s3 + $0xac8] sm:$0xf]  ;;  %v12421_v44 = vor.u32 %v14920_v42, %v12418_v45  ;;  %v11917_v25 = vor.u32 %v14794_v59, %v11914_v56  ;;  %v11864_v42 = vld [vmem:[%s23053_s3 + $0x638] sm:$0xf]  ;;  %v14784_v45 = vld [vmem:[%s23053_s3 + $0x650] sm:$0xf0] }
 0x2e0   :  { %6655 = vmatpush.bf16.msra.mxu0 %v11973_v9  ;;  %v20055_v26 = vpop.f32.mrf.mxu0  ;;  %v14930_v9 = vld [vmem:[%s23053_s3 + $0xae0] sm:$0xf0]  ;;  %6678 = vmatpush.bf16.msra.mxu2 %v12505_v49  ;;  %v11949_v49 = vor.u32 %v14805_v39, %v11948_v51  ;;  %v14773_v51 = vld [vmem:[%s23053_s3 + $0x5fc] sm:$0xf]  ;;  %v11830_v39 = vld [vmem:[%s23053_s3 + $0x614] sm:$0xf0] }
 0x2e1   :  { %6668 = vmatpush.bf16.msra.mxu1 %v12197_v10  ;;  %v20057_v4 = vpop.f32.mrf.mxu1  ;;  %v11388_v10 = vld [vmem:[%s23053_s3 + $0x280] sm:$0xf]  ;;  %v6359_v11 = vadd.f32 %v19644_v46, %v6346_v1  ;;  %v12446_v46 = vld [vmem:[%s23053_s3 + $0xae4] sm:$0xf0]  ;;  %v12445_v16 = vor.u32 %v14930_v9, %v12444_v60  ;;  %v11304_v9 = vld [vmem:[%s23053_s3 + $0x1d8] sm:$0xf] }
 0x2e2   :  { %6588 = vmatpush.bf16.msra.mxu3 %v12473_v28  ;;  %v12449_v33 = vor.u32 %v14927_v15, %v12446_v46  ;;  %v11920_v1 = vld [vmem:[%s23053_s3 + $0x6a8] sm:$0xf]  ;;  %v14787_v28 = vld [vmem:[%s23053_s3 + $0x66c] sm:$0xf]  ;;  %v12620_v15 = vld [vmem:[%s23053_s3 + $0xc20] sm:$0xf] }
 0x2e3   :  { %6656 = vmatmul.bf16.vlgmr.msra.gmra.mxu0 %v18253_v50  ;;  %v20085_v2 = vadd.f32 %v19902_v6, %v6359_v11  ;;  %v14801_v6 = vld [vmem:[%s23053_s3 + $0x6dc] sm:$0xf]  ;;  %v11886_v60 = vld [vmem:[%s23053_s3 + $0x684] sm:$0xf0]  ;;  %v11921_v11 = vor.u32 %v14798_v43, %v11920_v1  ;;  %v14959_v59 = vld [vmem:[%s23053_s3 + $0xbc8] sm:$0xf0] }
 0x2e4   :  { %6700 = vmatpush.bf16.msrb.mxu0 %v11501_v18  ;;  %6669 = vmatmul.bf16.vlgmr.msra.gmra.mxu1 %v18531_v37  ;;  %v14665_v18 = vld [vmem:[%s23053_s3 + $0x298] sm:$0xf0]  ;;  %v6334_v17 = vpop.f32.mrf.mxu3  ;;  %v11945_v52 = vor.u32 %v14801_v6, %v11942_v30  ;;  %v14780_v30 = vld [vmem:[%s23053_s3 + $0x634] sm:$0xf]  ;;  %v11836_v56 = vld [vmem:[%s23053_s3 + $0x600] sm:$0xf] }
 0x2e5   :  { %6713 = vmatpush.bf16.msrb.mxu1 %v11725_v13  ;;  %v11612_v13 = vld [vmem:[%s23053_s3 + $0x440] sm:$0xf]  ;;  %v11389_v21 = vor.u32 %v14665_v18, %v11388_v10  ;;  %6679 = vmatpush.bf16.msra.mxu2 %v12477_v12  ;;  %v14644_v10 = vld [vmem:[%s23053_s3 + $0x1f0] sm:$0xf0]  ;;  %v11528_v12 = vld [vmem:[%s23053_s3 + $0x398] sm:$0xf] }
 0x2e6   :  { %v11613_v7 = vor.u32 %v14721_v53, %v11612_v13  ;;  %6589 = vmatpush.bf16.msra.mxu3 %v12445_v16  ;;  %v14700_v18 = vld [vmem:[%s23053_s3 + $0x3b0] sm:$0xf0]  ;;  %v12396_v13 = vld [vmem:[%s23053_s3 + $0xa60] sm:$0xf]  ;;  %v14917_v53 = vld [vmem:[%s23053_s3 + $0xa78] sm:$0xf0]  ;;  %v11889_v16 = vor.u32 %v14787_v28, %v11886_v60 }
 0x2e7   :  { %v14973_v46 = vld [vmem:[%s23053_s3 + $0xc38] sm:$0xf0]  ;;  %v11892_v17 = vld [vmem:[%s23053_s3 + $0x670] sm:$0xf]  ;;  %v12397_v3 = vor.u32 %v14917_v53, %v12396_v13  ;;  %v12312_v43 = vld [vmem:[%s23053_s3 + $0x9b8] sm:$0xf] }
 0x2e8   :  { %6701 = vmatpush.bf16.msrb.mxu0 %v11473_v35  ;;  %v6425_v35 = vpop.f32.mrf.mxu2  ;;  %v6451_v36 = vpop.f32.mrf.mxu0  ;;  %v12621_v6 = vor.u32 %v14973_v46, %v12620_v15  ;;  %v14759_v15 = vld [vmem:[%s23053_s3 + $0x58c] sm:$0xf]  ;;  %v11774_v46 = vld [vmem:[%s23053_s3 + $0x5a4] sm:$0xf0] }
 0x2e9   :  { %6714 = vmatpush.bf16.msrb.mxu1 %v11697_v57  ;;  %v11360_v57 = vld [vmem:[%s23053_s3 + $0x248] sm:$0xf]  ;;  %v6464_v47 = vpop.f32.mrf.mxu1  ;;  %6680 = vmatpush.bf16.msra.mxu2 %v12449_v33  ;;  %v11858_v33 = vld [vmem:[%s23053_s3 + $0x64c] sm:$0xf0] }
 0x2ea   :  { %6590 = vmatpush.bf16.msra.mxu3 %v12417_v48  ;;  %v12368_v35 = vld [vmem:[%s23053_s3 + $0xa28] sm:$0xf]  ;;  %v11861_v36 = vor.u32 %v14780_v30, %v11858_v33  ;;  %v14752_v33 = vld [vmem:[%s23053_s3 + $0x554] sm:$0xf] }
 0x2ec   :  { %6702 = vmatpush.bf16.msrb.mxu0 %v11445_v22  ;;  %v11361_v22 = vor.u32 %v14658_v38, %v11360_v57  ;;  %v11893_v57 = vor.u32 %v14791_v20, %v11892_v17  ;;  %v14910_v38 = vld [vmem:[%s23053_s3 + $0xa40] sm:$0xf0]  ;;  %v12508_v20 = vld [vmem:[%s23053_s3 + $0xb40] sm:$0xf] }
 0x2ed   :  { %6715 = vmatpush.bf16.msrb.mxu1 %v11669_v32  ;;  %v11585_v32 = vor.u32 %v14714_v55, %v11584_v41  ;;  %6681 = vmatpush.bf16.msra.mxu2 %v12421_v44  ;;  %v12592_v41 = vld [vmem:[%s23053_s3 + $0xbe8] sm:$0xf]  ;;  %v14966_v55 = vld [vmem:[%s23053_s3 + $0xc00] sm:$0xf0]  ;;  %v12369_v47 = vor.u32 %v14910_v38, %v12368_v35  ;;  %v12564_v44 = vld [vmem:[%s23053_s3 + $0xbb0] sm:$0xf] }
 0x2ee   :  { %6635 = vmatpush.bf16.msrb.mxu3 %v11945_v52  ;;  %v12593_v48 = vor.u32 %v14966_v55, %v12592_v41  ;;  %v12340_v52 = vld [vmem:[%s23053_s3 + $0x9f0] sm:$0xf]  ;;  %v12565_v1 = vor.u32 %v14959_v59, %v12564_v44  ;;  %v11276_v41 = vld [vmem:[%s23053_s3 + $0x1a0] sm:$0xf]  ;;  %v14637_v55 = vld [vmem:[%s23053_s3 + $0x1b8] sm:$0xf0] }
 0x2ef   :  { %6591 = vmatmul.bf16.vlgmr.msra.gmra.mxu3 %v18890_v61  ;;  %v11746_v38 = vld [vmem:[%s23053_s3 + $0x56c] sm:$0xf0]  ;;  %v12820_v59 = vld [vmem:[%s23055_s5 + $0x188] sm:$0xf] }
 0x2f0   :  { %6703 = vmatpush.bf16.msrb.mxu0 %v11417_v14  ;;  %v11333_v14 = vor.u32 %v14651_v63, %v11332_v29  ;;  %6682 = vmatmul.bf16.vlgmr.msra.gmra.mxu2 %v18890_v61  ;;  %v14777_v29 = vld [vmem:[%s23053_s3 + $0x618] sm:$0xf0]  ;;  %v6384_v63 = vpop.f32.mrf.mxu3  ;;  %v11749_v44 = vor.u32 %v14752_v33, %v11746_v38 }
 0x2f1   :  { %6716 = vmatpush.bf16.msrb.mxu1 %v11641_v8  ;;  %v11557_v8 = vor.u32 %v14707_v40, %v11556_v0  ;;  %6726 = vmatpush.bf16.msrb.mxu2 %v11949_v49  ;;  %v11833_v49 = vor.u32 %v14773_v51, %v11830_v39  ;;  %v6385_v0 = vadd.f32 %v6384_v63, %v20085_v2  ;;  %v20245_v28 = vpop.f32.mrf.mxu2  ;;  %v14896_v2 = vld [vmem:[%s23053_s3 + $0x9d0] sm:$0xf0]  ;;  %v14938_v51 = vld [vmem:[%s23053_s3 + $0xb20] sm:$0xf0]  ;;  %v11752_v39 = vld [vmem:[%s23053_s3 + $0x558] sm:$0xf] }
 0x2f2   :  { %6636 = vmatpush.bf16.msrb.mxu3 %v11917_v25  ;;  %v11837_v25 = vor.u32 %v14777_v29, %v11836_v56  ;;  %v15026_v56 = vld [vmem:[%s23055_s5 + $0x1a0] sm:$0xf0]  ;;  %v11277_v29 = vor.u32 %v14637_v55, %v11276_v41  ;;  %v14616_v41 = vld [vmem:[%s23053_s3 + $0x110] sm:$0xf0]  ;;  %v13240_v55 = vld [vmem:[%s23055_s5 + $0x4d0] sm:$0xf] }
 0x2f3   :  { %v6398_v60 = vadd.f32 %v19838_v54, %v6385_v0  ;;  %v12313_v54 = vor.u32 %v14896_v2, %v12312_v43  ;;  %v14875_v43 = vld [vmem:[%s23053_s3 + $0x928] sm:$0xf0] }
 0x2f4   :  { %6704 = vmatpush.bf16.msrb.mxu0 %v11389_v21  ;;  %v11305_v21 = vor.u32 %v14644_v10, %v11304_v9  ;;  %v11808_v9 = vld [vmem:[%s23053_s3 + $0x5c8] sm:$0xf]  ;;  %v14770_v10 = vld [vmem:[%s23053_s3 + $0x5e0] sm:$0xf0]  ;;  %v14931_v2 = vld [vmem:[%s23053_s3 + $0xae8] sm:$0xf0] }
 0x2f5   :  { %6717 = vmatpush.bf16.msrb.mxu1 %v11613_v7  ;;  %v11529_v7 = vor.u32 %v14700_v18, %v11528_v12  ;;  %6727 = vmatpush.bf16.msrb.mxu2 %v11921_v11  ;;  %v20268_v13 = vadd.f32 %v19840_v58, %v6398_v60  ;;  %v11809_v17 = vor.u32 %v14770_v10, %v11808_v9  ;;  %v14889_v58 = vld [vmem:[%s23053_s3 + $0x998] sm:$0xf0]  ;;  %v11220_v9 = vld [vmem:[%s23053_s3 + $0x130] sm:$0xf] }
 0x2f6   :  { %6637 = vmatpush.bf16.msrb.mxu3 %v11889_v16  ;;  %v12284_v16 = vld [vmem:[%s23053_s3 + $0x980] sm:$0xf] }
 0x2f7   :  { %v12285_v35 = vor.u32 %v14889_v58, %v12284_v16  ;;  %v12424_v16 = vld [vmem:[%s23053_s3 + $0xa98] sm:$0xf]  ;;  %v13268_v58 = vld [vmem:[%s23055_s5 + $0x508] sm:$0xf] }
 0x2f8   :  { %6705 = vmatpush.bf16.msrb.mxu0 %v11361_v22  ;;  %v11865_v22 = vor.u32 %v14784_v45, %v11864_v42  ;;  %v6386_v30 = vpop.f32.mrf.mxu3 }
 0x2f9   :  { %6718 = vmatpush.bf16.msrb.mxu1 %v11585_v32  ;;  %6728 = vmatpush.bf16.msrb.mxu2 %v11893_v57  ;;  %v14903_v32 = vld [vmem:[%s23053_s3 + $0xa08] sm:$0xf0]  ;;  %v6477_v45 = vpop.f32.mrf.mxu2  ;;  %v15012_v30 = vld [vmem:[%s23055_s5 + $0x130] sm:$0xf0] }
 0x2fa   :  { %6638 = vmatpush.bf16.msrb.mxu3 %v11861_v36  ;;  %v12341_v40 = vor.u32 %v14903_v32, %v12340_v52  ;;  %v12256_v36 = vld [vmem:[%s23053_s3 + $0x948] sm:$0xf]  ;;  %v14756_v52 = vld [vmem:[%s23053_s3 + $0x570] sm:$0xf0]  ;;  %v15131_v45 = vld [vmem:[%s23055_s5 + $0x4e8] sm:$0xf0] }
 0x2fb   :  { %v11753_v0 = vor.u32 %v14756_v52, %v11752_v39  ;;  %v15005_v39 = vld [vmem:[%s23055_s5 + $0xf8] sm:$0xf0]  ;;  %v4115_v52 = vperm.slane %v20008_v19, 4 }
 0x2fc   :  { %6706 = vmatpush.bf16.msrb.mxu0 %v11333_v14  ;;  %v12536_v14 = vld [vmem:[%s23053_s3 + $0xb78] sm:$0xf] }
 0x2fd   :  { %6719 = vmatpush.bf16.msrb.mxu1 %v11557_v8  ;;  %6729 = vmatpush.bf16.msrb.mxu2 %v11865_v22  ;;  %v14952_v8 = vld [vmem:[%s23053_s3 + $0xb90] sm:$0xf0] }
 0x2fe   :  { %6639 = vmatpush.bf16.msrb.mxu3 %v11833_v49  ;;  %v12537_v53 = vor.u32 %v14952_v8, %v12536_v14  ;;  %v12792_v14 = vld [vmem:[%s23055_s5 + $0x150] sm:$0xf]  ;;  %v15019_v8 = vld [vmem:[%s23055_s5 + $0x168] sm:$0xf0] }
 0x300   :  { %6707 = vmatpush.bf16.msrb.mxu0 %v11305_v21  ;;  %v20263_v11 = vpop.f32.mrf.mxu0  ;;  %v14945_v21 = vld [vmem:[%s23053_s3 + $0xb58] sm:$0xf0] }
 0x301   :  { %6720 = vmatpush.bf16.msrb.mxu1 %v11529_v7  ;;  %v20265_v12 = vpop.f32.mrf.mxu1  ;;  %6730 = vmatpush.bf16.msrb.mxu2 %v11837_v25  ;;  %v11780_v7 = vld [vmem:[%s23053_s3 + $0x590] sm:$0xf]  ;;  %v12509_v57 = vor.u32 %v14945_v21, %v12508_v20  ;;  %v15138_v20 = vld [vmem:[%s23055_s5 + $0x520] sm:$0xf0]  ;;  %v13492_v21 = vld [vmem:[%s23055_s5 + $0x6c8] sm:$0xf] }
 0x302   :  { %v12452_v25 = vld [vmem:[%s23053_s3 + $0xad0] sm:$0xf] }
 0x303   :  { %6708 = vmatmul.bf16.vlgmr.msrb.gmra.mxu0 %v18087_v27  ;;  %v14766_v27 = vld [vmem:[%s23053_s3 + $0x5c4] sm:$0xf] }
 0x304   :  { %6752 = vmatpush.bf16.msra.mxu0 %v12397_v3  ;;  %6721 = vmatmul.bf16.vlgmr.msrb.gmra.mxu1 %v18095_v31  ;;  %v11802_v31 = vld [vmem:[%s23053_s3 + $0x5dc] sm:$0xf0]  ;;  %v14763_v3 = vld [vmem:[%s23053_s3 + $0x5a8] sm:$0xf0] }
 0x305   :  { %6765 = vmatpush.bf16.msra.mxu1 %v12621_v6  ;;  %v11805_v18 = vor.u32 %v14766_v27, %v11802_v31  ;;  %v11777_v6 = vor.u32 %v14759_v15, %v11774_v46  ;;  %6731 = vmatpush.bf16.msrb.mxu2 %v11809_v17  ;;  %v11781_v42 = vor.u32 %v14763_v3, %v11780_v7  ;;  %v12228_v27 = vld [vmem:[%s23053_s3 + $0x910] sm:$0xf]  ;;  %v14868_v15 = vld [vmem:[%s23053_s3 + $0x8f0] sm:$0xf0]  ;;  %v15194_v7 = vld [vmem:[%s23055_s5 + $0x6e0] sm:$0xf0] }
 0x306   :  { %v12821_v31 = vor.u32 %v15026_v56, %v12820_v59  ;;  %v12229_v10 = vor.u32 %v14875_v43, %v12228_v27  ;;  %v12793_v46 = vor.u32 %v15019_v8, %v12792_v14  ;;  %v14924_v17 = vld [vmem:[%s23053_s3 + $0xab0] sm:$0xf0]  ;;  %v13493_v38 = vor.u32 %v15194_v7, %v13492_v21  ;;  %v14609_v56 = vld [vmem:[%s23053_s3 + $0xd8] sm:$0xf0]  ;;  %v12708_v27 = vld [vmem:[%s23055_s5 + $0xa8] sm:$0xf] }
 0x307   :  { %6640 = vmatpush.bf16.msrb.mxu3 %v11805_v18  ;;  %v12453_v18 = vor.u32 %v14931_v2, %v12452_v25  ;;  %v6515_v14 = vadd.f32 %v20265_v12, %v4115_v52  ;;  %v14602_v8 = vld [vmem:[%s23053_s3 + $0xa0] sm:$0xf0]  ;;  %v15117_v12 = vld [vmem:[%s23055_s5 + $0x478] sm:$0xf0]  ;;  %v11108_v7 = vld [vmem:[%s23053_s3 + $0x50] sm:$0xf] }
 0x308   :  { %6753 = vmatpush.bf16.msra.mxu0 %v12369_v47  ;;  %v14882_v47 = vld [vmem:[%s23053_s3 + $0x960] sm:$0xf0]  ;;  %v6503_v22 = vpop.f32.mrf.mxu0 }
 0x309   :  { %6766 = vmatpush.bf16.msra.mxu1 %v12593_v48  ;;  %v12480_v48 = vld [vmem:[%s23053_s3 + $0xb08] sm:$0xf]  ;;  %v6516_v32 = vpop.f32.mrf.mxu1  ;;  %v12257_v49 = vor.u32 %v14882_v47, %v12256_v36  ;;  %6732 = vmatpush.bf16.msrb.mxu2 %v11781_v42  ;;  %v13464_v36 = vld [vmem:[%s23055_s5 + $0x690] sm:$0xf]  ;;  %v15187_v47 = vld [vmem:[%s23055_s5 + $0x6a8] sm:$0xf0] }
 0x30a   :  { %v12481_v63 = vor.u32 %v14938_v51, %v12480_v48  ;;  %v4114_v48 = vperm.slane %v20008_v19, 3  ;;  %v12736_v51 = vld [vmem:[%s23055_s5 + $0xe0] sm:$0xf]  ;;  %v13465_v59 = vor.u32 %v15187_v47, %v13464_v36 }
 0x30b   :  { %6641 = vmatpush.bf16.msrb.mxu3 %v11777_v6  ;;  %v12764_v6 = vld [vmem:[%s23055_s5 + $0x118] sm:$0xf]  ;;  %v11164_v32 = vld [vmem:[%s23053_s3 + $0xc0] sm:$0xf] }
 0x30c   :  { %6754 = vmatpush.bf16.msra.mxu0 %v12341_v40  ;;  %v11248_v40 = vld [vmem:[%s23053_s3 + $0x168] sm:$0xf]  ;;  %v12765_v42 = vor.u32 %v15012_v30, %v12764_v6  ;;  %v11165_v43 = vor.u32 %v14609_v56, %v11164_v32  ;;  %v13128_v32 = vld [vmem:[%s23055_s5 + $0x3f0] sm:$0xf]  ;;  %v15159_v56 = vld [vmem:[%s23055_s5 + $0x5c8] sm:$0xf0] }
 0x30d   :  { %6767 = vmatpush.bf16.msra.mxu1 %v12565_v1  ;;  %v14630_v1 = vld [vmem:[%s23053_s3 + $0x180] sm:$0xf0]  ;;  %6733 = vmatpush.bf16.msrb.mxu2 %v11753_v0  ;;  %v13436_v0 = vld [vmem:[%s23055_s5 + $0x658] sm:$0xf]  ;;  %v13156_v6 = vld [vmem:[%s23055_s5 + $0x428] sm:$0xf] }
 0x30e   :  { %v11249_v60 = vor.u32 %v14630_v1, %v11248_v40  ;;  %v15180_v40 = vld [vmem:[%s23055_s5 + $0x670] sm:$0xf0]  ;;  %v6424_v1 = vadd.f32 %v20037_v23, %v4114_v48 }
 0x30f   :  { %6642 = vmatpush.bf16.msrb.mxu3 %v11749_v44  ;;  %v13241_v44 = vor.u32 %v15131_v45, %v13240_v55  ;;  %v6436_v25 = vpop.f32.mrf.mxu3  ;;  %v11080_v45 = vld [vmem:[%s23053_s3 + $0x18] sm:$0xf]  ;;  %v14588_v48 = vld [vmem:[%s23053_s3 + $0x30] sm:$0xf0] }
 0x310   :  { %6755 = vmatpush.bf16.msra.mxu0 %v12313_v54  ;;  %v14623_v54 = vld [vmem:[%s23053_s3 + $0x148] sm:$0xf0]  ;;  %6734 = vmatmul.bf16.vlgmr.msrb.gmra.mxu2 %v18245_v62  ;;  %v6437_v23 = vadd.f32 %v6436_v25, %v6424_v1  ;;  %v13716_v1 = vld [vmem:[%s23055_s5 + $0x888] sm:$0xf] }
 0x311   :  { %6768 = vmatpush.bf16.msra.mxu1 %v12537_v53  ;;  %v12200_v53 = vld [vmem:[%s23053_s3 + $0x8d8] sm:$0xf]  ;;  %8830 = vmatpush.bf16.msra.mxu2 %v12821_v31  ;;  %v11221_v3 = vor.u32 %v14623_v54, %v11220_v9  ;;  %v14998_v31 = vld [vmem:[%s23055_s5 + $0xc0] sm:$0xf0]  ;;  %v15173_v54 = vld [vmem:[%s23055_s5 + $0x638] sm:$0xf0] }
 0x312   :  { %6643 = vmatmul.bf16.vlgmr.msrb.gmra.mxu3 %v18245_v62  ;;  %v12201_v33 = vor.u32 %v14868_v15, %v12200_v53  ;;  %v11192_v62 = vld [vmem:[%s23053_s3 + $0xf8] sm:$0xf]  ;;  %v12709_v9 = vor.u32 %v14998_v31, %v12708_v27  ;;  %v6450_v53 = vadd.f32 %v20055_v26, %v6437_v23  ;;  %v15250_v27 = vld [vmem:[%s23055_s5 + $0x8a0] sm:$0xf0] }
 0x313   :  { %6687 = vmatpush.bf16.msra.mxu3 %v11277_v29  ;;  %v11193_v22 = vor.u32 %v14616_v41, %v11192_v62  ;;  %v13212_v29 = vld [vmem:[%s23055_s5 + $0x498] sm:$0xf]  ;;  %v6778_v41 = vmul.f32 0.2, %v19806_v34  ;;  %v14854_v23 = vld [vmem:[%s23053_s3 + $0x880] sm:$0xf0] }
 0x314   :  { %6756 = vmatpush.bf16.msra.mxu0 %v12285_v35  ;;  %v12425_v35 = vor.u32 %v14924_v17, %v12424_v16  ;;  %v14991_v16 = vld [vmem:[%s23055_s5 + $0x88] sm:$0xf0]  ;;  %v20487_v30 = vadd.f32 %v20057_v4, %v6450_v53  ;;  %v12652_v62 = vld [vmem:[%s23055_s5 + $0x38] sm:$0xf]  ;;  %v14984_v4 = vld [vmem:[%s23055_s5 + $0x50] sm:$0xf0] }
 0x315   :  { %6769 = vmatpush.bf16.msra.mxu1 %v12509_v57  ;;  %8831 = vmatpush.bf16.msra.mxu2 %v12793_v46  ;;  %v13269_v57 = vor.u32 %v15138_v20, %v13268_v58  ;;  %v12680_v46 = vld [vmem:[%s23055_s5 + $0x70] sm:$0xf]  ;;  %v12653_v52 = vor.u32 %v14984_v4, %v12652_v62 }
 0x316   :  { %v12116_v53 = vld [vmem:[%s23053_s3 + $0x830] sm:$0xf] }
 0x317   :  { %6688 = vmatpush.bf16.msra.mxu3 %v11249_v60  ;;  %v13184_v60 = vld [vmem:[%s23055_s5 + $0x460] sm:$0xf] }
 0x318   :  { %6757 = vmatpush.bf16.msra.mxu0 %v12257_v49  ;;  %v15124_v49 = vld [vmem:[%s23055_s5 + $0x4b0] sm:$0xf0]  ;;  %v13185_v21 = vor.u32 %v15117_v12, %v13184_v60  ;;  %v13324_v60 = vld [vmem:[%s23055_s5 + $0x578] sm:$0xf]  ;;  %v13688_v12 = vld [vmem:[%s23055_s5 + $0x850] sm:$0xf] }
 0x319   :  { %6770 = vmatpush.bf16.msra.mxu1 %v12481_v63  ;;  %8832 = vmatpush.bf16.msra.mxu2 %v12765_v42  ;;  %v12737_v63 = vor.u32 %v15005_v39, %v12736_v51  ;;  %v13213_v2 = vor.u32 %v15124_v49, %v13212_v29  ;;  %v6438_v42 = vpop.f32.mrf.mxu3  ;;  %v12172_v51 = vld [vmem:[%s23053_s3 + $0x8a0] sm:$0xf]  ;;  %v14861_v39 = vld [vmem:[%s23053_s3 + $0x8b8] sm:$0xf0] }
 0x31a   :  { %v12624_v29 = vld [vmem:[%s23055_s5] sm:$0xf]  ;;  %v14977_v49 = vld [vmem:[%s23055_s5 + $0x18] sm:$0xf0]  ;;  %v12173_v31 = vor.u32 %v14861_v39, %v12172_v51  ;;  %v14840_v42 = vld [vmem:[%s23053_s3 + $0x810] sm:$0xf0] }
 0x31b   :  { %6689 = vmatpush.bf16.msra.mxu3 %v11221_v3  ;;  %v14595_v3 = vld [vmem:[%s23053_s3 + $0x68] sm:$0xf0]  ;;  %v12794_v51 = vld [vmem:[%s23055_s5 + $0x16c] sm:$0xf0]  ;;  %v13632_v39 = vld [vmem:[%s23055_s5 + $0x7e0] sm:$0xf] }
 0x31c   :  { %6758 = vmatpush.bf16.msra.mxu0 %v12229_v10  ;;  %v6527_v10 = vpop.f32.mrf.mxu2  ;;  %v11109_v55 = vor.u32 %v14595_v3, %v11108_v7  ;;  %v13296_v3 = vld [vmem:[%s23055_s5 + $0x540] sm:$0xf] }
 0x31d   :  { %6771 = vmatpush.bf16.msra.mxu1 %v12453_v18  ;;  %8833 = vmatpush.bf16.msra.mxu2 %v12737_v63  ;;  %v13408_v18 = vld [vmem:[%s23055_s5 + $0x620] sm:$0xf]  ;;  %v20465_v15 = vadd.f32 %v6527_v10, %v6515_v14  ;;  %v12144_v14 = vld [vmem:[%s23053_s3 + $0x868] sm:$0xf]  ;;  %v13717_v10 = vor.u32 %v15250_v27, %v13716_v1  ;;  %v6476_v1 = vadd.f32 %v20245_v28, %v20487_v30 }
 0x31e   :  { %v13409_v26 = vor.u32 %v15173_v54, %v13408_v18  ;;  %v6780_v18 = vmul.f32 0.2, %v20268_v13  ;;  %v12145_v54 = vor.u32 %v14854_v23, %v12144_v14  ;;  %v4116_v14 = vperm.slane %v20008_v19, 5  ;;  %v15002_v23 = vld [vmem:[%s23055_s5 + $0xe4] sm:$0xf] }
 0x31f   :  { %6690 = vmatpush.bf16.msra.mxu3 %v11193_v22  ;;  %v15215_v19 = vld [vmem:[%s23055_s5 + $0x788] sm:$0xf0] }
 0x320   :  { %6759 = vmatpush.bf16.msra.mxu0 %v12201_v33  ;;  %v20473_v17 = vpop.f32.mrf.mxu0  ;;  %v12681_v33 = vor.u32 %v14991_v16, %v12680_v46 }
 0x321   :  { %6772 = vmatpush.bf16.msra.mxu1 %v12425_v35  ;;  %v20475_v58 = vpop.f32.mrf.mxu1  ;;  %8834 = vmatpush.bf16.msra.mxu2 %v12709_v9  ;;  %v15110_v35 = vld [vmem:[%s23055_s5 + $0x440] sm:$0xf0]  ;;  %v15152_v9 = vld [vmem:[%s23055_s5 + $0x590] sm:$0xf0] }
 0x322   :  { %v13157_v36 = vor.u32 %v15110_v35, %v13156_v6  ;;  %v13325_v16 = vor.u32 %v15152_v9, %v13324_v60  ;;  %v15145_v6 = vld [vmem:[%s23055_s5 + $0x558] sm:$0xf0] }
 0x323   :  { %6760 = vmatmul.bf16.vlgmr.msra.gmra.mxu0 %v18531_v37  ;;  %v13437_v37 = vor.u32 %v15180_v40, %v13436_v0  ;;  %6691 = vmatpush.bf16.msra.mxu3 %v11165_v43  ;;  %v11081_v40 = vor.u32 %v14588_v48, %v11080_v45  ;;  %v6787_v45 = vmax.f32 %v20268_v13, %v6780_v18 }
 0x324   :  { %8856 = vmatpush.bf16.msrb.mxu0 %v13269_v57  ;;  %6773 = vmatmul.bf16.vlgmr.msra.gmra.mxu1 %v18890_v61  ;;  %v11136_v61 = vld [vmem:[%s23053_s3 + $0x88] sm:$0xf]  ;;  %v6529_v22 = vpop.f32.mrf.mxu2 }
 0x325   :  { %8869 = vmatpush.bf16.msrb.mxu1 %v13493_v38  ;;  %v11137_v20 = vor.u32 %v14602_v8, %v11136_v61  ;;  %v13380_v57 = vld [vmem:[%s23055_s5 + $0x5e8] sm:$0xf]  ;;  %v15166_v38 = vld [vmem:[%s23055_s5 + $0x600] sm:$0xf0]  ;;  %8835 = vmatpush.bf16.msra.mxu2 %v12681_v33  ;;  %v6785_v61 = vmax.f32 %v19806_v34, %v6778_v41  ;;  %v15096_v8 = vld [vmem:[%s23055_s5 + $0x3d0] sm:$0xf0]  ;;  %v13297_v41 = vor.u32 %v15145_v6, %v13296_v3 }
 0x326   :  { %v13381_v47 = vor.u32 %v15166_v38, %v13380_v57  ;;  %v15243_v34 = vld [vmem:[%s23055_s5 + $0x868] sm:$0xf0]  ;;  %v12822_v57 = vld [vmem:[%s23055_s5 + $0x1a4] sm:$0xf0]  ;;  %v15236_v38 = vld [vmem:[%s23055_s5 + $0x830] sm:$0xf0] }
 0x327   :  { %6692 = vmatpush.bf16.msra.mxu3 %v11137_v20  ;;  %v14847_v20 = vld [vmem:[%s23053_s3 + $0x848] sm:$0xf0]  ;;  %v20579_v7 = vpack.c.bf16 %v6785_v61, %v6785_v61  ;;  %v13689_v35 = vor.u32 %v15243_v34, %v13688_v12  ;;  %v12060_v22 = vld [vmem:[%s23053_s3 + $0x7c0] sm:$0xf]  ;;  %v13576_v61 = vld [vmem:[%s23055_s5 + $0x770] sm:$0xf] }
 0x328   :  { %8857 = vmatpush.bf16.msrb.mxu0 %v13241_v44  ;;  %v15103_v44 = vld [vmem:[%s23055_s5 + $0x408] sm:$0xf0]  ;;  %v6555_v63 = vpop.f32.mrf.mxu0  ;;  %v12117_v62 = vor.u32 %v14847_v20, %v12116_v53  ;;  %v12004_v12 = vld [vmem:[%s23053_s3 + $0x750] sm:$0xf]  ;;  %v13548_v20 = vld [vmem:[%s23055_s5 + $0x738] sm:$0xf] }
 0x329   :  { %8870 = vmatpush.bf16.msrb.mxu1 %v13465_v59  ;;  %v13352_v59 = vld [vmem:[%s23055_s5 + $0x5b0] sm:$0xf]  ;;  %v6568_v0 = vpop.f32.mrf.mxu1  ;;  %v13129_v43 = vor.u32 %v15103_v44, %v13128_v32  ;;  %8836 = vmatpush.bf16.msra.mxu2 %v12653_v52  ;;  %v15023_v33 = vld [vmem:[%s23055_s5 + $0x18c] sm:$0xf]  ;;  %v15229_v52 = vld [vmem:[%s23055_s5 + $0x7f8] sm:$0xf0]  ;;  %v20626_v44 = vpack.c.bf16 %v6787_v45, %v6787_v45 }
 0x32a   :  { %v13353_v25 = vor.u32 %v15159_v56, %v13352_v59  ;;  %v14833_v32 = vld [vmem:[%s23053_s3 + $0x7d8] sm:$0xf0]  ;;  %v13604_v63 = vld [vmem:[%s23055_s5 + $0x7a8] sm:$0xf]  ;;  %v15222_v0 = vld [vmem:[%s23055_s5 + $0x7c0] sm:$0xf0] }
 0x32b   :  { %6693 = vmatpush.bf16.msra.mxu3 %v11109_v55  ;;  %v12088_v55 = vld [vmem:[%s23053_s3 + $0x7f8] sm:$0xf]  ;;  %v15009_v56 = vld [vmem:[%s23055_s5 + $0x11c] sm:$0xf]  ;;  %v13605_v28 = vor.u32 %v15222_v0, %v13604_v63  ;;  %v14819_v34 = vld [vmem:[%s23053_s3 + $0x768] sm:$0xf0] }
 0x32c   :  { %8858 = vmatpush.bf16.msrb.mxu0 %v13213_v2  ;;  %v12625_v2 = vor.u32 %v14977_v49, %v12624_v29  ;;  %v12089_v13 = vor.u32 %v14840_v42, %v12088_v55  ;;  %v13633_v29 = vor.u32 %v15229_v52, %v13632_v39  ;;  %v12766_v49 = vld [vmem:[%s23055_s5 + $0x134] sm:$0xf0]  ;;  %v12005_v6 = vor.u32 %v14819_v34, %v12004_v12  ;;  %v12682_v45 = vld [vmem:[%s23055_s5 + $0x8c] sm:$0xf0]  ;;  %v13046_v39 = vld [vmem:[%s23055_s5 + $0x364] sm:$0xf0] }
 0x32d   :  { %8871 = vmatpush.bf16.msrb.mxu1 %v13437_v37  ;;  %v13100_v37 = vld [vmem:[%s23055_s5 + $0x3b8] sm:$0xf]  ;;  %v15240_v12 = vld [vmem:[%s23055_s5 + $0x854] sm:$0xf] }
 0x32e   :  { %8837 = vmatpush.bf16.msra.mxu2 %v12625_v2  ;;  %v13101_v46 = vor.u32 %v15096_v8, %v13100_v37  ;;  %v12769_v2 = vor.u32 %v15009_v56, %v12766_v49  ;;  %v12738_v37 = vld [vmem:[%s23055_s5 + $0xfc] sm:$0xf0]  ;;  %v15075_v56 = vld [vmem:[%s23055_s5 + $0x328] sm:$0xf0]  ;;  %v14981_v49 = vld [vmem:[%s23055_s5 + $0x3c] sm:$0xf] }
 0x32f   :  { %6694 = vmatpush.bf16.msra.mxu3 %v11081_v40  ;;  %v12061_v40 = vor.u32 %v14833_v32, %v12060_v22  ;;  %v6488_v27 = vpop.f32.mrf.mxu3  ;;  %v12741_v53 = vor.u32 %v15002_v23, %v12738_v37  ;;  %v12654_v63 = vld [vmem:[%s23055_s5 + $0x54] sm:$0xf0]  ;;  %v15247_v23 = vld [vmem:[%s23055_s5 + $0x88c] sm:$0xf]  ;;  %v13718_v37 = vld [vmem:[%s23055_s5 + $0x8a4] sm:$0xf0] }
 0x330   :  { %8859 = vmatpush.bf16.msrb.mxu0 %v13185_v21  ;;  %v13072_v21 = vld [vmem:[%s23055_s5 + $0x380] sm:$0xf] }
 0x331   :  { %8872 = vmatpush.bf16.msrb.mxu1 %v13409_v26  ;;  %v15089_v26 = vld [vmem:[%s23055_s5 + $0x398] sm:$0xf0]  ;;  %8838 = vmatmul.bf16.vlgmr.msra.gmra.mxu2 %v20579_v7  ;;  %v20653_v30 = vpop.f32.mrf.mxu2 }
 0x332   :  { %6695 = vmatmul.bf16.vlgmr.msra.gmra.mxu3 %v18085_v24  ;;  %8882 = vmatpush.bf16.msrb.mxu2 %v13717_v10  ;;  %v13660_v24 = vld [vmem:[%s23055_s5 + $0x818] sm:$0xf]  ;;  %v13073_v4 = vor.u32 %v15089_v26, %v13072_v21  ;;  %v15208_v21 = vld [vmem:[%s23055_s5 + $0x750] sm:$0xf0] }
 0x333   :  { %6739 = vmatpush.bf16.msrb.mxu3 %v12173_v31  ;;  %v13661_v48 = vor.u32 %v15236_v38, %v13660_v24  ;;  %v12032_v31 = vld [vmem:[%s23053_s3 + $0x788] sm:$0xf]  ;;  %v13549_v55 = vor.u32 %v15208_v21, %v13548_v20  ;;  %v15233_v21 = vld [vmem:[%s23055_s5 + $0x81c] sm:$0xf] }
 0x334   :  { %8860 = vmatpush.bf16.msrb.mxu0 %v13157_v36  ;;  %v12825_v36 = vor.u32 %v15023_v33, %v12822_v57  ;;  %v14812_v57 = vld [vmem:[%s23053_s3 + $0x730] sm:$0xf0] }
 0x335   :  { %8873 = vmatpush.bf16.msrb.mxu1 %v13381_v47  ;;  %v15016_v47 = vld [vmem:[%s23055_s5 + $0x154] sm:$0xf] }
 0x336   :  { %8883 = vmatpush.bf16.msrb.mxu2 %v13689_v35  ;;  %v12797_v59 = vor.u32 %v15016_v47, %v12794_v51  ;;  %v11976_v35 = vld [vmem:[%s23053_s3 + $0x718] sm:$0xf]  ;;  %v15201_v47 = vld [vmem:[%s23055_s5 + $0x718] sm:$0xf0]  ;;  %v15079_v51 = vld [vmem:[%s23055_s5 + $0x34c] sm:$0xf] }
 0x337   :  { %6740 = vmatpush.bf16.msrb.mxu3 %v12145_v54  ;;  %v6490_v33 = vpop.f32.mrf.mxu3  ;;  %v13049_v0 = vor.u32 %v15079_v51, %v13046_v39 }
 0x338   :  { %8861 = vmatpush.bf16.msrb.mxu0 %v13129_v43  ;;  %v14826_v43 = vld [vmem:[%s23053_s3 + $0x7a0] sm:$0xf0]  ;;  %v15051_v33 = vld [vmem:[%s23055_s5 + $0x26c] sm:$0xf] }
 0x339   :  { %8874 = vmatpush.bf16.msrb.mxu1 %v13353_v25  ;;  %v6489_v25 = vadd.f32 %v6488_v27, %v6476_v1  ;;  %v12033_v60 = vor.u32 %v14826_v43, %v12032_v31  ;;  %v6581_v42 = vpop.f32.mrf.mxu2  ;;  %v13018_v1 = vld [vmem:[%s23055_s5 + $0x32c] sm:$0xf0]  ;;  %v12657_v31 = vor.u32 %v14981_v49, %v12654_v63  ;;  %v12988_v43 = vld [vmem:[%s23055_s5 + $0x2d8] sm:$0xf]  ;;  %v15037_v63 = vld [vmem:[%s23055_s5 + $0x1fc] sm:$0xf] }
 0x33a   :  { %8884 = vmatpush.bf16.msrb.mxu2 %v13661_v48  ;;  %v11977_v48 = vor.u32 %v14812_v57, %v11976_v35  ;;  %v12934_v35 = vld [vmem:[%s23055_s5 + $0x284] sm:$0xf0] }
 0x33b   :  { %6741 = vmatpush.bf16.msrb.mxu3 %v12117_v62  ;;  %v6502_v8 = vadd.f32 %v20263_v11, %v6489_v25  ;;  %v13577_v11 = vor.u32 %v15215_v19, %v13576_v61  ;;  %v13044_v62 = vld [vmem:[%s23055_s5 + $0x348] sm:$0xf]  ;;  %v15068_v25 = vld [vmem:[%s23055_s5 + $0x2f0] sm:$0xf0]  ;;  %v12990_v61 = vld [vmem:[%s23055_s5 + $0x2f4] sm:$0xf0]  ;;  %v12937_v42 = vor.u32 %v15051_v33, %v12934_v35 }
 0x33c   :  { %8862 = vmatpush.bf16.msrb.mxu0 %v13101_v46  ;;  %v14995_v46 = vld [vmem:[%s23055_s5 + $0xac] sm:$0xf]  ;;  %v12989_v19 = vor.u32 %v15068_v25, %v12988_v43  ;;  %v15212_v25 = vld [vmem:[%s23055_s5 + $0x774] sm:$0xf]  ;;  %v13052_v33 = vld [vmem:[%s23055_s5 + $0x350] sm:$0xf] }
 0x33d   :  { %8875 = vmatpush.bf16.msrb.mxu1 %v13325_v16  ;;  %v6781_v18 = vmul.f32 0.2, %v6502_v8  ;;  %v12710_v16 = vld [vmem:[%s23055_s5 + $0xc4] sm:$0xf0]  ;;  %v15083_v35 = vld [vmem:[%s23055_s5 + $0x368] sm:$0xf0] }
 0x33e   :  { %8885 = vmatpush.bf16.msrb.mxu2 %v13633_v29  ;;  %v12713_v38 = vor.u32 %v14995_v46, %v12710_v16  ;;  %v15054_v16 = vld [vmem:[%s23055_s5 + $0x280] sm:$0xf0] }
 0x33f   :  { %6742 = vmatpush.bf16.msrb.mxu3 %v12089_v13  ;;  %v6788_v26 = vmax.f32 %v6502_v8, %v6781_v18  ;;  %v13690_v18 = vld [vmem:[%s23055_s5 + $0x86c] sm:$0xf0] }
 0x340   :  { %8863 = vmatpush.bf16.msrb.mxu0 %v13073_v4  ;;  %v6605_v9 = vpop.f32.mrf.mxu0  ;;  %v15082_v4 = vld [vmem:[%s23055_s5 + $0x360] sm:$0xf0]  ;;  %v13693_v20 = vor.u32 %v15240_v12, %v13690_v18  ;;  %v15299_v18 = vld [vmem:[%s23055_s5 + $0xa28] sm:$0xf0] }
 0x341   :  { %8876 = vmatpush.bf16.msrb.mxu1 %v13297_v41  ;;  %v6618_v10 = vpop.f32.mrf.mxu1  ;;  %v6606_v54 = vadd.f32 %v6605_v9, %v4116_v14  ;;  %v20691_v24 = vpack.c.bf16 %v6788_v26, %v6788_v26  ;;  %v14988_v41 = vld [vmem:[%s23055_s5 + $0x74] sm:$0xf]  ;;  %v13045_v22 = vor.u32 %v15082_v4, %v13044_v62  ;;  %v12626_v14 = vld [vmem:[%s23055_s5 + $0x1c] sm:$0xf0]  ;;  %v15061_v9 = vld [vmem:[%s23055_s5 + $0x2b8] sm:$0xf0] }
 0x342   :  { %8886 = vmatpush.bf16.msrb.mxu2 %v13605_v28  ;;  %v12685_v32 = vor.u32 %v14988_v41, %v12682_v45  ;;  %v15047_v62 = vld [vmem:[%s23055_s5 + $0x248] sm:$0xf0] }
 0x343   :  { %8864 = vmatmul.bf16.vlgmr.msrb.gmra.mxu0 %v20626_v44  ;;  %6743 = vmatpush.bf16.msrb.mxu3 %v12061_v40  ;;  %v20683_v3 = vadd.f32 %v6618_v10, %v6606_v54  ;;  %v15072_v40 = vld [vmem:[%s23055_s5 + $0x314] sm:$0xf]  ;;  %v13721_v10 = vor.u32 %v15247_v23, %v13718_v37  ;;  %v15058_v54 = vld [vmem:[%s23055_s5 + $0x2a4] sm:$0xf] }
 0x344   :  { %8877 = vmatmul.bf16.vlgmr.msrb.gmra.mxu1 %v20691_v24  ;;  %v13021_v28 = vor.u32 %v15072_v40, %v13018_v1  ;;  %v6779_v1 = vmul.f32 0.2, %v19963_v5  ;;  %v15030_v37 = vld [vmem:[%s23055_s5 + $0x1c4] sm:$0xf] }
 0x345   :  { %8921 = vmatpush.bf16.msra.mxu1 %v12825_v36  ;;  %v13520_v36 = vld [vmem:[%s23055_s5 + $0x700] sm:$0xf] }
 0x346   :  { %8887 = vmatpush.bf16.msrb.mxu2 %v13577_v11  ;;  %v13521_v29 = vor.u32 %v15201_v47, %v13520_v36  ;;  %v12932_v11 = vld [vmem:[%s23055_s5 + $0x268] sm:$0xf]  ;;  %v13634_v36 = vld [vmem:[%s23055_s5 + $0x7fc] sm:$0xf0]  ;;  %v15044_v47 = vld [vmem:[%s23055_s5 + $0x234] sm:$0xf] }
 0x347   :  { %6744 = vmatpush.bf16.msrb.mxu3 %v12033_v60  ;;  %v12960_v60 = vld [vmem:[%s23055_s5 + $0x2a0] sm:$0xf]  ;;  %v12933_v57 = vor.u32 %v15054_v16, %v12932_v11 }
 0x348   :  { %v6607_v52 = vpop.f32.mrf.mxu0  ;;  %v12961_v46 = vor.u32 %v15061_v9, %v12960_v60 }
 0x349   :  { %8922 = vmatpush.bf16.msra.mxu1 %v12797_v59  ;;  %v6620_v13 = vpop.f32.mrf.mxu1  ;;  %v13016_v59 = vld [vmem:[%s23055_s5 + $0x310] sm:$0xf] }
 0x34a   :  { %8888 = vmatpush.bf16.msrb.mxu2 %v13549_v55  ;;  %v13017_v27 = vor.u32 %v15075_v56, %v13016_v59  ;;  %v15226_v55 = vld [vmem:[%s23055_s5 + $0x7e4] sm:$0xf]  ;;  %v15040_v13 = vld [vmem:[%s23055_s5 + $0x210] sm:$0xf0]  ;;  %v15219_v56 = vld [vmem:[%s23055_s5 + $0x7ac] sm:$0xf] }
 0x34b   :  { %6745 = vmatpush.bf16.msrb.mxu3 %v12005_v6  ;;  %v13662_v6 = vld [vmem:[%s23055_s5 + $0x834] sm:$0xf0]  ;;  %v13637_v59 = vor.u32 %v15226_v55, %v13634_v36  ;;  %v13828_v36 = vld [vmem:[%s23055_s5 + $0x968] sm:$0xf] }
 0x34c   :  { %v13665_v41 = vor.u32 %v15233_v21, %v13662_v6  ;;  %v15292_v21 = vld [vmem:[%s23055_s5 + $0x9f0] sm:$0xf0]  ;;  %v13522_v6 = vld [vmem:[%s23055_s5 + $0x71c] sm:$0xf0]  ;;  %v13024_v55 = vld [vmem:[%s23055_s5 + $0x318] sm:$0xf] }
 0x34d   :  { %8923 = vmatpush.bf16.msra.mxu1 %v12769_v2  ;;  %v14974_v2 = vld [vmem:[%s23055_s5 + $0x4] sm:$0xf] }
 0x34e   :  { %8889 = vmatpush.bf16.msrb.mxu2 %v13521_v29  ;;  %v12629_v8 = vor.u32 %v14974_v2, %v12626_v14  ;;  %v13606_v29 = vld [vmem:[%s23055_s5 + $0x7c4] sm:$0xf0]  ;;  %v15306_v14 = vld [vmem:[%s23055_s5 + $0xa60] sm:$0xf0] }
 0x34f   :  { %6746 = vmatpush.bf16.msrb.mxu3 %v11977_v48  ;;  %v12906_v48 = vld [vmem:[%s23055_s5 + $0x24c] sm:$0xf0]  ;;  %v13609_v43 = vor.u32 %v15219_v56, %v13606_v29  ;;  %v13940_v2 = vld [vmem:[%s23055_s5 + $0xa48] sm:$0xf] }
 0x350   :  { %v13941_v60 = vor.u32 %v15306_v14, %v13940_v2 }
 0x351   :  { %8924 = vmatpush.bf16.msra.mxu1 %v12741_v53  ;;  %v12962_v53 = vld [vmem:[%s23055_s5 + $0x2bc] sm:$0xf0]  ;;  %v6540_v4 = vpop.f32.mrf.mxu3 }
 0x352   :  { %6747 = vmatmul.bf16.vlgmr.msrb.gmra.mxu3 %v18253_v50  ;;  %8934 = vmatpush.bf16.msra.mxu2 %v13049_v0  ;;  %v15065_v50 = vld [vmem:[%s23055_s5 + $0x2dc] sm:$0xf]  ;;  %v12965_v26 = vor.u32 %v15058_v54, %v12962_v53  ;;  %v6541_v45 = vadd.f32 %v6540_v4, %v20465_v15  ;;  %v20817_v51 = vpop.f32.mrf.mxu2  ;;  %v12876_v15 = vld [vmem:[%s23055_s5 + $0x1f8] sm:$0xf] }
 0x353   :  { %8843 = vmatpush.bf16.msra.mxu3 %v13045_v22  ;;  %v12993_v34 = vor.u32 %v15065_v50, %v12990_v61  ;;  %v12878_v0 = vld [vmem:[%s23055_s5 + $0x214] sm:$0xf0]  ;;  %v12877_v40 = vor.u32 %v15040_v13, %v12876_v15  ;;  %v12850_v50 = vld [vmem:[%s23055_s5 + $0x1dc] sm:$0xf0]  ;;  %v15205_v53 = vld [vmem:[%s23055_s5 + $0x73c] sm:$0xf] }
 0x354   :  { %v6554_v52 = vadd.f32 %v20473_v17, %v6541_v45  ;;  %v12909_v17 = vor.u32 %v15044_v47, %v12906_v48  ;;  %v12881_v23 = vor.u32 %v15037_v63, %v12878_v0  ;;  %v12853_v54 = vor.u32 %v15030_v37, %v12850_v50  ;;  %v15285_v4 = vld [vmem:[%s23055_s5 + $0x9b8] sm:$0xf0]  ;;  %v15278_v47 = vld [vmem:[%s23055_s5 + $0x980] sm:$0xf0]  ;;  %v13800_v13 = vld [vmem:[%s23055_s5 + $0x930] sm:$0xf] }
 0x355   :  { %8925 = vmatpush.bf16.msra.mxu1 %v12713_v38  ;;  %v12904_v38 = vld [vmem:[%s23055_s5 + $0x230] sm:$0xf]  ;;  %v13829_v15 = vor.u32 %v15278_v47, %v13828_v36  ;;  %v12968_v63 = vld [vmem:[%s23055_s5 + $0x2a8] sm:$0xf]  ;;  %v15062_v0 = vld [vmem:[%s23055_s5 + $0x2c0] sm:$0xf0] }
 0x356   :  { %8935 = vmatpush.bf16.msra.mxu2 %v13021_v28  ;;  %v12905_v39 = vor.u32 %v15047_v62, %v12904_v38  ;;  %v20837_v49 = vadd.f32 %v20475_v58, %v6554_v52  ;;  %v15033_v58 = vld [vmem:[%s23055_s5 + $0x1d8] sm:$0xf0]  ;;  %v13578_v28 = vld [vmem:[%s23055_s5 + $0x78c] sm:$0xf0]  ;;  %v13856_v62 = vld [vmem:[%s23055_s5 + $0x9a0] sm:$0xf] }
 0x357   :  { %8844 = vmatpush.bf16.msra.mxu3 %v13017_v27  ;;  %v12848_v27 = vld [vmem:[%s23055_s5 + $0x1c0] sm:$0xf]  ;;  %v13581_v12 = vor.u32 %v15212_v25, %v13578_v28  ;;  %v13857_v45 = vor.u32 %v15285_v4, %v13856_v62  ;;  %v15069_v52 = vld [vmem:[%s23055_s5 + $0x2f8] sm:$0xf0]  ;;  %v15264_v25 = vld [vmem:[%s23055_s5 + $0x910] sm:$0xf0] }
 0x358   :  { %v6580_v56 = vadd.f32 %v20653_v30, %v20837_v49  ;;  %v13942_v30 = vld [vmem:[%s23055_s5 + $0xa64] sm:$0xf0]  ;;  %v15055_v28 = vld [vmem:[%s23055_s5 + $0x288] sm:$0xf0]  ;;  %v14136_v47 = vld [vmem:[%s23055_s5 + $0xbd0] sm:$0xf] }
 0x359   :  { %8926 = vmatpush.bf16.msra.mxu1 %v12685_v32 }
 0x35a   :  { %8936 = vmatpush.bf16.msra.mxu2 %v12993_v34  ;;  %v6633_v61 = vpop.f32.mrf.mxu2  ;;  %v13912_v34 = vld [vmem:[%s23055_s5 + $0xa10] sm:$0xf] }
 0x35b   :  { %8845 = vmatpush.bf16.msra.mxu3 %v12989_v19  ;;  %v12849_v19 = vor.u32 %v15033_v58, %v12848_v27  ;;  %v13913_v11 = vor.u32 %v15299_v18, %v13912_v34  ;;  %v15303_v58 = vld [vmem:[%s23055_s5 + $0xa4c] sm:$0xf]  ;;  %v15257_v34 = vld [vmem:[%s23055_s5 + $0x8d8] sm:$0xf0] }
 0x35c   :  { %v13945_v50 = vor.u32 %v15303_v58, %v13942_v30  ;;  %v14108_v58 = vld [vmem:[%s23055_s5 + $0xb98] sm:$0xf]  ;;  %v15348_v30 = vld [vmem:[%s23055_s5 + $0xbb0] sm:$0xf0] }
 0x35d   :  { %8927 = vmatpush.bf16.msra.mxu1 %v12657_v31  ;;  %v6542_v31 = vpop.f32.mrf.mxu3 }
 0x35e   :  { %8937 = vmatpush.bf16.msra.mxu2 %v12965_v26  ;;  %v15198_v26 = vld [vmem:[%s23055_s5 + $0x704] sm:$0xf]  ;;  %v12969_v31 = vor.u32 %v15062_v0, %v12968_v63  ;;  %v13214_v63 = vld [vmem:[%s23055_s5 + $0x4b4] sm:$0xf0]  ;;  %v13948_v0 = vld [vmem:[%s23055_s5 + $0xa50] sm:$0xf] }
 0x35f   :  { %8846 = vmatpush.bf16.msra.mxu3 %v12961_v46  ;;  %v13525_v38 = vor.u32 %v15198_v26, %v13522_v6  ;;  %v15362_v26 = vld [vmem:[%s23055_s5 + $0xc20] sm:$0xf0] }
 0x360   :  { %v20826_v22 = vpop.f32.mrf.mxu0 }
 0x361   :  { %8928 = vmatpush.bf16.msra.mxu1 %v12629_v8  ;;  %v20828_v32 = vpop.f32.mrf.mxu1  ;;  %v6786_v8 = vmax.f32 %v19963_v5, %v6779_v1  ;;  %v13550_v5 = vld [vmem:[%s23055_s5 + $0x754] sm:$0xf0] }
 0x362   :  { %8938 = vmatpush.bf16.msra.mxu2 %v12937_v42  ;;  %v13553_v16 = vor.u32 %v15205_v53, %v13550_v5  ;;  %v15076_v42 = vld [vmem:[%s23055_s5 + $0x330] sm:$0xf0]  ;;  %v15135_v53 = vld [vmem:[%s23055_s5 + $0x50c] sm:$0xf]  ;;  %v13270_v5 = vld [vmem:[%s23055_s5 + $0x524] sm:$0xf0] }
 0x363   :  { %8847 = vmatpush.bf16.msra.mxu3 %v12933_v57  ;;  %v20883_v46 = vpack.c.bf16 %v6786_v8, %v6786_v8  ;;  %v13025_v48 = vor.u32 %v15076_v42, %v13024_v55  ;;  %v15296_v8 = vld [vmem:[%s23055_s5 + $0xa14] sm:$0xf]  ;;  %v15041_v55 = vld [vmem:[%s23055_s5 + $0x218] sm:$0xf0] }
 0x364   :  { %8929 = vmatmul.bf16.vlgmr.msra.gmra.mxu1 %v20579_v7  ;;  %v15128_v42 = vld [vmem:[%s23055_s5 + $0x4d4] sm:$0xf] }
 0x365   :  { %8973 = vmatpush.bf16.msrb.mxu1 %v13721_v10 }
 0x366   :  { %8939 = vmatpush.bf16.msra.mxu2 %v12909_v17 }
 0x367   :  { %8848 = vmatpush.bf16.msra.mxu3 %v12905_v39  ;;  %v12996_v39 = vld [vmem:[%s23055_s5 + $0x2e0] sm:$0xf] }
 0x368   :  { %v6659_v9 = vpop.f32.mrf.mxu0  ;;  %v12997_v17 = vor.u32 %v15069_v52, %v12996_v39 }
 0x369   :  { %8974 = vmatpush.bf16.msrb.mxu1 %v13693_v20  ;;  %v6672_v10 = vpop.f32.mrf.mxu1  ;;  %v13884_v20 = vld [vmem:[%s23055_s5 + $0x9d8] sm:$0xf] }
 0x36a   :  { %8940 = vmatpush.bf16.msra.mxu2 %v12881_v23  ;;  %v13885_v57 = vor.u32 %v15292_v21, %v13884_v20  ;;  %v12940_v23 = vld [vmem:[%s23055_s5 + $0x270] sm:$0xf]  ;;  %v14164_v21 = vld [vmem:[%s23055_s5 + $0xc08] sm:$0xf] }
 0x36b   :  { %8849 = vmatpush.bf16.msra.mxu3 %v12877_v40  ;;  %v12941_v9 = vor.u32 %v15055_v28, %v12940_v23  ;;  %v13914_v10 = vld [vmem:[%s23055_s5 + $0xa2c] sm:$0xf0]  ;;  %v14165_v62 = vor.u32 %v15362_v26, %v14164_v21  ;;  %v14109_v23 = vor.u32 %v15348_v30, %v14108_v58  ;;  %v14052_v26 = vld [vmem:[%s23055_s5 + $0xb28] sm:$0xf]  ;;  %v15279_v58 = vld [vmem:[%s23055_s5 + $0x988] sm:$0xf0] }
 0x36d   :  { %8975 = vmatpush.bf16.msrb.mxu1 %v13665_v41  ;;  %v13053_v41 = vor.u32 %v15083_v35, %v13052_v33  ;;  %v13273_v33 = vor.u32 %v15135_v53, %v13270_v5  ;;  %v12884_v35 = vld [vmem:[%s23055_s5 + $0x200] sm:$0xf]  ;;  %8908 = vmatpush.bf16.msra.mxu0 %v14165_v62  ;;  %v15107_v5 = vld [vmem:[%s23055_s5 + $0x42c] sm:$0xf] }
 0x36e   :  { %8941 = vmatpush.bf16.msra.mxu2 %v12853_v54  ;;  %v15048_v54 = vld [vmem:[%s23055_s5 + $0x250] sm:$0xf0]  ;;  %v12885_v39 = vor.u32 %v15041_v55, %v12884_v35  ;;  %v15261_v35 = vld [vmem:[%s23055_s5 + $0x8fc] sm:$0xf]  ;;  %v6632_v55 = vadd.f32 %v20817_v51, %v20683_v3  ;;  %v15327_v3 = vld [vmem:[%s23055_s5 + $0xb08] sm:$0xf0] }
 0x36f   :  { %8850 = vmatpush.bf16.msra.mxu3 %v12849_v19  ;;  %v12912_v19 = vld [vmem:[%s23055_s5 + $0x238] sm:$0xf] }
 0x370   :  { %v12913_v6 = vor.u32 %v15048_v54, %v12912_v19  ;;  %v15300_v19 = vld [vmem:[%s23055_s5 + $0xa30] sm:$0xf0] }
 0x371   :  { %8976 = vmatpush.bf16.msrb.mxu1 %v13637_v59  ;;  %v15271_v59 = vld [vmem:[%s23055_s5 + $0x948] sm:$0xf0] }
 0x372   :  { %8851 = vmatmul.bf16.vlgmr.msra.gmra.mxu3 %v20883_v46  ;;  %v6592_v29 = vpop.f32.mrf.mxu3  ;;  %v13801_v1 = vor.u32 %v15271_v59, %v13800_v13  ;;  %v15282_v13 = vld [vmem:[%s23055_s5 + $0x9a4] sm:$0xf]  ;;  %v13858_v59 = vld [vmem:[%s23055_s5 + $0x9bc] sm:$0xf0] }
 0x373   :  { %8895 = vmatpush.bf16.msrb.mxu3 %v13941_v60  ;;  %v6593_v40 = vadd.f32 %v6592_v29, %v6580_v56  ;;  %v20942_v27 = vpop.f32.mrf.mxu2  ;;  %v15121_v29 = vld [vmem:[%s23055_s5 + $0x49c] sm:$0xf] }
 0x375   :  { %8977 = vmatpush.bf16.msrb.mxu1 %v13609_v43  ;;  %v6782_v49 = vmul.f32 0.2, %v6593_v40  ;;  %v13772_v43 = vld [vmem:[%s23055_s5 + $0x8f8] sm:$0xf] }
 0x376   :  { %v13773_v61 = vor.u32 %v15264_v25, %v13772_v43  ;;  %v15275_v43 = vld [vmem:[%s23055_s5 + $0x96c] sm:$0xf]  ;;  %v13830_v25 = vld [vmem:[%s23055_s5 + $0x984] sm:$0xf0] }
 0x377   :  { %8896 = vmatpush.bf16.msrb.mxu3 %v13913_v11  ;;  %v6789_v37 = vmax.f32 %v6593_v40, %v6782_v49  ;;  %v15307_v40 = vld [vmem:[%s23055_s5 + $0xa68] sm:$0xf0] }
 0x378   :  { %v13949_v28 = vor.u32 %v15307_v40, %v13948_v0  ;;  %v13102_v0 = vld [vmem:[%s23055_s5 + $0x3d4] sm:$0xf0] }
 0x379   :  { %8978 = vmatpush.bf16.msrb.mxu1 %v13581_v12  ;;  %v20972_v60 = vpack.c.bf16 %v6789_v37, %v6789_v37  ;;  %v13744_v12 = vld [vmem:[%s23055_s5 + $0x8c0] sm:$0xf]  ;;  %v15114_v37 = vld [vmem:[%s23055_s5 + $0x464] sm:$0xf] }
 0x37a   :  { %v6594_v18 = vpop.f32.mrf.mxu3  ;;  %v13745_v20 = vor.u32 %v15257_v34, %v13744_v12  ;;  %v15268_v34 = vld [vmem:[%s23055_s5 + $0x934] sm:$0xf] }
 0x37b   :  { %8897 = vmatpush.bf16.msrb.mxu3 %v13885_v57  ;;  %8890 = vmatmul.bf16.vlgmr.msrb.gmra.mxu2 %v20972_v60  ;;  %v6685_v11 = vpop.f32.mrf.mxu2  ;;  %v15289_v57 = vld [vmem:[%s23055_s5 + $0x9dc] sm:$0xf]  ;;  %v13802_v18 = vld [vmem:[%s23055_s5 + $0x94c] sm:$0xf0] }
 0x37c   :  { %8986 = vmatpush.bf16.msrb.mxu2 %v13945_v50  ;;  %v13186_v50 = vld [vmem:[%s23055_s5 + $0x47c] sm:$0xf0]  ;;  %v13158_v11 = vld [vmem:[%s23055_s5 + $0x444] sm:$0xf0]  ;;  %v13805_v21 = vor.u32 %v15268_v34, %v13802_v18  ;;  %v15359_v18 = vld [vmem:[%s23055_s5 + $0xc0c] sm:$0xf] }
 0x37d   :  { %8979 = vmatpush.bf16.msrb.mxu1 %v13553_v16  ;;  %v13917_v16 = vor.u32 %v15296_v8, %v13914_v10  ;;  %v13833_v8 = vor.u32 %v15275_v43, %v13830_v25  ;;  %v15341_v10 = vld [vmem:[%s23055_s5 + $0xb78] sm:$0xf0]  ;;  %v13189_v12 = vor.u32 %v15114_v37, %v13186_v50  ;;  %v13996_v43 = vld [vmem:[%s23055_s5 + $0xab8] sm:$0xf] }
 0x37e   :  { %v13248_v37 = vld [vmem:[%s23055_s5 + $0x4d8] sm:$0xf] }
 0x37f   :  { %8898 = vmatpush.bf16.msrb.mxu3 %v13857_v45  ;;  %v13242_v45 = vld [vmem:[%s23055_s5 + $0x4ec] sm:$0xf0] }
 0x380   :  { %v20956_v2 = vpop.f32.mrf.mxu0  ;;  %8987 = vmatpush.bf16.msrb.mxu2 %v13917_v16  ;;  %v13245_v52 = vor.u32 %v15128_v42, %v13242_v45  ;;  %v13892_v16 = vld [vmem:[%s23055_s5 + $0x9e0] sm:$0xf]  ;;  %v13864_v42 = vld [vmem:[%s23055_s5 + $0x9a8] sm:$0xf]  ;;  %v15286_v45 = vld [vmem:[%s23055_s5 + $0x9c0] sm:$0xf0] }
 0x381   :  { %8980 = vmatpush.bf16.msrb.mxu1 %v13525_v38  ;;  %v20958_v14 = vpop.f32.mrf.mxu1  ;;  %v13886_v38 = vld [vmem:[%s23055_s5 + $0x9f4] sm:$0xf0] }
 0x382   :  { %v13889_v36 = vor.u32 %v15289_v57, %v13886_v38  ;;  %v13774_v57 = vld [vmem:[%s23055_s5 + $0x914] sm:$0xf0] }
 0x383   :  { %8899 = vmatpush.bf16.msrb.mxu3 %v13829_v15  ;;  %v12856_v15 = vld [vmem:[%s23055_s5 + $0x1c8] sm:$0xf] }
 0x384   :  { %8981 = vmatmul.bf16.vlgmr.msrb.gmra.mxu1 %v20972_v60  ;;  %8988 = vmatpush.bf16.msrb.mxu2 %v13889_v36 }
 0x385   :  { %9025 = vmatpush.bf16.msra.mxu1 %v13053_v41 }
 0x387   :  { %8900 = vmatpush.bf16.msrb.mxu3 %v13801_v1  ;;  %v13861_v1 = vor.u32 %v15282_v13, %v13858_v59  ;;  %v13276_v13 = vld [vmem:[%s23055_s5 + $0x510] sm:$0xf] }
 0x388   :  { %v6711_v4 = vpop.f32.mrf.mxu0 }
 0x389   :  { %9026 = vmatpush.bf16.msra.mxu1 %v13025_v48  ;;  %v6724_v41 = vpop.f32.mrf.mxu1  ;;  %v15355_v48 = vld [vmem:[%s23055_s5 + $0xbe8] sm:$0xf0]  ;;  %8989 = vmatpush.bf16.msrb.mxu2 %v13861_v1  ;;  %v15100_v4 = vld [vmem:[%s23055_s5 + $0x3f4] sm:$0xf]  ;;  %v13836_v1 = vld [vmem:[%s23055_s5 + $0x970] sm:$0xf] }
 0x38a   :  { %v14137_v56 = vor.u32 %v15355_v48, %v14136_v47  ;;  %v13130_v41 = vld [vmem:[%s23055_s5 + $0x40c] sm:$0xf0]  ;;  %v13777_v47 = vor.u32 %v15261_v35, %v13774_v57  ;;  %v15125_v35 = vld [vmem:[%s23055_s5 + $0x4b8] sm:$0xf0]  ;;  %v13494_v57 = vld [vmem:[%s23055_s5 + $0x6e4] sm:$0xf0] }
 0x38b   :  { %8901 = vmatpush.bf16.msrb.mxu3 %v13773_v61  ;;  %v13920_v61 = vld [vmem:[%s23055_s5 + $0xa18] sm:$0xf]  ;;  %8942 = vmatmul.bf16.vlgmr.msra.gmra.mxu2 %v20883_v46  ;;  %v14024_v48 = vld [vmem:[%s23055_s5 + $0xaf0] sm:$0xf] }
 0x38c   :  { %8909 = vmatpush.bf16.msra.mxu0 %v14137_v56  ;;  %v13921_v53 = vor.u32 %v15300_v19, %v13920_v61  ;;  %v14025_v59 = vor.u32 %v15327_v3, %v14024_v48  ;;  %v13837_v61 = vor.u32 %v15279_v58, %v13836_v1  ;;  %v15132_v19 = vld [vmem:[%s23055_s5 + $0x4f0] sm:$0xf0]  ;;  %v14138_v3 = vld [vmem:[%s23055_s5 + $0xbec] sm:$0xf0]  ;;  %v15345_v1 = vld [vmem:[%s23055_s5 + $0xb9c] sm:$0xf] }
 0x38d   :  { %9027 = vmatpush.bf16.msra.mxu1 %v12997_v17  ;;  %v15034_v17 = vld [vmem:[%s23055_s5 + $0x1e0] sm:$0xf0]  ;;  %8990 = vmatpush.bf16.msrb.mxu2 %v13833_v8 }
 0x38e   :  { %v12857_v49 = vor.u32 %v15034_v17, %v12856_v15  ;;  %v13746_v15 = vld [vmem:[%s23055_s5 + $0x8dc] sm:$0xf0]  ;;  %v13865_v17 = vor.u32 %v15286_v45, %v13864_v42  ;;  %v15086_v8 = vld [vmem:[%s23055_s5 + $0x384] sm:$0xf] }
 0x38f   :  { %8902 = vmatpush.bf16.msrb.mxu3 %v13745_v20  ;;  %v15293_v20 = vld [vmem:[%s23055_s5 + $0x9f8] sm:$0xf0] }
 0x390   :  { %8910 = vmatpush.bf16.msra.mxu0 %v14109_v23  ;;  %v13893_v62 = vor.u32 %v15293_v20, %v13892_v16  ;;  %v14166_v16 = vld [vmem:[%s23055_s5 + $0xc24] sm:$0xf0] }
 0x391   :  { %9028 = vmatpush.bf16.msra.mxu1 %v12969_v31  ;;  %v13217_v31 = vor.u32 %v15121_v29, %v13214_v63  ;;  %8991 = vmatpush.bf16.msrb.mxu2 %v13805_v21  ;;  %v15139_v29 = vld [vmem:[%s23055_s5 + $0x528] sm:$0xf0]  ;;  %v15093_v63 = vld [vmem:[%s23055_s5 + $0x3bc] sm:$0xf]  ;;  %v14169_v45 = vor.u32 %v15359_v18, %v14166_v16  ;;  %v13136_v18 = vld [vmem:[%s23055_s5 + $0x3f8] sm:$0xf] }
 0x392   :  { %v13277_v23 = vor.u32 %v15139_v29, %v13276_v13  ;;  %v15191_v21 = vld [vmem:[%s23055_s5 + $0x6cc] sm:$0xf]  ;;  %v15118_v13 = vld [vmem:[%s23055_s5 + $0x480] sm:$0xf0]  ;;  %v13222_v16 = vld [vmem:[%s23055_s5 + $0x4bc] sm:$0xf0] }
 0x393   :  { %8947 = vmatpush.bf16.msra.mxu3 %v13273_v33  ;;  %v13161_v33 = vor.u32 %v15107_v5, %v13158_v11  ;;  %v21139_v56 = vpop.f32.mrf.mxu2  ;;  %v13249_v5 = vor.u32 %v15132_v19, %v13248_v37  ;;  %v15258_v29 = vld [vmem:[%s23055_s5 + $0x8e0] sm:$0xf0]  ;;  %v15129_v19 = vld [vmem:[%s23055_s5 + $0x4dc] sm:$0xf] }
 0x395   :  { %9029 = vmatpush.bf16.msra.mxu1 %v12941_v9  ;;  %v14080_v9 = vld [vmem:[%s23055_s5 + $0xb60] sm:$0xf]  ;;  %v6644_v36 = vpop.f32.mrf.mxu3  ;;  %8992 = vmatpush.bf16.msrb.mxu2 %v13777_v47 }
 0x396   :  { %v14081_v54 = vor.u32 %v15341_v10, %v14080_v9  ;;  %v6645_v51 = vadd.f32 %v6644_v36, %v6632_v55  ;;  %v13808_v10 = vld [vmem:[%s23055_s5 + $0x938] sm:$0xf]  ;;  %v15352_v36 = vld [vmem:[%s23055_s5 + $0xbd4] sm:$0xf] }
 0x397   :  { %8948 = vmatpush.bf16.msra.mxu3 %v13245_v52  ;;  %v15254_v52 = vld [vmem:[%s23055_s5 + $0x8c4] sm:$0xf] }
 0x398   :  { %8911 = vmatpush.bf16.msra.mxu0 %v14081_v54  ;;  %v6658_v40 = vadd.f32 %v20826_v22, %v6645_v51  ;;  %v15320_v22 = vld [vmem:[%s23055_s5 + $0xad0] sm:$0xf0]  ;;  %v13968_v54 = vld [vmem:[%s23055_s5 + $0xa80] sm:$0xf] }
 0x399   :  { %9030 = vmatpush.bf16.msra.mxu1 %v12913_v6  ;;  %v15334_v6 = vld [vmem:[%s23055_s5 + $0xb40] sm:$0xf0]  ;;  %v13997_v50 = vor.u32 %v15320_v22, %v13996_v43  ;;  %v15184_v51 = vld [vmem:[%s23055_s5 + $0x694] sm:$0xf]  ;;  %v15177_v43 = vld [vmem:[%s23055_s5 + $0x65c] sm:$0xf] }
 0x39a   :  { %v14053_v38 = vor.u32 %v15334_v6, %v14052_v26  ;;  %v6671_v25 = vadd.f32 %v20828_v32, %v6658_v40  ;;  %v13074_v32 = vld [vmem:[%s23055_s5 + $0x39c] sm:$0xf0]  ;;  %v13278_v40 = vld [vmem:[%s23055_s5 + $0x52c] sm:$0xf0]  ;;  %v13438_v22 = vld [vmem:[%s23055_s5 + $0x674] sm:$0xf0] }
 0x39b   :  { %8949 = vmatpush.bf16.msra.mxu3 %v13217_v31  ;;  %v13749_v31 = vor.u32 %v15254_v52, %v13746_v15  ;;  %v13077_v11 = vor.u32 %v15086_v8, %v13074_v32  ;;  %v6737_v26 = vpop.f32.mrf.mxu2  ;;  %v13192_v15 = vld [vmem:[%s23055_s5 + $0x468] sm:$0xf]  ;;  %v13441_v37 = vor.u32 %v15177_v43, %v13438_v22  ;;  %v13250_v8 = vld [vmem:[%s23055_s5 + $0x4f4] sm:$0xf0]  ;;  %v15338_v32 = vld [vmem:[%s23055_s5 + $0xb64] sm:$0xf] }
 0x39c   :  { %8912 = vmatpush.bf16.msra.mxu0 %v14053_v38  ;;  %v6684_v9 = vadd.f32 %v20942_v27, %v6671_v25  ;;  %v15313_v27 = vld [vmem:[%s23055_s5 + $0xa98] sm:$0xf0]  ;;  %v13193_v58 = vor.u32 %v15118_v13, %v13192_v15  ;;  %v14054_v26 = vld [vmem:[%s23055_s5 + $0xb44] sm:$0xf0]  ;;  %v15090_v13 = vld [vmem:[%s23055_s5 + $0x3a0] sm:$0xf0] }
 0x39d   :  { %9031 = vmatpush.bf16.msra.mxu1 %v12885_v39  ;;  %v13133_v39 = vor.u32 %v15100_v4, %v13130_v41  ;;  %v6646_v34 = vpop.f32.mrf.mxu3  ;;  %8993 = vmatpush.bf16.msrb.mxu2 %v13749_v31  ;;  %v13969_v20 = vor.u32 %v15313_v27, %v13968_v54  ;;  %v15265_v4 = vld [vmem:[%s23055_s5 + $0x918] sm:$0xf0]  ;;  %v13497_v41 = vor.u32 %v15191_v21, %v13494_v57  ;;  %v14110_v31 = vld [vmem:[%s23055_s5 + $0xbb4] sm:$0xf0]  ;;  %v15104_v54 = vld [vmem:[%s23055_s5 + $0x410] sm:$0xf0] }
 0x39e   :  { %v13410_v34 = vld [vmem:[%s23055_s5 + $0x63c] sm:$0xf0]  ;;  %v13137_v21 = vor.u32 %v15104_v54, %v13136_v18  ;;  %v15097_v57 = vld [vmem:[%s23055_s5 + $0x3d8] sm:$0xf0]  ;;  %v13080_v15 = vld [vmem:[%s23055_s5 + $0x388] sm:$0xf] }
 0x39f   :  { %8950 = vmatpush.bf16.msra.mxu3 %v13189_v12  ;;  %v15272_v12 = vld [vmem:[%s23055_s5 + $0x950] sm:$0xf0]  ;;  %v15317_v43 = vld [vmem:[%s23055_s5 + $0xabc] sm:$0xf]  ;;  %v15310_v18 = vld [vmem:[%s23055_s5 + $0xa84] sm:$0xf] }
 0x3a0   :  { %8913 = vmatpush.bf16.msra.mxu0 %v14025_v59  ;;  %v21157_v30 = vpop.f32.mrf.mxu0  ;;  %v13809_v6 = vor.u32 %v15272_v12, %v13808_v10  ;;  %v14082_v10 = vld [vmem:[%s23055_s5 + $0xb7c] sm:$0xf0]  ;;  %v15170_v12 = vld [vmem:[%s23055_s5 + $0x624] sm:$0xf] }
 0x3a1   :  { %9032 = vmatpush.bf16.msra.mxu1 %v12857_v49  ;;  %v21159_v49 = vpop.f32.mrf.mxu1  ;;  %9038 = vmatpush.bf16.msra.mxu2 %v13277_v23  ;;  %v13164_v23 = vld [vmem:[%s23055_s5 + $0x430] sm:$0xf]  ;;  %v13413_v27 = vor.u32 %v15170_v12, %v13410_v34  ;;  %v15101_v12 = vld [vmem:[%s23055_s5 + $0x3fc] sm:$0xf]  ;;  %v13138_v34 = vld [vmem:[%s23055_s5 + $0x414] sm:$0xf0] }
 0x3a2   :  { %v15142_v54 = vld [vmem:[%s23055_s5 + $0x544] sm:$0xf] }
 0x3a3   :  { %8951 = vmatpush.bf16.msra.mxu3 %v13161_v33  ;;  %v13220_v33 = vld [vmem:[%s23055_s5 + $0x4a0] sm:$0xf] }
 0x3a4   :  { %9033 = vmatmul.bf16.vlgmr.msra.gmra.mxu1 %v20883_v46  ;;  %8914 = vmatpush.bf16.msra.mxu0 %v13997_v50  ;;  %v13221_v48 = vor.u32 %v15125_v35, %v13220_v33  ;;  %v13382_v33 = vld [vmem:[%s23055_s5 + $0x604] sm:$0xf0]  ;;  %v13108_v35 = vld [vmem:[%s23055_s5 + $0x3c0] sm:$0xf] }
 0x3a5   :  { %9077 = vmatpush.bf16.msrb.mxu1 %v13949_v28  ;;  %v13105_v28 = vor.u32 %v15093_v63, %v13102_v0  ;;  %9039 = vmatpush.bf16.msra.mxu2 %v13249_v5  ;;  %v14141_v63 = vor.u32 %v15352_v36, %v14138_v3  ;;  %v15136_v0 = vld [vmem:[%s23055_s5 + $0x514] sm:$0xf]  ;;  %v14085_v5 = vor.u32 %v15338_v32, %v14082_v10  ;;  %v14026_v3 = vld [vmem:[%s23055_s5 + $0xb0c] sm:$0xf0] }
 0x3a6   :  { %v13281_v50 = vor.u32 %v15136_v0, %v13278_v40  ;;  %v15324_v36 = vld [vmem:[%s23055_s5 + $0xaf4] sm:$0xf]  ;;  %v15363_v0 = vld [vmem:[%s23055_s5 + $0xc28] sm:$0xf0] }
 0x3a7   :  { %8952 = vmatpush.bf16.msra.mxu3 %v13133_v39  ;;  %v13466_v39 = vld [vmem:[%s23055_s5 + $0x6ac] sm:$0xf0]  ;;  %v15356_v32 = vld [vmem:[%s23055_s5 + $0xbf0] sm:$0xf0] }
 0x3a8   :  { %8915 = vmatpush.bf16.msra.mxu0 %v13969_v20  ;;  %v6763_v55 = vpop.f32.mrf.mxu0  ;;  %v13469_v59 = vor.u32 %v15184_v51, %v13466_v39  ;;  %v15331_v20 = vld [vmem:[%s23055_s5 + $0xb2c] sm:$0xf]  ;;  %v15156_v51 = vld [vmem:[%s23055_s5 + $0x5b4] sm:$0xf]  ;;  %v13354_v39 = vld [vmem:[%s23055_s5 + $0x5cc] sm:$0xf0] }
 0x3a9   :  { %9078 = vmatpush.bf16.msrb.mxu1 %v13921_v53  ;;  %v6783_v53 = vmul.f32 0.2, %v6684_v9  ;;  %v6776_v42 = vpop.f32.mrf.mxu1  ;;  %9040 = vmatpush.bf16.msra.mxu2 %v13221_v48  ;;  %v14057_v55 = vor.u32 %v15331_v20, %v14054_v26  ;;  %v13109_v48 = vor.u32 %v15097_v57, %v13108_v35  ;;  %v14116_v26 = vld [vmem:[%s23055_s5 + $0xba0] sm:$0xf]  ;;  %v15094_v57 = vld [vmem:[%s23055_s5 + $0x3c4] sm:$0xf] }
 0x3aa   :  { %v15115_v42 = vld [vmem:[%s23055_s5 + $0x46c] sm:$0xf] }
 0x3ab   :  { %8953 = vmatpush.bf16.msra.mxu3 %v13105_v28  ;;  %v6790_v38 = vmax.f32 %v6684_v9, %v6783_v53  ;;  %v15111_v28 = vld [vmem:[%s23055_s5 + $0x448] sm:$0xf0]  ;;  %v13253_v53 = vor.u32 %v15129_v19, %v13250_v8  ;;  %v14144_v8 = vld [vmem:[%s23055_s5 + $0xbd8] sm:$0xf] }
 0x3ac   :  { %8960 = vmatpush.bf16.msrb.mxu0 %v13497_v41  ;;  %v13165_v9 = vor.u32 %v15111_v28, %v13164_v23  ;;  %v13998_v23 = vld [vmem:[%s23055_s5 + $0xad4] sm:$0xf0]  ;;  %v15149_v28 = vld [vmem:[%s23055_s5 + $0x57c] sm:$0xf] }
 0x3ad   :  { %9079 = vmatpush.bf16.msrb.mxu1 %v13893_v62  ;;  %v13780_v62 = vld [vmem:[%s23055_s5 + $0x900] sm:$0xf]  ;;  %v21220_v47 = vpack.c.bf16 %v6790_v38, %v6790_v38  ;;  %9041 = vmatpush.bf16.msra.mxu2 %v13193_v58  ;;  %v15108_v58 = vld [vmem:[%s23055_s5 + $0x434] sm:$0xf]  ;;  %v14001_v10 = vor.u32 %v15317_v43, %v13998_v23  ;;  %v15353_v43 = vld [vmem:[%s23055_s5 + $0xbdc] sm:$0xf] }
 0x3ae   :  { %v13781_v52 = vor.u32 %v15265_v4, %v13780_v62  ;;  %v15384_v62 = vld [vmem:[%s23054_s4] sm:$0xff]  ;;  %v13416_v23 = vld [vmem:[%s23055_s5 + $0x628] sm:$0xf] }
 0x3af   :  { %8954 = vmatpush.bf16.msra.mxu3 %v13077_v11  ;;  %8994 = vmatmul.bf16.vlgmr.msrb.gmra.mxu2 %v21220_v47  ;;  %v15122_v11 = vld [vmem:[%s23055_s5 + $0x4a4] sm:$0xf]  ;;  %v4117_v4 = vperm.slane %v15384_v62, 6 }
 0x3b0   :  { %8903 = vmatmul.bf16.vlgmr.msrb.gmra.mxu3 %v21220_v47  ;;  %8961 = vmatpush.bf16.msrb.mxu0 %v13469_v59  ;;  %v13225_v41 = vor.u32 %v15122_v11, %v13222_v16  ;;  %v13357_v59 = vor.u32 %v15156_v51, %v13354_v39  ;;  %v13500_v11 = vld [vmem:[%s23055_s5 + $0x6d0] sm:$0xf]  ;;  %v15195_v16 = vld [vmem:[%s23055_s5 + $0x6e8] sm:$0xf0]  ;;  %v13082_v51 = vld [vmem:[%s23055_s5 + $0x3a4] sm:$0xf0] }
 0x3b1   :  { %9080 = vmatpush.bf16.msrb.mxu1 %v13865_v17  ;;  %v13752_v17 = vld [vmem:[%s23055_s5 + $0x8c8] sm:$0xf]  ;;  %9042 = vmatpush.bf16.msra.mxu2 %v13165_v9  ;;  %v13501_v62 = vor.u32 %v15195_v16, %v13500_v11 }
 0x3b2   :  { %v13753_v25 = vor.u32 %v15258_v29, %v13752_v17  ;;  %v14090_v11 = vld [vmem:[%s23055_s5 + $0xb84] sm:$0xf0] }
 0x3b3   :  { %8999 = vmatpush.bf16.msrb.mxu3 %v14169_v45  ;;  %v13194_v45 = vld [vmem:[%s23055_s5 + $0x484] sm:$0xf0] }
 0x3b4   :  { %8962 = vmatpush.bf16.msrb.mxu0 %v13441_v37  ;;  %v13197_v29 = vor.u32 %v15115_v42, %v13194_v45  ;;  %v21352_v40 = vpop.f32.mrf.mxu2  ;;  %v13326_v37 = vld [vmem:[%s23055_s5 + $0x594] sm:$0xf0]  ;;  %v15188_v42 = vld [vmem:[%s23055_s5 + $0x6b0] sm:$0xf0] }
 0x3b5   :  { %9081 = vmatpush.bf16.msrb.mxu1 %v13837_v61  ;;  %v14113_v61 = vor.u32 %v15345_v1, %v14110_v31  ;;  %9043 = vmatpush.bf16.msra.mxu2 %v13137_v21  ;;  %v14029_v1 = vor.u32 %v15324_v36, %v14026_v3  ;;  %v13166_v31 = vld [vmem:[%s23055_s5 + $0x44c] sm:$0xf0]  ;;  %v13329_v19 = vor.u32 %v15149_v28, %v13326_v37  ;;  %v14088_v36 = vld [vmem:[%s23055_s5 + $0xb68] sm:$0xf]  ;;  %v15087_v3 = vld [vmem:[%s23055_s5 + $0x38c] sm:$0xf] }
 0x3b6   :  { %v13141_v21 = vor.u32 %v15101_v12, %v13138_v34  ;;  %v15174_v28 = vld [vmem:[%s23055_s5 + $0x640] sm:$0xf0]  ;;  %v14032_v37 = vld [vmem:[%s23055_s5 + $0xaf8] sm:$0xf]  ;;  %v13388_v34 = vld [vmem:[%s23055_s5 + $0x5f0] sm:$0xf] }
 0x3b7   :  { %9000 = vmatpush.bf16.msrb.mxu3 %v14141_v63  ;;  %v14172_v63 = vld [vmem:[%s23055_s5 + $0xc10] sm:$0xf] }
 0x3b8   :  { %8963 = vmatpush.bf16.msrb.mxu0 %v13413_v27  ;;  %v13298_v27 = vld [vmem:[%s23055_s5 + $0x55c] sm:$0xf0] }
 0x3b9   :  { %9082 = vmatpush.bf16.msrb.mxu1 %v13809_v6  ;;  %v15163_v6 = vld [vmem:[%s23055_s5 + $0x5ec] sm:$0xf]  ;;  %9044 = vmatpush.bf16.msra.mxu2 %v13109_v48  ;;  %v13301_v20 = vor.u32 %v15142_v54, %v13298_v27  ;;  %v15342_v48 = vld [vmem:[%s23055_s5 + $0xb80] sm:$0xf0]  ;;  %v15321_v54 = vld [vmem:[%s23055_s5 + $0xad8] sm:$0xf0] }
 0x3ba   :  { %v13385_v38 = vor.u32 %v15163_v6, %v13382_v33  ;;  %v15349_v6 = vld [vmem:[%s23055_s5 + $0xbb8] sm:$0xf0] }
 0x3bb   :  { %9001 = vmatpush.bf16.msrb.mxu3 %v14113_v61  ;;  %v14173_v61 = vor.u32 %v15363_v0, %v14172_v63  ;;  %v13085_v63 = vor.u32 %v15087_v3, %v13082_v51  ;;  %v14060_v0 = vld [vmem:[%s23055_s5 + $0xb30] sm:$0xf] }
 0x3bc   :  { %8964 = vmatpush.bf16.msrb.mxu0 %v13385_v38  ;;  %v8841_v33 = vpop.f32.mrf.mxu2  ;;  %v13110_v38 = vld [vmem:[%s23055_s5 + $0x3dc] sm:$0xf0] }
 0x3bd   :  { %9083 = vmatpush.bf16.msrb.mxu1 %v13781_v52  ;;  %v6696_v52 = vpop.f32.mrf.mxu3  ;;  %v13113_v45 = vor.u32 %v15094_v57, %v13110_v38  ;;  %v13976_v33 = vld [vmem:[%s23055_s5 + $0xa88] sm:$0xf]  ;;  %v15192_v57 = vld [vmem:[%s23055_s5 + $0x6d4] sm:$0xf]  ;;  %v13502_v38 = vld [vmem:[%s23055_s5 + $0x6ec] sm:$0xf0] }
 0x3be   :  { %v6697_v17 = vadd.f32 %v6696_v52, %v4117_v4  ;;  %v15360_v52 = vld [vmem:[%s23055_s5 + $0xc14] sm:$0xf]  ;;  %v13505_v3 = vor.u32 %v15192_v57, %v13502_v38  ;;  %v15010_v38 = vld [vmem:[%s23055_s5 + $0x124] sm:$0xf] }
 0x3bf   :  { %9002 = vmatpush.bf16.msrb.mxu3 %v14085_v5  ;;  %v14145_v5 = vor.u32 %v15356_v32, %v14144_v8  ;;  %v15346_v8 = vld [vmem:[%s23055_s5 + $0xba4] sm:$0xf]  ;;  %v14118_v32 = vld [vmem:[%s23055_s5 + $0xbbc] sm:$0xf0] }
 0x3c0   :  { %8955 = vmatmul.bf16.vlgmr.msra.gmra.mxu3 %v20626_v44  ;;  %v6710_v22 = vadd.f32 %v20956_v2, %v6697_v17  ;;  %8965 = vmatpush.bf16.msrb.mxu0 %v13357_v59  ;;  %v13169_v2 = vor.u32 %v15108_v58, %v13166_v31  ;;  %v14089_v59 = vor.u32 %v15342_v48, %v14088_v36  ;;  %v13444_v17 = vld [vmem:[%s23055_s5 + $0x660] sm:$0xf]  ;;  %v15153_v36 = vld [vmem:[%s23055_s5 + $0x598] sm:$0xf0] }
 0x3c1   :  { %9084 = vmatpush.bf16.msrb.mxu1 %v13753_v25  ;;  %v13081_v25 = vor.u32 %v15090_v13, %v13080_v15  ;;  %v14174_v15 = vld [vmem:[%s23055_s5 + $0xc2c] sm:$0xf0]  ;;  %v21445_v13 = vpop.f32.mrf.mxu1  ;;  %v14121_v27 = vor.u32 %v15346_v8, %v14118_v32 }
 0x3c2   :  { %v21382_v9 = vadd.f32 %v20958_v14, %v6710_v22  ;;  %v13970_v14 = vld [vmem:[%s23055_s5 + $0xa9c] sm:$0xf0]  ;;  %v14177_v58 = vor.u32 %v15360_v52, %v14174_v15  ;;  %v14146_v22 = vld [vmem:[%s23055_s5 + $0xbf4] sm:$0xf0] }
 0x3c3   :  { %9003 = vmatpush.bf16.msrb.mxu3 %v14057_v55  ;;  %9045 = vmatpush.bf16.msra.mxu2 %v13081_v25  ;;  %v13973_v35 = vor.u32 %v15310_v18, %v13970_v14  ;;  %v13472_v55 = vld [vmem:[%s23055_s5 + $0x698] sm:$0xf]  ;;  %v15167_v18 = vld [vmem:[%s23055_s5 + $0x608] sm:$0xf0]  ;;  %v14004_v14 = vld [vmem:[%s23055_s5 + $0xac0] sm:$0xf] }
 0x3c4   :  { %9085 = vmatmul.bf16.vlgmr.msrb.gmra.mxu1 %v21220_v47  ;;  %8966 = vmatpush.bf16.msrb.mxu0 %v13329_v19  ;;  %v13473_v39 = vor.u32 %v15188_v42, %v13472_v55  ;;  %v14149_v19 = vor.u32 %v15353_v43, %v14146_v22  ;;  %v6736_v16 = vadd.f32 %v21139_v56, %v21382_v9  ;;  %v13474_v52 = vld [vmem:[%s23055_s5 + $0x6b4] sm:$0xf0]  ;;  %v15024_v43 = vld [vmem:[%s23055_s5 + $0x194] sm:$0xf] }
 0x3c5   :  { %9129 = vmatpush.bf16.msra.mxu1 %v13281_v50  ;;  %v21373_v50 = vpop.f32.mrf.mxu0 }
 0x3c6   :  { %9046 = vmatmul.bf16.vlgmr.msra.gmra.mxu2 %v20626_v44 }
 0x3c7   :  { %9004 = vmatpush.bf16.msrb.mxu3 %v14029_v1  ;;  %9090 = vmatpush.bf16.msrb.mxu2 %v14173_v61  ;;  %v15335_v1 = vld [vmem:[%s23055_s5 + $0xb48] sm:$0xf0]  ;;  %v15328_v61 = vld [vmem:[%s23055_s5 + $0xb10] sm:$0xf0] }
 0x3c8   :  { %8967 = vmatpush.bf16.msrb.mxu0 %v13301_v20  ;;  %v14061_v25 = vor.u32 %v15335_v1, %v14060_v0  ;;  %v14033_v12 = vor.u32 %v15328_v61, %v14032_v37  ;;  %v14005_v20 = vor.u32 %v15321_v54, %v14004_v14  ;;  %v13446_v37 = vld [vmem:[%s23055_s5 + $0x67c] sm:$0xf0]  ;;  %v15017_v54 = vld [vmem:[%s23055_s5 + $0x15c] sm:$0xf] }
 0x3c9   :  { %9130 = vmatpush.bf16.msra.mxu1 %v13253_v53  ;;  %v6698_v53 = vpop.f32.mrf.mxu3 }
 0x3ca   :  { %v13389_v53 = vor.u32 %v15167_v18, %v13388_v34 }
 0x3cb   :  { %9005 = vmatpush.bf16.msrb.mxu3 %v14001_v10  ;;  %9091 = vmatpush.bf16.msrb.mxu2 %v14145_v5  ;;  %v8880_v10 = vpop.f32.mrf.mxu1  ;;  %v15339_v5 = vld [vmem:[%s23055_s5 + $0xb6c] sm:$0xf] }
 0x3cc   :  { %v14093_v9 = vor.u32 %v15339_v5, %v14090_v11  ;;  %v12800_v10 = vld [vmem:[%s23055_s5 + $0x158] sm:$0xf]  ;;  %v15171_v5 = vld [vmem:[%s23055_s5 + $0x62c] sm:$0xf]  ;;  %v13418_v11 = vld [vmem:[%s23055_s5 + $0x644] sm:$0xf0] }
 0x3cd   :  { %9131 = vmatpush.bf16.msra.mxu1 %v13225_v41  ;;  %v8867_v4 = vpop.f32.mrf.mxu0  ;;  %v14117_v41 = vor.u32 %v15349_v6, %v14116_v26  ;;  %v15160_v26 = vld [vmem:[%s23055_s5 + $0x5d0] sm:$0xf0] }
 0x3ce   :  { %v15332_v4 = vld [vmem:[%s23055_s5 + $0xb34] sm:$0xf] }
 0x3cf   :  { %9006 = vmatpush.bf16.msrb.mxu3 %v13973_v35  ;;  %9092 = vmatpush.bf16.msrb.mxu2 %v14117_v41  ;;  %v15314_v35 = vld [vmem:[%s23055_s5 + $0xaa0] sm:$0xf0]  ;;  %v14062_v41 = vld [vmem:[%s23055_s5 + $0xb4c] sm:$0xf0] }
 0x3d0   :  { %v13977_v42 = vor.u32 %v15314_v35, %v13976_v33  ;;  %v13508_v33 = vld [vmem:[%s23055_s5 + $0x6d8] sm:$0xf]  ;;  %v15196_v35 = vld [vmem:[%s23055_s5 + $0x6f0] sm:$0xf0] }
 0x3d1   :  { %9132 = vmatpush.bf16.msra.mxu1 %v13197_v29  ;;  %v15181_v29 = vld [vmem:[%s23055_s5 + $0x678] sm:$0xf0] }
 0x3d2   :  { %v13445_v31 = vor.u32 %v15181_v29, %v13444_v17  ;;  %v12828_v29 = vld [vmem:[%s23055_s5 + $0x190] sm:$0xf] }
 0x3d3   :  { %9051 = vmatpush.bf16.msra.mxu3 %v13501_v62  ;;  %9093 = vmatpush.bf16.msrb.mxu2 %v14089_v59  ;;  %v15325_v59 = vld [vmem:[%s23055_s5 + $0xafc] sm:$0xf] }
 0x3d5   :  { %9133 = vmatpush.bf16.msra.mxu1 %v13169_v2  ;;  %v13417_v2 = vor.u32 %v15174_v28, %v13416_v23  ;;  %v6748_v6 = vpop.f32.mrf.mxu3  ;;  %v12830_v23 = vld [vmem:[%s23055_s5 + $0x1ac] sm:$0xf0]  ;;  %v15178_v28 = vld [vmem:[%s23055_s5 + $0x664] sm:$0xf] }
 0x3d6   :  { %v6749_v56 = vadd.f32 %v6748_v6, %v6736_v16  ;;  %v12833_v18 = vor.u32 %v15024_v43, %v12830_v23  ;;  %v13449_v14 = vor.u32 %v15178_v28, %v13446_v37  ;;  %v15013_v6 = vld [vmem:[%s23055_s5 + $0x138] sm:$0xf0]  ;;  %v13452_v43 = vld [vmem:[%s23055_s5 + $0x668] sm:$0xf]  ;;  %v14996_v23 = vld [vmem:[%s23055_s5 + $0xb4] sm:$0xf] }
 0x3d7   :  { %9052 = vmatpush.bf16.msra.mxu3 %v13473_v39  ;;  %9094 = vmatpush.bf16.msrb.mxu2 %v14061_v25  ;;  %v14065_v39 = vor.u32 %v15332_v4, %v14062_v41  ;;  %v13509_v41 = vor.u32 %v15196_v35, %v13508_v33  ;;  %v12718_v28 = vld [vmem:[%s23055_s5 + $0xcc] sm:$0xf0]  ;;  %v12836_v33 = vld [vmem:[%s23055_s5 + $0x198] sm:$0xf]  ;;  %v15028_v35 = vld [vmem:[%s23055_s5 + $0x1b0] sm:$0xf0] }
 0x3d8   :  { %v6762_v55 = vadd.f32 %v21157_v30, %v6749_v56  ;;  %v15185_v30 = vld [vmem:[%s23055_s5 + $0x69c] sm:$0xf] }
 0x3d9   :  { %9134 = vmatpush.bf16.msra.mxu1 %v13141_v21  ;;  %v13360_v21 = vld [vmem:[%s23055_s5 + $0x5b8] sm:$0xf]  ;;  %v13477_v1 = vor.u32 %v15185_v30, %v13474_v52  ;;  %v21648_v30 = vld [vmem:[%s23056_s6] sm:$0xff] }
 0x3da   :  { %v13361_v62 = vor.u32 %v15160_v26, %v13360_v21  ;;  %v6775_v51 = vadd.f32 %v21159_v49, %v6762_v55  ;;  %v14034_v49 = vld [vmem:[%s23055_s5 + $0xb14] sm:$0xf0]  ;;  %v13978_v21 = vld [vmem:[%s23055_s5 + $0xaa4] sm:$0xf0]  ;;  %v12772_v26 = vld [vmem:[%s23055_s5 + $0x120] sm:$0xf] }
 0x3db   :  { %9053 = vmatpush.bf16.msra.mxu3 %v13445_v31  ;;  %9095 = vmatpush.bf16.msrb.mxu2 %v14033_v12  ;;  %v15146_v31 = vld [vmem:[%s23055_s5 + $0x560] sm:$0xf0]  ;;  %v14037_v25 = vor.u32 %v15325_v59, %v14034_v49  ;;  %v15020_v12 = vld [vmem:[%s23055_s5 + $0x170] sm:$0xf0]  ;;  %v12773_v4 = vor.u32 %v15013_v6, %v12772_v26  ;;  %v12744_v55 = vld [vmem:[%s23055_s5 + $0xe8] sm:$0xf] }
 0x3dc   :  { %v6784_v17 = vmul.f32 0.2, %v6775_v51  ;;  %v12801_v16 = vor.u32 %v15020_v12, %v12800_v10  ;;  %v12746_v59 = vld [vmem:[%s23055_s5 + $0x104] sm:$0xf0]  ;;  %v14992_v10 = vld [vmem:[%s23055_s5 + $0x90] sm:$0xf0] }
 0x3dd   :  { %9135 = vmatpush.bf16.msra.mxu1 %v13113_v45  ;;  %v13332_v45 = vld [vmem:[%s23055_s5 + $0x580] sm:$0xf]  ;;  %v6750_v0 = vpop.f32.mrf.mxu3  ;;  %v14985_v6 = vld [vmem:[%s23055_s5 + $0x58] sm:$0xf0] }
 0x3de   :  { %v13333_v15 = vor.u32 %v15153_v36, %v13332_v45  ;;  %v6791_v22 = vmax.f32 %v6775_v51, %v6784_v17  ;;  %v13390_v45 = vld [vmem:[%s23055_s5 + $0x60c] sm:$0xf0]  ;;  %v15006_v36 = vld [vmem:[%s23055_s5 + $0x100] sm:$0xf0]  ;;  %v15189_v51 = vld [vmem:[%s23055_s5 + $0x6b8] sm:$0xf0] }
 0x3df   :  { %9054 = vmatpush.bf16.msra.mxu3 %v13417_v2  ;;  %9096 = vmatpush.bf16.msrb.mxu2 %v14005_v20  ;;  %v14006_v2 = vld [vmem:[%s23055_s5 + $0xadc] sm:$0xf0]  ;;  %v15311_v20 = vld [vmem:[%s23055_s5 + $0xa8c] sm:$0xf]  ;;  %v12745_v49 = vor.u32 %v15006_v36, %v12744_v55  ;;  %v12716_v0 = vld [vmem:[%s23055_s5 + $0xb0] sm:$0xf]  ;;  %v12837_v55 = vor.u32 %v15028_v35, %v12836_v33 }
 0x3e0   :  { %v21580_v8 = vpack.c.bf16 %v6791_v22, %v6791_v22  ;;  %v13981_v57 = vor.u32 %v15311_v20, %v13978_v21  ;;  %v15182_v22 = vld [vmem:[%s23055_s5 + $0x680] sm:$0xf0]  ;;  %v15143_v20 = vld [vmem:[%s23055_s5 + $0x54c] sm:$0xf]  ;;  %v13306_v21 = vld [vmem:[%s23055_s5 + $0x564] sm:$0xf0] }
 0x3e1   :  { %9136 = vmatpush.bf16.msra.mxu1 %v13085_v63  ;;  %v21535_v48 = vpop.f32.mrf.mxu1  ;;  %v15027_v63 = vld [vmem:[%s23055_s5 + $0x1a8] sm:$0xf0]  ;;  %v15234_v33 = vld [vmem:[%s23055_s5 + $0x824] sm:$0xf]  ;;  %v13670_v35 = vld [vmem:[%s23055_s5 + $0x83c] sm:$0xf0] }
 0x3e2   :  { %v12829_v61 = vor.u32 %v15027_v63, %v12828_v29  ;;  %8916 = vmatmul.bf16.vlgmr.msra.gmra.mxu0 %v21580_v8  ;;  %9007 = vmatmul.bf16.vlgmr.msrb.gmra.mxu3 %v21580_v8  ;;  %v15157_v29 = vld [vmem:[%s23055_s5 + $0x5bc] sm:$0xf]  ;;  %v13362_v63 = vld [vmem:[%s23055_s5 + $0x5d4] sm:$0xf0] }
 0x3e3   :  { %9055 = vmatpush.bf16.msra.mxu3 %v13389_v53  ;;  %9097 = vmatpush.bf16.msrb.mxu2 %v13977_v42  ;;  %v12802_v53 = vld [vmem:[%s23055_s5 + $0x174] sm:$0xf0]  ;;  %v15164_v42 = vld [vmem:[%s23055_s5 + $0x5f4] sm:$0xf] }
 0x3e4   :  { %9137 = vmatmul.bf16.vlgmr.msra.gmra.mxu1 %v20626_v44  ;;  %9012 = vmatpush.bf16.msra.mxu0 %v12829_v61  ;;  %v12805_v56 = vor.u32 %v15017_v54, %v12802_v53  ;;  %v13393_v52 = vor.u32 %v15164_v42, %v13390_v45  ;;  %v15150_v61 = vld [vmem:[%s23055_s5 + $0x584] sm:$0xf]  ;;  %v14989_v53 = vld [vmem:[%s23055_s5 + $0x7c] sm:$0xf]  ;;  %v12632_v42 = vld [vmem:[%s23055_s5 + $0x8] sm:$0xf] }
 0x3e5   :  { %9181 = vmatpush.bf16.msrb.mxu1 %v14177_v58  ;;  %v13304_v58 = vld [vmem:[%s23055_s5 + $0x548] sm:$0xf]  ;;  %v14978_v45 = vld [vmem:[%s23055_s5 + $0x20] sm:$0xf0] }
 0x3e6   :  { %v13305_v32 = vor.u32 %v15146_v31, %v13304_v58  ;;  %9098 = vmatmul.bf16.vlgmr.msrb.gmra.mxu2 %v21580_v8  ;;  %v6800_v58 = vperm.slane %v21648_v30, 0 }
 0x3e7   :  { %9056 = vmatpush.bf16.msra.mxu3 %v13361_v62  ;;  %9142 = vmatpush.bf16.msra.mxu2 %v13505_v3  ;;  %v12774_v62 = vld [vmem:[%s23055_s5 + $0x13c] sm:$0xf0] }
 0x3e8   :  { %9013 = vmatpush.bf16.msra.mxu0 %v12801_v16  ;;  %v13480_v3 = vld [vmem:[%s23055_s5 + $0x6a0] sm:$0xf]  ;;  %v8840_v12 = vadd.f32 %v21352_v40, %v6800_v58  ;;  %v12690_v40 = vld [vmem:[%s23055_s5 + $0x94] sm:$0xf0]  ;;  %v15248_v58 = vld [vmem:[%s23055_s5 + $0x894] sm:$0xf] }
 0x3e9   :  { %9182 = vmatpush.bf16.msrb.mxu1 %v14149_v19  ;;  %v15318_v19 = vld [vmem:[%s23055_s5 + $0xac4] sm:$0xf]  ;;  %v8932_v34 = vpop.f32.mrf.mxu1  ;;  %v13481_v17 = vor.u32 %v15189_v51, %v13480_v3  ;;  %v12660_v16 = vld [vmem:[%s23055_s5 + $0x40] sm:$0xf] }
 0x3ea   :  { %v12721_v34 = vor.u32 %v14996_v23, %v12718_v28  ;;  %v13368_v51 = vld [vmem:[%s23055_s5 + $0x5c0] sm:$0xf]  ;;  %v12780_v23 = vld [vmem:[%s23055_s5 + $0x128] sm:$0xf]  ;;  %v15014_v28 = vld [vmem:[%s23055_s5 + $0x140] sm:$0xf0] }
 0x3eb   :  { %9057 = vmatpush.bf16.msra.mxu3 %v13333_v15  ;;  %9143 = vmatpush.bf16.msra.mxu2 %v13477_v1  ;;  %v15003_v15 = vld [vmem:[%s23055_s5 + $0xec] sm:$0xf] }
 0x3ec   :  { %9014 = vmatpush.bf16.msra.mxu0 %v12773_v4  ;;  %v14999_v1 = vld [vmem:[%s23055_s5 + $0xc8] sm:$0xf0]  ;;  %v12749_v31 = vor.u32 %v15003_v15, %v12746_v59  ;;  %v14982_v4 = vld [vmem:[%s23055_s5 + $0x44] sm:$0xf]  ;;  %v13724_v59 = vld [vmem:[%s23055_s5 + $0x890] sm:$0xf] }
 0x3ed   :  { %9183 = vmatpush.bf16.msrb.mxu1 %v14121_v27  ;;  %v14009_v27 = vor.u32 %v15318_v19, %v14006_v2  ;;  %v12717_v37 = vor.u32 %v14999_v1, %v12716_v0  ;;  %v13334_v19 = vld [vmem:[%s23055_s5 + $0x59c] sm:$0xf0]  ;;  %v13453_v2 = vor.u32 %v15182_v22, %v13452_v43  ;;  %v12633_v0 = vor.u32 %v14978_v45, %v12632_v42 }
 0x3ee   :  { %v12810_v42 = vld [vmem:[%s23055_s5 + $0x17c] sm:$0xf0] }
 0x3ef   :  { %9058 = vmatpush.bf16.msra.mxu3 %v13305_v32  ;;  %9144 = vmatpush.bf16.msra.mxu2 %v13449_v14  ;;  %v12688_v32 = vld [vmem:[%s23055_s5 + $0x78] sm:$0xf]  ;;  %v15175_v14 = vld [vmem:[%s23055_s5 + $0x648] sm:$0xf0] }
 0x3f0   :  { %9015 = vmatpush.bf16.msra.mxu0 %v12745_v49  ;;  %v15251_v49 = vld [vmem:[%s23055_s5 + $0x8a8] sm:$0xf0] }
 0x3f1   :  { %9184 = vmatpush.bf16.msrb.mxu1 %v14093_v9  ;;  %v13421_v9 = vor.u32 %v15171_v5, %v13418_v11  ;;  %v12689_v11 = vor.u32 %v14992_v10, %v12688_v32  ;;  %v13725_v22 = vor.u32 %v15251_v49, %v13724_v59  ;;  %v12781_v10 = vor.u32 %v15014_v28, %v12780_v23  ;;  %v14986_v23 = vld [vmem:[%s23055_s5 + $0x60] sm:$0xf0] }
 0x3f2   :  { %8968 = vmatmul.bf16.vlgmr.msrb.gmra.mxu0 %v20691_v24  ;;  %9059 = vmatmul.bf16.vlgmr.msra.gmra.mxu3 %v20691_v24 }
 0x3f3   :  { %9103 = vmatpush.bf16.msrb.mxu3 %v12833_v18  ;;  %9145 = vmatpush.bf16.msra.mxu2 %v13421_v9  ;;  %v13424_v18 = vld [vmem:[%s23055_s5 + $0x630] sm:$0xf]  ;;  %v12693_v9 = vor.u32 %v14989_v53, %v12690_v40  ;;  %v15007_v53 = vld [vmem:[%s23055_s5 + $0x108] sm:$0xf0] }
 0x3f4   :  { %9016 = vmatpush.bf16.msra.mxu0 %v12717_v37  ;;  %v13425_v26 = vor.u32 %v15175_v14, %v13424_v18  ;;  %v15147_v40 = vld [vmem:[%s23055_s5 + $0x568] sm:$0xf0] }
 0x3f5   :  { %9185 = vmatpush.bf16.msrb.mxu1 %v14065_v39  ;;  %v12777_v39 = vor.u32 %v15010_v38, %v12774_v62  ;;  %v8852_v54 = vpop.f32.mrf.mxu3  ;;  %v15168_v38 = vld [vmem:[%s23055_s5 + $0x610] sm:$0xf0]  ;;  %v13309_v62 = vor.u32 %v15143_v20, %v13306_v21  ;;  %v15025_v21 = vld [vmem:[%s23055_s5 + $0x19c] sm:$0xf] }
 0x3f6   :  { %v8853_v5 = vadd.f32 %v8852_v54, %v8840_v12  ;;  %v15241_v12 = vld [vmem:[%s23055_s5 + $0x85c] sm:$0xf]  ;;  %v13312_v54 = vld [vmem:[%s23055_s5 + $0x550] sm:$0xf] }
 0x3f7   :  { %9104 = vmatpush.bf16.msrb.mxu3 %v12805_v56  ;;  %9146 = vmatpush.bf16.msra.mxu2 %v13393_v52  ;;  %v15021_v52 = vld [vmem:[%s23055_s5 + $0x178] sm:$0xf0] }
 0x3f8   :  { %v8866_v56 = vadd.f32 %v21373_v50, %v8853_v5  ;;  %v12662_v50 = vld [vmem:[%s23055_s5 + $0x5c] sm:$0xf0]  ;;  %9017 = vmatpush.bf16.msra.mxu0 %v12689_v11  ;;  %v15237_v11 = vld [vmem:[%s23055_s5 + $0x838] sm:$0xf0] }
 0x3f9   :  { %9186 = vmatpush.bf16.msrb.mxu1 %v14037_v25  ;;  %v13365_v25 = vor.u32 %v15157_v29, %v13362_v63  ;;  %v12665_v15 = vor.u32 %v14982_v4, %v12662_v50  ;;  %v14975_v29 = vld [vmem:[%s23055_s5 + $0xc] sm:$0xf]  ;;  %v12634_v63 = vld [vmem:[%s23055_s5 + $0x24] sm:$0xf0]  ;;  %v13668_v5 = vld [vmem:[%s23055_s5 + $0x820] sm:$0xf] }
 0x3fa   :  { %v21747_v36 = vadd.f32 %v21445_v13, %v8866_v56  ;;  %v15161_v13 = vld [vmem:[%s23055_s5 + $0x5d8] sm:$0xf0]  ;;  %v12637_v37 = vor.u32 %v14975_v29, %v12634_v63  ;;  %v13313_v56 = vor.u32 %v15147_v40, %v13312_v54  ;;  %v13640_v4 = vld [vmem:[%s23055_s5 + $0x7e8] sm:$0xf]  ;;  %v15230_v50 = vld [vmem:[%s23055_s5 + $0x800] sm:$0xf0] }
 0x3fb   :  { %9105 = vmatpush.bf16.msrb.mxu3 %v12777_v39  ;;  %9147 = vmatpush.bf16.msra.mxu2 %v13365_v25  ;;  %v12808_v39 = vld [vmem:[%s23055_s5 + $0x160] sm:$0xf]  ;;  %v13369_v43 = vor.u32 %v15161_v13, %v13368_v51  ;;  %v13340_v25 = vld [vmem:[%s23055_s5 + $0x588] sm:$0xf]  ;;  %v14993_v13 = vld [vmem:[%s23055_s5 + $0x98] sm:$0xf0] }
 0x3fc   :  { %v12809_v1 = vor.u32 %v15021_v52, %v12808_v39  ;;  %v13642_v51 = vld [vmem:[%s23055_s5 + $0x804] sm:$0xf0]  ;;  %v13641_v52 = vor.u32 %v15230_v50, %v13640_v4  ;;  %v15223_v29 = vld [vmem:[%s23055_s5 + $0x7c8] sm:$0xf0]  ;;  %v13556_v54 = vld [vmem:[%s23055_s5 + $0x740] sm:$0xf] }
 0x3fd   :  { %9187 = vmatpush.bf16.msrb.mxu1 %v14009_v27  ;;  %v13337_v27 = vor.u32 %v15150_v61, %v13334_v19  ;;  %v15154_v61 = vld [vmem:[%s23055_s5 + $0x5a0] sm:$0xf0]  ;;  %v13696_v19 = vld [vmem:[%s23055_s5 + $0x858] sm:$0xf]  ;;  %v13528_v4 = vld [vmem:[%s23055_s5 + $0x708] sm:$0xf] }
 0x3fe   :  { %v13341_v18 = vor.u32 %v15154_v61, %v13340_v25  ;;  %v8891_v39 = vpop.f32.mrf.mxu2  ;;  %v12668_v25 = vld [vmem:[%s23055_s5 + $0x48] sm:$0xf]  ;;  %v15216_v61 = vld [vmem:[%s23055_s5 + $0x790] sm:$0xf0] }
 0x3ff   :  { %9106 = vmatpush.bf16.msrb.mxu3 %v12749_v31  ;;  %9148 = vmatpush.bf16.msra.mxu2 %v13337_v27  ;;  %v13726_v31 = vld [vmem:[%s23055_s5 + $0x8ac] sm:$0xf0]  ;;  %v21869_v59 = vadd.f32 %v8891_v39, %v21747_v36  ;;  %v12782_v36 = vld [vmem:[%s23055_s5 + $0x144] sm:$0xf0] }
 0x400   :  { %v13729_v32 = vor.u32 %v15248_v58, %v13726_v31  ;;  %v12752_v27 = vld [vmem:[%s23055_s5 + $0xf0] sm:$0xf]  ;;  %v15220_v31 = vld [vmem:[%s23055_s5 + $0x7b4] sm:$0xf] }
 0x401   :  { %9188 = vmatpush.bf16.msrb.mxu1 %v13981_v57  ;;  %v13396_v57 = vld [vmem:[%s23055_s5 + $0x5f8] sm:$0xf]  ;;  %v13054_v39 = vld [vmem:[%s23055_s5 + $0x36c] sm:$0xf0] }
 0x402   :  { %v13397_v3 = vor.u32 %v15168_v38, %v13396_v57  ;;  %v12724_v57 = vld [vmem:[%s23055_s5 + $0xb8] sm:$0xf]  ;;  %v15000_v38 = vld [vmem:[%s23055_s5 + $0xd0] sm:$0xf0] }
 0x403   :  { %9107 = vmatpush.bf16.msrb.mxu3 %v12721_v34  ;;  %9149 = vmatpush.bf16.msra.mxu2 %v13309_v62  ;;  %v13698_v34 = vld [vmem:[%s23055_s5 + $0x874] sm:$0xf0]  ;;  %v12725_v45 = vor.u32 %v15000_v38, %v12724_v57  ;;  %v13558_v57 = vld [vmem:[%s23055_s5 + $0x75c] sm:$0xf0] }
 0x404   :  { %9189 = vmatmul.bf16.vlgmr.msrb.gmra.mxu1 %v21580_v8  ;;  %v13701_v20 = vor.u32 %v15241_v12, %v13698_v34  ;;  %v15213_v12 = vld [vmem:[%s23055_s5 + $0x77c] sm:$0xf]  ;;  %v13586_v34 = vld [vmem:[%s23055_s5 + $0x794] sm:$0xf0] }
 0x405   :  { %9233 = vmatpush.bf16.msra.mxu1 %v13509_v41  ;;  %v12661_v41 = vor.u32 %v14985_v6, %v12660_v16  ;;  %v21823_v16 = vpop.f32.mrf.mxu1  ;;  %v12753_v6 = vor.u32 %v15007_v53, %v12752_v27  ;;  %v12640_v27 = vld [vmem:[%s23055_s5 + $0x10] sm:$0xf]  ;;  %v14979_v53 = vld [vmem:[%s23055_s5 + $0x28] sm:$0xf0] }
 0x406   :  { %9150 = vmatmul.bf16.vlgmr.msra.gmra.mxu2 %v20691_v24 }
 0x407   :  { %9108 = vmatpush.bf16.msrb.mxu3 %v12693_v9  ;;  %9018 = vmatpush.bf16.msra.mxu0 %v12661_v41  ;;  %v13669_v9 = vor.u32 %v15237_v11, %v13668_v5  ;;  %v13673_v41 = vor.u32 %v15234_v33, %v13670_v35  ;;  %v15209_v5 = vld [vmem:[%s23055_s5 + $0x758] sm:$0xf0]  ;;  %v13732_v11 = vld [vmem:[%s23055_s5 + $0x898] sm:$0xf]  ;;  %v6801_v33 = vperm.slane %v21648_v30, 1 }
 0x408   :  { %9194 = vmatpush.bf16.msrb.mxu2 %v12837_v55  ;;  %v15018_v55 = vld [vmem:[%s23055_s5 + $0x164] sm:$0xf]  ;;  %v13557_v38 = vor.u32 %v15209_v5, %v13556_v54  ;;  %v12642_v54 = vld [vmem:[%s23055_s5 + $0x2c] sm:$0xf0]  ;;  %v15249_v5 = vld [vmem:[%s23055_s5 + $0x89c] sm:$0xf] }
 0x409   :  { %9234 = vmatpush.bf16.msra.mxu1 %v13481_v17  ;;  %v8854_v17 = vpop.f32.mrf.mxu3  ;;  %v12813_v49 = vor.u32 %v15018_v55, %v12810_v42  ;;  %v15202_v30 = vld [vmem:[%s23055_s5 + $0x720] sm:$0xf0]  ;;  %v13704_v55 = vld [vmem:[%s23055_s5 + $0x860] sm:$0xf]  ;;  %v15245_v42 = vld [vmem:[%s23055_s5 + $0x878] sm:$0xf0] }
 0x40a   :  { %v13612_v17 = vld [vmem:[%s23055_s5 + $0x7b0] sm:$0xf] }
 0x40b   :  { %9109 = vmatpush.bf16.msrb.mxu3 %v12665_v15  ;;  %9019 = vmatpush.bf16.msra.mxu0 %v12633_v0  ;;  %v12696_v15 = vld [vmem:[%s23055_s5 + $0x80] sm:$0xf] }
 0x40c   :  { %9195 = vmatpush.bf16.msrb.mxu2 %v12809_v1  ;;  %v15011_v1 = vld [vmem:[%s23055_s5 + $0x12c] sm:$0xf]  ;;  %v12697_v58 = vor.u32 %v14993_v13, %v12696_v15  ;;  %v13530_v13 = vld [vmem:[%s23055_s5 + $0x724] sm:$0xf0] }
 0x40d   :  { %9235 = vmatpush.bf16.msra.mxu1 %v13453_v2  ;;  %v15244_v2 = vld [vmem:[%s23055_s5 + $0x870] sm:$0xf0]  ;;  %v8984_v63 = vpop.f32.mrf.mxu1  ;;  %v12785_v28 = vor.u32 %v15011_v1, %v12782_v36  ;;  %v15199_v15 = vld [vmem:[%s23055_s5 + $0x70c] sm:$0xf] }
 0x40e   :  { %v13697_v14 = vor.u32 %v15244_v2, %v13696_v19  ;;  %9020 = vmatmul.bf16.vlgmr.msra.gmra.mxu0 %v20579_v7  ;;  %v15004_v2 = vld [vmem:[%s23055_s5 + $0xf4] sm:$0xf]  ;;  %v13060_v63 = vld [vmem:[%s23055_s5 + $0x358] sm:$0xf] }
 0x40f   :  { %9064 = vmatpush.bf16.msrb.mxu0 %v13725_v22  ;;  %9110 = vmatpush.bf16.msrb.mxu3 %v12637_v37  ;;  %v13613_v22 = vor.u32 %v15223_v29, %v13612_v17  ;;  %v13584_v37 = vld [vmem:[%s23055_s5 + $0x778] sm:$0xf]  ;;  %v13529_v17 = vor.u32 %v15202_v30, %v13528_v4  ;;  %v13705_v29 = vor.u32 %v15245_v42, %v13704_v55  ;;  %v12970_v4 = vld [vmem:[%s23055_s5 + $0x2c4] sm:$0xf0]  ;;  %v12976_v42 = vld [vmem:[%s23055_s5 + $0x2b0] sm:$0xf] }
 0x410   :  { %9196 = vmatpush.bf16.msrb.mxu2 %v12781_v10  ;;  %v12669_v10 = vor.u32 %v14986_v23, %v12668_v25  ;;  %v12670_v25 = vld [vmem:[%s23055_s5 + $0x64] sm:$0xf0]  ;;  %v15073_v23 = vld [vmem:[%s23055_s5 + $0x31c] sm:$0xf] }
 0x411   :  { %9236 = vmatpush.bf16.msra.mxu1 %v13425_v26  ;;  %v12838_v26 = vld [vmem:[%s23055_s5 + $0x1b4] sm:$0xf0] }
 0x412   :  { %9111 = vmatmul.bf16.vlgmr.msrb.gmra.mxu3 %v20579_v7  ;;  %v12841_v62 = vor.u32 %v15025_v21, %v12838_v26  ;;  %v13589_v21 = vor.u32 %v15213_v12, %v13586_v34  ;;  %v14997_v26 = vld [vmem:[%s23055_s5 + $0xbc] sm:$0xf]  ;;  %v14976_v34 = vld [vmem:[%s23055_s5 + $0x14] sm:$0xf] }
 0x413   :  { %9155 = vmatpush.bf16.msra.mxu3 %v13729_v32  ;;  %9065 = vmatpush.bf16.msrb.mxu0 %v13697_v14  ;;  %v12754_v32 = vld [vmem:[%s23055_s5 + $0x10c] sm:$0xf0]  ;;  %v13585_v14 = vor.u32 %v15216_v61, %v13584_v37 }
 0x414   :  { %9197 = vmatpush.bf16.msrb.mxu2 %v12753_v6  ;;  %v12757_v40 = vor.u32 %v15004_v2, %v12754_v32  ;;  %v12726_v6 = vld [vmem:[%s23055_s5 + $0xd4] sm:$0xf0]  ;;  %v13032_v2 = vld [vmem:[%s23055_s5 + $0x320] sm:$0xf]  ;;  %v15077_v32 = vld [vmem:[%s23055_s5 + $0x338] sm:$0xf0] }
 0x415   :  { %9237 = vmatpush.bf16.msra.mxu1 %v13397_v3  ;;  %v15227_v3 = vld [vmem:[%s23055_s5 + $0x7ec] sm:$0xf]  ;;  %v12729_v50 = vor.u32 %v14997_v26, %v12726_v6  ;;  %v13004_v26 = vld [vmem:[%s23055_s5 + $0x2e8] sm:$0xf]  ;;  %v15070_v6 = vld [vmem:[%s23055_s5 + $0x300] sm:$0xf0] }
 0x416   :  { %v13645_v0 = vor.u32 %v15227_v3, %v13642_v51  ;;  %v12698_v3 = vld [vmem:[%s23055_s5 + $0x9c] sm:$0xf0]  ;;  %v15080_v51 = vld [vmem:[%s23055_s5 + $0x354] sm:$0xf]  ;;  %v13005_v30 = vor.u32 %v15070_v6, %v13004_v26  ;;  %v12892_v6 = vld [vmem:[%s23055_s5 + $0x208] sm:$0xf] }
 0x417   :  { %9156 = vmatpush.bf16.msra.mxu3 %v13701_v20  ;;  %9066 = vmatpush.bf16.msrb.mxu0 %v13669_v9  ;;  %v15252_v20 = vld [vmem:[%s23055_s5 + $0x8b0] sm:$0xf0]  ;;  %v15206_v9 = vld [vmem:[%s23055_s5 + $0x744] sm:$0xf]  ;;  %v13057_v36 = vor.u32 %v15080_v51, %v13054_v39  ;;  %v13592_v51 = vld [vmem:[%s23055_s5 + $0x780] sm:$0xf] }
 0x418   :  { %9198 = vmatpush.bf16.msrb.mxu2 %v12725_v45  ;;  %v13561_v45 = vor.u32 %v15206_v9, %v13558_v57  ;;  %v13620_v9 = vld [vmem:[%s23055_s5 + $0x7b8] sm:$0xf]  ;;  %v15224_v57 = vld [vmem:[%s23055_s5 + $0x7d0] sm:$0xf0]  ;;  %v15217_v39 = vld [vmem:[%s23055_s5 + $0x798] sm:$0xf0] }
 0x419   :  { %9238 = vmatpush.bf16.msra.mxu1 %v13369_v43  ;;  %v13614_v43 = vld [vmem:[%s23055_s5 + $0x7cc] sm:$0xf0]  ;;  %v13621_v55 = vor.u32 %v15224_v57, %v13620_v9  ;;  %v15031_v57 = vld [vmem:[%s23055_s5 + $0x1cc] sm:$0xf] }
 0x41a   :  { %v13617_v19 = vor.u32 %v15220_v31, %v13614_v43  ;;  %v13676_v31 = vld [vmem:[%s23055_s5 + $0x828] sm:$0xf]  ;;  %v15238_v43 = vld [vmem:[%s23055_s5 + $0x840] sm:$0xf0] }
 0x41b   :  { %9157 = vmatpush.bf16.msra.mxu3 %v13673_v41  ;;  %9067 = vmatpush.bf16.msrb.mxu0 %v13641_v52  ;;  %v14990_v41 = vld [vmem:[%s23055_s5 + $0x84] sm:$0xf]  ;;  %v8931_v52 = vadd.f32 %v21535_v48, %v6801_v33  ;;  %v15084_v48 = vld [vmem:[%s23055_s5 + $0x370] sm:$0xf0]  ;;  %v12645_v33 = vor.u32 %v14976_v34, %v12642_v54 }
 0x41c   :  { %9199 = vmatpush.bf16.msrb.mxu2 %v12697_v58  ;;  %v12701_v1 = vor.u32 %v14990_v41, %v12698_v3  ;;  %v14983_v58 = vld [vmem:[%s23055_s5 + $0x4c] sm:$0xf]  ;;  %v13061_v61 = vor.u32 %v15084_v48, %v13060_v63  ;;  %v13706_v41 = vld [vmem:[%s23055_s5 + $0x87c] sm:$0xf0]  ;;  %v13593_v63 = vor.u32 %v15217_v39, %v13592_v51  ;;  %v12948_v48 = vld [vmem:[%s23055_s5 + $0x278] sm:$0xf] }
 0x41d   :  { %9239 = vmatpush.bf16.msra.mxu1 %v13341_v18  ;;  %v8893_v18 = vpop.f32.mrf.mxu2  ;;  %v15038_v34 = vld [vmem:[%s23055_s5 + $0x204] sm:$0xf]  ;;  %v12864_v39 = vld [vmem:[%s23055_s5 + $0x1d0] sm:$0xf] }
 0x41e   :  { %v13648_v18 = vld [vmem:[%s23055_s5 + $0x7f0] sm:$0xf] }
 0x41f   :  { %9158 = vmatpush.bf16.msra.mxu3 %v13645_v0  ;;  %9068 = vmatpush.bf16.msrb.mxu0 %v13613_v22  ;;  %v13533_v22 = vor.u32 %v15199_v15, %v13530_v13  ;;  %v15052_v15 = vld [vmem:[%s23055_s5 + $0x274] sm:$0xf]  ;;  %v12942_v13 = vld [vmem:[%s23055_s5 + $0x28c] sm:$0xf0] }
 0x420   :  { %9200 = vmatpush.bf16.msrb.mxu2 %v12669_v10  ;;  %v12673_v10 = vor.u32 %v14983_v58, %v12670_v25  ;;  %v13564_v58 = vld [vmem:[%s23055_s5 + $0x748] sm:$0xf]  ;;  %v12914_v25 = vld [vmem:[%s23055_s5 + $0x254] sm:$0xf0] }
 0x421   :  { %9240 = vmatpush.bf16.msra.mxu1 %v13313_v56  ;;  %v21939_v35 = vpop.f32.mrf.mxu1  ;;  %v12641_v56 = vor.u32 %v14979_v53, %v12640_v27  ;;  %v15066_v27 = vld [vmem:[%s23055_s5 + $0x2e4] sm:$0xf]  ;;  %v12998_v53 = vld [vmem:[%s23055_s5 + $0x2fc] sm:$0xf0] }
 0x423   :  { %9159 = vmatpush.bf16.msra.mxu3 %v13617_v19  ;;  %9069 = vmatpush.bf16.msrb.mxu0 %v13585_v14  ;;  %v13677_v19 = vor.u32 %v15238_v43, %v13676_v31  ;;  %v15231_v14 = vld [vmem:[%s23055_s5 + $0x808] sm:$0xf0]  ;;  %v15210_v31 = vld [vmem:[%s23055_s5 + $0x760] sm:$0xf0] }
 0x424   :  { %9241 = vmatmul.bf16.vlgmr.msra.gmra.mxu1 %v20691_v24  ;;  %9201 = vmatpush.bf16.msrb.mxu2 %v12641_v56  ;;  %v13001_v56 = vor.u32 %v15066_v27, %v12998_v53  ;;  %v12886_v27 = vld [vmem:[%s23055_s5 + $0x21c] sm:$0xf0]  ;;  %v15081_v53 = vld [vmem:[%s23055_s5 + $0x35c] sm:$0xf] }
 0x425   :  { %9285 = vmatpush.bf16.msrb.mxu1 %v12841_v62  ;;  %v13733_v62 = vor.u32 %v15252_v20, %v13732_v11  ;;  %v13734_v11 = vld [vmem:[%s23055_s5 + $0x8b4] sm:$0xf0] }
 0x427   :  { %9160 = vmatpush.bf16.msra.mxu3 %v13589_v21  ;;  %9070 = vmatpush.bf16.msrb.mxu0 %v13557_v38  ;;  %v13649_v21 = vor.u32 %v15231_v14, %v13648_v18  ;;  %v13737_v38 = vor.u32 %v15249_v5, %v13734_v11  ;;  %v13536_v18 = vld [vmem:[%s23055_s5 + $0x710] sm:$0xf]  ;;  %v15203_v14 = vld [vmem:[%s23055_s5 + $0x728] sm:$0xf0]  ;;  %v15221_v11 = vld [vmem:[%s23055_s5 + $0x7bc] sm:$0xf] }
 0x428   :  { %9246 = vmatpush.bf16.msra.mxu2 %v13733_v62  ;;  %v15059_v62 = vld [vmem:[%s23055_s5 + $0x2ac] sm:$0xf]  ;;  %v13537_v26 = vor.u32 %v15203_v14, %v13536_v18  ;;  %v12978_v18 = vld [vmem:[%s23055_s5 + $0x2cc] sm:$0xf0] }
 0x429   :  { %9286 = vmatpush.bf16.msrb.mxu1 %v12813_v49  ;;  %v8943_v49 = vpop.f32.mrf.mxu2  ;;  %9202 = vmatmul.bf16.vlgmr.msrb.gmra.mxu2 %v20579_v7  ;;  %v9036_v37 = vpop.f32.mrf.mxu1  ;;  %v12973_v3 = vor.u32 %v15059_v62, %v12970_v4  ;;  %v15214_v4 = vld [vmem:[%s23055_s5 + $0x784] sm:$0xf]  ;;  %v13538_v14 = vld [vmem:[%s23055_s5 + $0x72c] sm:$0xf0] }
 0x42a   :  { %v21984_v0 = vadd.f32 %v8943_v49, %v8931_v52  ;;  %v13650_v37 = vld [vmem:[%s23055_s5 + $0x80c] sm:$0xf0] }
 0x42b   :  { %9161 = vmatpush.bf16.msra.mxu3 %v13561_v45  ;;  %9071 = vmatpush.bf16.msrb.mxu0 %v13529_v17  ;;  %v15063_v45 = vld [vmem:[%s23055_s5 + $0x2c8] sm:$0xf0] }
 0x42c   :  { %9247 = vmatpush.bf16.msra.mxu2 %v13705_v29  ;;  %v12977_v49 = vor.u32 %v15063_v45, %v12976_v42  ;;  %v15235_v17 = vld [vmem:[%s23055_s5 + $0x82c] sm:$0xf]  ;;  %v13678_v29 = vld [vmem:[%s23055_s5 + $0x844] sm:$0xf0]  ;;  %v15304_v42 = vld [vmem:[%s23055_s5 + $0xa54] sm:$0xf] }
 0x42d   :  { %9287 = vmatpush.bf16.msrb.mxu1 %v12785_v28  ;;  %v13026_v28 = vld [vmem:[%s23055_s5 + $0x334] sm:$0xf0]  ;;  %v13681_v43 = vor.u32 %v15235_v17, %v13678_v29  ;;  %v13950_v45 = vld [vmem:[%s23055_s5 + $0xa6c] sm:$0xf0]  ;;  %v15308_v17 = vld [vmem:[%s23055_s5 + $0xa70] sm:$0xf0] }
 0x42e   :  { %v13029_v12 = vor.u32 %v15073_v23, %v13026_v28  ;;  %9072 = vmatmul.bf16.vlgmr.msrb.gmra.mxu0 %v20972_v60  ;;  %v15228_v28 = vld [vmem:[%s23055_s5 + $0x7f4] sm:$0xf] }
 0x42f   :  { %9116 = vmatpush.bf16.msra.mxu0 %v13057_v36  ;;  %9162 = vmatpush.bf16.msra.mxu3 %v13533_v22  ;;  %v12945_v36 = vor.u32 %v15052_v15, %v12942_v13  ;;  %v15045_v22 = vld [vmem:[%s23055_s5 + $0x23c] sm:$0xf]  ;;  %v13653_v54 = vor.u32 %v15228_v28, %v13650_v37  ;;  %v13928_v37 = vld [vmem:[%s23055_s5 + $0xa20] sm:$0xf] }
 0x430   :  { %9248 = vmatpush.bf16.msra.mxu2 %v13677_v19 }
 0x431   :  { %9288 = vmatpush.bf16.msrb.mxu1 %v12757_v40  ;;  %v13033_v40 = vor.u32 %v15077_v32, %v13032_v2  ;;  %v8945_v20 = vpop.f32.mrf.mxu2  ;;  %v13565_v2 = vor.u32 %v15210_v31, %v13564_v58  ;;  %v12920_v32 = vld [vmem:[%s23055_s5 + $0x240] sm:$0xf]  ;;  %v13566_v31 = vld [vmem:[%s23055_s5 + $0x764] sm:$0xf0] }
 0x432   :  { %9163 = vmatmul.bf16.vlgmr.msra.gmra.mxu3 %v20972_v60  ;;  %v13622_v20 = vld [vmem:[%s23055_s5 + $0x7d4] sm:$0xf0] }
 0x433   :  { %9207 = vmatpush.bf16.msrb.mxu3 %v13061_v61  ;;  %9117 = vmatpush.bf16.msra.mxu0 %v13029_v12  ;;  %v22110_v61 = vpop.f32.mrf.mxu3  ;;  %v12917_v12 = vor.u32 %v15045_v22, %v12914_v25  ;;  %v13625_v62 = vor.u32 %v15221_v11, %v13622_v20  ;;  %v13922_v22 = vld [vmem:[%s23055_s5 + $0xa34] sm:$0xf0]  ;;  %v15085_v11 = vld [vmem:[%s23055_s5 + $0x378] sm:$0xf0] }
 0x434   :  { %9249 = vmatpush.bf16.msra.mxu2 %v13649_v21 }
 0x435   :  { %9289 = vmatpush.bf16.msrb.mxu1 %v12729_v50  ;;  %v15242_v50 = vld [vmem:[%s23055_s5 + $0x864] sm:$0xf] }
 0x436   :  { %v13709_v52 = vor.u32 %v15242_v50, %v13706_v41  ;;  %v13034_v50 = vld [vmem:[%s23055_s5 + $0x33c] sm:$0xf0] }
 0x437   :  { %9208 = vmatpush.bf16.msrb.mxu3 %v13033_v40  ;;  %9118 = vmatpush.bf16.msra.mxu0 %v13001_v56  ;;  %v13062_v40 = vld [vmem:[%s23055_s5 + $0x374] sm:$0xf0]  ;;  %v12889_v56 = vor.u32 %v15038_v34, %v12886_v27  ;;  %v15060_v34 = vld [vmem:[%s23055_s5 + $0x2b4] sm:$0xf]  ;;  %v13894_v27 = vld [vmem:[%s23055_s5 + $0x9fc] sm:$0xf0] }
 0x438   :  { %9250 = vmatpush.bf16.msra.mxu2 %v13621_v55  ;;  %v13065_v9 = vor.u32 %v15081_v53, %v13062_v40  ;;  %v13594_v55 = vld [vmem:[%s23055_s5 + $0x79c] sm:$0xf0]  ;;  %v12981_v20 = vor.u32 %v15060_v34, %v12978_v18  ;;  %v15273_v34 = vld [vmem:[%s23055_s5 + $0x958] sm:$0xf0] }
 0x439   :  { %9290 = vmatpush.bf16.msrb.mxu1 %v12701_v1  ;;  %v15056_v1 = vld [vmem:[%s23055_s5 + $0x290] sm:$0xf0]  ;;  %v22112_v19 = vpop.f32.mrf.mxu2  ;;  %v13597_v29 = vor.u32 %v15214_v4, %v13594_v55  ;;  %v13866_v4 = vld [vmem:[%s23055_s5 + $0x9c4] sm:$0xf0] }
 0x43a   :  { %v12949_v23 = vor.u32 %v15056_v1, %v12948_v48  ;;  %v15207_v48 = vld [vmem:[%s23055_s5 + $0x74c] sm:$0xf] }
 0x43b   :  { %9209 = vmatpush.bf16.msrb.mxu3 %v13005_v30  ;;  %9119 = vmatpush.bf16.msra.mxu0 %v12973_v3  ;;  %v15074_v30 = vld [vmem:[%s23055_s5 + $0x324] sm:$0xf]  ;;  %v8906_v3 = vpop.f32.mrf.mxu3  ;;  %v15067_v1 = vld [vmem:[%s23055_s5 + $0x2ec] sm:$0xf] }
 0x43c   :  { %9251 = vmatpush.bf16.msra.mxu2 %v13593_v63  ;;  %v13037_v13 = vor.u32 %v15074_v30, %v13034_v50  ;;  %v13953_v63 = vor.u32 %v15304_v42, %v13950_v45  ;;  %v13040_v50 = vld [vmem:[%s23055_s5 + $0x328] sm:$0xf]  ;;  %v13872_v42 = vld [vmem:[%s23055_s5 + $0x9b0] sm:$0xf]  ;;  %v15287_v45 = vld [vmem:[%s23055_s5 + $0x9c8] sm:$0xf0] }
 0x43d   :  { %9291 = vmatpush.bf16.msrb.mxu1 %v12673_v10  ;;  %v15049_v10 = vld [vmem:[%s23055_s5 + $0x258] sm:$0xf0] }
 0x43e   :  { %v12921_v5 = vor.u32 %v15049_v10, %v12920_v32  ;;  %v13569_v32 = vor.u32 %v15207_v48, %v13566_v31 }
 0x43f   :  { %9210 = vmatpush.bf16.msrb.mxu3 %v12977_v49  ;;  %9120 = vmatpush.bf16.msra.mxu0 %v12945_v36  ;;  %v13956_v49 = vld [vmem:[%s23055_s5 + $0xa58] sm:$0xf]  ;;  %v13006_v36 = vld [vmem:[%s23055_s5 + $0x304] sm:$0xf0] }
 0x440   :  { %9252 = vmatpush.bf16.msra.mxu2 %v13565_v2  ;;  %v13009_v28 = vor.u32 %v15067_v1, %v13006_v36  ;;  %v15301_v2 = vld [vmem:[%s23055_s5 + $0xa38] sm:$0xf0]  ;;  %v13844_v36 = vld [vmem:[%s23055_s5 + $0x978] sm:$0xf] }
 0x441   :  { %9292 = vmatpush.bf16.msrb.mxu1 %v12645_v33  ;;  %v22144_v21 = vpop.f32.mrf.mxu1  ;;  %v15042_v33 = vld [vmem:[%s23055_s5 + $0x220] sm:$0xf0]  ;;  %v8997_v51 = vpop.f32.mrf.mxu2  ;;  %v13929_v40 = vor.u32 %v15301_v2, %v13928_v37  ;;  %v12984_v2 = vld [vmem:[%s23055_s5 + $0x2b8] sm:$0xf] }
 0x442   :  { %v12893_v41 = vor.u32 %v15042_v33, %v12892_v6  ;;  %v15294_v6 = vld [vmem:[%s23055_s5 + $0xa00] sm:$0xf0] }
 0x443   :  { %9211 = vmatpush.bf16.msrb.mxu3 %v12949_v23  ;;  %9121 = vmatpush.bf16.msra.mxu0 %v12917_v12  ;;  %v13957_v23 = vor.u32 %v15308_v17, %v13956_v49  ;;  %v15200_v12 = vld [vmem:[%s23055_s5 + $0x714] sm:$0xf]  ;;  %v22232_v53 = vpop.f32.mrf.mxu3  ;;  %v15046_v51 = vld [vmem:[%s23055_s5 + $0x244] sm:$0xf]  ;;  %v13873_v17 = vor.u32 %v15287_v45, %v13872_v42  ;;  %v12928_v42 = vld [vmem:[%s23055_s5 + $0x248] sm:$0xf] }
 0x444   :  { %9293 = vmatmul.bf16.vlgmr.msrb.gmra.mxu1 %v20579_v7  ;;  %9253 = vmatpush.bf16.msra.mxu2 %v13537_v26  ;;  %v13900_v26 = vld [vmem:[%s23055_s5 + $0x9e8] sm:$0xf]  ;;  %v13541_v33 = vor.u32 %v15200_v12, %v13538_v14  ;;  %v13816_v12 = vld [vmem:[%s23055_s5 + $0x940] sm:$0xf]  ;;  %v15262_v14 = vld [vmem:[%s23055_s5 + $0x904] sm:$0xf] }
 0x445   :  { %9337 = vmatpush.bf16.msra.mxu1 %v13737_v38  ;;  %v12858_v38 = vld [vmem:[%s23055_s5 + $0x1e4] sm:$0xf0]  ;;  %v13901_v30 = vor.u32 %v15294_v6, %v13900_v26  ;;  %v13817_v26 = vor.u32 %v15273_v34, %v13816_v12  ;;  %v12956_v6 = vld [vmem:[%s23055_s5 + $0x280] sm:$0xf]  ;;  %v15298_v45 = vld [vmem:[%s23055_s5 + $0xa24] sm:$0xf] }
 0x446   :  { %v12861_v15 = vor.u32 %v15031_v57, %v12858_v38  ;;  %v12950_v57 = vld [vmem:[%s23055_s5 + $0x294] sm:$0xf0]  ;;  %v15130_v12 = vld [vmem:[%s23055_s5 + $0x4e4] sm:$0xf]  ;;  %v13258_v34 = vld [vmem:[%s23055_s5 + $0x4fc] sm:$0xf0] }
 0x447   :  { %9212 = vmatpush.bf16.msrb.mxu3 %v12921_v5  ;;  %9122 = vmatpush.bf16.msra.mxu0 %v12889_v56  ;;  %v13068_v5 = vld [vmem:[%s23055_s5 + $0x360] sm:$0xf] }
 0x448   :  { %9298 = vmatpush.bf16.msrb.mxu2 %v13065_v9  ;;  %v15053_v9 = vld [vmem:[%s23055_s5 + $0x27c] sm:$0xf]  ;;  %v13069_v38 = vor.u32 %v15085_v11, %v13068_v5  ;;  %v13782_v5 = vld [vmem:[%s23055_s5 + $0x91c] sm:$0xf0] }
 0x449   :  { %9338 = vmatpush.bf16.msra.mxu1 %v13709_v52  ;;  %v15035_v52 = vld [vmem:[%s23055_s5 + $0x1e8] sm:$0xf0]  ;;  %9254 = vmatmul.bf16.vlgmr.msra.gmra.mxu2 %v20972_v60  ;;  %v9088_v25 = vpop.f32.mrf.mxu1  ;;  %v12953_v55 = vor.u32 %v15053_v9, %v12950_v57  ;;  %v22290_v48 = vpop.f32.mrf.mxu2  ;;  %v15305_v11 = vld [vmem:[%s23055_s5 + $0xa5c] sm:$0xf] }
 0x44a   :  { %v12865_v58 = vor.u32 %v15035_v52, %v12864_v39  ;;  %v12922_v39 = vld [vmem:[%s23055_s5 + $0x25c] sm:$0xf0] }
 0x44b   :  { %9213 = vmatpush.bf16.msrb.mxu3 %v12893_v41  ;;  %9123 = vmatpush.bf16.msra.mxu0 %v12861_v15  ;;  %v15078_v41 = vld [vmem:[%s23055_s5 + $0x340] sm:$0xf0]  ;;  %v15276_v15 = vld [vmem:[%s23055_s5 + $0x974] sm:$0xf]  ;;  %v8958_v49 = vpop.f32.mrf.mxu3  ;;  %v12925_v1 = vor.u32 %v15046_v51, %v12922_v39 }
 0x44c   :  { %9299 = vmatpush.bf16.msrb.mxu2 %v13037_v13  ;;  %v13041_v52 = vor.u32 %v15078_v41, %v13040_v50  ;;  %v13838_v13 = vld [vmem:[%s23055_s5 + $0x98c] sm:$0xf0]  ;;  %v15255_v50 = vld [vmem:[%s23055_s5 + $0x8cc] sm:$0xf]  ;;  %v13754_v41 = vld [vmem:[%s23055_s5 + $0x8e4] sm:$0xf0] }
 0x44d   :  { %9339 = vmatpush.bf16.msra.mxu1 %v13681_v43  ;;  %v15297_v43 = vld [vmem:[%s23055_s5 + $0xa1c] sm:$0xf]  ;;  %v13841_v31 = vor.u32 %v15276_v15, %v13838_v13  ;;  %v15050_v39 = vld [vmem:[%s23055_s5 + $0x260] sm:$0xf0]  ;;  %v15140_v15 = vld [vmem:[%s23055_s5 + $0x530] sm:$0xf0] }
 0x44e   :  { %v13925_v10 = vor.u32 %v15297_v43, %v13922_v22  ;;  %9124 = vmatmul.bf16.vlgmr.msra.gmra.mxu0 %v20883_v46  ;;  %v15039_v43 = vld [vmem:[%s23055_s5 + $0x20c] sm:$0xf]  ;;  %v12894_v22 = vld [vmem:[%s23055_s5 + $0x224] sm:$0xf0]  ;;  %v13760_v13 = vld [vmem:[%s23055_s5 + $0x8d0] sm:$0xf] }
 0x44f   :  { %9168 = vmatpush.bf16.msrb.mxu0 %v13953_v63  ;;  %9214 = vmatpush.bf16.msrb.mxu3 %v12865_v58  ;;  %v15071_v63 = vld [vmem:[%s23055_s5 + $0x308] sm:$0xf0]  ;;  %v15280_v58 = vld [vmem:[%s23055_s5 + $0x990] sm:$0xf0] }
 0x450   :  { %9300 = vmatpush.bf16.msrb.mxu2 %v13009_v28  ;;  %v13810_v28 = vld [vmem:[%s23055_s5 + $0x954] sm:$0xf0]  ;;  %v13845_v37 = vor.u32 %v15280_v58, %v13844_v36  ;;  %v15259_v49 = vld [vmem:[%s23055_s5 + $0x8e8] sm:$0xf0]  ;;  %v12929_v36 = vor.u32 %v15050_v39, %v12928_v42  ;;  %v8905_v39 = vadd.f32 %v22110_v61, %v21869_v59  ;;  %v13818_v59 = vld [vmem:[%s23055_s5 + $0x95c] sm:$0xf0] }
 0x451   :  { %9340 = vmatpush.bf16.msra.mxu1 %v13653_v54  ;;  %v15290_v54 = vld [vmem:[%s23055_s5 + $0x9e4] sm:$0xf]  ;;  %v9049_v9 = vpop.f32.mrf.mxu2  ;;  %v15119_v42 = vld [vmem:[%s23055_s5 + $0x488] sm:$0xf0] }
 0x452   :  { %v13897_v56 = vor.u32 %v15290_v54, %v13894_v27  ;;  %9215 = vmatmul.bf16.vlgmr.msrb.gmra.mxu3 %v20883_v46  ;;  %v15032_v54 = vld [vmem:[%s23055_s5 + $0x1d4] sm:$0xf]  ;;  %v12866_v27 = vld [vmem:[%s23055_s5 + $0x1ec] sm:$0xf0] }
 0x453   :  { %9259 = vmatpush.bf16.msra.mxu3 %v13957_v23  ;;  %9169 = vmatpush.bf16.msrb.mxu0 %v13925_v10  ;;  %v15269_v23 = vld [vmem:[%s23055_s5 + $0x93c] sm:$0xf]  ;;  %v12897_v10 = vor.u32 %v15039_v43, %v12894_v22  ;;  %v12869_v57 = vor.u32 %v15032_v54, %v12866_v27  ;;  %v15291_v43 = vld [vmem:[%s23055_s5 + $0x9ec] sm:$0xf]  ;;  %v13902_v22 = vld [vmem:[%s23055_s5 + $0xa04] sm:$0xf0] }
 0x454   :  { %9301 = vmatpush.bf16.msrb.mxu2 %v12981_v20  ;;  %v13813_v18 = vor.u32 %v15269_v23, %v13810_v28  ;;  %v13958_v20 = vld [vmem:[%s23055_s5 + $0xa74] sm:$0xf0]  ;;  %v15043_v23 = vld [vmem:[%s23055_s5 + $0x228] sm:$0xf0]  ;;  %v13256_v28 = vld [vmem:[%s23055_s5 + $0x4e0] sm:$0xf] }
 0x455   :  { %9341 = vmatpush.bf16.msra.mxu1 %v13625_v62  ;;  %v15283_v62 = vld [vmem:[%s23055_s5 + $0x9ac] sm:$0xf]  ;;  %v12872_v54 = vld [vmem:[%s23055_s5 + $0x1d8] sm:$0xf]  ;;  %v15284_v27 = vld [vmem:[%s23055_s5 + $0x9b4] sm:$0xf] }
 0x456   :  { %v13869_v3 = vor.u32 %v15283_v62, %v13866_v4  ;;  %v15266_v62 = vld [vmem:[%s23055_s5 + $0x920] sm:$0xf0]  ;;  %v13785_v4 = vor.u32 %v15262_v14, %v13782_v5  ;;  %v15036_v5 = vld [vmem:[%s23055_s5 + $0x1f0] sm:$0xf0] }
 0x457   :  { %9260 = vmatpush.bf16.msra.mxu3 %v13929_v40  ;;  %9170 = vmatpush.bf16.msrb.mxu0 %v13897_v56 }
 0x458   :  { %9302 = vmatpush.bf16.msrb.mxu2 %v12953_v55 }
 0x459   :  { %9342 = vmatpush.bf16.msra.mxu1 %v13597_v29  ;;  %v13012_v29 = vld [vmem:[%s23055_s5 + $0x2f0] sm:$0xf] }
 0x45a   :  { %v13013_v25 = vor.u32 %v15071_v63, %v13012_v29  ;;  %v15137_v63 = vld [vmem:[%s23055_s5 + $0x51c] sm:$0xf] }
 0x45b   :  { %9261 = vmatpush.bf16.msra.mxu3 %v13901_v30  ;;  %9171 = vmatpush.bf16.msrb.mxu0 %v13869_v3  ;;  %v13961_v30 = vor.u32 %v15305_v11, %v13958_v20  ;;  %v13930_v3 = vld [vmem:[%s23055_s5 + $0xa3c] sm:$0xf0]  ;;  %v13228_v11 = vld [vmem:[%s23055_s5 + $0x4a8] sm:$0xf]  ;;  %v15126_v20 = vld [vmem:[%s23055_s5 + $0x4c0] sm:$0xf0] }
 0x45c   :  { %9303 = vmatpush.bf16.msrb.mxu2 %v12925_v1  ;;  %v13933_v29 = vor.u32 %v15298_v45, %v13930_v3  ;;  %v13286_v1 = vld [vmem:[%s23055_s5 + $0x534] sm:$0xf0]  ;;  %v13936_v3 = vld [vmem:[%s23055_s5 + $0xa28] sm:$0xf] }
 0x45d   :  { %9343 = vmatpush.bf16.msra.mxu1 %v13569_v32  ;;  %v15064_v32 = vld [vmem:[%s23055_s5 + $0x2d0] sm:$0xf0] }
 0x45e   :  { %v12985_v40 = vor.u32 %v15064_v32, %v12984_v2  ;;  %v13289_v32 = vor.u32 %v15137_v63, %v13286_v1  ;;  %v13172_v1 = vld [vmem:[%s23055_s5 + $0x438] sm:$0xf] }
 0x45f   :  { %9262 = vmatpush.bf16.msra.mxu3 %v13873_v17  ;;  %9172 = vmatpush.bf16.msrb.mxu0 %v13841_v31  ;;  %v13757_v17 = vor.u32 %v15255_v50, %v13754_v41  ;;  %v12900_v31 = vld [vmem:[%s23055_s5 + $0x210] sm:$0xf]  ;;  %v13846_v50 = vld [vmem:[%s23055_s5 + $0x994] sm:$0xf0] }
 0x460   :  { %9304 = vmatpush.bf16.msrb.mxu2 %v12897_v10  ;;  %v13905_v10 = vor.u32 %v15291_v43, %v13902_v22  ;;  %v15295_v43 = vld [vmem:[%s23055_s5 + $0xa08] sm:$0xf0] }
 0x461   :  { %9344 = vmatpush.bf16.msra.mxu1 %v13541_v33  ;;  %v15057_v33 = vld [vmem:[%s23055_s5 + $0x298] sm:$0xf0]  ;;  %v22346_v56 = vpop.f32.mrf.mxu1 }
 0x462   :  { %v12957_v55 = vor.u32 %v15057_v33, %v12956_v6  ;;  %v13964_v6 = vld [vmem:[%s23055_s5 + $0xa60] sm:$0xf]  ;;  %v15309_v33 = vld [vmem:[%s23055_s5 + $0xa78] sm:$0xf0] }
 0x463   :  { %9263 = vmatpush.bf16.msra.mxu3 %v13845_v37  ;;  %9173 = vmatpush.bf16.msrb.mxu0 %v13813_v18  ;;  %v15133_v37 = vld [vmem:[%s23055_s5 + $0x4f8] sm:$0xf0]  ;;  %v12901_v18 = vor.u32 %v15043_v23, %v12900_v31  ;;  %v13965_v41 = vor.u32 %v15309_v33, %v13964_v6  ;;  %v13908_v31 = vld [vmem:[%s23055_s5 + $0x9f0] sm:$0xf]  ;;  %v13174_v23 = vld [vmem:[%s23055_s5 + $0x454] sm:$0xf0] }
 0x464   :  { %9345 = vmatmul.bf16.vlgmr.msra.gmra.mxu1 %v20972_v60  ;;  %9305 = vmatpush.bf16.msrb.mxu2 %v12869_v57  ;;  %v13257_v14 = vor.u32 %v15133_v37, %v13256_v28  ;;  %v15123_v57 = vld [vmem:[%s23055_s5 + $0x4ac] sm:$0xf]  ;;  %v15256_v6 = vld [vmem:[%s23055_s5 + $0x8d4] sm:$0xf]  ;;  %v13762_v33 = vld [vmem:[%s23055_s5 + $0x8ec] sm:$0xf0] }
 0x465   :  { %9389 = vmatpush.bf16.msrb.mxu1 %v13069_v38  ;;  %v13788_v38 = vld [vmem:[%s23055_s5 + $0x908] sm:$0xf]  ;;  %v15263_v37 = vld [vmem:[%s23055_s5 + $0x90c] sm:$0xf] }
 0x466   :  { %v13789_v51 = vor.u32 %v15266_v62, %v13788_v38  ;;  %v13230_v38 = vld [vmem:[%s23055_s5 + $0x4c4] sm:$0xf0]  ;;  %v12873_v62 = vor.u32 %v15036_v5, %v12872_v54 }
 0x467   :  { %9264 = vmatpush.bf16.msra.mxu3 %v13817_v26  ;;  %9174 = vmatpush.bf16.msrb.mxu0 %v13785_v4  ;;  %v13261_v26 = vor.u32 %v15130_v12, %v13258_v34  ;;  %v13229_v4 = vor.u32 %v15126_v20, %v13228_v11  ;;  %v13233_v45 = vor.u32 %v15123_v57, %v13230_v38  ;;  %v13880_v34 = vld [vmem:[%s23055_s5 + $0x9b8] sm:$0xf]  ;;  %v15098_v38 = vld [vmem:[%s23055_s5 + $0x3e0] sm:$0xf0] }
 0x468   :  { %9350 = vmatpush.bf16.msra.mxu2 %v13961_v30  ;;  %v15277_v30 = vld [vmem:[%s23055_s5 + $0x97c] sm:$0xf] }
 0x469   :  { %9390 = vmatpush.bf16.msrb.mxu1 %v13041_v52  ;;  %v13284_v52 = vld [vmem:[%s23055_s5 + $0x518] sm:$0xf]  ;;  %9306 = vmatmul.bf16.vlgmr.msrb.gmra.mxu2 %v20883_v46  ;;  %v9140_v2 = vpop.f32.mrf.mxu1  ;;  %v22524_v5 = vpop.f32.mrf.mxu2 }
 0x46a   :  { %v13285_v58 = vor.u32 %v15140_v15, %v13284_v52  ;;  %v13849_v52 = vor.u32 %v15277_v30, %v13846_v50  ;;  %v15116_v15 = vld [vmem:[%s23055_s5 + $0x474] sm:$0xf]  ;;  %v13909_v2 = vor.u32 %v15295_v43, %v13908_v31  ;;  %v13852_v50 = vld [vmem:[%s23055_s5 + $0x980] sm:$0xf]  ;;  %v13090_v43 = vld [vmem:[%s23055_s5 + $0x3ac] sm:$0xf0] }
 0x46b   :  { %9265 = vmatpush.bf16.msra.mxu3 %v13789_v51  ;;  %9175 = vmatpush.bf16.msrb.mxu0 %v13757_v17  ;;  %v15302_v51 = vld [vmem:[%s23055_s5 + $0xa40] sm:$0xf0]  ;;  %v15088_v31 = vld [vmem:[%s23055_s5 + $0x394] sm:$0xf] }
 0x46c   :  { %9351 = vmatpush.bf16.msra.mxu2 %v13933_v29  ;;  %v15270_v29 = vld [vmem:[%s23055_s5 + $0x944] sm:$0xf]  ;;  %v13937_v63 = vor.u32 %v15302_v51, %v13936_v3  ;;  %v13118_v3 = vld [vmem:[%s23055_s5 + $0x3e4] sm:$0xf0] }
 0x46d   :  { %9391 = vmatpush.bf16.msrb.mxu1 %v13013_v25  ;;  %v13761_v25 = vor.u32 %v15259_v49, %v13760_v13  ;;  %v13202_v13 = vld [vmem:[%s23055_s5 + $0x48c] sm:$0xf0]  ;;  %v8917_v49 = vpop.f32.mrf.mxu0  ;;  %v13821_v22 = vor.u32 %v15270_v29, %v13818_v59  ;;  %v15134_v29 = vld [vmem:[%s23055_s5 + $0x500] sm:$0xf0] }
 0x46e   :  { %9176 = vmatmul.bf16.vlgmr.msrb.gmra.mxu0 %v21220_v47  ;;  %v8918_v61 = vadd.f32 %v8917_v49, %v8905_v39  ;;  %v13824_v49 = vld [vmem:[%s23055_s5 + $0x948] sm:$0xf] }
 0x46f   :  { %9220 = vmatpush.bf16.msra.mxu0 %v13285_v58  ;;  %9266 = vmatpush.bf16.msra.mxu3 %v13761_v25  ;;  %v13205_v58 = vor.u32 %v15116_v15, %v13202_v13  ;;  %v15109_v25 = vld [vmem:[%s23055_s5 + $0x43c] sm:$0xf]  ;;  %v15091_v15 = vld [vmem:[%s23055_s5 + $0x3a8] sm:$0xf0] }
 0x470   :  { %9352 = vmatpush.bf16.msra.mxu2 %v13905_v10  ;;  %15367 = vtanh.f32 %v8918_v61  ;;  %v15105_v10 = vld [vmem:[%s23055_s5 + $0x418] sm:$0xf0]  ;;  %v13177_v12 = vor.u32 %v15109_v25, %v13174_v23  ;;  %v15274_v61 = vld [vmem:[%s23055_s5 + $0x960] sm:$0xf0] }
 0x471   :  { %9392 = vmatpush.bf16.msrb.mxu1 %v12985_v40  ;;  %v13874_v40 = vld [vmem:[%s23055_s5 + $0x9cc] sm:$0xf0] }
 0x472   :  { %v13877_v9 = vor.u32 %v15284_v27, %v13874_v40  ;;  %9267 = vmatmul.bf16.vlgmr.msra.gmra.mxu3 %v21220_v47  ;;  %v15102_v27 = vld [vmem:[%s23055_s5 + $0x404] sm:$0xf]  ;;  %v13146_v40 = vld [vmem:[%s23055_s5 + $0x41c] sm:$0xf0] }
 0x473   :  { %9311 = vmatpush.bf16.msrb.mxu3 %v13289_v32  ;;  %9221 = vmatpush.bf16.msra.mxu0 %v13257_v14  ;;  %v13144_v32 = vld [vmem:[%s23055_s5 + $0x400] sm:$0xf]  ;;  %v22516_v14 = vpop.f32.mrf.mxu3  ;;  %v13149_v30 = vor.u32 %v15102_v27, %v13146_v40  ;;  %v15357_v27 = vld [vmem:[%s23055_s5 + $0xbf8] sm:$0xf0] }
 0x474   :  { %9353 = vmatpush.bf16.msra.mxu2 %v13877_v9  ;;  %v13145_v20 = vor.u32 %v15105_v10, %v13144_v32  ;;  %v13796_v32 = vld [vmem:[%s23055_s5 + $0x910] sm:$0xf] }
 0x475   :  { %9393 = vmatpush.bf16.msrb.mxu1 %v12957_v55  ;;  %v13200_v55 = vld [vmem:[%s23055_s5 + $0x470] sm:$0xf]  ;;  %v8919_v11 = vpop.f32.mrf.mxu0 }
 0x476   :  { %v13201_v17 = vor.u32 %v15119_v42, %v13200_v55  ;;  %v15368_v9 = vpop.eup %15367  ;;  %v13765_v42 = vor.u32 %v15256_v6, %v13762_v33  ;;  %v13236_v10 = vld [vmem:[%s23055_s5 + $0x4b0] sm:$0xf]  ;;  %v15354_v6 = vld [vmem:[%s23055_s5 + $0xbe4] sm:$0xf]  ;;  %v14154_v33 = vld [vmem:[%s23055_s5 + $0xbfc] sm:$0xf0] }
 0x477   :  { %9312 = vmatpush.bf16.msrb.mxu3 %v13261_v26  ;;  %9222 = vmatpush.bf16.msra.mxu0 %v13229_v4  ;;  %v13116_v26 = vld [vmem:[%s23055_s5 + $0x3c8] sm:$0xf]  ;;  %v15141_v4 = vld [vmem:[%s23055_s5 + $0x538] sm:$0xf0]  ;;  %9474 = vst [vmem:[%s23057_s7] sm:$0xff] %v15368_v9 }
 0x478   :  { %9354 = vmatpush.bf16.msra.mxu2 %v13849_v52  ;;  %v13117_v51 = vor.u32 %v15098_v38, %v13116_v26  ;;  %v13088_v52 = vld [vmem:[%s23055_s5 + $0x390] sm:$0xf] }
 0x479   :  { %9394 = vmatpush.bf16.msrb.mxu1 %v12929_v36  ;;  %v15112_v36 = vld [vmem:[%s23055_s5 + $0x450] sm:$0xf0]  ;;  %v13089_v23 = vor.u32 %v15091_v15, %v13088_v52  ;;  %v14126_v52 = vld [vmem:[%s23055_s5 + $0xbc4] sm:$0xf0] }
 0x47a   :  { %v13173_v28 = vor.u32 %v15112_v36, %v13172_v1  ;;  %v15364_v1 = vld [vmem:[%s23055_s5 + $0xc30] sm:$0xf0]  ;;  %v8957_v36 = vadd.f32 %v22232_v53, %v21984_v0  ;;  %v15361_v0 = vld [vmem:[%s23055_s5 + $0xc1c] sm:$0xf]  ;;  %v14182_v53 = vld [vmem:[%s23055_s5 + $0xc34] sm:$0xf0] }
 0x47b   :  { %9313 = vmatpush.bf16.msrb.mxu3 %v13233_v45  ;;  %9223 = vmatpush.bf16.msra.mxu0 %v13201_v17  ;;  %v15095_v45 = vld [vmem:[%s23055_s5 + $0x3cc] sm:$0xf]  ;;  %v13264_v17 = vld [vmem:[%s23055_s5 + $0x4e8] sm:$0xf] }
 0x47c   :  { %9355 = vmatpush.bf16.msra.mxu2 %v13821_v22  ;;  %v13121_v59 = vor.u32 %v15095_v45, %v13118_v3  ;;  %v9101_v22 = vpop.f32.mrf.mxu2  ;;  %v14157_v45 = vor.u32 %v15354_v6, %v14154_v33  ;;  %v15092_v6 = vld [vmem:[%s23055_s5 + $0x3b0] sm:$0xf0]  ;;  %v15322_v33 = vld [vmem:[%s23055_s5 + $0xae0] sm:$0xf0] }
 0x47d   :  { %9395 = vmatpush.bf16.msrb.mxu1 %v12901_v18  ;;  %v15288_v18 = vld [vmem:[%s23055_s5 + $0x9d0] sm:$0xf0]  ;;  %v8969_v25 = vpop.f32.mrf.mxu0 }
 0x47e   :  { %v13881_v57 = vor.u32 %v15288_v18, %v13880_v34  ;;  %v13093_v34 = vor.u32 %v15088_v31, %v13090_v43  ;;  %v15267_v18 = vld [vmem:[%s23055_s5 + $0x928] sm:$0xf0]  ;;  %v15106_v31 = vld [vmem:[%s23055_s5 + $0x420] sm:$0xf0]  ;;  %v14068_v43 = vld [vmem:[%s23055_s5 + $0xb38] sm:$0xf] }
 0x47f   :  { %9314 = vmatpush.bf16.msrb.mxu3 %v13205_v58  ;;  %9224 = vmatpush.bf16.msra.mxu0 %v13173_v28  ;;  %v9010_v58 = vpop.f32.mrf.mxu3  ;;  %v13265_v28 = vor.u32 %v15134_v29, %v13264_v17  ;;  %v14096_v17 = vld [vmem:[%s23055_s5 + $0xb70] sm:$0xf]  ;;  %v15343_v29 = vld [vmem:[%s23055_s5 + $0xb88] sm:$0xf0]  ;;  %v15336_v22 = vld [vmem:[%s23055_s5 + $0xb50] sm:$0xf0] }
 0x480   :  { %v13152_v58 = vld [vmem:[%s23055_s5 + $0x408] sm:$0xf] }
 0x481   :  { %9396 = vmatpush.bf16.msrb.mxu1 %v12873_v62  ;;  %v13292_v62 = vld [vmem:[%s23055_s5 + $0x520] sm:$0xf]  ;;  %v22553_v55 = vpop.f32.mrf.mxu1 }
 0x482   :  { %v13293_v39 = vor.u32 %v15141_v4, %v13292_v62  ;;  %v13208_v62 = vld [vmem:[%s23055_s5 + $0x478] sm:$0xf]  ;;  %v15120_v4 = vld [vmem:[%s23055_s5 + $0x490] sm:$0xf0] }
 0x483   :  { %9315 = vmatpush.bf16.msrb.mxu3 %v13177_v12  ;;  %9225 = vmatpush.bf16.msra.mxu0 %v13145_v20  ;;  %v15127_v12 = vld [vmem:[%s23055_s5 + $0x4c8] sm:$0xf0]  ;;  %v14185_v20 = vor.u32 %v15361_v0, %v14182_v53  ;;  %v13153_v53 = vor.u32 %v15106_v31, %v13152_v58  ;;  %v15197_v58 = vld [vmem:[%s23055_s5 + $0x6f8] sm:$0xf0] }
 0x484   :  { %9397 = vmatmul.bf16.vlgmr.msrb.gmra.mxu1 %v20883_v46  ;;  %v13790_v46 = vld [vmem:[%s23055_s5 + $0x924] sm:$0xf0]  ;;  %v13237_v26 = vor.u32 %v15127_v12, %v13236_v10  ;;  %v15099_v10 = vld [vmem:[%s23055_s5 + $0x3e8] sm:$0xf0]  ;;  %v14040_v12 = vld [vmem:[%s23055_s5 + $0xb00] sm:$0xf] }
 0x485   :  { %9441 = vmatpush.bf16.msra.mxu1 %v13965_v41  ;;  %v13793_v54 = vor.u32 %v15263_v37, %v13790_v46  ;;  %v15281_v41 = vld [vmem:[%s23055_s5 + $0x998] sm:$0xf0]  ;;  %v8970_v37 = vadd.f32 %v8969_v25, %v8957_v36  ;;  %v13825_v46 = vor.u32 %v15274_v61, %v13824_v49  ;;  %v8971_v3 = vpop.f32.mrf.mxu0  ;;  %v14097_v36 = vor.u32 %v15343_v29, %v14096_v17  ;;  %v22766_v17 = vld [vmem:[%s23056_s6] sm:$0xff] }
 0x486   :  { %v13853_v13 = vor.u32 %v15281_v41, %v13852_v50  ;;  %v15350_v50 = vld [vmem:[%s23055_s5 + $0xbc0] sm:$0xf0]  ;;  %v15113_v49 = vld [vmem:[%s23055_s5 + $0x458] sm:$0xf0]  ;;  %v13984_v3 = vld [vmem:[%s23055_s5 + $0xa90] sm:$0xf] }
 0x487   :  { %9356 = vmatpush.bf16.msra.mxu2 %v13793_v54  ;;  %9316 = vmatpush.bf16.msrb.mxu3 %v13149_v30  ;;  %v14152_v54 = vld [vmem:[%s23055_s5 + $0xbe0] sm:$0xf]  ;;  %v8983_v40 = vadd.f32 %v21823_v16, %v8970_v37  ;;  %v13768_v16 = vld [vmem:[%s23055_s5 + $0x8d8] sm:$0xf]  ;;  %v14124_v30 = vld [vmem:[%s23055_s5 + $0xba8] sm:$0xf] }
 0x488   :  { %9226 = vmatpush.bf16.msra.mxu0 %v13117_v51  ;;  %v14153_v38 = vor.u32 %v15357_v27, %v14152_v54  ;;  %v13209_v51 = vor.u32 %v15120_v4, %v13208_v62  ;;  %v14125_v15 = vor.u32 %v15350_v50, %v14124_v30  ;;  %v15333_v37 = vld [vmem:[%s23055_s5 + $0xb3c] sm:$0xf]  ;;  %v15326_v27 = vld [vmem:[%s23055_s5 + $0xb04] sm:$0xf]  ;;  %v15319_v4 = vld [vmem:[%s23055_s5 + $0xacc] sm:$0xf] }
 0x489   :  { %9442 = vmatpush.bf16.msra.mxu1 %v13937_v63  ;;  %v14180_v63 = vld [vmem:[%s23055_s5 + $0xc18] sm:$0xf]  ;;  %v9192_v11 = vpop.f32.mrf.mxu1  ;;  %v8996_v9 = vadd.f32 %v22112_v19, %v8983_v40  ;;  %v15260_v19 = vld [vmem:[%s23055_s5 + $0x8f0] sm:$0xf0]  ;;  %v14042_v40 = vld [vmem:[%s23055_s5 + $0xb1c] sm:$0xf0] }
 0x48a   :  { %v6802_v29 = vperm.slane %v22766_v17, 2 }
 0x48b   :  { %9357 = vmatpush.bf16.msra.mxu2 %v13765_v42  ;;  %9317 = vmatpush.bf16.msrb.mxu3 %v13121_v59  ;;  %v9009_v41 = vadd.f32 %v22516_v14, %v8996_v9  ;;  %v22645_v42 = vpop.f32.mrf.mxu3  ;;  %v13769_v14 = vor.u32 %v15260_v19, %v13768_v16  ;;  %v14188_v9 = vld [vmem:[%s23055_s5 + $0xc20] sm:$0xf]  ;;  %v14014_v19 = vld [vmem:[%s23055_s5 + $0xae4] sm:$0xf0] }
 0x48c   :  { %9227 = vmatpush.bf16.msra.mxu0 %v13089_v23 }
 0x48d   :  { %9443 = vmatpush.bf16.msra.mxu1 %v13909_v2  ;;  %v14181_v2 = vor.u32 %v15364_v1, %v14180_v63  ;;  %15369 = vtanh.f32 %v9009_v41  ;;  %v15340_v63 = vld [vmem:[%s23055_s5 + $0xb74] sm:$0xf]  ;;  %v14098_v1 = vld [vmem:[%s23055_s5 + $0xb8c] sm:$0xf0]  ;;  %v22689_v0 = vpop.f32.mrf.mxu0 }
 0x48e   :  { %9358 = vmatmul.bf16.vlgmr.msra.gmra.mxu2 %v21220_v47 }
 0x48f   :  { %9402 = vmatpush.bf16.msrb.mxu2 %v13293_v39  ;;  %9318 = vmatpush.bf16.msrb.mxu3 %v13093_v34  ;;  %v15347_v39 = vld [vmem:[%s23055_s5 + $0xbac] sm:$0xf]  ;;  %v15329_v34 = vld [vmem:[%s23055_s5 + $0xb18] sm:$0xf0] }
 0x490   :  { %9272 = vmatpush.bf16.msrb.mxu0 %v14181_v2  ;;  %v14129_v59 = vor.u32 %v15347_v39, %v14126_v52  ;;  %v22697_v2 = vpop.f32.mrf.mxu2  ;;  %v14041_v11 = vor.u32 %v15329_v34, %v14040_v12  ;;  %v15315_v39 = vld [vmem:[%s23055_s5 + $0xaa8] sm:$0xf0]  ;;  %v14160_v52 = vld [vmem:[%s23055_s5 + $0xbe8] sm:$0xf]  ;;  %v15344_v34 = vld [vmem:[%s23055_s5 + $0xb90] sm:$0xf0] }
 0x491   :  { %9444 = vmatpush.bf16.msra.mxu1 %v13881_v57  ;;  %v13797_v57 = vor.u32 %v15267_v18, %v13796_v32  ;;  %9228 = vmatmul.bf16.vlgmr.msra.gmra.mxu0 %v20626_v44  ;;  %v14069_v32 = vor.u32 %v15336_v22, %v14068_v43  ;;  %v14132_v43 = vld [vmem:[%s23055_s5 + $0xbb0] sm:$0xf]  ;;  %v15351_v22 = vld [vmem:[%s23055_s5 + $0xbc8] sm:$0xf0] }
 0x492   :  { %9319 = vmatmul.bf16.vlgmr.msrb.gmra.mxu3 %v20626_v44 }
 0x493   :  { %9403 = vmatpush.bf16.msrb.mxu2 %v13265_v28  ;;  %9363 = vmatpush.bf16.msra.mxu3 %v14185_v20  ;;  %v15370_v25 = vpop.eup %15369  ;;  %v9062_v23 = vpop.f32.mrf.mxu3  ;;  %v14101_v28 = vor.u32 %v15340_v63, %v14098_v1  ;;  %v14012_v20 = vld [vmem:[%s23055_s5 + $0xac8] sm:$0xf]  ;;  %v13985_v63 = vor.u32 %v15315_v39, %v13984_v3  ;;  %v15165_v3 = vld [vmem:[%s23055_s5 + $0x5fc] sm:$0xf] }
 0x494   :  { %9273 = vmatpush.bf16.msrb.mxu0 %v14153_v38  ;;  %9475 = vst [vmem:[%s23057_s7 + $0x8] sm:$0xff] %v15370_v25  ;;  %v14045_v38 = vor.u32 %v15326_v27, %v14042_v40  ;;  %v14013_v41 = vor.u32 %v15322_v33, %v14012_v20  ;;  %v15186_v23 = vld [vmem:[%s23055_s5 + $0x6a4] sm:$0xf]  ;;  %v13460_v20 = vld [vmem:[%s23055_s5 + $0x670] sm:$0xf] }
 0x495   :  { %9445 = vmatpush.bf16.msra.mxu1 %v13853_v13  ;;  %v13180_v13 = vld [vmem:[%s23055_s5 + $0x440] sm:$0xf]  ;;  %v9023_v16 = vpop.f32.mrf.mxu0  ;;  %v15337_v33 = vld [vmem:[%s23055_s5 + $0xb58] sm:$0xf0] }
 0x496   :  { %v13181_v61 = vor.u32 %v15113_v49, %v13180_v13  ;;  %v15193_v13 = vld [vmem:[%s23055_s5 + $0x6dc] sm:$0xf]  ;;  %v13510_v49 = vld [vmem:[%s23055_s5 + $0x6f4] sm:$0xf0] }
 0x497   :  { %9404 = vmatpush.bf16.msrb.mxu2 %v13237_v26  ;;  %9364 = vmatpush.bf16.msra.mxu3 %v14157_v45  ;;  %v13096_v26 = vld [vmem:[%s23055_s5 + $0x398] sm:$0xf]  ;;  %v13513_v31 = vor.u32 %v15193_v13, %v13510_v49  ;;  %v13404_v13 = vld [vmem:[%s23055_s5 + $0x600] sm:$0xf]  ;;  %v15169_v49 = vld [vmem:[%s23055_s5 + $0x618] sm:$0xf0] }
 0x498   :  { %9274 = vmatpush.bf16.msrb.mxu0 %v14125_v15  ;;  %v13097_v62 = vor.u32 %v15092_v6, %v13096_v26  ;;  %v14017_v15 = vor.u32 %v15319_v4, %v14014_v19  ;;  %v15183_v26 = vld [vmem:[%s23055_s5 + $0x688] sm:$0xf0]  ;;  %v13432_v4 = vld [vmem:[%s23055_s5 + $0x638] sm:$0xf]  ;;  %v15176_v19 = vld [vmem:[%s23055_s5 + $0x650] sm:$0xf0] }
 0x499   :  { %9446 = vmatpush.bf16.msra.mxu1 %v13825_v46  ;;  %v14070_v46 = vld [vmem:[%s23055_s5 + $0xb54] sm:$0xf0] }
 0x49a   :  { %v14073_v18 = vor.u32 %v15333_v37, %v14070_v46 }
 0x49b   :  { %9405 = vmatpush.bf16.msrb.mxu2 %v13209_v51  ;;  %9365 = vmatpush.bf16.msra.mxu3 %v14129_v59  ;;  %v22741_v30 = vpop.f32.mrf.mxu3  ;;  %v9153_v51 = vpop.f32.mrf.mxu2  ;;  %v15312_v59 = vld [vmem:[%s23055_s5 + $0xa94] sm:$0xf] }
 0x49c   :  { %9275 = vmatpush.bf16.msrb.mxu0 %v14097_v36  ;;  %v13516_v36 = vld [vmem:[%s23055_s5 + $0x6e0] sm:$0xf]  ;;  %v13398_v51 = vld [vmem:[%s23055_s5 + $0x614] sm:$0xf0] }
 0x49d   :  { %9447 = vmatpush.bf16.msra.mxu1 %v13797_v57  ;;  %v15365_v57 = vld [vmem:[%s23055_s5 + $0xc38] sm:$0xf0]  ;;  %v13517_v37 = vor.u32 %v15197_v58, %v13516_v36  ;;  %v13370_v36 = vld [vmem:[%s23055_s5 + $0x5dc] sm:$0xf0] }
 0x49e   :  { %v14189_v45 = vor.u32 %v15365_v57, %v14188_v9  ;;  %v15172_v9 = vld [vmem:[%s23055_s5 + $0x634] sm:$0xf]  ;;  %v13426_v57 = vld [vmem:[%s23055_s5 + $0x64c] sm:$0xf0] }
 0x49f   :  { %9406 = vmatpush.bf16.msrb.mxu2 %v13181_v61  ;;  %9366 = vmatpush.bf16.msra.mxu3 %v14101_v28  ;;  %v13986_v61 = vld [vmem:[%s23055_s5 + $0xaac] sm:$0xf0]  ;;  %v13482_v28 = vld [vmem:[%s23055_s5 + $0x6bc] sm:$0xf0] }
 0x4a0   :  { %9276 = vmatpush.bf16.msrb.mxu0 %v14069_v32  ;;  %v13989_v25 = vor.u32 %v15312_v59, %v13986_v61  ;;  %v13485_v12 = vor.u32 %v15186_v23, %v13482_v28  ;;  %v13401_v61 = vor.u32 %v15165_v3, %v13398_v51  ;;  %v15008_v3 = vld [vmem:[%s23055_s5 + $0x110] sm:$0xf0]  ;;  %v6803_v51 = vperm.slane %v22766_v17, 3 }
 0x4a1   :  { %9448 = vmatpush.bf16.msra.mxu1 %v13769_v14  ;;  %v22743_v50 = vpop.f32.mrf.mxu1  ;;  %v15358_v14 = vld [vmem:[%s23055_s5 + $0xc00] sm:$0xf0] }
 0x4a2   :  { %v14161_v1 = vor.u32 %v15358_v14, %v14160_v52  ;;  %v13433_v52 = vor.u32 %v15176_v19, %v13432_v4 }
 0x4a3   :  { %9407 = vmatpush.bf16.msrb.mxu2 %v13153_v53  ;;  %9367 = vmatpush.bf16.msra.mxu3 %v14073_v18  ;;  %v9022_v53 = vadd.f32 %v22689_v0, %v6802_v29  ;;  %v9114_v46 = vpop.f32.mrf.mxu3  ;;  %v14104_v0 = vld [vmem:[%s23055_s5 + $0xb78] sm:$0xf]  ;;  %v15179_v18 = vld [vmem:[%s23055_s5 + $0x66c] sm:$0xf] }
 0x4a4   :  { %9449 = vmatmul.bf16.vlgmr.msra.gmra.mxu1 %v21220_v47  ;;  %v13124_v47 = vld [vmem:[%s23055_s5 + $0x3d0] sm:$0xf]  ;;  %9277 = vmatpush.bf16.msrb.mxu0 %v14041_v11  ;;  %v14105_v11 = vor.u32 %v15344_v34, %v14104_v0  ;;  %v13342_v46 = vld [vmem:[%s23055_s5 + $0x5a4] sm:$0xf0] }
 0x4a5   :  { %v13125_v54 = vor.u32 %v15099_v10, %v13124_v47  ;;  %v14133_v47 = vor.u32 %v15351_v22, %v14132_v43  ;;  %v15190_v10 = vld [vmem:[%s23055_s5 + $0x6c0] sm:$0xf0]  ;;  %v9035_v27 = vadd.f32 %v21939_v35, %v9022_v53  ;;  %v14076_v35 = vld [vmem:[%s23055_s5 + $0xb40] sm:$0xf]  ;;  %v13376_v22 = vld [vmem:[%s23055_s5 + $0x5c8] sm:$0xf] }
 0x4a6   :  { %v15316_v53 = vld [vmem:[%s23055_s5 + $0xab0] sm:$0xf0] }
 0x4a7   :  { %9408 = vmatpush.bf16.msrb.mxu2 %v13125_v54  ;;  %9368 = vmatpush.bf16.msra.mxu3 %v14045_v38  ;;  %v13454_v54 = vld [vmem:[%s23055_s5 + $0x684] sm:$0xf0]  ;;  %v13461_v38 = vor.u32 %v15183_v26, %v13460_v20  ;;  %v9048_v16 = vadd.f32 %v22290_v48, %v9035_v27  ;;  %v15330_v48 = vld [vmem:[%s23055_s5 + $0xb20] sm:$0xf0]  ;;  %v13314_v27 = vld [vmem:[%s23055_s5 + $0x56c] sm:$0xf0] }
 0x4a8   :  { %9278 = vmatpush.bf16.msrb.mxu0 %v14013_v41  ;;  %v13457_v6 = vor.u32 %v15179_v18, %v13454_v54  ;;  %v13429_v41 = vor.u32 %v15172_v9, %v13426_v57  ;;  %v15144_v54 = vld [vmem:[%s23055_s5 + $0x554] sm:$0xf]  ;;  %v15029_v20 = vld [vmem:[%s23055_s5 + $0x1b8] sm:$0xf0]  ;;  %v13320_v26 = vld [vmem:[%s23055_s5 + $0x558] sm:$0xf] }
 0x4a9   :  { %v9244_v32 = vpop.f32.mrf.mxu1  ;;  %v9061_v39 = vadd.f32 %v22645_v42, %v9048_v16  ;;  %v14020_v42 = vld [vmem:[%s23055_s5 + $0xad0] sm:$0xf]  ;;  %v15022_v16 = vld [vmem:[%s23055_s5 + $0x180] sm:$0xf0] }
 0x4ab   :  { %9409 = vmatpush.bf16.msrb.mxu2 %v13097_v62  ;;  %9369 = vmatpush.bf16.msra.mxu3 %v14017_v15  ;;  %v14077_v62 = vor.u32 %v15337_v33, %v14076_v35  ;;  %v9073_v14 = vpop.f32.mrf.mxu0  ;;  %v13317_v33 = vor.u32 %v15144_v54, %v13314_v27  ;;  %v15239_v54 = vld [vmem:[%s23055_s5 + $0x848] sm:$0xf0] }
 0x4ac   :  { %9279 = vmatpush.bf16.msrb.mxu0 %v13985_v63  ;;  %v9074_v29 = vadd.f32 %v9073_v14, %v9061_v39  ;;  %v22860_v59 = vpop.f32.mrf.mxu2  ;;  %v15323_v63 = vld [vmem:[%s23055_s5 + $0xae8] sm:$0xf0]  ;;  %v9113_v14 = vadd.f32 %v22741_v30, %v6803_v51 }
 0x4ad   :  { %v14021_v43 = vor.u32 %v15323_v63, %v14020_v42  ;;  %v14994_v42 = vld [vmem:[%s23055_s5 + $0xa0] sm:$0xf0] }
 0x4ae   :  { %9410 = vmatmul.bf16.vlgmr.msrb.gmra.mxu2 %v20626_v44  ;;  %v13488_v44 = vld [vmem:[%s23055_s5 + $0x6a8] sm:$0xf]  ;;  %v9087_v58 = vadd.f32 %v22144_v21, %v9074_v29  ;;  %v13992_v21 = vld [vmem:[%s23055_s5 + $0xa98] sm:$0xf] }
 0x4af   :  { %9454 = vmatpush.bf16.msra.mxu2 %v14189_v45  ;;  %9370 = vmatpush.bf16.msra.mxu3 %v13989_v25  ;;  %v13489_v40 = vor.u32 %v15190_v10, %v13488_v44  ;;  %v14048_v45 = vld [vmem:[%s23055_s5 + $0xb08] sm:$0xf]  ;;  %v15162_v25 = vld [vmem:[%s23055_s5 + $0x5e0] sm:$0xf0]  ;;  %v13348_v44 = vld [vmem:[%s23055_s5 + $0x590] sm:$0xf] }
 0x4b0   :  { %9324 = vmatpush.bf16.msra.mxu0 %v13513_v31  ;;  %v14049_v15 = vor.u32 %v15330_v48, %v14048_v45  ;;  %v13405_v31 = vor.u32 %v15169_v49, %v13404_v13  ;;  %v9100_v23 = vadd.f32 %v22524_v5, %v9087_v58  ;;  %v13377_v5 = vor.u32 %v15162_v25, %v13376_v22  ;;  %v15155_v10 = vld [vmem:[%s23055_s5 + $0x5a8] sm:$0xf0]  ;;  %v12760_v48 = vld [vmem:[%s23055_s5 + $0xf8] sm:$0xf]  ;;  %v12676_v58 = vld [vmem:[%s23055_s5 + $0x50] sm:$0xf] }
 0x4b1   :  { %9280 = vmatmul.bf16.vlgmr.msrb.gmra.mxu0 %v21580_v8  ;;  %v12761_v39 = vor.u32 %v15008_v3, %v12760_v48 }
 0x4b2   :  { %9371 = vmatmul.bf16.vlgmr.msra.gmra.mxu3 %v21580_v8  ;;  %15371 = vtanh.f32 %v9100_v23 }
 0x4b3   :  { %9455 = vmatpush.bf16.msra.mxu2 %v14161_v1  ;;  %9415 = vmatpush.bf16.msrb.mxu3 %v13517_v37  ;;  %v15158_v1 = vld [vmem:[%s23055_s5 + $0x5c4] sm:$0xf]  ;;  %v15151_v37 = vld [vmem:[%s23055_s5 + $0x58c] sm:$0xf]  ;;  %v9075_v32 = vpop.f32.mrf.mxu0 }
 0x4b4   :  { %9325 = vmatpush.bf16.msra.mxu0 %v13485_v12  ;;  %v13373_v28 = vor.u32 %v15158_v1, %v13370_v36  ;;  %v13345_v34 = vor.u32 %v15151_v37, %v13342_v46  ;;  %v9205_v18 = vpop.f32.mrf.mxu2  ;;  %v6804_v1 = vperm.slane %v22766_v17, 4  ;;  %v15253_v37 = vld [vmem:[%s23055_s5 + $0x8b8] sm:$0xf0]  ;;  %v13712_v32 = vld [vmem:[%s23055_s5 + $0x868] sm:$0xf] }
 0x4b5   :  { %v22900_v12 = vpop.f32.mrf.mxu3  ;;  %v13684_v18 = vld [vmem:[%s23055_s5 + $0x830] sm:$0xf] }
 0x4b6   :  { %v13685_v27 = vor.u32 %v15239_v54, %v13684_v18 }
 0x4b7   :  { %9456 = vmatpush.bf16.msra.mxu2 %v14133_v47  ;;  %9416 = vmatpush.bf16.msrb.mxu3 %v13489_v40  ;;  %v13993_v47 = vor.u32 %v15316_v53, %v13992_v21  ;;  %v13349_v40 = vor.u32 %v15155_v10, %v13348_v44  ;;  %v14980_v53 = vld [vmem:[%s23055_s5 + $0x30] sm:$0xf0] }
 0x4b8   :  { %9326 = vmatpush.bf16.msra.mxu0 %v13457_v6  ;;  %v15148_v6 = vld [vmem:[%s23055_s5 + $0x570] sm:$0xf0]  ;;  %v15372_v35 = vpop.eup %15371 }
 0x4b9   :  { %9476 = vst [vmem:[%s23057_s7 + $0x10] sm:$0xff] %v15372_v35  ;;  %v13321_v57 = vor.u32 %v15148_v6, %v13320_v26  ;;  %v13628_v6 = vld [vmem:[%s23055_s5 + $0x7c0] sm:$0xf] }
 0x4bb   :  { %9457 = vmatpush.bf16.msra.mxu2 %v14105_v11  ;;  %9417 = vmatpush.bf16.msrb.mxu3 %v13461_v38  ;;  %v12844_v11 = vld [vmem:[%s23055_s5 + $0x1a0] sm:$0xf]  ;;  %v12816_v38 = vld [vmem:[%s23055_s5 + $0x168] sm:$0xf] }
 0x4bc   :  { %9327 = vmatpush.bf16.msra.mxu0 %v13429_v41  ;;  %v12845_v9 = vor.u32 %v15029_v20, %v12844_v11  ;;  %v12817_v19 = vor.u32 %v15022_v16, %v12816_v38  ;;  %v12788_v41 = vld [vmem:[%s23055_s5 + $0x130] sm:$0xf]  ;;  %v15232_v11 = vld [vmem:[%s23055_s5 + $0x810] sm:$0xf0]  ;;  %v6805_v20 = vperm.slane %v22766_v17, 5 }
 0x4bf   :  { %9458 = vmatpush.bf16.msra.mxu2 %v14077_v62  ;;  %9418 = vmatpush.bf16.msrb.mxu3 %v13433_v52  ;;  %v9166_v62 = vpop.f32.mrf.mxu3  ;;  %v12732_v52 = vld [vmem:[%s23055_s5 + $0xc0] sm:$0xf] }
 0x4c0   :  { %9328 = vmatpush.bf16.msra.mxu0 %v13401_v61  ;;  %v12704_v61 = vld [vmem:[%s23055_s5 + $0x88] sm:$0xf] }
 0x4c1   :  { %v22902_v0 = vpop.f32.mrf.mxu1  ;;  %v12705_v30 = vor.u32 %v14994_v42, %v12704_v61 }
 0x4c3   :  { %9459 = vmatpush.bf16.msra.mxu2 %v14049_v15  ;;  %9419 = vmatpush.bf16.msrb.mxu3 %v13405_v31  ;;  %v14987_v31 = vld [vmem:[%s23055_s5 + $0x68] sm:$0xf0] }
 0x4c4   :  { %9329 = vmatpush.bf16.msra.mxu0 %v13373_v28 }
 0x4c7   :  { %9460 = vmatpush.bf16.msra.mxu2 %v14021_v43  ;;  %9420 = vmatpush.bf16.msrb.mxu3 %v13377_v5  ;;  %v9204_v43 = vadd.f32 %v22860_v59, %v6804_v1  ;;  %v13740_v59 = vld [vmem:[%s23055_s5 + $0x8a0] sm:$0xf] }
 0x4c8   :  { %9330 = vmatpush.bf16.msra.mxu0 %v13345_v34  ;;  %v13741_v5 = vor.u32 %v15253_v37, %v13740_v59 }
 0x4c9   :  { %v9296_v4 = vpop.f32.mrf.mxu1 }
 0x4ca   :  { %v13600_v4 = vld [vmem:[%s23055_s5 + $0x788] sm:$0xf] }
 0x4cb   :  { %9461 = vmatpush.bf16.msra.mxu2 %v13993_v47  ;;  %9421 = vmatpush.bf16.msrb.mxu3 %v13349_v40  ;;  %v9125_v15 = vpop.f32.mrf.mxu0  ;;  %v15246_v47 = vld [vmem:[%s23055_s5 + $0x880] sm:$0xf0]  ;;  %v13656_v40 = vld [vmem:[%s23055_s5 + $0x7f8] sm:$0xf] }
 0x4cc   :  { %9331 = vmatpush.bf16.msra.mxu0 %v13317_v33  ;;  %v9126_v13 = vadd.f32 %v9125_v15, %v9113_v14  ;;  %v22954_v49 = vpop.f32.mrf.mxu2  ;;  %v13713_v34 = vor.u32 %v15246_v47, %v13712_v32  ;;  %v13657_v26 = vor.u32 %v15232_v11, %v13656_v40  ;;  %v9295_v33 = vadd.f32 %v22902_v0, %v6805_v20  ;;  %v13572_v0 = vld [vmem:[%s23055_s5 + $0x750] sm:$0xf] }
 0x4cd   :  { %v6806_v20 = vperm.slane %v22766_v17, 6 }
 0x4ce   :  { %9462 = vmatmul.bf16.vlgmr.msra.gmra.mxu2 %v21580_v8  ;;  %v15015_v8 = vld [vmem:[%s23055_s5 + $0x148] sm:$0xf0]  ;;  %v9139_v63 = vadd.f32 %v22346_v56, %v9126_v13  ;;  %v12677_v56 = vor.u32 %v14987_v31, %v12676_v58 }
 0x4cf   :  { %9422 = vmatpush.bf16.msrb.mxu3 %v13321_v57  ;;  %9332 = vmatmul.bf16.vlgmr.msra.gmra.mxu0 %v20691_v24  ;;  %v12789_v45 = vor.u32 %v15015_v8, %v12788_v41  ;;  %v15211_v8 = vld [vmem:[%s23055_s5 + $0x768] sm:$0xf0] }
 0x4d0   :  { %9376 = vmatpush.bf16.msrb.mxu0 %v12845_v9  ;;  %v9152_v36 = vadd.f32 %v22697_v2, %v9139_v63  ;;  %v12648_v2 = vld [vmem:[%s23055_s5 + $0x18] sm:$0xf]  ;;  %v13573_v51 = vor.u32 %v15211_v8, %v13572_v0 }
 0x4d1   :  { %v12649_v46 = vor.u32 %v14980_v53, %v12648_v2 }
 0x4d2   :  { %9423 = vmatmul.bf16.vlgmr.msrb.gmra.mxu3 %v20691_v24  ;;  %v15001_v24 = vld [vmem:[%s23055_s5 + $0xd8] sm:$0xf0]  ;;  %v9165_v35 = vadd.f32 %v22900_v12, %v9152_v36 }
 0x4d3   :  { %v12733_v29 = vor.u32 %v15001_v24, %v12732_v52  ;;  %v9127_v22 = vpop.f32.mrf.mxu0  ;;  %v15204_v52 = vld [vmem:[%s23055_s5 + $0x730] sm:$0xf0] }
 0x4d4   :  { %9377 = vmatpush.bf16.msrb.mxu0 %v12817_v19  ;;  %v9257_v21 = vpop.f32.mrf.mxu2  ;;  %v15218_v19 = vld [vmem:[%s23055_s5 + $0x7a0] sm:$0xf0] }
 0x4d5   :  { %v9216_v25 = vpop.f32.mrf.mxu3  ;;  %v13601_v12 = vor.u32 %v15218_v19, %v13600_v4 }
 0x4d6   :  { %v9217_v28 = vadd.f32 %v9216_v25, %v9204_v43 }
 0x4d8   :  { %9378 = vmatpush.bf16.msrb.mxu0 %v12789_v45 }
 0x4dc   :  { %9379 = vmatpush.bf16.msrb.mxu0 %v12761_v39 }
 0x4dd   :  { %v9218_v44 = vpop.f32.mrf.mxu3 }
 0x4e0   :  { %9380 = vmatpush.bf16.msrb.mxu0 %v12733_v29 }
 0x4e1   :  { %v22972_v23 = vpop.f32.mrf.mxu1 }
 0x4e4   :  { %9381 = vmatpush.bf16.msrb.mxu0 %v12705_v30 }
 0x4e8   :  { %9382 = vmatpush.bf16.msrb.mxu0 %v12677_v56 }
 0x4e9   :  { %v9348_v10 = vpop.f32.mrf.mxu1 }
 0x4eb   :  { %v9177_v9 = vpop.f32.mrf.mxu0 }
 0x4ec   :  { %9383 = vmatpush.bf16.msrb.mxu0 %v12649_v46  ;;  %v9178_v57 = vadd.f32 %v9177_v9, %v9165_v35  ;;  %v9307_v38 = vpop.f32.mrf.mxu2 }
 0x4ed   :  { %v9308_v62 = vadd.f32 %v9307_v38, %v9295_v33 }
 0x4ee   :  { %v9191_v41 = vadd.f32 %v22553_v55, %v9178_v57  ;;  %v13544_v55 = vld [vmem:[%s23055_s5 + $0x718] sm:$0xf] }
 0x4ef   :  { %9384 = vmatmul.bf16.vlgmr.msrb.gmra.mxu0 %v20579_v7  ;;  %v15225_v7 = vld [vmem:[%s23055_s5 + $0x7d8] sm:$0xf0]  ;;  %v13545_v14 = vor.u32 %v15204_v52, %v13544_v55 }
 0x4f0   :  { %9428 = vmatpush.bf16.msra.mxu0 %v13741_v5  ;;  %v13629_v16 = vor.u32 %v15225_v7, %v13628_v6  ;;  %15373 = vtanh.f32 %v9191_v41 }
 0x4f3   :  { %v9179_v45 = vpop.f32.mrf.mxu0 }
 0x4f4   :  { %9429 = vmatpush.bf16.msra.mxu0 %v13713_v34  ;;  %v9309_v39 = vpop.f32.mrf.mxu2 }
 0x4f5   :  { %v9268_v48 = vpop.f32.mrf.mxu3 }
 0x4f6   :  { %v15374_v24 = vpop.eup %15373 }
 0x4f7   :  { %9477 = vst [vmem:[%s23057_s7 + $0x18] sm:$0xff] %v15374_v24 }
 0x4f8   :  { %9430 = vmatpush.bf16.msra.mxu0 %v13685_v27 }
 0x4fc   :  { %9431 = vmatpush.bf16.msra.mxu0 %v13657_v26 }
 0x4fd   :  { %v9270_v15 = vpop.f32.mrf.mxu3 }
 0x500   :  { %9432 = vmatpush.bf16.msra.mxu0 %v13629_v16 }
 0x501   :  { %v9398_v3 = vpop.f32.mrf.mxu1 }
 0x504   :  { %9433 = vmatpush.bf16.msra.mxu0 %v13601_v12 }
 0x508   :  { %9434 = vmatpush.bf16.msra.mxu0 %v13573_v51 }
 0x509   :  { %v9400_v13 = vpop.f32.mrf.mxu1 }
 0x50c   :  { %9435 = vmatpush.bf16.msra.mxu0 %v13545_v14 }
 0x50e   :  { %v9229_v29 = vpop.f32.mrf.mxu0 }
 0x50f   :  { %9436 = vmatmul.bf16.vlgmr.msra.gmra.mxu0 %v20972_v60  ;;  %v9230_v61 = vadd.f32 %v9229_v29, %v9217_v28 }
 0x511   :  { %v9359_v42 = vpop.f32.mrf.mxu2  ;;  %v9243_v63 = vadd.f32 %v22743_v50, %v9230_v61 }
 0x513   :  { %v9256_v1 = vadd.f32 %v22954_v49, %v9243_v63 }
 0x515   :  { %v9320_v36 = vpop.f32.mrf.mxu3  ;;  %v9269_v25 = vadd.f32 %v9268_v48, %v9256_v1 }
 0x516   :  { %v9231_v30 = vpop.f32.mrf.mxu0  ;;  %v9321_v49 = vadd.f32 %v9320_v36, %v9308_v62 }
 0x519   :  { %v9361_v31 = vpop.f32.mrf.mxu2 }
 0x51d   :  { %v9322_v43 = vpop.f32.mrf.mxu3 }
 0x521   :  { %v9450_v58 = vpop.f32.mrf.mxu1 }
 0x529   :  { %v9452_v22 = vpop.f32.mrf.mxu1 }
 0x52e   :  { %v9281_v56 = vpop.f32.mrf.mxu0 }
 0x52f   :  { %v9282_v21 = vadd.f32 %v9281_v56, %v9269_v25 }
 0x531   :  { %v9411_v2 = vpop.f32.mrf.mxu2  ;;  %15375 = vtanh.f32 %v9282_v21 }
 0x535   :  { %v9372_v60 = vpop.f32.mrf.mxu3 }
 0x536   :  { %v9283_v53 = vpop.f32.mrf.mxu0 }
 0x537   :  { %v15376_v59 = vpop.eup %15375 }
 0x538   :  { %9478 = vst [vmem:[%s23057_s7 + $0x20] sm:$0xff] %v15376_v59 }
 0x539   :  { %v9413_v28 = vpop.f32.mrf.mxu2 }
 0x53d   :  { %v9374_v50 = vpop.f32.mrf.mxu3 }
 0x54c   :  { %v9333_v37 = vpop.f32.mrf.mxu0 }
 0x54d   :  { %v9334_v46 = vadd.f32 %v9333_v37, %v9321_v49 }
 0x54f   :  { %v9347_v32 = vadd.f32 %v22972_v23, %v9334_v46 }
 0x551   :  { %v9463_v5 = vpop.f32.mrf.mxu2  ;;  %v9360_v47 = vadd.f32 %v9359_v42, %v9347_v32 }
 0x553   :  { %v9373_v44 = vadd.f32 %v9372_v60, %v9360_v47 }
 0x554   :  { %v9335_v10 = vpop.f32.mrf.mxu0 }
 0x555   :  { %v9424_v34 = vpop.f32.mrf.mxu3  ;;  %15377 = vtanh.f32 %v9373_v44 }
 0x559   :  { %v9465_v18 = vpop.f32.mrf.mxu2 }
 0x55b   :  { %v15378_v54 = vpop.eup %15377 }
 0x55c   :  { %9479 = vst [vmem:[%s23057_s7 + $0x28] sm:$0xff] %v15378_v54 }
 0x55d   :  { %v9426_v27 = vpop.f32.mrf.mxu3 }
 0x56c   :  { %v9385_v40 = vpop.f32.mrf.mxu0 }
 0x56d   :  { %v9386_v26 = vadd.f32 %v9385_v40, %v6806_v20 }
 0x56f   :  { %v9399_v6 = vadd.f32 %v9398_v3, %v9386_v26 }
 0x571   :  { %v9412_v7 = vadd.f32 %v9411_v2, %v9399_v6 }
 0x573   :  { %v9425_v23 = vadd.f32 %v9424_v34, %v9412_v7 }
 0x574   :  { %v9387_v11 = vpop.f32.mrf.mxu0 }
 0x58c   :  { %v9437_v35 = vpop.f32.mrf.mxu0 }
 0x58d   :  { %v9438_v33 = vadd.f32 %v9437_v35, %v9425_v23 }
 0x58f   :  { %v9451_v9 = vadd.f32 %v9450_v58, %v9438_v33 }
 0x591   :  { %v9464_v57 = vadd.f32 %v9463_v5, %v9451_v9 }
 0x593   :  { %15379 = vtanh.f32 %v9464_v57 }
 0x594   :  { %v9439_v38 = vpop.f32.mrf.mxu0 }
 0x599   :  { %v15380_v16 = vpop.eup %15379 }
 0x59a   :  { %9481 = vst.msk [vmem:[%s23057_s7 + $0x30] sm:$0xff] %vm9480_vm2, %v15380_v16 }

</bundles_post_ra>
